<compile_context>
chip_gen: v5e
topology: v5e:2x2
jax: 0.10.0
libtpu: 0.0.40
codegen_flags: <defaults>
</compile_context>

<pallas_src>
import numpy as np
import jax
import jax.numpy as jnp
from jax.experimental import pallas as pl
from jax.experimental.pallas import tpu as pltpu


def get_dct_matrix(N):
    dct_m = np.eye(N)
    for k in np.arange(N):
        for i in np.arange(N):
            w = np.sqrt(2 / N)
            if k == 0:
                w = np.sqrt(1 / N)
            dct_m[k, i] = w * np.cos(np.pi * (i + 1 / 2) * k / N)
    idct_m = np.linalg.inv(dct_m)
    return dct_m, idct_m


def _idct_kernel(w_ref, x_ref, o_ref):
    # w_ref: (nd*K, frame*nd) f32 -- VMEM-resident across the whole grid (index (0,0))
    # x_ref: (tb, nd*K)       f32 -- one lane-dense batch block of DCT coefficients
    # o_ref: (tb, frame*nd)   f32 -- lane-dense output slab, already in final order
    o_ref[...] = jnp.dot(
        x_ref[...], w_ref[...], preferred_element_type=jnp.float32
    ).astype(o_ref.dtype)


def idct_transform(x, idct_m, node, dim, dct_used=16, batch_block=256):
    """Matches IDCT_Transform.forward(x, node, dim, dct_used)."""
    frame = idct_m.shape[0]
    nd = node * dim
    kin = nd * dct_used            # input row width  (e.g. 1024)
    kout = frame * nd              # output row width (e.g. 2048)

    # Free view: one lane-dense coefficient row per batch element.
    x2 = jnp.asarray(x, jnp.float32).reshape(-1, kin)                 # (B, nd*K)
    b = x2.shape[0]
    idct_sub = jnp.asarray(idct_m, jnp.float32)[:, :dct_used]         # (frame, K)

    # Fold contraction + (m,f)->(f,m) transpose into one block-structured weight:
    #   W[m*K + k, f*nd + m'] = idct[f, k] * delta(m, m')
    w = jnp.einsum(
        "fk,mp->mkfp", idct_sub, jnp.eye(nd, dtype=jnp.float32)
    ).reshape(kin, kout)                                              # (nd*K, frame*nd)

    tb = min(b, batch_block)
    if tb < b:
        tb = max(8, (tb // 8) * 8)   # keep sublane-aligned blocks when tiling
    grid = (pl.cdiv(b, tb),)

    # Advisory hint: this kernel should be HBM-bandwidth bound.
    cost = pl.CostEstimate(
        flops=2 * b * kin * kout,
        transcendentals=0,
        bytes_accessed=4 * (b * kin + kin * kout + b * kout),
    )

    out = pl.pallas_call(
        _idct_kernel,
        out_shape=jax.ShapeDtypeStruct((b, kout), jnp.float32),
        grid_spec=pltpu.PrefetchScalarGridSpec(
            num_scalar_prefetch=0,
            grid=grid,
            in_specs=[
                # Resident weight: constant block index -> fetched once.
                pl.BlockSpec((kin, kout), lambda i: (0, 0)),
                # Lane-dense, pipelined batch block of coefficients.
                pl.BlockSpec((tb, kin), lambda i: (i, 0)),
            ],
            # Lane-dense output slab in the final memory order.
            out_specs=pl.BlockSpec((tb, kout), lambda i: (i, 0)),
        ),
        compiler_params=pltpu.CompilerParams(
            # Independent batch blocks -> v7x can shard them across both TCs.
            dimension_semantics=("parallel",),
            # Explicit budget: ~22 MiB used; 40 MiB is safe on v5e/v6e (128 MiB
            # physical) and v7x (64 MiB physical).
            vmem_limit_bytes=40 * 1024 * 1024,
        ),
        cost_estimate=cost,
    )(w, x2)

    # Free view: (B, frame*node*dim) -> (B, frame, node, dim)
    return out.reshape(b, frame, node, dim)


def _numpy_ref(x_np, idct_np, node, dim, dct_used, frame):
    # Mirrors the PyTorch forward exactly.
    x_t = x_np.astype(np.float32).reshape(-1, dct_used).T             # (K, M)
    pred = idct_np[:, :dct_used].astype(np.float32) @ x_t             # (frame, M)
    return pred.reshape(frame, -1, node, dim).transpose(1, 0, 2, 3)


if __name__ == "__main__":
    frame = 32
    dct_used = 16
    node = 16
    dim = 4

    # Deterministic "parameter": the fixed IDCT basis from __init__.
    _, idct_np = get_dct_matrix(N=frame)
    idct_m = jnp.asarray(idct_np, dtype=jnp.float32)                  # (frame, frame)

    key = jax.random.PRNGKey(0)

    # Small shape consistent with the module forward: B=2, node=16, dim=4, K=16.
    x_small = jax.random.normal(key, (2, node * dim, dct_used), dtype=jnp.float32)
    pred = jax.block_until_ready(idct_transform(x_small, idct_m, node, dim, dct_used))
    ref = _numpy_ref(np.asarray(x_small), idct_np, node, dim, dct_used, frame)
    assert pred.shape == (2, frame, node, dim), pred.shape
    np.testing.assert_allclose(np.asarray(pred), ref, rtol=1e-4, atol=1e-4)

    # Larger batch with a smaller block: exercises the multi-step pipelined grid.
    x_big = jax.random.normal(key, (128, node * dim, dct_used), dtype=jnp.float32)
    pred_big = jax.block_until_ready(
        idct_transform(x_big, idct_m, node, dim, dct_used, batch_block=64)
    )
    ref_big = _numpy_ref(np.asarray(x_big), idct_np, node, dim, dct_used, frame)
    assert pred_big.shape == (128, frame, node, dim), pred_big.shape
    np.testing.assert_allclose(np.asarray(pred_big), ref_big, rtol=1e-4, atol=1e-4)

    print("KERNEL_OK")
</pallas_src>

<mosaic_0001>
module attributes {stable_mosaic.version = 11 : i64} {
  func.func @_idct_kernel(%arg0: i32, %arg1: memref<1024x2048xf32, #tpu.memory_space<vmem>>, %arg2: memref<2x1024xf32, #tpu.memory_space<vmem>>, %arg3: memref<2x2048xf32, #tpu.memory_space<vmem>>) attributes {dimension_semantics = [#tpu.dimension_semantics<parallel>], iteration_bounds = array<i64: 1>, scalar_prefetch = 0 : i64, scratch_operands = 0 : i64, tpu.core_type = #tpu.core_type<tc>, window_params = [{pipeline_mode = #tpu.pipeline_mode<synchronous>, transform_indices = @transform_0, window_bounds = array<i64: 1024, 2048>}, {transform_indices = @transform_1, window_bounds = array<i64: 2, 1024>}, {transform_indices = @transform_2, window_bounds = array<i64: 2, 2048>}]} {
    %c0 = arith.constant 0 : index
    %c0_0 = arith.constant 0 : index
    %0 = vector.load %arg2[%c0, %c0_0] : memref<2x1024xf32, #tpu.memory_space<vmem>>, vector<2x1024xf32>
    %c0_1 = arith.constant 0 : index
    %c0_2 = arith.constant 0 : index
    %1 = vector.load %arg1[%c0_1, %c0_2] : memref<1024x2048xf32, #tpu.memory_space<vmem>>, vector<1024x2048xf32>
    %cst = arith.constant dense<0.000000e+00> : vector<2x2048xf32>
    %2 = tpu.matmul %0, %1, %cst {dimension_numbers = #tpu.dot_dimension_numbers<[1], [0], [0], [1], [0, 0, 1, 1], [], []>} : vector<2x1024xf32>, vector<1024x2048xf32>, vector<2x2048xf32> -> vector<2x2048xf32>
    %c0_3 = arith.constant 0 : index
    %c0_4 = arith.constant 0 : index
    %3 = vector.load %arg3[%c0_3, %c0_4] : memref<2x2048xf32, #tpu.memory_space<vmem>>, vector<2x2048xf32>
    tpu.vector_store %arg3[%c0_3, %c0_4], %2 {strides = array<i32>} : memref<2x2048xf32, #tpu.memory_space<vmem>>, vector<2x2048xf32>,
    return
  }
  func.func @transform_0(%arg0: i32) -> (i32, i32) {
    %c0_i32 = arith.constant 0 : i32
    %c0_i32_0 = arith.constant 0 : i32
    %c0_i32_1 = arith.constant 0 : i32
    return %c0_i32, %c0_i32_0 : i32, i32
  }
  func.func @transform_1(%arg0: i32) -> (i32, i32) {
    %c0_i32 = arith.constant 0 : i32
    %c0_i32_0 = arith.constant 0 : i32
    return %arg0, %c0_i32 : i32, i32
  }
  func.func @transform_2(%arg0: i32) -> (i32, i32) {
    %c0_i32 = arith.constant 0 : i32
    %c0_i32_0 = arith.constant 0 : i32
    return %arg0, %c0_i32 : i32, i32
  }
}

</mosaic_0001>

<bundles_post_ra>
// kernel: tpu_custom_call.1
= control target key start
LH: loop header
LB: loop body
LE: loop exit
PB: predicated region body
PF: predicated region fallthrough
CT: control target
= control target key end

     0   :  { %7 = vsyncpa [#allocation3], 0  ;;  %s5349_s0 = inlined_call_operand.hbm [shape: f32[1024,2048], index: 0, kind: input, shape index: {}]   ;;  %s5350_s1 = inlined_call_operand.hbm [shape: f32[2,1024], index: 1, kind: input, shape index: {}]   ;;  %s5351_s2 = inlined_call_operand.hbm [shape: f32[2,2048], index: 2, kind: output, shape index: {}]  }
   0x1   :  { %8 = vsyncpa [#allocation6], 0 }
   0x2   :  { %9 = vsyncpa [#allocation4], 0  ;;  %s14_s11 = sshll.u32 %s5349_s0, 4  ;;  %s4881_s12 = smov [#allocation2]   ;;  %s15_s11 = int_to_ptr.hbm [resolvable:$true] %s14_s11 }
   0x3   :  { %s16_s13 = sshll.u32 %s4881_s12, 4  ;;  %s28_s16 = sshll.u32 %s5350_s1, 4  ;;  %s17_s13 = int_to_ptr.vmem [resolvable:$true] %s16_s13  ;;  %s29_s16 = int_to_ptr.hbm [resolvable:$true] %s28_s16 }
   0x4   :  { %s4882_s17 = smov 2048   ;;  %s4883_s18 = smov 128  }
   0x5   :  { %22 = dma.hbm_to_vmem [thread:$0]  %s15_s11, 262144, %s17_s13, [#allocation3], %s4882_s17, %s4882_s17, %s4883_s18  }
   0x6   :  { %s4884_s19 = smov [#allocation5]  }
   0x7   :  { %s30_s20 = sshll.u32 %s4884_s19, 4  ;;  %s31_s20 = int_to_ptr.vmem [resolvable:$true] %s30_s20 }
   0x8   :  { %33 = dma.hbm_to_vmem [thread:$0]  %s29_s16, 256, %s31_s20, [#allocation6]  }
   0x9   :  { %4875 = dma.done.wait [#allocation3], 262144  }
   0xa   :  { %4876 = vsyncadd [#allocation3], 4294705152 }
   0xb   :  { %4877 = dma.done.wait [#allocation6], 256  }
   0xc   :  { %4878 = vsyncadd [#allocation6], 4294967040  ;;  %v284_v0 = vld [vmem:[#allocation2 + $0x780] sm:$0xff]  ;;  %vm4701_vm0 = vcmask 1041408   ;;  %vm4703_vm1 = vcmask 1045508   ;;  %vm4705_vm2 = vcmask 1043456  }
   0xd   :  { %v796_v1 = vld [vmem:[#allocation2 + $0x1780] sm:$0xff]  ;;  %2113 = vmatpush.msra.mxu0 %v284_v0  ;;  %s4885_s0 = smov [#allocation7]   ;;  %s4731_s23 = sshll.u32 %s5351_s2, 4  ;;  %s4732_s23 = int_to_ptr.hbm [resolvable:$true] %s4731_s23 }
   0xe   :  { %v268_v2 = vld [vmem:[#allocation2 + $0x700] sm:$0xff]  ;;  %2153 = vmatpush.msra.mxu2 %v796_v1  ;;  %s4729_s1 = sshll.u32 %s4885_s0, 4  ;;  %s4730_s1 = int_to_ptr.vmem [resolvable:$true] %s4729_s1 }
   0xf   :  { %v540_v3 = vld [vmem:[#allocation2 + $0xf80] sm:$0xff]  ;;  %2114 = vmatpush.msra.mxu0 %v268_v2 }
  0x10   :  { %v780_v4 = vld [vmem:[#allocation2 + $0x1700] sm:$0xff]  ;;  %2133 = vmatpush.msra.mxu1 %v540_v3 }
  0x11   :  { %v1052_v5 = vld [vmem:[#allocation2 + $0x1f80] sm:$0xff]  ;;  %2154 = vmatpush.msra.mxu2 %v780_v4 }
  0x12   :  { %2173 = vmatpush.msra.mxu3 %v1052_v5  ;;  %v252_v6 = vld [vmem:[#allocation2 + $0x680] sm:$0xff] }
  0x13   :  { %v524_v7 = vld [vmem:[#allocation2 + $0xf00] sm:$0xff]  ;;  %2115 = vmatpush.msra.mxu0 %v252_v6 }
  0x14   :  { %v764_v8 = vld [vmem:[#allocation2 + $0x1680] sm:$0xff]  ;;  %2134 = vmatpush.msra.mxu1 %v524_v7 }
  0x15   :  { %v1036_v9 = vld [vmem:[#allocation2 + $0x1f00] sm:$0xff]  ;;  %2155 = vmatpush.msra.mxu2 %v764_v8 }
  0x16   :  { %v508_v10 = vld [vmem:[#allocation2 + $0xe80] sm:$0xff]  ;;  %2174 = vmatpush.msra.mxu3 %v1036_v9 }
  0x17   :  { %v236_v11 = vld [vmem:[#allocation2 + $0x600] sm:$0xff]  ;;  %2135 = vmatpush.msra.mxu1 %v508_v10 }
  0x18   :  { %v748_v12 = vld [vmem:[#allocation2 + $0x1600] sm:$0xff]  ;;  %2116 = vmatpush.msra.mxu0 %v236_v11 }
  0x19   :  { %v1020_v13 = vld [vmem:[#allocation2 + $0x1e80] sm:$0xff]  ;;  %2156 = vmatpush.msra.mxu2 %v748_v12 }
  0x1a   :  { %v492_v14 = vld [vmem:[#allocation2 + $0xe00] sm:$0xff]  ;;  %2175 = vmatpush.msra.mxu3 %v1020_v13 }
  0x1b   :  { %v1004_v15 = vld [vmem:[#allocation2 + $0x1e00] sm:$0xff]  ;;  %2136 = vmatpush.msra.mxu1 %v492_v14 }
  0x1c   :  { %v220_v16 = vld [vmem:[#allocation2 + $0x580] sm:$0xff]  ;;  %2176 = vmatpush.msra.mxu3 %v1004_v15 }
  0x1d   :  { %v732_v17 = vld [vmem:[#allocation2 + $0x1580] sm:$0xff]  ;;  %2117 = vmatpush.msra.mxu0 %v220_v16 }
  0x1e   :  { %v476_v18 = vld [vmem:[#allocation2 + $0xd80] sm:$0xff]  ;;  %2157 = vmatpush.msra.mxu2 %v732_v17 }
  0x1f   :  { %v988_v19 = vld [vmem:[#allocation2 + $0x1d80] sm:$0xff]  ;;  %2137 = vmatpush.msra.mxu1 %v476_v18 }
  0x20   :  { %v204_v20 = vld [vmem:[#allocation2 + $0x500] sm:$0xff]  ;;  %2177 = vmatpush.msra.mxu3 %v988_v19 }
  0x21   :  { %v716_v21 = vld [vmem:[#allocation2 + $0x1500] sm:$0xff]  ;;  %2118 = vmatpush.msra.mxu0 %v204_v20 }
  0x22   :  { %v460_v22 = vld [vmem:[#allocation2 + $0xd00] sm:$0xff]  ;;  %2158 = vmatpush.msra.mxu2 %v716_v21 }
  0x23   :  { %v972_v23 = vld [vmem:[#allocation2 + $0x1d00] sm:$0xff]  ;;  %2138 = vmatpush.msra.mxu1 %v460_v22 }
  0x24   :  { %v188_v24 = vld [vmem:[#allocation2 + $0x480] sm:$0xff]  ;;  %2178 = vmatpush.msra.mxu3 %v972_v23 }
  0x25   :  { %v700_v25 = vld [vmem:[#allocation2 + $0x1480] sm:$0xff]  ;;  %2119 = vmatpush.msra.mxu0 %v188_v24 }
  0x26   :  { %v444_v26 = vld [vmem:[#allocation2 + $0xc80] sm:$0xff]  ;;  %2159 = vmatpush.msra.mxu2 %v700_v25 }
  0x27   :  { %v956_v27 = vld [vmem:[#allocation2 + $0x1c80] sm:$0xff]  ;;  %2139 = vmatpush.msra.mxu1 %v444_v26 }
  0x28   :  { %v172_v28 = vld [vmem:[#allocation2 + $0x400] sm:$0xff]  ;;  %2179 = vmatpush.msra.mxu3 %v956_v27 }
  0x29   :  { %v684_v29 = vld [vmem:[#allocation2 + $0x1400] sm:$0xff]  ;;  %2120 = vmatpush.msra.mxu0 %v172_v28 }
  0x2a   :  { %v428_v30 = vld [vmem:[#allocation2 + $0xc00] sm:$0xff]  ;;  %2160 = vmatpush.msra.mxu2 %v684_v29 }
  0x2b   :  { %v940_v31 = vld [vmem:[#allocation2 + $0x1c00] sm:$0xff]  ;;  %2140 = vmatpush.msra.mxu1 %v428_v30 }
  0x2c   :  { %v156_v32 = vld [vmem:[#allocation2 + $0x380] sm:$0xff]  ;;  %2180 = vmatpush.msra.mxu3 %v940_v31 }
  0x2d   :  { %v668_v33 = vld [vmem:[#allocation2 + $0x1380] sm:$0xff]  ;;  %2121 = vmatpush.msra.mxu0 %v156_v32 }
  0x2e   :  { %v412_v34 = vld [vmem:[#allocation2 + $0xb80] sm:$0xff]  ;;  %2161 = vmatpush.msra.mxu2 %v668_v33 }
  0x2f   :  { %v924_v35 = vld [vmem:[#allocation2 + $0x1b80] sm:$0xff]  ;;  %2141 = vmatpush.msra.mxu1 %v412_v34 }
  0x30   :  { %v140_v36 = vld [vmem:[#allocation2 + $0x300] sm:$0xff]  ;;  %2181 = vmatpush.msra.mxu3 %v924_v35  ;;  %v43_v35 = vld [vmem:[#allocation5 + $0x8] sm:$0xff] }
  0x31   :  { %v652_v37 = vld [vmem:[#allocation2 + $0x1300] sm:$0xff]  ;;  %2122 = vmatpush.msra.mxu0 %v140_v36  ;;  %2096 = vst [vmem:[#allocation1 + $0x20] ss:$4 sm:$0xff] %v43_v35  ;;  %v973_v35 = vld [vmem:[#allocation2 + $0x1d08] sm:$0xff] }
  0x32   :  { %v396_v38 = vld [vmem:[#allocation2 + $0xb00] sm:$0xff]  ;;  %2162 = vmatpush.msra.mxu2 %v652_v37 }
  0x33   :  { %v908_v39 = vld [vmem:[#allocation2 + $0x1b00] sm:$0xff]  ;;  %2142 = vmatpush.msra.mxu1 %v396_v38 }
  0x34   :  { %v124_v40 = vld [vmem:[#allocation2 + $0x280] sm:$0xff]  ;;  %2182 = vmatpush.msra.mxu3 %v908_v39 }
  0x35   :  { %v636_v41 = vld [vmem:[#allocation2 + $0x1280] sm:$0xff]  ;;  %2123 = vmatpush.msra.mxu0 %v124_v40 }
  0x36   :  { %v380_v42 = vld [vmem:[#allocation2 + $0xa80] sm:$0xff]  ;;  %2163 = vmatpush.msra.mxu2 %v636_v41 }
  0x37   :  { %v892_v43 = vld [vmem:[#allocation2 + $0x1a80] sm:$0xff]  ;;  %2143 = vmatpush.msra.mxu1 %v380_v42 }
  0x38   :  { %v108_v44 = vld [vmem:[#allocation2 + $0x200] sm:$0xff]  ;;  %2183 = vmatpush.msra.mxu3 %v892_v43 }
  0x39   :  { %v620_v45 = vld [vmem:[#allocation2 + $0x1200] sm:$0xff]  ;;  %2124 = vmatpush.msra.mxu0 %v108_v44 }
  0x3a   :  { %v364_v46 = vld [vmem:[#allocation2 + $0xa00] sm:$0xff]  ;;  %2164 = vmatpush.msra.mxu2 %v620_v45 }
  0x3b   :  { %v876_v47 = vld [vmem:[#allocation2 + $0x1a00] sm:$0xff]  ;;  %2144 = vmatpush.msra.mxu1 %v364_v46 }
  0x3c   :  { %v92_v48 = vld [vmem:[#allocation2 + $0x180] sm:$0xff]  ;;  %2184 = vmatpush.msra.mxu3 %v876_v47 }
  0x3d   :  { %v604_v49 = vld [vmem:[#allocation2 + $0x1180] sm:$0xff]  ;;  %2125 = vmatpush.msra.mxu0 %v92_v48 }
  0x3e   :  { %v348_v50 = vld [vmem:[#allocation2 + $0x980] sm:$0xff]  ;;  %2165 = vmatpush.msra.mxu2 %v604_v49 }
  0x3f   :  { %v860_v51 = vld [vmem:[#allocation2 + $0x1980] sm:$0xff]  ;;  %2145 = vmatpush.msra.mxu1 %v348_v50 }
  0x40   :  { %v76_v52 = vld [vmem:[#allocation2 + $0x100] sm:$0xff]  ;;  %2185 = vmatpush.msra.mxu3 %v860_v51 }
  0x41   :  { %v588_v53 = vld [vmem:[#allocation2 + $0x1100] sm:$0xff]  ;;  %2126 = vmatpush.msra.mxu0 %v76_v52 }
  0x42   :  { %v332_v54 = vld [vmem:[#allocation2 + $0x900] sm:$0xff]  ;;  %2166 = vmatpush.msra.mxu2 %v588_v53 }
  0x43   :  { %v844_v55 = vld [vmem:[#allocation2 + $0x1900] sm:$0xff]  ;;  %2146 = vmatpush.msra.mxu1 %v332_v54 }
  0x44   :  { %v60_v56 = vld [vmem:[#allocation2 + $0x80] sm:$0xff]  ;;  %2186 = vmatpush.msra.mxu3 %v844_v55 }
  0x45   :  { %v572_v57 = vld [vmem:[#allocation2 + $0x1080] sm:$0xff]  ;;  %2127 = vmatpush.msra.mxu0 %v60_v56 }
  0x46   :  { %v316_v58 = vld [vmem:[#allocation2 + $0x880] sm:$0xff]  ;;  %2167 = vmatpush.msra.mxu2 %v572_v57 }
  0x47   :  { %v828_v59 = vld [vmem:[#allocation2 + $0x1880] sm:$0xff]  ;;  %2147 = vmatpush.msra.mxu1 %v316_v58 }
  0x48   :  { %v44_v60 = vld [vmem:[#allocation2] sm:$0xff]  ;;  %2187 = vmatpush.msra.mxu3 %v828_v59 }
  0x49   :  { %v556_v61 = vld [vmem:[#allocation2 + $0x1000] sm:$0xff]  ;;  %2128 = vmatpush.msra.mxu0 %v44_v60 }
  0x4a   :  { %v1308_v62 = vld [vmem:[#allocation2 + $0x2780] sm:$0xff]  ;;  %2168 = vmatpush.msra.mxu2 %v556_v61 }
  0x4b   :  { %v1820_v63 = vld [vmem:[#allocation2 + $0x3780] sm:$0xff]  ;;  %2193 = vmatpush.msrb.mxu0 %v1308_v62 }
  0x4c   :  { %v300_v0 = vld [vmem:[#allocation2 + $0x800] sm:$0xff]  ;;  %2233 = vmatpush.msrb.mxu2 %v1820_v63 }
  0x4d   :  { %v812_v1 = vld [vmem:[#allocation2 + $0x1800] sm:$0xff]  ;;  %2148 = vmatpush.msra.mxu1 %v300_v0 }
  0x4e   :  { %v1292_v2 = vld [vmem:[#allocation2 + $0x2700] sm:$0xff]  ;;  %2188 = vmatpush.msra.mxu3 %v812_v1 }
  0x4f   :  { %v1564_v3 = vld [vmem:[#allocation2 + $0x2f80] sm:$0xff]  ;;  %2194 = vmatpush.msrb.mxu0 %v1292_v2 }
  0x50   :  { %v1804_v4 = vld [vmem:[#allocation2 + $0x3700] sm:$0xff]  ;;  %2213 = vmatpush.msrb.mxu1 %v1564_v3  ;;  %v285_v3 = vld [vmem:[#allocation2 + $0x788] sm:$0xff] }
  0x51   :  { %v2076_v5 = vld [vmem:[#allocation2 + $0x3f80] sm:$0xff]  ;;  %2234 = vmatpush.msrb.mxu2 %v1804_v4  ;;  %v797_v4 = vld [vmem:[#allocation2 + $0x1788] sm:$0xff] }
  0x52   :  { %v1276_v6 = vld [vmem:[#allocation2 + $0x2680] sm:$0xff]  ;;  %2253 = vmatpush.msrb.mxu3 %v2076_v5 }
  0x53   :  { %v1548_v7 = vld [vmem:[#allocation2 + $0x2f00] sm:$0xff]  ;;  %2195 = vmatpush.msrb.mxu0 %v1276_v6 }
  0x54   :  { %v1788_v8 = vld [vmem:[#allocation2 + $0x3680] sm:$0xff]  ;;  %2214 = vmatpush.msrb.mxu1 %v1548_v7 }
  0x55   :  { %v2060_v9 = vld [vmem:[#allocation2 + $0x3f00] sm:$0xff]  ;;  %2235 = vmatpush.msrb.mxu2 %v1788_v8  ;;  %v269_v8 = vld [vmem:[#allocation2 + $0x708] sm:$0xff] }
  0x56   :  { %v1260_v10 = vld [vmem:[#allocation2 + $0x2600] sm:$0xff]  ;;  %2254 = vmatpush.msrb.mxu3 %v2060_v9  ;;  %v541_v9 = vld [vmem:[#allocation2 + $0xf88] sm:$0xff] }
  0x57   :  { %v1532_v11 = vld [vmem:[#allocation2 + $0x2e80] sm:$0xff]  ;;  %2196 = vmatpush.msrb.mxu0 %v1260_v10  ;;  %v781_v10 = vld [vmem:[#allocation2 + $0x1708] sm:$0xff] }
  0x58   :  { %v1772_v12 = vld [vmem:[#allocation2 + $0x3600] sm:$0xff]  ;;  %2215 = vmatpush.msrb.mxu1 %v1532_v11  ;;  %v1053_v11 = vld [vmem:[#allocation2 + $0x1f88] sm:$0xff] }
  0x59   :  { %v2044_v13 = vld [vmem:[#allocation2 + $0x3e80] sm:$0xff]  ;;  %2236 = vmatpush.msrb.mxu2 %v1772_v12  ;;  %v253_v12 = vld [vmem:[#allocation2 + $0x688] sm:$0xff] }
  0x5a   :  { %v1244_v14 = vld [vmem:[#allocation2 + $0x2580] sm:$0xff]  ;;  %2255 = vmatpush.msrb.mxu3 %v2044_v13  ;;  %v525_v13 = vld [vmem:[#allocation2 + $0xf08] sm:$0xff] }
  0x5b   :  { %v1516_v15 = vld [vmem:[#allocation2 + $0x2e00] sm:$0xff]  ;;  %2197 = vmatpush.msrb.mxu0 %v1244_v14  ;;  %v765_v14 = vld [vmem:[#allocation2 + $0x1688] sm:$0xff] }
  0x5c   :  { %v1756_v16 = vld [vmem:[#allocation2 + $0x3580] sm:$0xff]  ;;  %2216 = vmatpush.msrb.mxu1 %v1516_v15  ;;  %v1037_v15 = vld [vmem:[#allocation2 + $0x1f08] sm:$0xff] }
  0x5d   :  { %v2028_v17 = vld [vmem:[#allocation2 + $0x3e00] sm:$0xff]  ;;  %2237 = vmatpush.msrb.mxu2 %v1756_v16  ;;  %v4919_v16 = vld.sshfl [vmem:[#allocation1 + $0x30] sm:$0xff pattern:$0x73625140] }
  0x5e   :  { %v1228_v18 = vld [vmem:[#allocation2 + $0x2500] sm:$0xff]  ;;  %2256 = vmatpush.msrb.mxu3 %v2028_v17  ;;  %v237_v17 = vld [vmem:[#allocation2 + $0x608] sm:$0xff] }
  0x5f   :  { %v1500_v19 = vld [vmem:[#allocation2 + $0x2d80] sm:$0xff]  ;;  %2198 = vmatpush.msrb.mxu0 %v1228_v18  ;;  %v509_v18 = vld [vmem:[#allocation2 + $0xe88] sm:$0xff] }
  0x60   :  { %v1740_v20 = vld [vmem:[#allocation2 + $0x3500] sm:$0xff]  ;;  %2217 = vmatpush.msrb.mxu1 %v1500_v19  ;;  %v749_v19 = vld [vmem:[#allocation2 + $0x1608] sm:$0xff] }
  0x61   :  { %v2012_v21 = vld [vmem:[#allocation2 + $0x3d80] sm:$0xff]  ;;  %2238 = vmatpush.msrb.mxu2 %v1740_v20  ;;  %v1021_v20 = vld [vmem:[#allocation2 + $0x1e88] sm:$0xff] }
  0x62   :  { %v42_v22 = vld [vmem:[#allocation5] sm:$0xff]  ;;  %2257 = vmatpush.msrb.mxu3 %v2012_v21  ;;  %v4921_v21 = vld.sshfl [vmem:[#allocation1 + $0x20] sm:$0xff pattern:$0x73625140] }
  0x63   :  { %v1212_v23 = vld [vmem:[#allocation2 + $0x2480] sm:$0xff]  ;;  %2094 = vst [vmem:[#allocation1] ss:$4 sm:$0xff] %v42_v22  ;;  %v4924_v22 = vld.sshfl [vmem:[#allocation1 + $0x38] sm:$0xff pattern:$0x73625140] }
  0x64   :  { %v1484_v24 = vld [vmem:[#allocation2 + $0x2d00] sm:$0xff]  ;;  %2199 = vmatpush.msrb.mxu0 %v1212_v23  ;;  %v221_v23 = vld [vmem:[#allocation2 + $0x588] sm:$0xff] }
  0x65   :  { %v1724_v25 = vld [vmem:[#allocation2 + $0x3480] sm:$0xff]  ;;  %2218 = vmatpush.msrb.mxu1 %v1484_v24  ;;  %v493_v24 = vld [vmem:[#allocation2 + $0xe08] sm:$0xff] }
  0x66   :  { %v1996_v26 = vld [vmem:[#allocation2 + $0x3d00] sm:$0xff]  ;;  %2239 = vmatpush.msrb.mxu2 %v1724_v25  ;;  %v733_v25 = vld [vmem:[#allocation2 + $0x1588] sm:$0xff] }
  0x67   :  { %v1196_v27 = vld [vmem:[#allocation2 + $0x2400] sm:$0xff]  ;;  %2258 = vmatpush.msrb.mxu3 %v1996_v26  ;;  %v1005_v26 = vld [vmem:[#allocation2 + $0x1e08] sm:$0xff] }
  0x68   :  { %v1468_v28 = vld [vmem:[#allocation2 + $0x2c80] sm:$0xff]  ;;  %2200 = vmatpush.msrb.mxu0 %v1196_v27 }
  0x69   :  { %v1708_v29 = vld [vmem:[#allocation2 + $0x3400] sm:$0xff]  ;;  %2219 = vmatpush.msrb.mxu1 %v1468_v28  ;;  %v205_v28 = vld [vmem:[#allocation2 + $0x508] sm:$0xff] }
  0x6a   :  { %v1980_v30 = vld [vmem:[#allocation2 + $0x3c80] sm:$0xff]  ;;  %2240 = vmatpush.msrb.mxu2 %v1708_v29  ;;  %v4907_v60 = vld.sshfl [vmem:[#allocation1 + $0x10] sm:$0xff pattern:$0x73625140] }
  0x6b   :  { %v1180_v31 = vld [vmem:[#allocation2 + $0x2380] sm:$0xff]  ;;  %2259 = vmatpush.msrb.mxu3 %v1980_v30  ;;  %v4909_v1 = vld.sshfl [vmem:[#allocation1] sm:$0xff pattern:$0x73625140]  ;;  %2169 = vmatmul.f32.vlgmr.msra.gmra.mxu2 %v4907_v60  ;;  %v477_v29 = vld [vmem:[#allocation2 + $0xd88] sm:$0xff] }
  0x6c   :  { %v1452_v32 = vld [vmem:[#allocation2 + $0x2c00] sm:$0xff]  ;;  %2201 = vmatpush.msrb.mxu0 %v1180_v31  ;;  %v4912_v2 = vld.sshfl [vmem:[#allocation1 + $0x18] sm:$0xff pattern:$0x73625140]  ;;  %v717_v30 = vld [vmem:[#allocation2 + $0x1508] sm:$0xff] }
  0x6d   :  { %v1692_v33 = vld [vmem:[#allocation2 + $0x3380] sm:$0xff]  ;;  %2220 = vmatpush.msrb.mxu1 %v1452_v32  ;;  %2129 = vmatmul.f32.vlgmr.msra.gmra.mxu0 %v4909_v1  ;;  %v989_v31 = vld [vmem:[#allocation2 + $0x1d88] sm:$0xff] }
  0x6e   :  { %v1964_v34 = vld [vmem:[#allocation2 + $0x3c00] sm:$0xff]  ;;  %2241 = vmatpush.msrb.mxu2 %v1692_v33  ;;  %2189 = vmatmul.f32.vlgmr.msra.gmra.mxu3 %v4912_v2  ;;  %v189_v32 = vld [vmem:[#allocation2 + $0x488] sm:$0xff] }
  0x6f   :  { %v1164_v36 = vld [vmem:[#allocation2 + $0x2300] sm:$0xff]  ;;  %2260 = vmatpush.msrb.mxu3 %v1964_v34  ;;  %v461_v33 = vld [vmem:[#allocation2 + $0xd08] sm:$0xff] }
  0x70   :  { %v1436_v37 = vld [vmem:[#allocation2 + $0x2b80] sm:$0xff]  ;;  %2202 = vmatpush.msrb.mxu0 %v1164_v36  ;;  %v701_v34 = vld [vmem:[#allocation2 + $0x1488] sm:$0xff] }
  0x71   :  { %v1676_v38 = vld [vmem:[#allocation2 + $0x3300] sm:$0xff]  ;;  %2221 = vmatpush.msrb.mxu1 %v1436_v37  ;;  %v173_v36 = vld [vmem:[#allocation2 + $0x408] sm:$0xff] }
  0x72   :  { %v1948_v39 = vld [vmem:[#allocation2 + $0x3b80] sm:$0xff]  ;;  %2242 = vmatpush.msrb.mxu2 %v1676_v38  ;;  %v445_v37 = vld [vmem:[#allocation2 + $0xc88] sm:$0xff] }
  0x73   :  { %v1148_v40 = vld [vmem:[#allocation2 + $0x2280] sm:$0xff]  ;;  %2261 = vmatpush.msrb.mxu3 %v1948_v39  ;;  %v685_v38 = vld [vmem:[#allocation2 + $0x1408] sm:$0xff] }
  0x74   :  { %v1420_v41 = vld [vmem:[#allocation2 + $0x2b00] sm:$0xff]  ;;  %2203 = vmatpush.msrb.mxu0 %v1148_v40  ;;  %v957_v39 = vld [vmem:[#allocation2 + $0x1c88] sm:$0xff] }
  0x75   :  { %v1660_v42 = vld [vmem:[#allocation2 + $0x3280] sm:$0xff]  ;;  %2222 = vmatpush.msrb.mxu1 %v1420_v41  ;;  %v157_v40 = vld [vmem:[#allocation2 + $0x388] sm:$0xff] }
  0x76   :  { %v1932_v43 = vld [vmem:[#allocation2 + $0x3b00] sm:$0xff]  ;;  %2243 = vmatpush.msrb.mxu2 %v1660_v42  ;;  %v429_v41 = vld [vmem:[#allocation2 + $0xc08] sm:$0xff] }
  0x77   :  { %v1132_v44 = vld [vmem:[#allocation2 + $0x2200] sm:$0xff]  ;;  %2262 = vmatpush.msrb.mxu3 %v1932_v43  ;;  %v669_v42 = vld [vmem:[#allocation2 + $0x1388] sm:$0xff] }
  0x78   :  { %v1404_v45 = vld [vmem:[#allocation2 + $0x2a80] sm:$0xff]  ;;  %2204 = vmatpush.msrb.mxu0 %v1132_v44  ;;  %v941_v43 = vld [vmem:[#allocation2 + $0x1c08] sm:$0xff] }
  0x79   :  { %v1644_v46 = vld [vmem:[#allocation2 + $0x3200] sm:$0xff]  ;;  %2223 = vmatpush.msrb.mxu1 %v1404_v45  ;;  %v141_v44 = vld [vmem:[#allocation2 + $0x308] sm:$0xff] }
  0x7a   :  { %v1916_v47 = vld [vmem:[#allocation2 + $0x3a80] sm:$0xff]  ;;  %2244 = vmatpush.msrb.mxu2 %v1644_v46  ;;  %v413_v45 = vld [vmem:[#allocation2 + $0xb88] sm:$0xff] }
  0x7b   :  { %v1116_v48 = vld [vmem:[#allocation2 + $0x2180] sm:$0xff]  ;;  %2263 = vmatpush.msrb.mxu3 %v1916_v47  ;;  %v653_v46 = vld [vmem:[#allocation2 + $0x1308] sm:$0xff] }
  0x7c   :  { %v1388_v49 = vld [vmem:[#allocation2 + $0x2a00] sm:$0xff]  ;;  %2205 = vmatpush.msrb.mxu0 %v1116_v48  ;;  %v925_v47 = vld [vmem:[#allocation2 + $0x1b88] sm:$0xff] }
  0x7d   :  { %v1628_v50 = vld [vmem:[#allocation2 + $0x3180] sm:$0xff]  ;;  %2224 = vmatpush.msrb.mxu1 %v1388_v49  ;;  %v125_v48 = vld [vmem:[#allocation2 + $0x288] sm:$0xff] }
  0x7e   :  { %v1900_v51 = vld [vmem:[#allocation2 + $0x3a00] sm:$0xff]  ;;  %2245 = vmatpush.msrb.mxu2 %v1628_v50  ;;  %v397_v49 = vld [vmem:[#allocation2 + $0xb08] sm:$0xff] }
  0x7f   :  { %v1100_v52 = vld [vmem:[#allocation2 + $0x2100] sm:$0xff]  ;;  %2264 = vmatpush.msrb.mxu3 %v1900_v51  ;;  %v637_v50 = vld [vmem:[#allocation2 + $0x1288] sm:$0xff] }
  0x80   :  { %v1372_v53 = vld [vmem:[#allocation2 + $0x2980] sm:$0xff]  ;;  %2206 = vmatpush.msrb.mxu0 %v1100_v52  ;;  %v909_v51 = vld [vmem:[#allocation2 + $0x1b08] sm:$0xff] }
  0x81   :  { %v1612_v54 = vld [vmem:[#allocation2 + $0x3100] sm:$0xff]  ;;  %2225 = vmatpush.msrb.mxu1 %v1372_v53  ;;  %v109_v52 = vld [vmem:[#allocation2 + $0x208] sm:$0xff] }
  0x82   :  { %v1884_v55 = vld [vmem:[#allocation2 + $0x3980] sm:$0xff]  ;;  %2246 = vmatpush.msrb.mxu2 %v1612_v54  ;;  %v381_v53 = vld [vmem:[#allocation2 + $0xa88] sm:$0xff] }
  0x83   :  { %v1084_v56 = vld [vmem:[#allocation2 + $0x2080] sm:$0xff]  ;;  %2265 = vmatpush.msrb.mxu3 %v1884_v55  ;;  %v621_v54 = vld [vmem:[#allocation2 + $0x1208] sm:$0xff] }
  0x84   :  { %v1356_v57 = vld [vmem:[#allocation2 + $0x2900] sm:$0xff]  ;;  %2207 = vmatpush.msrb.mxu0 %v1084_v56  ;;  %v893_v55 = vld [vmem:[#allocation2 + $0x1a88] sm:$0xff] }
  0x85   :  { %v1596_v58 = vld [vmem:[#allocation2 + $0x3080] sm:$0xff]  ;;  %2226 = vmatpush.msrb.mxu1 %v1356_v57  ;;  %v93_v56 = vld [vmem:[#allocation2 + $0x188] sm:$0xff] }
  0x86   :  { %v1868_v59 = vld [vmem:[#allocation2 + $0x3900] sm:$0xff]  ;;  %2247 = vmatpush.msrb.mxu2 %v1596_v58  ;;  %v365_v57 = vld [vmem:[#allocation2 + $0xa08] sm:$0xff] }
  0x87   :  { %v1068_v61 = vld [vmem:[#allocation2 + $0x2000] sm:$0xff]  ;;  %2266 = vmatpush.msrb.mxu3 %v1868_v59  ;;  %v605_v58 = vld [vmem:[#allocation2 + $0x1188] sm:$0xff] }
  0x88   :  { %v1340_v62 = vld [vmem:[#allocation2 + $0x2880] sm:$0xff]  ;;  %2208 = vmatpush.msrb.mxu0 %v1068_v61  ;;  %v877_v59 = vld [vmem:[#allocation2 + $0x1a08] sm:$0xff] }
  0x89   :  { %v1580_v63 = vld [vmem:[#allocation2 + $0x3000] sm:$0xff]  ;;  %2227 = vmatpush.msrb.mxu1 %v1340_v62  ;;  %2209 = vmatmul.f32.vlgmr.msrb.gmra.mxu0 %v4921_v21  ;;  %v77_v61 = vld [vmem:[#allocation2 + $0x108] sm:$0xff] }
  0x8a   :  { %v1852_v0 = vld [vmem:[#allocation2 + $0x3880] sm:$0xff]  ;;  %2248 = vmatpush.msrb.mxu2 %v1580_v63  ;;  %2273 = vmatpush.msra.mxu0 %v285_v3  ;;  %v349_v62 = vld [vmem:[#allocation2 + $0x988] sm:$0xff] }
  0x8b   :  { %v1324_v5 = vld [vmem:[#allocation2 + $0x2800] sm:$0xff]  ;;  %2267 = vmatpush.msrb.mxu3 %v1852_v0  ;;  %2249 = vmatmul.f32.vlgmr.msrb.gmra.mxu2 %v4919_v16  ;;  %v589_v63 = vld [vmem:[#allocation2 + $0x1108] sm:$0xff] }
  0x8c   :  { %v1836_v6 = vld [vmem:[#allocation2 + $0x3800] sm:$0xff]  ;;  %2313 = vmatpush.msra.mxu2 %v797_v4  ;;  %2228 = vmatpush.msrb.mxu1 %v1324_v5  ;;  %v861_v0 = vld [vmem:[#allocation2 + $0x1988] sm:$0xff] }
  0x8d   :  { %v4915_v7 = vld.sshfl [vmem:[#allocation1 + $0x8] sm:$0xff pattern:$0x73625140]  ;;  %2268 = vmatpush.msrb.mxu3 %v1836_v6  ;;  %2274 = vmatpush.msra.mxu0 %v269_v8  ;;  %v61_v3 = vld [vmem:[#allocation2 + $0x88] sm:$0xff] }
  0x8e   :  { %2149 = vmatmul.f32.vlgmr.msra.gmra.mxu1 %v4915_v7  ;;  %2314 = vmatpush.msra.mxu2 %v781_v10  ;;  %v4927_v27 = vld.sshfl [vmem:[#allocation1 + $0x28] sm:$0xff pattern:$0x73625140]  ;;  %v333_v4 = vld [vmem:[#allocation2 + $0x908] sm:$0xff] }
  0x8f   :  { %2293 = vmatpush.msra.mxu1 %v541_v9  ;;  %2333 = vmatpush.msra.mxu3 %v1053_v11  ;;  %v573_v5 = vld [vmem:[#allocation2 + $0x1088] sm:$0xff] }
  0x90   :  { %2275 = vmatpush.msra.mxu0 %v253_v12  ;;  %2315 = vmatpush.msra.mxu2 %v765_v14  ;;  %v845_v6 = vld [vmem:[#allocation2 + $0x1908] sm:$0xff] }
  0x91   :  { %2294 = vmatpush.msra.mxu1 %v525_v13  ;;  %2334 = vmatpush.msra.mxu3 %v1037_v15  ;;  %v45_v8 = vld [vmem:[#allocation2 + $0x8] sm:$0xff] }
  0x92   :  { %2276 = vmatpush.msra.mxu0 %v237_v17  ;;  %2316 = vmatpush.msra.mxu2 %v749_v19  ;;  %v317_v9 = vld [vmem:[#allocation2 + $0x888] sm:$0xff] }
  0x93   :  { %2295 = vmatpush.msra.mxu1 %v509_v18  ;;  %2335 = vmatpush.msra.mxu3 %v1021_v20  ;;  %v557_v10 = vld [vmem:[#allocation2 + $0x1008] sm:$0xff] }
  0x94   :  { %2269 = vmatmul.f32.vlgmr.msrb.gmra.mxu3 %v4924_v22  ;;  %2277 = vmatpush.msra.mxu0 %v221_v23  ;;  %v829_v11 = vld [vmem:[#allocation2 + $0x1888] sm:$0xff] }
  0x95   :  { %2296 = vmatpush.msra.mxu1 %v493_v24  ;;  %2317 = vmatpush.msra.mxu2 %v733_v25  ;;  %v1309_v12 = vld [vmem:[#allocation2 + $0x2788] sm:$0xff] }
  0x96   :  { %2336 = vmatpush.msra.mxu3 %v1005_v26  ;;  %2229 = vmatmul.f32.vlgmr.msrb.gmra.mxu1 %v4927_v27  ;;  %v1821_v13 = vld [vmem:[#allocation2 + $0x3788] sm:$0xff] }
  0x97   :  { %2278 = vmatpush.msra.mxu0 %v205_v28  ;;  %2297 = vmatpush.msra.mxu1 %v477_v29  ;;  %v301_v14 = vld [vmem:[#allocation2 + $0x808] sm:$0xff] }
  0x98   :  { %2318 = vmatpush.msra.mxu2 %v717_v30  ;;  %2337 = vmatpush.msra.mxu3 %v989_v31  ;;  %v813_v15 = vld [vmem:[#allocation2 + $0x1808] sm:$0xff] }
  0x99   :  { %2279 = vmatpush.msra.mxu0 %v189_v32  ;;  %2298 = vmatpush.msra.mxu1 %v461_v33  ;;  %v1293_v17 = vld [vmem:[#allocation2 + $0x2708] sm:$0xff] }
  0x9a   :  { %2319 = vmatpush.msra.mxu2 %v701_v34  ;;  %2338 = vmatpush.msra.mxu3 %v973_v35  ;;  %v1565_v18 = vld [vmem:[#allocation2 + $0x2f88] sm:$0xff] }
  0x9b   :  { %2280 = vmatpush.msra.mxu0 %v173_v36  ;;  %2299 = vmatpush.msra.mxu1 %v445_v37  ;;  %v1805_v19 = vld [vmem:[#allocation2 + $0x3708] sm:$0xff] }
  0x9c   :  { %2320 = vmatpush.msra.mxu2 %v685_v38  ;;  %2339 = vmatpush.msra.mxu3 %v957_v39  ;;  %v2077_v20 = vld [vmem:[#allocation2 + $0x3f88] sm:$0xff] }
  0x9d   :  { %2281 = vmatpush.msra.mxu0 %v157_v40  ;;  %2300 = vmatpush.msra.mxu1 %v429_v41  ;;  %v1277_v23 = vld [vmem:[#allocation2 + $0x2688] sm:$0xff] }
  0x9e   :  { %2321 = vmatpush.msra.mxu2 %v669_v42  ;;  %2340 = vmatpush.msra.mxu3 %v941_v43  ;;  %v1549_v24 = vld [vmem:[#allocation2 + $0x2f08] sm:$0xff] }
  0x9f   :  { %2282 = vmatpush.msra.mxu0 %v141_v44  ;;  %2301 = vmatpush.msra.mxu1 %v413_v45  ;;  %v1789_v25 = vld [vmem:[#allocation2 + $0x3688] sm:$0xff] }
  0xa0   :  { %2322 = vmatpush.msra.mxu2 %v653_v46  ;;  %2341 = vmatpush.msra.mxu3 %v925_v47  ;;  %v2061_v26 = vld [vmem:[#allocation2 + $0x3f08] sm:$0xff] }
  0xa1   :  { %2283 = vmatpush.msra.mxu0 %v125_v48  ;;  %2302 = vmatpush.msra.mxu1 %v397_v49  ;;  %v1261_v28 = vld [vmem:[#allocation2 + $0x2608] sm:$0xff] }
  0xa2   :  { %2323 = vmatpush.msra.mxu2 %v637_v50  ;;  %2342 = vmatpush.msra.mxu3 %v909_v51  ;;  %v1533_v29 = vld [vmem:[#allocation2 + $0x2e88] sm:$0xff] }
  0xa3   :  { %2284 = vmatpush.msra.mxu0 %v109_v52  ;;  %2303 = vmatpush.msra.mxu1 %v381_v53  ;;  %v1773_v30 = vld [vmem:[#allocation2 + $0x3608] sm:$0xff] }
  0xa4   :  { %2324 = vmatpush.msra.mxu2 %v621_v54  ;;  %2343 = vmatpush.msra.mxu3 %v893_v55  ;;  %v2045_v31 = vld [vmem:[#allocation2 + $0x3e88] sm:$0xff] }
  0xa5   :  { %2285 = vmatpush.msra.mxu0 %v93_v56  ;;  %2304 = vmatpush.msra.mxu1 %v365_v57  ;;  %v1245_v32 = vld [vmem:[#allocation2 + $0x2588] sm:$0xff] }
  0xa6   :  { %2325 = vmatpush.msra.mxu2 %v605_v58  ;;  %2344 = vmatpush.msra.mxu3 %v877_v59  ;;  %v1517_v33 = vld [vmem:[#allocation2 + $0x2e08] sm:$0xff] }
  0xa7   :  { %2286 = vmatpush.msra.mxu0 %v77_v61  ;;  %2305 = vmatpush.msra.mxu1 %v349_v62  ;;  %v1757_v34 = vld [vmem:[#allocation2 + $0x3588] sm:$0xff] }
  0xa8   :  { %2326 = vmatpush.msra.mxu2 %v589_v63  ;;  %2345 = vmatpush.msra.mxu3 %v861_v0  ;;  %v2029_v35 = vld [vmem:[#allocation2 + $0x3e08] sm:$0xff] }
  0xa9   :  { %2287 = vmatpush.msra.mxu0 %v61_v3  ;;  %2306 = vmatpush.msra.mxu1 %v333_v4  ;;  %v1229_v36 = vld [vmem:[#allocation2 + $0x2508] sm:$0xff] }
  0xaa   :  { %2327 = vmatpush.msra.mxu2 %v573_v5  ;;  %2346 = vmatpush.msra.mxu3 %v845_v6  ;;  %v1501_v37 = vld [vmem:[#allocation2 + $0x2d88] sm:$0xff] }
  0xab   :  { %2288 = vmatpush.msra.mxu0 %v45_v8  ;;  %2307 = vmatpush.msra.mxu1 %v317_v9  ;;  %v1741_v38 = vld [vmem:[#allocation2 + $0x3508] sm:$0xff] }
  0xac   :  { %2328 = vmatpush.msra.mxu2 %v557_v10  ;;  %2347 = vmatpush.msra.mxu3 %v829_v11  ;;  %v2013_v39 = vld [vmem:[#allocation2 + $0x3d88] sm:$0xff] }
  0xad   :  { %2353 = vmatpush.msrb.mxu0 %v1309_v12  ;;  %2308 = vmatpush.msra.mxu1 %v301_v14  ;;  %v1213_v40 = vld [vmem:[#allocation2 + $0x2488] sm:$0xff] }
  0xae   :  { %2393 = vmatpush.msrb.mxu2 %v1821_v13  ;;  %2348 = vmatpush.msra.mxu3 %v813_v15  ;;  %v1485_v41 = vld [vmem:[#allocation2 + $0x2d08] sm:$0xff] }
  0xaf   :  { %2354 = vmatpush.msrb.mxu0 %v1293_v17  ;;  %2373 = vmatpush.msrb.mxu1 %v1565_v18  ;;  %v1725_v42 = vld [vmem:[#allocation2 + $0x3488] sm:$0xff] }
  0xb0   :  { %2394 = vmatpush.msrb.mxu2 %v1805_v19  ;;  %2413 = vmatpush.msrb.mxu3 %v2077_v20  ;;  %v1997_v43 = vld [vmem:[#allocation2 + $0x3d08] sm:$0xff] }
  0xb1   :  { %2355 = vmatpush.msrb.mxu0 %v1277_v23  ;;  %2374 = vmatpush.msrb.mxu1 %v1549_v24  ;;  %v1197_v44 = vld [vmem:[#allocation2 + $0x2408] sm:$0xff]  ;;  %v542_v24 = vld [vmem:[#allocation2 + $0xf90] sm:$0xff] }
  0xb2   :  { %2395 = vmatpush.msrb.mxu2 %v1789_v25  ;;  %2414 = vmatpush.msrb.mxu3 %v2061_v26  ;;  %v1469_v45 = vld [vmem:[#allocation2 + $0x2c88] sm:$0xff]  ;;  %v782_v25 = vld [vmem:[#allocation2 + $0x1710] sm:$0xff] }
  0xb3   :  { %2356 = vmatpush.msrb.mxu0 %v1261_v28  ;;  %2375 = vmatpush.msrb.mxu1 %v1533_v29  ;;  %v1709_v46 = vld [vmem:[#allocation2 + $0x3408] sm:$0xff]  ;;  %v1054_v26 = vld [vmem:[#allocation2 + $0x1f90] sm:$0xff] }
  0xb4   :  { %2396 = vmatpush.msrb.mxu2 %v1773_v30  ;;  %2415 = vmatpush.msrb.mxu3 %v2045_v31  ;;  %v1981_v47 = vld [vmem:[#allocation2 + $0x3c88] sm:$0xff]  ;;  %v254_v28 = vld [vmem:[#allocation2 + $0x690] sm:$0xff] }
  0xb5   :  { %2357 = vmatpush.msrb.mxu0 %v1245_v32  ;;  %2376 = vmatpush.msrb.mxu1 %v1517_v33  ;;  %v1181_v48 = vld [vmem:[#allocation2 + $0x2388] sm:$0xff]  ;;  %v526_v29 = vld [vmem:[#allocation2 + $0xf10] sm:$0xff] }
  0xb6   :  { %2397 = vmatpush.msrb.mxu2 %v1757_v34  ;;  %2416 = vmatpush.msrb.mxu3 %v2029_v35  ;;  %v1453_v49 = vld [vmem:[#allocation2 + $0x2c08] sm:$0xff]  ;;  %v766_v30 = vld [vmem:[#allocation2 + $0x1690] sm:$0xff] }
  0xb7   :  { %2358 = vmatpush.msrb.mxu0 %v1229_v36  ;;  %2377 = vmatpush.msrb.mxu1 %v1501_v37  ;;  %v1693_v50 = vld [vmem:[#allocation2 + $0x3388] sm:$0xff]  ;;  %v1038_v31 = vld [vmem:[#allocation2 + $0x1f10] sm:$0xff] }
  0xb8   :  { %2398 = vmatpush.msrb.mxu2 %v1741_v38  ;;  %2417 = vmatpush.msrb.mxu3 %v2013_v39  ;;  %v1965_v51 = vld [vmem:[#allocation2 + $0x3c08] sm:$0xff]  ;;  %v510_v32 = vld [vmem:[#allocation2 + $0xe90] sm:$0xff] }
  0xb9   :  { %2359 = vmatpush.msrb.mxu0 %v1213_v40  ;;  %2378 = vmatpush.msrb.mxu1 %v1485_v41  ;;  %v1165_v52 = vld [vmem:[#allocation2 + $0x2308] sm:$0xff]  ;;  %v750_v33 = vld [vmem:[#allocation2 + $0x1610] sm:$0xff] }
  0xba   :  { %2399 = vmatpush.msrb.mxu2 %v1725_v42  ;;  %2418 = vmatpush.msrb.mxu3 %v1997_v43  ;;  %v1437_v53 = vld [vmem:[#allocation2 + $0x2b88] sm:$0xff]  ;;  %v1022_v34 = vld [vmem:[#allocation2 + $0x1e90] sm:$0xff] }
  0xbb   :  { %2360 = vmatpush.msrb.mxu0 %v1197_v44  ;;  %2379 = vmatpush.msrb.mxu1 %v1469_v45  ;;  %v1677_v54 = vld [vmem:[#allocation2 + $0x3308] sm:$0xff]  ;;  %v734_v35 = vld [vmem:[#allocation2 + $0x1590] sm:$0xff] }
  0xbc   :  { %2400 = vmatpush.msrb.mxu2 %v1709_v46  ;;  %2419 = vmatpush.msrb.mxu3 %v1981_v47  ;;  %v1949_v55 = vld [vmem:[#allocation2 + $0x3b88] sm:$0xff]  ;;  %v1006_v36 = vld [vmem:[#allocation2 + $0x1e10] sm:$0xff] }
  0xbd   :  { %2361 = vmatpush.msrb.mxu0 %v1181_v48  ;;  %2380 = vmatpush.msrb.mxu1 %v1453_v49  ;;  %v1149_v56 = vld [vmem:[#allocation2 + $0x2288] sm:$0xff]  ;;  %v206_v37 = vld [vmem:[#allocation2 + $0x510] sm:$0xff] }
  0xbe   :  { %2401 = vmatpush.msrb.mxu2 %v1693_v50  ;;  %2420 = vmatpush.msrb.mxu3 %v1965_v51  ;;  %v1421_v57 = vld [vmem:[#allocation2 + $0x2b08] sm:$0xff]  ;;  %v478_v38 = vld [vmem:[#allocation2 + $0xd90] sm:$0xff] }
  0xbf   :  { %2362 = vmatpush.msrb.mxu0 %v1165_v52  ;;  %2381 = vmatpush.msrb.mxu1 %v1437_v53  ;;  %v1661_v58 = vld [vmem:[#allocation2 + $0x3288] sm:$0xff]  ;;  %v990_v39 = vld [vmem:[#allocation2 + $0x1d90] sm:$0xff] }
  0xc0   :  { %v1933_v59 = vld [vmem:[#allocation2 + $0x3b08] sm:$0xff]  ;;  %2402 = vmatpush.msrb.mxu2 %v1677_v54  ;;  %2421 = vmatpush.msrb.mxu3 %v1949_v55  ;;  %v190_v40 = vld [vmem:[#allocation2 + $0x490] sm:$0xff] }
  0xc1   :  { %v1133_v61 = vld [vmem:[#allocation2 + $0x2208] sm:$0xff]  ;;  %2363 = vmatpush.msrb.mxu0 %v1149_v56  ;;  %2382 = vmatpush.msrb.mxu1 %v1421_v57  ;;  %v462_v41 = vld [vmem:[#allocation2 + $0xd10] sm:$0xff] }
  0xc2   :  { %v1405_v62 = vld [vmem:[#allocation2 + $0x2a88] sm:$0xff]  ;;  %2403 = vmatpush.msrb.mxu2 %v1661_v58  ;;  %2422 = vmatpush.msrb.mxu3 %v1933_v59  ;;  %v702_v42 = vld [vmem:[#allocation2 + $0x1490] sm:$0xff] }
  0xc3   :  { %v1645_v63 = vld [vmem:[#allocation2 + $0x3208] sm:$0xff]  ;;  %2364 = vmatpush.msrb.mxu0 %v1133_v61  ;;  %2383 = vmatpush.msrb.mxu1 %v1405_v62  ;;  %v974_v43 = vld [vmem:[#allocation2 + $0x1d10] sm:$0xff] }
  0xc4   :  { %v1917_v0 = vld [vmem:[#allocation2 + $0x3a88] sm:$0xff]  ;;  %2404 = vmatpush.msrb.mxu2 %v1645_v63  ;;  %2289 = vmatmul.f32.vlgmr.msra.gmra.mxu0 %v4909_v1  ;;  %v286_v1 = vld [vmem:[#allocation2 + $0x790] sm:$0xff] }
  0xc5   :  { %v1117_v3 = vld [vmem:[#allocation2 + $0x2188] sm:$0xff]  ;;  %2423 = vmatpush.msrb.mxu3 %v1917_v0  ;;  %2329 = vmatmul.f32.vlgmr.msra.gmra.mxu2 %v4907_v60  ;;  %v174_v44 = vld [vmem:[#allocation2 + $0x410] sm:$0xff] }
  0xc6   :  { %v1389_v4 = vld [vmem:[#allocation2 + $0x2a08] sm:$0xff]  ;;  %2365 = vmatpush.msrb.mxu0 %v1117_v3  ;;  %2349 = vmatmul.f32.vlgmr.msra.gmra.mxu3 %v4912_v2  ;;  %v798_v2 = vld [vmem:[#allocation2 + $0x1790] sm:$0xff] }
  0xc7   :  { %v1629_v5 = vld [vmem:[#allocation2 + $0x3188] sm:$0xff]  ;;  %2384 = vmatpush.msrb.mxu1 %v1389_v4  ;;  %v446_v45 = vld [vmem:[#allocation2 + $0xc90] sm:$0xff] }
  0xc8   :  { %v1901_v6 = vld [vmem:[#allocation2 + $0x3a08] sm:$0xff]  ;;  %2405 = vmatpush.msrb.mxu2 %v1629_v5  ;;  %2309 = vmatmul.f32.vlgmr.msra.gmra.mxu1 %v4915_v7  ;;  %v270_v7 = vld [vmem:[#allocation2 + $0x710] sm:$0xff] }
  0xc9   :  { %v1101_v8 = vld [vmem:[#allocation2 + $0x2108] sm:$0xff]  ;;  %2424 = vmatpush.msrb.mxu3 %v1901_v6  ;;  %v686_v46 = vld [vmem:[#allocation2 + $0x1410] sm:$0xff] }
  0xca   :  { %v1373_v9 = vld [vmem:[#allocation2 + $0x2988] sm:$0xff]  ;;  %2366 = vmatpush.msrb.mxu0 %v1101_v8  ;;  %v958_v47 = vld [vmem:[#allocation2 + $0x1c90] sm:$0xff] }
  0xcb   :  { %v1613_v10 = vld [vmem:[#allocation2 + $0x3108] sm:$0xff]  ;;  %2385 = vmatpush.msrb.mxu1 %v1373_v9  ;;  %v158_v48 = vld [vmem:[#allocation2 + $0x390] sm:$0xff] }
  0xcc   :  { %v1885_v11 = vld [vmem:[#allocation2 + $0x3988] sm:$0xff]  ;;  %2406 = vmatpush.msrb.mxu2 %v1613_v10  ;;  %v430_v49 = vld [vmem:[#allocation2 + $0xc10] sm:$0xff] }
  0xcd   :  { %v1085_v12 = vld [vmem:[#allocation2 + $0x2088] sm:$0xff]  ;;  %2425 = vmatpush.msrb.mxu3 %v1885_v11  ;;  %v670_v50 = vld [vmem:[#allocation2 + $0x1390] sm:$0xff] }
  0xce   :  { %v1357_v13 = vld [vmem:[#allocation2 + $0x2908] sm:$0xff]  ;;  %2367 = vmatpush.msrb.mxu0 %v1085_v12  ;;  %v942_v51 = vld [vmem:[#allocation2 + $0x1c10] sm:$0xff] }
  0xcf   :  { %v1597_v14 = vld [vmem:[#allocation2 + $0x3088] sm:$0xff]  ;;  %2386 = vmatpush.msrb.mxu1 %v1357_v13  ;;  %v142_v52 = vld [vmem:[#allocation2 + $0x310] sm:$0xff] }
  0xd0   :  { %v1869_v15 = vld [vmem:[#allocation2 + $0x3908] sm:$0xff]  ;;  %2407 = vmatpush.msrb.mxu2 %v1597_v14  ;;  %v414_v53 = vld [vmem:[#allocation2 + $0xb90] sm:$0xff] }
  0xd1   :  { %v1069_v60 = vld [vmem:[#allocation2 + $0x2008] sm:$0xff]  ;;  %2426 = vmatpush.msrb.mxu3 %v1869_v15  ;;  %v654_v54 = vld [vmem:[#allocation2 + $0x1310] sm:$0xff] }
  0xd2   :  { %v1341_v17 = vld [vmem:[#allocation2 + $0x2888] sm:$0xff]  ;;  %2368 = vmatpush.msrb.mxu0 %v1069_v60  ;;  %v926_v55 = vld [vmem:[#allocation2 + $0x1b90] sm:$0xff] }
  0xd3   :  { %v1581_v18 = vld [vmem:[#allocation2 + $0x3008] sm:$0xff]  ;;  %2387 = vmatpush.msrb.mxu1 %v1341_v17  ;;  %2369 = vmatmul.f32.vlgmr.msrb.gmra.mxu0 %v4921_v21  ;;  %v222_v21 = vld [vmem:[#allocation2 + $0x590] sm:$0xff] }
  0xd4   :  { %v1853_v19 = vld [vmem:[#allocation2 + $0x3888] sm:$0xff]  ;;  %2408 = vmatpush.msrb.mxu2 %v1581_v18  ;;  %2433 = vmatpush.msra.mxu0 %v286_v1  ;;  %v126_v56 = vld [vmem:[#allocation2 + $0x290] sm:$0xff] }
  0xd5   :  { %v1325_v20 = vld [vmem:[#allocation2 + $0x2808] sm:$0xff]  ;;  %2427 = vmatpush.msrb.mxu3 %v1853_v19  ;;  %2409 = vmatmul.f32.vlgmr.msrb.gmra.mxu2 %v4919_v16  ;;  %v238_v16 = vld [vmem:[#allocation2 + $0x610] sm:$0xff] }
  0xd6   :  { %v1837_v23 = vld [vmem:[#allocation2 + $0x3808] sm:$0xff]  ;;  %2473 = vmatpush.msra.mxu2 %v798_v2  ;;  %2388 = vmatpush.msrb.mxu1 %v1325_v20  ;;  %v398_v57 = vld [vmem:[#allocation2 + $0xb10] sm:$0xff] }
  0xd7   :  { %2428 = vmatpush.msrb.mxu3 %v1837_v23  ;;  %2434 = vmatpush.msra.mxu0 %v270_v7  ;;  %v638_v58 = vld [vmem:[#allocation2 + $0x1290] sm:$0xff] }
  0xd8   :  { %2429 = vmatmul.f32.vlgmr.msrb.gmra.mxu3 %v4924_v22  ;;  %2453 = vmatpush.msra.mxu1 %v542_v24  ;;  %v494_v22 = vld [vmem:[#allocation2 + $0xe10] sm:$0xff] }
  0xd9   :  { %2474 = vmatpush.msra.mxu2 %v782_v25  ;;  %2493 = vmatpush.msra.mxu3 %v1054_v26  ;;  %v910_v59 = vld [vmem:[#allocation2 + $0x1b10] sm:$0xff] }
  0xda   :  { %2389 = vmatmul.f32.vlgmr.msrb.gmra.mxu1 %v4927_v27  ;;  %2435 = vmatpush.msra.mxu0 %v254_v28  ;;  %v718_v27 = vld [vmem:[#allocation2 + $0x1510] sm:$0xff] }
  0xdb   :  { %2454 = vmatpush.msra.mxu1 %v526_v29  ;;  %2475 = vmatpush.msra.mxu2 %v766_v30  ;;  %v110_v61 = vld [vmem:[#allocation2 + $0x210] sm:$0xff] }
  0xdc   :  { %2494 = vmatpush.msra.mxu3 %v1038_v31  ;;  %2436 = vmatpush.msra.mxu0 %v238_v16  ;;  %v382_v62 = vld [vmem:[#allocation2 + $0xa90] sm:$0xff] }
  0xdd   :  { %2455 = vmatpush.msra.mxu1 %v510_v32  ;;  %2476 = vmatpush.msra.mxu2 %v750_v33  ;;  %v622_v63 = vld [vmem:[#allocation2 + $0x1210] sm:$0xff] }
  0xde   :  { %2495 = vmatpush.msra.mxu3 %v1022_v34  ;;  %2437 = vmatpush.msra.mxu0 %v222_v21  ;;  %v894_v0 = vld [vmem:[#allocation2 + $0x1a90] sm:$0xff] }
  0xdf   :  { %2456 = vmatpush.msra.mxu1 %v494_v22  ;;  %2477 = vmatpush.msra.mxu2 %v734_v35  ;;  %v94_v3 = vld [vmem:[#allocation2 + $0x190] sm:$0xff] }
  0xe0   :  { %2496 = vmatpush.msra.mxu3 %v1006_v36  ;;  %2438 = vmatpush.msra.mxu0 %v206_v37  ;;  %v366_v4 = vld [vmem:[#allocation2 + $0xa10] sm:$0xff] }
  0xe1   :  { %2457 = vmatpush.msra.mxu1 %v478_v38  ;;  %2478 = vmatpush.msra.mxu2 %v718_v27  ;;  %v606_v5 = vld [vmem:[#allocation2 + $0x1190] sm:$0xff] }
  0xe2   :  { %2497 = vmatpush.msra.mxu3 %v990_v39  ;;  %2439 = vmatpush.msra.mxu0 %v190_v40  ;;  %v878_v6 = vld [vmem:[#allocation2 + $0x1a10] sm:$0xff] }
  0xe3   :  { %2458 = vmatpush.msra.mxu1 %v462_v41  ;;  %2479 = vmatpush.msra.mxu2 %v702_v42  ;;  %v78_v8 = vld [vmem:[#allocation2 + $0x110] sm:$0xff] }
  0xe4   :  { %2498 = vmatpush.msra.mxu3 %v974_v43  ;;  %2440 = vmatpush.msra.mxu0 %v174_v44  ;;  %v350_v9 = vld [vmem:[#allocation2 + $0x990] sm:$0xff] }
  0xe5   :  { %2459 = vmatpush.msra.mxu1 %v446_v45  ;;  %2480 = vmatpush.msra.mxu2 %v686_v46  ;;  %v590_v10 = vld [vmem:[#allocation2 + $0x1110] sm:$0xff] }
  0xe6   :  { %2499 = vmatpush.msra.mxu3 %v958_v47  ;;  %2441 = vmatpush.msra.mxu0 %v158_v48  ;;  %v862_v11 = vld [vmem:[#allocation2 + $0x1990] sm:$0xff] }
  0xe7   :  { %2460 = vmatpush.msra.mxu1 %v430_v49  ;;  %2481 = vmatpush.msra.mxu2 %v670_v50  ;;  %v62_v12 = vld [vmem:[#allocation2 + $0x90] sm:$0xff] }
  0xe8   :  { %2500 = vmatpush.msra.mxu3 %v942_v51  ;;  %2442 = vmatpush.msra.mxu0 %v142_v52  ;;  %v334_v13 = vld [vmem:[#allocation2 + $0x910] sm:$0xff] }
  0xe9   :  { %2461 = vmatpush.msra.mxu1 %v414_v53  ;;  %2482 = vmatpush.msra.mxu2 %v654_v54  ;;  %v574_v14 = vld [vmem:[#allocation2 + $0x1090] sm:$0xff] }
  0xea   :  { %2501 = vmatpush.msra.mxu3 %v926_v55  ;;  %2443 = vmatpush.msra.mxu0 %v126_v56  ;;  %v846_v15 = vld [vmem:[#allocation2 + $0x1910] sm:$0xff] }
  0xeb   :  { %2462 = vmatpush.msra.mxu1 %v398_v57  ;;  %2483 = vmatpush.msra.mxu2 %v638_v58  ;;  %v46_v60 = vld [vmem:[#allocation2 + $0x10] sm:$0xff] }
  0xec   :  { %2502 = vmatpush.msra.mxu3 %v910_v59  ;;  %2444 = vmatpush.msra.mxu0 %v110_v61  ;;  %v318_v17 = vld [vmem:[#allocation2 + $0x890] sm:$0xff] }
  0xed   :  { %2463 = vmatpush.msra.mxu1 %v382_v62  ;;  %2484 = vmatpush.msra.mxu2 %v622_v63  ;;  %v558_v18 = vld [vmem:[#allocation2 + $0x1010] sm:$0xff] }
  0xee   :  { %2503 = vmatpush.msra.mxu3 %v894_v0  ;;  %2445 = vmatpush.msra.mxu0 %v94_v3  ;;  %v830_v19 = vld [vmem:[#allocation2 + $0x1890] sm:$0xff] }
  0xef   :  { %2464 = vmatpush.msra.mxu1 %v366_v4  ;;  %2485 = vmatpush.msra.mxu2 %v606_v5  ;;  %v1310_v1 = vld [vmem:[#allocation2 + $0x2790] sm:$0xff] }
  0xf0   :  { %2504 = vmatpush.msra.mxu3 %v878_v6  ;;  %2446 = vmatpush.msra.mxu0 %v78_v8  ;;  %v1822_v2 = vld [vmem:[#allocation2 + $0x3790] sm:$0xff] }
  0xf1   :  { %2465 = vmatpush.msra.mxu1 %v350_v9  ;;  %2486 = vmatpush.msra.mxu2 %v590_v10  ;;  %v302_v20 = vld [vmem:[#allocation2 + $0x810] sm:$0xff] }
  0xf2   :  { %2505 = vmatpush.msra.mxu3 %v862_v11  ;;  %2447 = vmatpush.msra.mxu0 %v62_v12  ;;  %v814_v23 = vld [vmem:[#allocation2 + $0x1810] sm:$0xff] }
  0xf3   :  { %2466 = vmatpush.msra.mxu1 %v334_v13  ;;  %2487 = vmatpush.msra.mxu2 %v574_v14  ;;  %v1294_v7 = vld [vmem:[#allocation2 + $0x2710] sm:$0xff] }
  0xf4   :  { %2506 = vmatpush.msra.mxu3 %v846_v15  ;;  %2448 = vmatpush.msra.mxu0 %v46_v60  ;;  %v1566_v24 = vld [vmem:[#allocation2 + $0x2f90] sm:$0xff] }
  0xf5   :  { %2467 = vmatpush.msra.mxu1 %v318_v17  ;;  %2488 = vmatpush.msra.mxu2 %v558_v18  ;;  %v1806_v25 = vld [vmem:[#allocation2 + $0x3710] sm:$0xff] }
  0xf6   :  { %2507 = vmatpush.msra.mxu3 %v830_v19  ;;  %2513 = vmatpush.msrb.mxu0 %v1310_v1  ;;  %v2078_v26 = vld [vmem:[#allocation2 + $0x3f90] sm:$0xff]  ;;  %v4939_v1 = vld.sshfl [vmem:[#allocation1 + $0x10] sm:$0xff pattern:$0x73625140] }
  0xf7   :  { %2553 = vmatpush.msrb.mxu2 %v1822_v2  ;;  %2468 = vmatpush.msra.mxu1 %v302_v20  ;;  %v1278_v28 = vld [vmem:[#allocation2 + $0x2690] sm:$0xff]  ;;  %v287_v2 = vld [vmem:[#allocation2 + $0x798] sm:$0xff] }
  0xf8   :  { %2508 = vmatpush.msra.mxu3 %v814_v23  ;;  %v1550_v29 = vld [vmem:[#allocation2 + $0x2f10] sm:$0xff]  ;;  %2514 = vmatpush.msrb.mxu0 %v1294_v7  ;;  %v799_v20 = vld [vmem:[#allocation2 + $0x1798] sm:$0xff] }
  0xf9   :  { %2533 = vmatpush.msrb.mxu1 %v1566_v24  ;;  %v1790_v30 = vld [vmem:[#allocation2 + $0x3690] sm:$0xff]  ;;  %2554 = vmatpush.msrb.mxu2 %v1806_v25  ;;  %v4942_v7 = vld.sshfl [vmem:[#allocation1] sm:$0xff pattern:$0x73625140] }
  0xfa   :  { %v2062_v31 = vld [vmem:[#allocation2 + $0x3f10] sm:$0xff]  ;;  %2573 = vmatpush.msrb.mxu3 %v2078_v26  ;;  %2515 = vmatpush.msrb.mxu0 %v1278_v28  ;;  %v271_v26 = vld [vmem:[#allocation2 + $0x718] sm:$0xff] }
  0xfb   :  { %v1262_v16 = vld [vmem:[#allocation2 + $0x2610] sm:$0xff]  ;;  %2534 = vmatpush.msrb.mxu1 %v1550_v29  ;;  %2555 = vmatpush.msrb.mxu2 %v1790_v30  ;;  %v543_v28 = vld [vmem:[#allocation2 + $0xf98] sm:$0xff] }
  0xfc   :  { %v1534_v32 = vld [vmem:[#allocation2 + $0x2e90] sm:$0xff]  ;;  %2574 = vmatpush.msrb.mxu3 %v2062_v31  ;;  %2516 = vmatpush.msrb.mxu0 %v1262_v16  ;;  %v783_v29 = vld [vmem:[#allocation2 + $0x1718] sm:$0xff]  ;;  %v4948_v31 = vld.sshfl [vmem:[#allocation1 + $0x8] sm:$0xff pattern:$0x73625140] }
  0xfd   :  { %v1774_v33 = vld [vmem:[#allocation2 + $0x3610] sm:$0xff]  ;;  %2535 = vmatpush.msrb.mxu1 %v1534_v32  ;;  %2489 = vmatmul.f32.vlgmr.msra.gmra.mxu2 %v4939_v1  ;;  %v1055_v30 = vld [vmem:[#allocation2 + $0x1f98] sm:$0xff] }
  0xfe   :  { %v2046_v34 = vld [vmem:[#allocation2 + $0x3e90] sm:$0xff]  ;;  %2556 = vmatpush.msrb.mxu2 %v1774_v33  ;;  %2449 = vmatmul.f32.vlgmr.msra.gmra.mxu0 %v4942_v7  ;;  %v255_v16 = vld [vmem:[#allocation2 + $0x698] sm:$0xff] }
  0xff   :  { %v1246_v21 = vld [vmem:[#allocation2 + $0x2590] sm:$0xff]  ;;  %2575 = vmatpush.msrb.mxu3 %v2046_v34  ;;  %2469 = vmatmul.f32.vlgmr.msra.gmra.mxu1 %v4948_v31  ;;  %v527_v32 = vld [vmem:[#allocation2 + $0xf18] sm:$0xff] }
 0x100   :  { %v1518_v22 = vld [vmem:[#allocation2 + $0x2e10] sm:$0xff]  ;;  %2517 = vmatpush.msrb.mxu0 %v1246_v21  ;;  %v767_v33 = vld [vmem:[#allocation2 + $0x1698] sm:$0xff] }
 0x101   :  { %v1758_v35 = vld [vmem:[#allocation2 + $0x3590] sm:$0xff]  ;;  %2536 = vmatpush.msrb.mxu1 %v1518_v22  ;;  %v1039_v34 = vld [vmem:[#allocation2 + $0x1f18] sm:$0xff] }
 0x102   :  { %v2030_v36 = vld [vmem:[#allocation2 + $0x3e10] sm:$0xff]  ;;  %2557 = vmatpush.msrb.mxu2 %v1758_v35  ;;  %v239_v21 = vld [vmem:[#allocation2 + $0x618] sm:$0xff] }
 0x103   :  { %v1230_v37 = vld [vmem:[#allocation2 + $0x2510] sm:$0xff]  ;;  %2576 = vmatpush.msrb.mxu3 %v2030_v36  ;;  %v511_v22 = vld [vmem:[#allocation2 + $0xe98] sm:$0xff] }
 0x104   :  { %v1502_v38 = vld [vmem:[#allocation2 + $0x2d90] sm:$0xff]  ;;  %2518 = vmatpush.msrb.mxu0 %v1230_v37  ;;  %v751_v35 = vld [vmem:[#allocation2 + $0x1618] sm:$0xff]  ;;  %v4951_v37 = vld.sshfl [vmem:[#allocation1 + $0x30] sm:$0xff pattern:$0x73625140] }
 0x105   :  { %v1742_v27 = vld [vmem:[#allocation2 + $0x3510] sm:$0xff]  ;;  %2537 = vmatpush.msrb.mxu1 %v1502_v38  ;;  %v1023_v36 = vld [vmem:[#allocation2 + $0x1e98] sm:$0xff] }
 0x106   :  { %v2014_v39 = vld [vmem:[#allocation2 + $0x3d90] sm:$0xff]  ;;  %2558 = vmatpush.msrb.mxu2 %v1742_v27  ;;  %v223_v38 = vld [vmem:[#allocation2 + $0x598] sm:$0xff] }
 0x107   :  { %v1214_v40 = vld [vmem:[#allocation2 + $0x2490] sm:$0xff]  ;;  %2577 = vmatpush.msrb.mxu3 %v2014_v39  ;;  %v495_v27 = vld [vmem:[#allocation2 + $0xe18] sm:$0xff] }
 0x108   :  { %v1486_v41 = vld [vmem:[#allocation2 + $0x2d10] sm:$0xff]  ;;  %2519 = vmatpush.msrb.mxu0 %v1214_v40  ;;  %v735_v39 = vld [vmem:[#allocation2 + $0x1598] sm:$0xff] }
 0x109   :  { %v1726_v42 = vld [vmem:[#allocation2 + $0x3490] sm:$0xff]  ;;  %2538 = vmatpush.msrb.mxu1 %v1486_v41  ;;  %v4954_v40 = vld.sshfl [vmem:[#allocation1 + $0x20] sm:$0xff pattern:$0x73625140] }
 0x10a   :  { %v1998_v43 = vld [vmem:[#allocation2 + $0x3d10] sm:$0xff]  ;;  %2559 = vmatpush.msrb.mxu2 %v1726_v42  ;;  %v1007_v41 = vld [vmem:[#allocation2 + $0x1e18] sm:$0xff] }
 0x10b   :  { %v1198_v44 = vld [vmem:[#allocation2 + $0x2410] sm:$0xff]  ;;  %2578 = vmatpush.msrb.mxu3 %v1998_v43  ;;  %v207_v43 = vld [vmem:[#allocation2 + $0x518] sm:$0xff] }
 0x10c   :  { %v1470_v45 = vld [vmem:[#allocation2 + $0x2c90] sm:$0xff]  ;;  %2520 = vmatpush.msrb.mxu0 %v1198_v44  ;;  %v479_v44 = vld [vmem:[#allocation2 + $0xd98] sm:$0xff] }
 0x10d   :  { %v1710_v46 = vld [vmem:[#allocation2 + $0x3410] sm:$0xff]  ;;  %2539 = vmatpush.msrb.mxu1 %v1470_v45  ;;  %v719_v45 = vld [vmem:[#allocation2 + $0x1518] sm:$0xff] }
 0x10e   :  { %v1982_v47 = vld [vmem:[#allocation2 + $0x3c90] sm:$0xff]  ;;  %2560 = vmatpush.msrb.mxu2 %v1710_v46  ;;  %v991_v46 = vld [vmem:[#allocation2 + $0x1d98] sm:$0xff] }
 0x10f   :  { %v1182_v48 = vld [vmem:[#allocation2 + $0x2390] sm:$0xff]  ;;  %2579 = vmatpush.msrb.mxu3 %v1982_v47  ;;  %v4960_v47 = vld.sshfl [vmem:[#allocation1 + $0x28] sm:$0xff pattern:$0x73625140] }
 0x110   :  { %v1454_v49 = vld [vmem:[#allocation2 + $0x2c10] sm:$0xff]  ;;  %2521 = vmatpush.msrb.mxu0 %v1182_v48  ;;  %v191_v48 = vld [vmem:[#allocation2 + $0x498] sm:$0xff] }
 0x111   :  { %v1694_v50 = vld [vmem:[#allocation2 + $0x3390] sm:$0xff]  ;;  %2540 = vmatpush.msrb.mxu1 %v1454_v49  ;;  %v463_v49 = vld [vmem:[#allocation2 + $0xd18] sm:$0xff] }
 0x112   :  { %v1966_v51 = vld [vmem:[#allocation2 + $0x3c10] sm:$0xff]  ;;  %2561 = vmatpush.msrb.mxu2 %v1694_v50  ;;  %v703_v50 = vld [vmem:[#allocation2 + $0x1498] sm:$0xff] }
 0x113   :  { %v1166_v52 = vld [vmem:[#allocation2 + $0x2310] sm:$0xff]  ;;  %2580 = vmatpush.msrb.mxu3 %v1966_v51  ;;  %v975_v51 = vld [vmem:[#allocation2 + $0x1d18] sm:$0xff] }
 0x114   :  { %v1438_v53 = vld [vmem:[#allocation2 + $0x2b90] sm:$0xff]  ;;  %2522 = vmatpush.msrb.mxu0 %v1166_v52  ;;  %v175_v52 = vld [vmem:[#allocation2 + $0x418] sm:$0xff] }
 0x115   :  { %v1678_v54 = vld [vmem:[#allocation2 + $0x3310] sm:$0xff]  ;;  %2541 = vmatpush.msrb.mxu1 %v1438_v53  ;;  %v447_v53 = vld [vmem:[#allocation2 + $0xc98] sm:$0xff] }
 0x116   :  { %v1950_v55 = vld [vmem:[#allocation2 + $0x3b90] sm:$0xff]  ;;  %2562 = vmatpush.msrb.mxu2 %v1678_v54  ;;  %v687_v54 = vld [vmem:[#allocation2 + $0x1418] sm:$0xff] }
 0x117   :  { %v1150_v56 = vld [vmem:[#allocation2 + $0x2290] sm:$0xff]  ;;  %2581 = vmatpush.msrb.mxu3 %v1950_v55  ;;  %v959_v55 = vld [vmem:[#allocation2 + $0x1c98] sm:$0xff] }
 0x118   :  { %v1422_v57 = vld [vmem:[#allocation2 + $0x2b10] sm:$0xff]  ;;  %2523 = vmatpush.msrb.mxu0 %v1150_v56  ;;  %v159_v56 = vld [vmem:[#allocation2 + $0x398] sm:$0xff] }
 0x119   :  { %v1662_v58 = vld [vmem:[#allocation2 + $0x3290] sm:$0xff]  ;;  %2542 = vmatpush.msrb.mxu1 %v1422_v57  ;;  %v431_v57 = vld [vmem:[#allocation2 + $0xc18] sm:$0xff] }
 0x11a   :  { %v1934_v59 = vld [vmem:[#allocation2 + $0x3b10] sm:$0xff]  ;;  %2563 = vmatpush.msrb.mxu2 %v1662_v58  ;;  %v671_v58 = vld [vmem:[#allocation2 + $0x1398] sm:$0xff] }
 0x11b   :  { %v1134_v61 = vld [vmem:[#allocation2 + $0x2210] sm:$0xff]  ;;  %2582 = vmatpush.msrb.mxu3 %v1934_v59  ;;  %v943_v59 = vld [vmem:[#allocation2 + $0x1c18] sm:$0xff] }
 0x11c   :  { %v1406_v62 = vld [vmem:[#allocation2 + $0x2a90] sm:$0xff]  ;;  %2524 = vmatpush.msrb.mxu0 %v1134_v61  ;;  %v143_v61 = vld [vmem:[#allocation2 + $0x318] sm:$0xff] }
 0x11d   :  { %v1646_v63 = vld [vmem:[#allocation2 + $0x3210] sm:$0xff]  ;;  %2543 = vmatpush.msrb.mxu1 %v1406_v62  ;;  %v415_v62 = vld [vmem:[#allocation2 + $0xb98] sm:$0xff] }
 0x11e   :  { %v1918_v0 = vld [vmem:[#allocation2 + $0x3a90] sm:$0xff]  ;;  %2564 = vmatpush.msrb.mxu2 %v1646_v63  ;;  %v655_v63 = vld [vmem:[#allocation2 + $0x1318] sm:$0xff] }
 0x11f   :  { %v1118_v3 = vld [vmem:[#allocation2 + $0x2190] sm:$0xff]  ;;  %2583 = vmatpush.msrb.mxu3 %v1918_v0  ;;  %v927_v0 = vld [vmem:[#allocation2 + $0x1b98] sm:$0xff] }
 0x120   :  { %v1390_v4 = vld [vmem:[#allocation2 + $0x2a10] sm:$0xff]  ;;  %2525 = vmatpush.msrb.mxu0 %v1118_v3  ;;  %v127_v3 = vld [vmem:[#allocation2 + $0x298] sm:$0xff] }
 0x121   :  { %v1630_v5 = vld [vmem:[#allocation2 + $0x3190] sm:$0xff]  ;;  %2544 = vmatpush.msrb.mxu1 %v1390_v4  ;;  %v399_v4 = vld [vmem:[#allocation2 + $0xb18] sm:$0xff] }
 0x122   :  { %v1902_v6 = vld [vmem:[#allocation2 + $0x3a10] sm:$0xff]  ;;  %2565 = vmatpush.msrb.mxu2 %v1630_v5  ;;  %v639_v5 = vld [vmem:[#allocation2 + $0x1298] sm:$0xff] }
 0x123   :  { %v1102_v8 = vld [vmem:[#allocation2 + $0x2110] sm:$0xff]  ;;  %2584 = vmatpush.msrb.mxu3 %v1902_v6  ;;  %v911_v6 = vld [vmem:[#allocation2 + $0x1b18] sm:$0xff] }
 0x124   :  { %v1374_v9 = vld [vmem:[#allocation2 + $0x2990] sm:$0xff]  ;;  %2526 = vmatpush.msrb.mxu0 %v1102_v8  ;;  %v111_v8 = vld [vmem:[#allocation2 + $0x218] sm:$0xff] }
 0x125   :  { %v1614_v10 = vld [vmem:[#allocation2 + $0x3110] sm:$0xff]  ;;  %2545 = vmatpush.msrb.mxu1 %v1374_v9  ;;  %v383_v9 = vld [vmem:[#allocation2 + $0xa98] sm:$0xff] }
 0x126   :  { %v1886_v11 = vld [vmem:[#allocation2 + $0x3990] sm:$0xff]  ;;  %2566 = vmatpush.msrb.mxu2 %v1614_v10  ;;  %v623_v10 = vld [vmem:[#allocation2 + $0x1218] sm:$0xff] }
 0x127   :  { %v1086_v12 = vld [vmem:[#allocation2 + $0x2090] sm:$0xff]  ;;  %2585 = vmatpush.msrb.mxu3 %v1886_v11  ;;  %v895_v11 = vld [vmem:[#allocation2 + $0x1a98] sm:$0xff] }
 0x128   :  { %v1358_v13 = vld [vmem:[#allocation2 + $0x2910] sm:$0xff]  ;;  %2527 = vmatpush.msrb.mxu0 %v1086_v12  ;;  %v95_v12 = vld [vmem:[#allocation2 + $0x198] sm:$0xff] }
 0x129   :  { %v1598_v14 = vld [vmem:[#allocation2 + $0x3090] sm:$0xff]  ;;  %2546 = vmatpush.msrb.mxu1 %v1358_v13  ;;  %v367_v13 = vld [vmem:[#allocation2 + $0xa18] sm:$0xff] }
 0x12a   :  { %v1870_v15 = vld [vmem:[#allocation2 + $0x3910] sm:$0xff]  ;;  %2567 = vmatpush.msrb.mxu2 %v1598_v14  ;;  %v607_v14 = vld [vmem:[#allocation2 + $0x1198] sm:$0xff] }
 0x12b   :  { %v1070_v60 = vld [vmem:[#allocation2 + $0x2010] sm:$0xff]  ;;  %2586 = vmatpush.msrb.mxu3 %v1870_v15  ;;  %v879_v15 = vld [vmem:[#allocation2 + $0x1a18] sm:$0xff] }
 0x12c   :  { %v1342_v17 = vld [vmem:[#allocation2 + $0x2890] sm:$0xff]  ;;  %2528 = vmatpush.msrb.mxu0 %v1070_v60  ;;  %v79_v60 = vld [vmem:[#allocation2 + $0x118] sm:$0xff] }
 0x12d   :  { %v1582_v18 = vld [vmem:[#allocation2 + $0x3010] sm:$0xff]  ;;  %2547 = vmatpush.msrb.mxu1 %v1342_v17  ;;  %2529 = vmatmul.f32.vlgmr.msrb.gmra.mxu0 %v4954_v40  ;;  %v351_v17 = vld [vmem:[#allocation2 + $0x998] sm:$0xff] }
 0x12e   :  { %v1854_v19 = vld [vmem:[#allocation2 + $0x3890] sm:$0xff]  ;;  %2568 = vmatpush.msrb.mxu2 %v1582_v18  ;;  %2593 = vmatpush.msra.mxu0 %v287_v2  ;;  %v591_v18 = vld [vmem:[#allocation2 + $0x1118] sm:$0xff] }
 0x12f   :  { %v1326_v23 = vld [vmem:[#allocation2 + $0x2810] sm:$0xff]  ;;  %2587 = vmatpush.msrb.mxu3 %v1854_v19  ;;  %2569 = vmatmul.f32.vlgmr.msrb.gmra.mxu2 %v4951_v37  ;;  %v863_v19 = vld [vmem:[#allocation2 + $0x1998] sm:$0xff] }
 0x130   :  { %v1838_v24 = vld [vmem:[#allocation2 + $0x3810] sm:$0xff]  ;;  %2633 = vmatpush.msra.mxu2 %v799_v20  ;;  %2548 = vmatpush.msrb.mxu1 %v1326_v23  ;;  %v63_v2 = vld [vmem:[#allocation2 + $0x98] sm:$0xff] }
 0x131   :  { %v4945_v25 = vld.sshfl [vmem:[#allocation1 + $0x18] sm:$0xff pattern:$0x73625140]  ;;  %2588 = vmatpush.msrb.mxu3 %v1838_v24  ;;  %2594 = vmatpush.msra.mxu0 %v271_v26  ;;  %v335_v20 = vld [vmem:[#allocation2 + $0x918] sm:$0xff] }
 0x132   :  { %2509 = vmatmul.f32.vlgmr.msra.gmra.mxu3 %v4945_v25  ;;  %2613 = vmatpush.msra.mxu1 %v543_v28  ;;  %v4957_v42 = vld.sshfl [vmem:[#allocation1 + $0x38] sm:$0xff pattern:$0x73625140]  ;;  %v575_v23 = vld [vmem:[#allocation2 + $0x1098] sm:$0xff] }
 0x133   :  { %2634 = vmatpush.msra.mxu2 %v783_v29  ;;  %2653 = vmatpush.msra.mxu3 %v1055_v30  ;;  %v847_v24 = vld [vmem:[#allocation2 + $0x1918] sm:$0xff] }
 0x134   :  { %2595 = vmatpush.msra.mxu0 %v255_v16  ;;  %2614 = vmatpush.msra.mxu1 %v527_v32  ;;  %v47_v26 = vld [vmem:[#allocation2 + $0x18] sm:$0xff] }
 0x135   :  { %2635 = vmatpush.msra.mxu2 %v767_v33  ;;  %2654 = vmatpush.msra.mxu3 %v1039_v34  ;;  %v319_v28 = vld [vmem:[#allocation2 + $0x898] sm:$0xff] }
 0x136   :  { %2596 = vmatpush.msra.mxu0 %v239_v21  ;;  %2615 = vmatpush.msra.mxu1 %v511_v22  ;;  %v559_v29 = vld [vmem:[#allocation2 + $0x1018] sm:$0xff] }
 0x137   :  { %2636 = vmatpush.msra.mxu2 %v751_v35  ;;  %2655 = vmatpush.msra.mxu3 %v1023_v36  ;;  %v831_v30 = vld [vmem:[#allocation2 + $0x1898] sm:$0xff] }
 0x138   :  { %2597 = vmatpush.msra.mxu0 %v223_v38  ;;  %2616 = vmatpush.msra.mxu1 %v495_v27  ;;  %v1311_v16 = vld [vmem:[#allocation2 + $0x2798] sm:$0xff] }
 0x139   :  { %2637 = vmatpush.msra.mxu2 %v735_v39  ;;  %2656 = vmatpush.msra.mxu3 %v1007_v41  ;;  %v1823_v32 = vld [vmem:[#allocation2 + $0x3798] sm:$0xff] }
 0x13a   :  { %2589 = vmatmul.f32.vlgmr.msrb.gmra.mxu3 %v4957_v42  ;;  %2549 = vmatmul.f32.vlgmr.msrb.gmra.mxu1 %v4960_v47  ;;  %v303_v33 = vld [vmem:[#allocation2 + $0x818] sm:$0xff] }
 0x13b   :  { %2598 = vmatpush.msra.mxu0 %v207_v43  ;;  %2617 = vmatpush.msra.mxu1 %v479_v44  ;;  %v815_v34 = vld [vmem:[#allocation2 + $0x1818] sm:$0xff] }
 0x13c   :  { %2638 = vmatpush.msra.mxu2 %v719_v45  ;;  %2657 = vmatpush.msra.mxu3 %v991_v46  ;;  %v1295_v21 = vld [vmem:[#allocation2 + $0x2718] sm:$0xff] }
 0x13d   :  { %2599 = vmatpush.msra.mxu0 %v191_v48  ;;  %2618 = vmatpush.msra.mxu1 %v463_v49  ;;  %v1567_v22 = vld [vmem:[#allocation2 + $0x2f98] sm:$0xff] }
 0x13e   :  { %2639 = vmatpush.msra.mxu2 %v703_v50  ;;  %2658 = vmatpush.msra.mxu3 %v975_v51  ;;  %v1807_v35 = vld [vmem:[#allocation2 + $0x3718] sm:$0xff] }
 0x13f   :  { %2600 = vmatpush.msra.mxu0 %v175_v52  ;;  %2619 = vmatpush.msra.mxu1 %v447_v53  ;;  %v2079_v36 = vld [vmem:[#allocation2 + $0x3f98] sm:$0xff] }
 0x140   :  { %2640 = vmatpush.msra.mxu2 %v687_v54  ;;  %2659 = vmatpush.msra.mxu3 %v959_v55  ;;  %v1279_v38 = vld [vmem:[#allocation2 + $0x2698] sm:$0xff] }
 0x141   :  { %2601 = vmatpush.msra.mxu0 %v159_v56  ;;  %2620 = vmatpush.msra.mxu1 %v431_v57  ;;  %v1551_v27 = vld [vmem:[#allocation2 + $0x2f18] sm:$0xff] }
 0x142   :  { %2641 = vmatpush.msra.mxu2 %v671_v58  ;;  %2660 = vmatpush.msra.mxu3 %v943_v59  ;;  %v1791_v39 = vld [vmem:[#allocation2 + $0x3698] sm:$0xff] }
 0x143   :  { %2602 = vmatpush.msra.mxu0 %v143_v61  ;;  %2621 = vmatpush.msra.mxu1 %v415_v62  ;;  %v2063_v41 = vld [vmem:[#allocation2 + $0x3f18] sm:$0xff] }
 0x144   :  { %2642 = vmatpush.msra.mxu2 %v655_v63  ;;  %2661 = vmatpush.msra.mxu3 %v927_v0  ;;  %v1263_v43 = vld [vmem:[#allocation2 + $0x2618] sm:$0xff] }
 0x145   :  { %2603 = vmatpush.msra.mxu0 %v127_v3  ;;  %2622 = vmatpush.msra.mxu1 %v399_v4  ;;  %v1535_v44 = vld [vmem:[#allocation2 + $0x2e98] sm:$0xff] }
 0x146   :  { %2643 = vmatpush.msra.mxu2 %v639_v5  ;;  %2662 = vmatpush.msra.mxu3 %v911_v6  ;;  %v1775_v45 = vld [vmem:[#allocation2 + $0x3618] sm:$0xff] }
 0x147   :  { %2604 = vmatpush.msra.mxu0 %v111_v8  ;;  %2623 = vmatpush.msra.mxu1 %v383_v9  ;;  %v2047_v46 = vld [vmem:[#allocation2 + $0x3e98] sm:$0xff] }
 0x148   :  { %2644 = vmatpush.msra.mxu2 %v623_v10  ;;  %2663 = vmatpush.msra.mxu3 %v895_v11  ;;  %v1247_v48 = vld [vmem:[#allocation2 + $0x2598] sm:$0xff] }
 0x149   :  { %2605 = vmatpush.msra.mxu0 %v95_v12  ;;  %2624 = vmatpush.msra.mxu1 %v367_v13  ;;  %v1519_v49 = vld [vmem:[#allocation2 + $0x2e18] sm:$0xff] }
 0x14a   :  { %2645 = vmatpush.msra.mxu2 %v607_v14  ;;  %2664 = vmatpush.msra.mxu3 %v879_v15  ;;  %v1759_v50 = vld [vmem:[#allocation2 + $0x3598] sm:$0xff] }
 0x14b   :  { %2606 = vmatpush.msra.mxu0 %v79_v60  ;;  %2625 = vmatpush.msra.mxu1 %v351_v17  ;;  %v2031_v51 = vld [vmem:[#allocation2 + $0x3e18] sm:$0xff] }
 0x14c   :  { %2646 = vmatpush.msra.mxu2 %v591_v18  ;;  %2665 = vmatpush.msra.mxu3 %v863_v19  ;;  %v1231_v52 = vld [vmem:[#allocation2 + $0x2518] sm:$0xff] }
 0x14d   :  { %2607 = vmatpush.msra.mxu0 %v63_v2  ;;  %2626 = vmatpush.msra.mxu1 %v335_v20  ;;  %v1503_v53 = vld [vmem:[#allocation2 + $0x2d98] sm:$0xff] }
 0x14e   :  { %2647 = vmatpush.msra.mxu2 %v575_v23  ;;  %2666 = vmatpush.msra.mxu3 %v847_v24  ;;  %v1743_v54 = vld [vmem:[#allocation2 + $0x3518] sm:$0xff] }
 0x14f   :  { %2608 = vmatpush.msra.mxu0 %v47_v26  ;;  %2627 = vmatpush.msra.mxu1 %v319_v28  ;;  %v2015_v55 = vld [vmem:[#allocation2 + $0x3d98] sm:$0xff] }
 0x150   :  { %2648 = vmatpush.msra.mxu2 %v559_v29  ;;  %2667 = vmatpush.msra.mxu3 %v831_v30  ;;  %v1215_v56 = vld [vmem:[#allocation2 + $0x2498] sm:$0xff] }
 0x151   :  { %2673 = vmatpush.msrb.mxu0 %v1311_v16  ;;  %2628 = vmatpush.msra.mxu1 %v303_v33  ;;  %v1487_v57 = vld [vmem:[#allocation2 + $0x2d18] sm:$0xff] }
 0x152   :  { %2713 = vmatpush.msrb.mxu2 %v1823_v32  ;;  %2668 = vmatpush.msra.mxu3 %v815_v34  ;;  %v1727_v58 = vld [vmem:[#allocation2 + $0x3498] sm:$0xff] }
 0x153   :  { %2674 = vmatpush.msrb.mxu0 %v1295_v21  ;;  %2693 = vmatpush.msrb.mxu1 %v1567_v22  ;;  %v1999_v59 = vld [vmem:[#allocation2 + $0x3d18] sm:$0xff] }
 0x154   :  { %2714 = vmatpush.msrb.mxu2 %v1807_v35  ;;  %2733 = vmatpush.msrb.mxu3 %v2079_v36  ;;  %v1199_v61 = vld [vmem:[#allocation2 + $0x2418] sm:$0xff] }
 0x155   :  { %2675 = vmatpush.msrb.mxu0 %v1279_v38  ;;  %2694 = vmatpush.msrb.mxu1 %v1551_v27  ;;  %v1471_v62 = vld [vmem:[#allocation2 + $0x2c98] sm:$0xff]  ;;  %v544_v27 = vld [vmem:[#allocation2 + $0xfa0] sm:$0xff] }
 0x156   :  { %2715 = vmatpush.msrb.mxu2 %v1791_v39  ;;  %2734 = vmatpush.msrb.mxu3 %v2063_v41  ;;  %v1711_v63 = vld [vmem:[#allocation2 + $0x3418] sm:$0xff]  ;;  %v784_v39 = vld [vmem:[#allocation2 + $0x1720] sm:$0xff] }
 0x157   :  { %2676 = vmatpush.msrb.mxu0 %v1263_v43  ;;  %2695 = vmatpush.msrb.mxu1 %v1535_v44  ;;  %v1983_v0 = vld [vmem:[#allocation2 + $0x3c98] sm:$0xff]  ;;  %v1056_v41 = vld [vmem:[#allocation2 + $0x1fa0] sm:$0xff] }
 0x158   :  { %2716 = vmatpush.msrb.mxu2 %v1775_v45  ;;  %2735 = vmatpush.msrb.mxu3 %v2047_v46  ;;  %v1183_v3 = vld [vmem:[#allocation2 + $0x2398] sm:$0xff]  ;;  %v256_v43 = vld [vmem:[#allocation2 + $0x6a0] sm:$0xff] }
 0x159   :  { %2677 = vmatpush.msrb.mxu0 %v1247_v48  ;;  %2696 = vmatpush.msrb.mxu1 %v1519_v49  ;;  %v1455_v4 = vld [vmem:[#allocation2 + $0x2c18] sm:$0xff]  ;;  %v528_v44 = vld [vmem:[#allocation2 + $0xf20] sm:$0xff] }
 0x15a   :  { %2717 = vmatpush.msrb.mxu2 %v1759_v50  ;;  %2736 = vmatpush.msrb.mxu3 %v2031_v51  ;;  %v1695_v5 = vld [vmem:[#allocation2 + $0x3398] sm:$0xff]  ;;  %v768_v45 = vld [vmem:[#allocation2 + $0x16a0] sm:$0xff] }
 0x15b   :  { %2678 = vmatpush.msrb.mxu0 %v1231_v52  ;;  %2697 = vmatpush.msrb.mxu1 %v1503_v53  ;;  %v1967_v6 = vld [vmem:[#allocation2 + $0x3c18] sm:$0xff]  ;;  %v1040_v46 = vld [vmem:[#allocation2 + $0x1f20] sm:$0xff] }
 0x15c   :  { %2718 = vmatpush.msrb.mxu2 %v1743_v54  ;;  %2737 = vmatpush.msrb.mxu3 %v2015_v55  ;;  %v1167_v8 = vld [vmem:[#allocation2 + $0x2318] sm:$0xff]  ;;  %v512_v48 = vld [vmem:[#allocation2 + $0xea0] sm:$0xff] }
 0x15d   :  { %2679 = vmatpush.msrb.mxu0 %v1215_v56  ;;  %2698 = vmatpush.msrb.mxu1 %v1487_v57  ;;  %v1439_v9 = vld [vmem:[#allocation2 + $0x2b98] sm:$0xff]  ;;  %v752_v49 = vld [vmem:[#allocation2 + $0x1620] sm:$0xff] }
 0x15e   :  { %2719 = vmatpush.msrb.mxu2 %v1727_v58  ;;  %2738 = vmatpush.msrb.mxu3 %v1999_v59  ;;  %v1679_v10 = vld [vmem:[#allocation2 + $0x3318] sm:$0xff]  ;;  %v1024_v50 = vld [vmem:[#allocation2 + $0x1ea0] sm:$0xff] }
 0x15f   :  { %2680 = vmatpush.msrb.mxu0 %v1199_v61  ;;  %2699 = vmatpush.msrb.mxu1 %v1471_v62  ;;  %v1951_v11 = vld [vmem:[#allocation2 + $0x3b98] sm:$0xff]  ;;  %v736_v51 = vld [vmem:[#allocation2 + $0x15a0] sm:$0xff] }
 0x160   :  { %2720 = vmatpush.msrb.mxu2 %v1711_v63  ;;  %2739 = vmatpush.msrb.mxu3 %v1983_v0  ;;  %v1151_v12 = vld [vmem:[#allocation2 + $0x2298] sm:$0xff]  ;;  %v1008_v52 = vld [vmem:[#allocation2 + $0x1e20] sm:$0xff] }
 0x161   :  { %2681 = vmatpush.msrb.mxu0 %v1183_v3  ;;  %2700 = vmatpush.msrb.mxu1 %v1455_v4  ;;  %v1423_v13 = vld [vmem:[#allocation2 + $0x2b18] sm:$0xff]  ;;  %v208_v53 = vld [vmem:[#allocation2 + $0x520] sm:$0xff] }
 0x162   :  { %2721 = vmatpush.msrb.mxu2 %v1695_v5  ;;  %2740 = vmatpush.msrb.mxu3 %v1967_v6  ;;  %v1663_v14 = vld [vmem:[#allocation2 + $0x3298] sm:$0xff]  ;;  %v480_v54 = vld [vmem:[#allocation2 + $0xda0] sm:$0xff] }
 0x163   :  { %2682 = vmatpush.msrb.mxu0 %v1167_v8  ;;  %2701 = vmatpush.msrb.mxu1 %v1439_v9  ;;  %v1935_v15 = vld [vmem:[#allocation2 + $0x3b18] sm:$0xff]  ;;  %v992_v55 = vld [vmem:[#allocation2 + $0x1da0] sm:$0xff] }
 0x164   :  { %2722 = vmatpush.msrb.mxu2 %v1679_v10  ;;  %2741 = vmatpush.msrb.mxu3 %v1951_v11  ;;  %v1135_v60 = vld [vmem:[#allocation2 + $0x2218] sm:$0xff]  ;;  %v192_v56 = vld [vmem:[#allocation2 + $0x4a0] sm:$0xff] }
 0x165   :  { %v1407_v17 = vld [vmem:[#allocation2 + $0x2a98] sm:$0xff]  ;;  %2683 = vmatpush.msrb.mxu0 %v1151_v12  ;;  %2702 = vmatpush.msrb.mxu1 %v1423_v13  ;;  %v464_v57 = vld [vmem:[#allocation2 + $0xd20] sm:$0xff] }
 0x166   :  { %v1647_v18 = vld [vmem:[#allocation2 + $0x3218] sm:$0xff]  ;;  %2723 = vmatpush.msrb.mxu2 %v1663_v14  ;;  %2742 = vmatpush.msrb.mxu3 %v1935_v15  ;;  %v704_v58 = vld [vmem:[#allocation2 + $0x14a0] sm:$0xff] }
 0x167   :  { %v1919_v19 = vld [vmem:[#allocation2 + $0x3a98] sm:$0xff]  ;;  %2684 = vmatpush.msrb.mxu0 %v1135_v60  ;;  %2703 = vmatpush.msrb.mxu1 %v1407_v17  ;;  %v976_v59 = vld [vmem:[#allocation2 + $0x1d20] sm:$0xff] }
 0x168   :  { %v1119_v2 = vld [vmem:[#allocation2 + $0x2198] sm:$0xff]  ;;  %2724 = vmatpush.msrb.mxu2 %v1647_v18  ;;  %2743 = vmatpush.msrb.mxu3 %v1919_v19  ;;  %v176_v61 = vld [vmem:[#allocation2 + $0x420] sm:$0xff] }
 0x169   :  { %v1391_v20 = vld [vmem:[#allocation2 + $0x2a18] sm:$0xff]  ;;  %2649 = vmatmul.f32.vlgmr.msra.gmra.mxu2 %v4939_v1  ;;  %2685 = vmatpush.msrb.mxu0 %v1119_v2  ;;  %v448_v62 = vld [vmem:[#allocation2 + $0xca0] sm:$0xff] }
 0x16a   :  { %v1631_v23 = vld [vmem:[#allocation2 + $0x3198] sm:$0xff]  ;;  %2704 = vmatpush.msrb.mxu1 %v1391_v20  ;;  %2609 = vmatmul.f32.vlgmr.msra.gmra.mxu0 %v4942_v7  ;;  %v288_v7 = vld [vmem:[#allocation2 + $0x7a0] sm:$0xff] }
 0x16b   :  { %v1903_v24 = vld [vmem:[#allocation2 + $0x3a18] sm:$0xff]  ;;  %2725 = vmatpush.msrb.mxu2 %v1631_v23  ;;  %2669 = vmatmul.f32.vlgmr.msra.gmra.mxu3 %v4945_v25  ;;  %v800_v25 = vld [vmem:[#allocation2 + $0x17a0] sm:$0xff] }
 0x16c   :  { %v1103_v26 = vld [vmem:[#allocation2 + $0x2118] sm:$0xff]  ;;  %2744 = vmatpush.msrb.mxu3 %v1903_v24  ;;  %2629 = vmatmul.f32.vlgmr.msra.gmra.mxu1 %v4948_v31  ;;  %v272_v31 = vld [vmem:[#allocation2 + $0x720] sm:$0xff] }
 0x16d   :  { %v1375_v28 = vld [vmem:[#allocation2 + $0x2998] sm:$0xff]  ;;  %2686 = vmatpush.msrb.mxu0 %v1103_v26  ;;  %v688_v63 = vld [vmem:[#allocation2 + $0x1420] sm:$0xff] }
 0x16e   :  { %v1615_v29 = vld [vmem:[#allocation2 + $0x3118] sm:$0xff]  ;;  %2705 = vmatpush.msrb.mxu1 %v1375_v28  ;;  %v960_v0 = vld [vmem:[#allocation2 + $0x1ca0] sm:$0xff] }
 0x16f   :  { %v1887_v30 = vld [vmem:[#allocation2 + $0x3998] sm:$0xff]  ;;  %2726 = vmatpush.msrb.mxu2 %v1615_v29  ;;  %v160_v3 = vld [vmem:[#allocation2 + $0x3a0] sm:$0xff] }
 0x170   :  { %v1087_v16 = vld [vmem:[#allocation2 + $0x2098] sm:$0xff]  ;;  %2745 = vmatpush.msrb.mxu3 %v1887_v30  ;;  %v432_v4 = vld [vmem:[#allocation2 + $0xc20] sm:$0xff] }
 0x171   :  { %v1359_v32 = vld [vmem:[#allocation2 + $0x2918] sm:$0xff]  ;;  %2687 = vmatpush.msrb.mxu0 %v1087_v16  ;;  %v672_v5 = vld [vmem:[#allocation2 + $0x13a0] sm:$0xff] }
 0x172   :  { %v1599_v33 = vld [vmem:[#allocation2 + $0x3098] sm:$0xff]  ;;  %2706 = vmatpush.msrb.mxu1 %v1359_v32  ;;  %v944_v6 = vld [vmem:[#allocation2 + $0x1c20] sm:$0xff] }
 0x173   :  { %v1871_v34 = vld [vmem:[#allocation2 + $0x3918] sm:$0xff]  ;;  %2727 = vmatpush.msrb.mxu2 %v1599_v33  ;;  %v144_v8 = vld [vmem:[#allocation2 + $0x320] sm:$0xff] }
 0x174   :  { %v1071_v1 = vld [vmem:[#allocation2 + $0x2018] sm:$0xff]  ;;  %2746 = vmatpush.msrb.mxu3 %v1871_v34  ;;  %v416_v9 = vld [vmem:[#allocation2 + $0xba0] sm:$0xff] }
 0x175   :  { %v1343_v21 = vld [vmem:[#allocation2 + $0x2898] sm:$0xff]  ;;  %2688 = vmatpush.msrb.mxu0 %v1071_v1  ;;  %v656_v10 = vld [vmem:[#allocation2 + $0x1320] sm:$0xff] }
 0x176   :  { %v1583_v22 = vld [vmem:[#allocation2 + $0x3018] sm:$0xff]  ;;  %2707 = vmatpush.msrb.mxu1 %v1343_v21  ;;  %2689 = vmatmul.f32.vlgmr.msrb.gmra.mxu0 %v4954_v40  ;;  %v224_v40 = vld [vmem:[#allocation2 + $0x5a0] sm:$0xff] }
 0x177   :  { %v1855_v35 = vld [vmem:[#allocation2 + $0x3898] sm:$0xff]  ;;  %2728 = vmatpush.msrb.mxu2 %v1583_v22  ;;  %2753 = vmatpush.msra.mxu0 %v288_v7  ;;  %v928_v11 = vld [vmem:[#allocation2 + $0x1ba0] sm:$0xff] }
 0x178   :  { %v1327_v36 = vld [vmem:[#allocation2 + $0x2818] sm:$0xff]  ;;  %2747 = vmatpush.msrb.mxu3 %v1855_v35  ;;  %2729 = vmatmul.f32.vlgmr.msrb.gmra.mxu2 %v4951_v37  ;;  %v240_v37 = vld [vmem:[#allocation2 + $0x620] sm:$0xff] }
 0x179   :  { %v1839_v38 = vld [vmem:[#allocation2 + $0x3818] sm:$0xff]  ;;  %2793 = vmatpush.msra.mxu2 %v800_v25  ;;  %2708 = vmatpush.msrb.mxu1 %v1327_v36  ;;  %v128_v12 = vld [vmem:[#allocation2 + $0x2a0] sm:$0xff] }
 0x17a   :  { %2748 = vmatpush.msrb.mxu3 %v1839_v38  ;;  %2754 = vmatpush.msra.mxu0 %v272_v31  ;;  %v400_v13 = vld [vmem:[#allocation2 + $0xb20] sm:$0xff] }
 0x17b   :  { %2749 = vmatmul.f32.vlgmr.msrb.gmra.mxu3 %v4957_v42  ;;  %2773 = vmatpush.msra.mxu1 %v544_v27  ;;  %v496_v42 = vld [vmem:[#allocation2 + $0xe20] sm:$0xff] }
 0x17c   :  { %2794 = vmatpush.msra.mxu2 %v784_v39  ;;  %2813 = vmatpush.msra.mxu3 %v1056_v41  ;;  %v640_v14 = vld [vmem:[#allocation2 + $0x12a0] sm:$0xff] }
 0x17d   :  { %2709 = vmatmul.f32.vlgmr.msrb.gmra.mxu1 %v4960_v47  ;;  %2755 = vmatpush.msra.mxu0 %v256_v43  ;;  %v720_v47 = vld [vmem:[#allocation2 + $0x1520] sm:$0xff] }
 0x17e   :  { %2774 = vmatpush.msra.mxu1 %v528_v44  ;;  %2795 = vmatpush.msra.mxu2 %v768_v45  ;;  %v912_v15 = vld [vmem:[#allocation2 + $0x1b20] sm:$0xff] }
 0x17f   :  { %2814 = vmatpush.msra.mxu3 %v1040_v46  ;;  %2756 = vmatpush.msra.mxu0 %v240_v37  ;;  %v112_v60 = vld [vmem:[#allocation2 + $0x220] sm:$0xff] }
 0x180   :  { %2775 = vmatpush.msra.mxu1 %v512_v48  ;;  %2796 = vmatpush.msra.mxu2 %v752_v49  ;;  %v384_v17 = vld [vmem:[#allocation2 + $0xaa0] sm:$0xff] }
 0x181   :  { %2815 = vmatpush.msra.mxu3 %v1024_v50  ;;  %2757 = vmatpush.msra.mxu0 %v224_v40  ;;  %v624_v18 = vld [vmem:[#allocation2 + $0x1220] sm:$0xff] }
 0x182   :  { %2776 = vmatpush.msra.mxu1 %v496_v42  ;;  %2797 = vmatpush.msra.mxu2 %v736_v51  ;;  %v896_v19 = vld [vmem:[#allocation2 + $0x1aa0] sm:$0xff] }
 0x183   :  { %2816 = vmatpush.msra.mxu3 %v1008_v52  ;;  %2758 = vmatpush.msra.mxu0 %v208_v53  ;;  %v96_v2 = vld [vmem:[#allocation2 + $0x1a0] sm:$0xff] }
 0x184   :  { %2777 = vmatpush.msra.mxu1 %v480_v54  ;;  %2798 = vmatpush.msra.mxu2 %v720_v47  ;;  %v368_v20 = vld [vmem:[#allocation2 + $0xa20] sm:$0xff] }
 0x185   :  { %2817 = vmatpush.msra.mxu3 %v992_v55  ;;  %2759 = vmatpush.msra.mxu0 %v192_v56  ;;  %v608_v23 = vld [vmem:[#allocation2 + $0x11a0] sm:$0xff] }
 0x186   :  { %2778 = vmatpush.msra.mxu1 %v464_v57  ;;  %2799 = vmatpush.msra.mxu2 %v704_v58  ;;  %v880_v24 = vld [vmem:[#allocation2 + $0x1a20] sm:$0xff] }
 0x187   :  { %2818 = vmatpush.msra.mxu3 %v976_v59  ;;  %2760 = vmatpush.msra.mxu0 %v176_v61  ;;  %v80_v26 = vld [vmem:[#allocation2 + $0x120] sm:$0xff] }
 0x188   :  { %2779 = vmatpush.msra.mxu1 %v448_v62  ;;  %2800 = vmatpush.msra.mxu2 %v688_v63  ;;  %v352_v28 = vld [vmem:[#allocation2 + $0x9a0] sm:$0xff] }
 0x189   :  { %2819 = vmatpush.msra.mxu3 %v960_v0  ;;  %2761 = vmatpush.msra.mxu0 %v160_v3  ;;  %v592_v29 = vld [vmem:[#allocation2 + $0x1120] sm:$0xff] }
 0x18a   :  { %2780 = vmatpush.msra.mxu1 %v432_v4  ;;  %2801 = vmatpush.msra.mxu2 %v672_v5  ;;  %v864_v30 = vld [vmem:[#allocation2 + $0x19a0] sm:$0xff] }
 0x18b   :  { %2820 = vmatpush.msra.mxu3 %v944_v6  ;;  %2762 = vmatpush.msra.mxu0 %v144_v8  ;;  %v64_v16 = vld [vmem:[#allocation2 + $0xa0] sm:$0xff] }
 0x18c   :  { %2781 = vmatpush.msra.mxu1 %v416_v9  ;;  %2802 = vmatpush.msra.mxu2 %v656_v10  ;;  %v336_v32 = vld [vmem:[#allocation2 + $0x920] sm:$0xff] }
 0x18d   :  { %2821 = vmatpush.msra.mxu3 %v928_v11  ;;  %2763 = vmatpush.msra.mxu0 %v128_v12  ;;  %v576_v33 = vld [vmem:[#allocation2 + $0x10a0] sm:$0xff] }
 0x18e   :  { %2782 = vmatpush.msra.mxu1 %v400_v13  ;;  %2803 = vmatpush.msra.mxu2 %v640_v14  ;;  %v848_v34 = vld [vmem:[#allocation2 + $0x1920] sm:$0xff] }
 0x18f   :  { %2822 = vmatpush.msra.mxu3 %v912_v15  ;;  %2764 = vmatpush.msra.mxu0 %v112_v60  ;;  %v48_v1 = vld [vmem:[#allocation2 + $0x20] sm:$0xff] }
 0x190   :  { %2783 = vmatpush.msra.mxu1 %v384_v17  ;;  %2804 = vmatpush.msra.mxu2 %v624_v18  ;;  %v320_v21 = vld [vmem:[#allocation2 + $0x8a0] sm:$0xff] }
 0x191   :  { %2823 = vmatpush.msra.mxu3 %v896_v19  ;;  %2765 = vmatpush.msra.mxu0 %v96_v2  ;;  %v560_v22 = vld [vmem:[#allocation2 + $0x1020] sm:$0xff] }
 0x192   :  { %2784 = vmatpush.msra.mxu1 %v368_v20  ;;  %2805 = vmatpush.msra.mxu2 %v608_v23  ;;  %v832_v35 = vld [vmem:[#allocation2 + $0x18a0] sm:$0xff] }
 0x193   :  { %2824 = vmatpush.msra.mxu3 %v880_v24  ;;  %2766 = vmatpush.msra.mxu0 %v80_v26  ;;  %v1312_v7 = vld [vmem:[#allocation2 + $0x27a0] sm:$0xff] }
 0x194   :  { %2785 = vmatpush.msra.mxu1 %v352_v28  ;;  %2806 = vmatpush.msra.mxu2 %v592_v29  ;;  %v1824_v25 = vld [vmem:[#allocation2 + $0x37a0] sm:$0xff] }
 0x195   :  { %2825 = vmatpush.msra.mxu3 %v864_v30  ;;  %2767 = vmatpush.msra.mxu0 %v64_v16  ;;  %v304_v36 = vld [vmem:[#allocation2 + $0x820] sm:$0xff] }
 0x196   :  { %2786 = vmatpush.msra.mxu1 %v336_v32  ;;  %2807 = vmatpush.msra.mxu2 %v576_v33  ;;  %v816_v38 = vld [vmem:[#allocation2 + $0x1820] sm:$0xff] }
 0x197   :  { %2826 = vmatpush.msra.mxu3 %v848_v34  ;;  %2768 = vmatpush.msra.mxu0 %v48_v1  ;;  %v1296_v31 = vld [vmem:[#allocation2 + $0x2720] sm:$0xff] }
 0x198   :  { %2787 = vmatpush.msra.mxu1 %v320_v21  ;;  %2808 = vmatpush.msra.mxu2 %v560_v22  ;;  %v1568_v27 = vld [vmem:[#allocation2 + $0x2fa0] sm:$0xff] }
 0x199   :  { %2827 = vmatpush.msra.mxu3 %v832_v35  ;;  %2833 = vmatpush.msrb.mxu0 %v1312_v7  ;;  %v1808_v39 = vld [vmem:[#allocation2 + $0x3720] sm:$0xff]  ;;  %v4971_v35 = vpop.f32.mrf.mxu0 }
 0x19a   :  { %2873 = vmatpush.msrb.mxu2 %v1824_v25  ;;  %v2080_v41 = vld [vmem:[#allocation2 + $0x3fa0] sm:$0xff]  ;;  %2788 = vmatpush.msra.mxu1 %v304_v36  ;;  %v4973_v25 = vld.sshfl [vmem:[#allocation1 + $0x10] sm:$0xff pattern:$0x73625140] }
 0x19b   :  { %2828 = vmatpush.msra.mxu3 %v816_v38  ;;  %v1280_v43 = vld [vmem:[#allocation2 + $0x26a0] sm:$0xff]  ;;  %2834 = vmatpush.msrb.mxu0 %v1296_v31  ;;  %v289_v36 = vld [vmem:[#allocation2 + $0x7a8] sm:$0xff] }
 0x19c   :  { %v1552_v44 = vld [vmem:[#allocation2 + $0x2f20] sm:$0xff]  ;;  %2853 = vmatpush.msrb.mxu1 %v1568_v27  ;;  %2874 = vmatpush.msrb.mxu2 %v1808_v39  ;;  %v801_v38 = vld [vmem:[#allocation2 + $0x17a8] sm:$0xff]  ;;  %v4976_v27 = vpop.f32.mrf.mxu1  ;;  %v4978_v39 = vld.sshfl [vmem:[#allocation1] sm:$0xff pattern:$0x73625140] }
 0x19d   :  { %v1792_v45 = vld [vmem:[#allocation2 + $0x36a0] sm:$0xff]  ;;  %2893 = vmatpush.msrb.mxu3 %v2080_v41  ;;  %2835 = vmatpush.msrb.mxu0 %v1280_v43  ;;  %v4981_v43 = vpop.f32.mrf.mxu2 }
 0x19e   :  { %v2064_v46 = vld [vmem:[#allocation2 + $0x3f20] sm:$0xff]  ;;  %2854 = vmatpush.msrb.mxu1 %v1552_v44  ;;  %2875 = vmatpush.msrb.mxu2 %v1792_v45  ;;  %v4983_v44 = vld.sshfl [vmem:[#allocation1 + $0x18] sm:$0xff pattern:$0x73625140]  ;;  %v273_v45 = vld [vmem:[#allocation2 + $0x728] sm:$0xff] }
 0x19f   :  { %v1264_v37 = vld [vmem:[#allocation2 + $0x2620] sm:$0xff]  ;;  %2894 = vmatpush.msrb.mxu3 %v2064_v46  ;;  %2809 = vmatmul.f32.vlgmr.msra.gmra.mxu2 %v4973_v25  ;;  %v545_v46 = vld [vmem:[#allocation2 + $0xfa8] sm:$0xff] }
 0x1a0   :  { %v1536_v48 = vld [vmem:[#allocation2 + $0x2ea0] sm:$0xff]  ;;  %2836 = vmatpush.msrb.mxu0 %v1264_v37  ;;  %2829 = vmatmul.f32.vlgmr.msra.gmra.mxu3 %v4983_v44  ;;  %v785_v37 = vld [vmem:[#allocation2 + $0x1728] sm:$0xff] }
 0x1a1   :  { %v1776_v49 = vld [vmem:[#allocation2 + $0x3620] sm:$0xff]  ;;  %2855 = vmatpush.msrb.mxu1 %v1536_v48  ;;  %2769 = vmatmul.f32.vlgmr.msra.gmra.mxu0 %v4978_v39  ;;  %v1057_v48 = vld [vmem:[#allocation2 + $0x1fa8] sm:$0xff] }
 0x1a2   :  { %v2048_v50 = vld [vmem:[#allocation2 + $0x3ea0] sm:$0xff]  ;;  %2876 = vmatpush.msrb.mxu2 %v1776_v49 }
 0x1a3   :  { %v1248_v40 = vld [vmem:[#allocation2 + $0x25a0] sm:$0xff]  ;;  %2895 = vmatpush.msrb.mxu3 %v2048_v50  ;;  %v257_v50 = vld [vmem:[#allocation2 + $0x6a8] sm:$0xff] }
 0x1a4   :  { %v1520_v42 = vld [vmem:[#allocation2 + $0x2e20] sm:$0xff]  ;;  %2837 = vmatpush.msrb.mxu0 %v1248_v40  ;;  %v529_v40 = vld [vmem:[#allocation2 + $0xf28] sm:$0xff] }
 0x1a5   :  { %v1760_v51 = vld [vmem:[#allocation2 + $0x35a0] sm:$0xff]  ;;  %2856 = vmatpush.msrb.mxu1 %v1520_v42  ;;  %v4989_v42 = vpop.f32.mrf.mxu3 }
 0x1a6   :  { %v2032_v52 = vld [vmem:[#allocation2 + $0x3e20] sm:$0xff]  ;;  %2877 = vmatpush.msrb.mxu2 %v1760_v51  ;;  %v769_v51 = vld [vmem:[#allocation2 + $0x16a8] sm:$0xff] }
 0x1a7   :  { %v1232_v53 = vld [vmem:[#allocation2 + $0x2520] sm:$0xff]  ;;  %2896 = vmatpush.msrb.mxu3 %v2032_v52  ;;  %v1041_v52 = vld [vmem:[#allocation2 + $0x1f28] sm:$0xff] }
 0x1a8   :  { %v1504_v54 = vld [vmem:[#allocation2 + $0x2da0] sm:$0xff]  ;;  %2838 = vmatpush.msrb.mxu0 %v1232_v53  ;;  %v241_v53 = vld [vmem:[#allocation2 + $0x628] sm:$0xff] }
 0x1a9   :  { %v1744_v47 = vld [vmem:[#allocation2 + $0x3520] sm:$0xff]  ;;  %2857 = vmatpush.msrb.mxu1 %v1504_v54  ;;  %v513_v54 = vld [vmem:[#allocation2 + $0xea8] sm:$0xff] }
 0x1aa   :  { %v2016_v55 = vld [vmem:[#allocation2 + $0x3da0] sm:$0xff]  ;;  %2878 = vmatpush.msrb.mxu2 %v1744_v47  ;;  %v753_v47 = vld [vmem:[#allocation2 + $0x1628] sm:$0xff] }
 0x1ab   :  { %v1216_v56 = vld [vmem:[#allocation2 + $0x24a0] sm:$0xff]  ;;  %2897 = vmatpush.msrb.mxu3 %v2016_v55  ;;  %v4991_v55 = vpop.f32.mrf.mxu0 }
 0x1ac   :  { %v1488_v57 = vld [vmem:[#allocation2 + $0x2d20] sm:$0xff]  ;;  %2839 = vmatpush.msrb.mxu0 %v1216_v56  ;;  %v1025_v56 = vld [vmem:[#allocation2 + $0x1ea8] sm:$0xff] }
 0x1ad   :  { %v1728_v58 = vld [vmem:[#allocation2 + $0x34a0] sm:$0xff]  ;;  %2858 = vmatpush.msrb.mxu1 %v1488_v57  ;;  %v4993_v57 = vld.sshfl [vmem:[#allocation1 + $0x30] sm:$0xff pattern:$0x73625140] }
 0x1ae   :  { %v2000_v59 = vld [vmem:[#allocation2 + $0x3d20] sm:$0xff]  ;;  %2879 = vmatpush.msrb.mxu2 %v1728_v58  ;;  %v225_v58 = vld [vmem:[#allocation2 + $0x5a8] sm:$0xff] }
 0x1af   :  { %v1200_v61 = vld [vmem:[#allocation2 + $0x2420] sm:$0xff]  ;;  %2898 = vmatpush.msrb.mxu3 %v2000_v59  ;;  %v497_v59 = vld [vmem:[#allocation2 + $0xe28] sm:$0xff] }
 0x1b0   :  { %v1472_v62 = vld [vmem:[#allocation2 + $0x2ca0] sm:$0xff]  ;;  %2840 = vmatpush.msrb.mxu0 %v1200_v61  ;;  %v737_v61 = vld [vmem:[#allocation2 + $0x15a8] sm:$0xff] }
 0x1b1   :  { %v1712_v63 = vld [vmem:[#allocation2 + $0x3420] sm:$0xff]  ;;  %2859 = vmatpush.msrb.mxu1 %v1472_v62  ;;  %v4996_v62 = vpop.f32.mrf.mxu1 }
 0x1b2   :  { %v1984_v0 = vld [vmem:[#allocation2 + $0x3ca0] sm:$0xff]  ;;  %2880 = vmatpush.msrb.mxu2 %v1712_v63  ;;  %v4998_v63 = vld.sshfl [vmem:[#allocation1 + $0x20] sm:$0xff pattern:$0x73625140] }
 0x1b3   :  { %v1184_v3 = vld [vmem:[#allocation2 + $0x23a0] sm:$0xff]  ;;  %2899 = vmatpush.msrb.mxu3 %v1984_v0  ;;  %v1009_v0 = vld [vmem:[#allocation2 + $0x1e28] sm:$0xff] }
 0x1b4   :  { %v1456_v4 = vld [vmem:[#allocation2 + $0x2c20] sm:$0xff]  ;;  %2841 = vmatpush.msrb.mxu0 %v1184_v3  ;;  %v5001_v3 = vpop.f32.mrf.mxu2 }
 0x1b5   :  { %v1696_v5 = vld [vmem:[#allocation2 + $0x33a0] sm:$0xff]  ;;  %2860 = vmatpush.msrb.mxu1 %v1456_v4  ;;  %v5003_v4 = vld.sshfl [vmem:[#allocation1 + $0x38] sm:$0xff pattern:$0x73625140] }
 0x1b6   :  { %v1968_v6 = vld [vmem:[#allocation2 + $0x3c20] sm:$0xff]  ;;  %2881 = vmatpush.msrb.mxu2 %v1696_v5  ;;  %v209_v5 = vld [vmem:[#allocation2 + $0x528] sm:$0xff] }
 0x1b7   :  { %v1168_v8 = vld [vmem:[#allocation2 + $0x2320] sm:$0xff]  ;;  %2900 = vmatpush.msrb.mxu3 %v1968_v6  ;;  %v481_v6 = vld [vmem:[#allocation2 + $0xda8] sm:$0xff] }
 0x1b8   :  { %v1440_v9 = vld [vmem:[#allocation2 + $0x2ba0] sm:$0xff]  ;;  %2842 = vmatpush.msrb.mxu0 %v1168_v8  ;;  %v721_v8 = vld [vmem:[#allocation2 + $0x1528] sm:$0xff] }
 0x1b9   :  { %v1680_v10 = vld [vmem:[#allocation2 + $0x3320] sm:$0xff]  ;;  %2861 = vmatpush.msrb.mxu1 %v1440_v9  ;;  %v993_v9 = vld [vmem:[#allocation2 + $0x1da8] sm:$0xff] }
 0x1ba   :  { %v1952_v11 = vld [vmem:[#allocation2 + $0x3ba0] sm:$0xff]  ;;  %2882 = vmatpush.msrb.mxu2 %v1680_v10 }
 0x1bb   :  { %v1152_v12 = vld [vmem:[#allocation2 + $0x22a0] sm:$0xff]  ;;  %2901 = vmatpush.msrb.mxu3 %v1952_v11  ;;  %v193_v11 = vld [vmem:[#allocation2 + $0x4a8] sm:$0xff] }
 0x1bc   :  { %v1424_v13 = vld [vmem:[#allocation2 + $0x2b20] sm:$0xff]  ;;  %2843 = vmatpush.msrb.mxu0 %v1152_v12  ;;  %v465_v12 = vld [vmem:[#allocation2 + $0xd28] sm:$0xff] }
 0x1bd   :  { %v1664_v14 = vld [vmem:[#allocation2 + $0x32a0] sm:$0xff]  ;;  %2862 = vmatpush.msrb.mxu1 %v1424_v13  ;;  %v5009_v13 = vpop.f32.mrf.mxu3 }
 0x1be   :  { %v1936_v15 = vld [vmem:[#allocation2 + $0x3b20] sm:$0xff]  ;;  %2883 = vmatpush.msrb.mxu2 %v1664_v14  ;;  %v705_v14 = vld [vmem:[#allocation2 + $0x14a8] sm:$0xff] }
 0x1bf   :  { %v1136_v60 = vld [vmem:[#allocation2 + $0x2220] sm:$0xff]  ;;  %2902 = vmatpush.msrb.mxu3 %v1936_v15  ;;  %v977_v15 = vld [vmem:[#allocation2 + $0x1d28] sm:$0xff] }
 0x1c0   :  { %v1408_v17 = vld [vmem:[#allocation2 + $0x2aa0] sm:$0xff]  ;;  %2844 = vmatpush.msrb.mxu0 %v1136_v60  ;;  %v5011_v60 = vpop.f32.mrf.mxu0 }
 0x1c1   :  { %v1648_v18 = vld [vmem:[#allocation2 + $0x3220] sm:$0xff]  ;;  %2863 = vmatpush.msrb.mxu1 %v1408_v17  ;;  %v177_v17 = vld [vmem:[#allocation2 + $0x428] sm:$0xff] }
 0x1c2   :  { %v1920_v19 = vld [vmem:[#allocation2 + $0x3aa0] sm:$0xff]  ;;  %2884 = vmatpush.msrb.mxu2 %v1648_v18  ;;  %v449_v18 = vld [vmem:[#allocation2 + $0xca8] sm:$0xff] }
 0x1c3   :  { %v1120_v2 = vld [vmem:[#allocation2 + $0x21a0] sm:$0xff]  ;;  %2903 = vmatpush.msrb.mxu3 %v1920_v19  ;;  %v689_v19 = vld [vmem:[#allocation2 + $0x1428] sm:$0xff] }
 0x1c4   :  { %v1392_v20 = vld [vmem:[#allocation2 + $0x2a20] sm:$0xff]  ;;  %2845 = vmatpush.msrb.mxu0 %v1120_v2  ;;  %v961_v2 = vld [vmem:[#allocation2 + $0x1ca8] sm:$0xff] }
 0x1c5   :  { %v1632_v23 = vld [vmem:[#allocation2 + $0x31a0] sm:$0xff]  ;;  %2864 = vmatpush.msrb.mxu1 %v1392_v20  ;;  %v161_v20 = vld [vmem:[#allocation2 + $0x3a8] sm:$0xff] }
 0x1c6   :  { %v1904_v24 = vld [vmem:[#allocation2 + $0x3a20] sm:$0xff]  ;;  %2885 = vmatpush.msrb.mxu2 %v1632_v23  ;;  %v433_v23 = vld [vmem:[#allocation2 + $0xc28] sm:$0xff] }
 0x1c7   :  { %v1104_v26 = vld [vmem:[#allocation2 + $0x2120] sm:$0xff]  ;;  %2904 = vmatpush.msrb.mxu3 %v1904_v24  ;;  %v5013_v24 = vpop.f32.mrf.mxu1 }
 0x1c8   :  { %v1376_v28 = vld [vmem:[#allocation2 + $0x29a0] sm:$0xff]  ;;  %2846 = vmatpush.msrb.mxu0 %v1104_v26  ;;  %v673_v26 = vld [vmem:[#allocation2 + $0x13a8] sm:$0xff] }
 0x1c9   :  { %v1616_v29 = vld [vmem:[#allocation2 + $0x3120] sm:$0xff]  ;;  %2865 = vmatpush.msrb.mxu1 %v1376_v28  ;;  %v945_v28 = vld [vmem:[#allocation2 + $0x1c28] sm:$0xff] }
 0x1ca   :  { %v1888_v30 = vld [vmem:[#allocation2 + $0x39a0] sm:$0xff]  ;;  %2886 = vmatpush.msrb.mxu2 %v1616_v29  ;;  %v5015_v29 = vpop.f32.mrf.mxu2 }
 0x1cb   :  { %v1088_v16 = vld [vmem:[#allocation2 + $0x20a0] sm:$0xff]  ;;  %2905 = vmatpush.msrb.mxu3 %v1888_v30  ;;  %v145_v30 = vld [vmem:[#allocation2 + $0x328] sm:$0xff] }
 0x1cc   :  { %v1360_v32 = vld [vmem:[#allocation2 + $0x2920] sm:$0xff]  ;;  %2847 = vmatpush.msrb.mxu0 %v1088_v16  ;;  %v417_v16 = vld [vmem:[#allocation2 + $0xba8] sm:$0xff] }
 0x1cd   :  { %v1600_v33 = vld [vmem:[#allocation2 + $0x30a0] sm:$0xff]  ;;  %2866 = vmatpush.msrb.mxu1 %v1360_v32  ;;  %v657_v32 = vld [vmem:[#allocation2 + $0x1328] sm:$0xff] }
 0x1ce   :  { %v1872_v34 = vld [vmem:[#allocation2 + $0x3920] sm:$0xff]  ;;  %2887 = vmatpush.msrb.mxu2 %v1600_v33  ;;  %v929_v33 = vld [vmem:[#allocation2 + $0x1ba8] sm:$0xff] }
 0x1cf   :  { %v1072_v1 = vld [vmem:[#allocation2 + $0x2020] sm:$0xff]  ;;  %2906 = vmatpush.msrb.mxu3 %v1872_v34  ;;  %v129_v34 = vld [vmem:[#allocation2 + $0x2a8] sm:$0xff] }
 0x1d0   :  { %v1344_v21 = vld [vmem:[#allocation2 + $0x28a0] sm:$0xff]  ;;  %2848 = vmatpush.msrb.mxu0 %v1072_v1  ;;  %v401_v1 = vld [vmem:[#allocation2 + $0xb28] sm:$0xff] }
 0x1d1   :  { %v1584_v22 = vld [vmem:[#allocation2 + $0x3020] sm:$0xff]  ;;  %2867 = vmatpush.msrb.mxu1 %v1344_v21  ;;  %2849 = vmatmul.f32.vlgmr.msrb.gmra.mxu0 %v4998_v63  ;;  %v5017_v21 = vpop.f32.mrf.mxu3 }
 0x1d2   :  { %v1856_v7 = vld [vmem:[#allocation2 + $0x38a0] sm:$0xff]  ;;  %2888 = vmatpush.msrb.mxu2 %v1584_v22  ;;  %2913 = vmatpush.msra.mxu0 %v289_v36  ;;  %v641_v22 = vld [vmem:[#allocation2 + $0x12a8] sm:$0xff] }
 0x1d3   :  { %v1328_v31 = vld [vmem:[#allocation2 + $0x2820] sm:$0xff]  ;;  %2907 = vmatpush.msrb.mxu3 %v1856_v7  ;;  %2889 = vmatmul.f32.vlgmr.msrb.gmra.mxu2 %v4993_v57  ;;  %v913_v7 = vld [vmem:[#allocation2 + $0x1b28] sm:$0xff] }
 0x1d4   :  { %v1840_v41 = vld [vmem:[#allocation2 + $0x3820] sm:$0xff]  ;;  %2953 = vmatpush.msra.mxu2 %v801_v38  ;;  %2868 = vmatpush.msrb.mxu1 %v1328_v31  ;;  %v113_v36 = vld [vmem:[#allocation2 + $0x228] sm:$0xff] }
 0x1d5   :  { %2908 = vmatpush.msrb.mxu3 %v1840_v41  ;;  %v4986_v49 = vld.sshfl [vmem:[#allocation1 + $0x8] sm:$0xff pattern:$0x73625140]  ;;  %2914 = vmatpush.msra.mxu0 %v273_v45  ;;  %v385_v38 = vld [vmem:[#allocation2 + $0xaa8] sm:$0xff]  ;;  %v5019_v45 = vpop.f32.mrf.mxu0 }
 0x1d6   :  { %2789 = vmatmul.f32.vlgmr.msra.gmra.mxu1 %v4986_v49  ;;  %2954 = vmatpush.msra.mxu2 %v785_v37  ;;  %v5006_v10 = vld.sshfl [vmem:[#allocation1 + $0x28] sm:$0xff pattern:$0x73625140]  ;;  %v625_v31 = vld [vmem:[#allocation2 + $0x1228] sm:$0xff] }
 0x1d7   :  { %2933 = vmatpush.msra.mxu1 %v545_v46  ;;  %2973 = vmatpush.msra.mxu3 %v1057_v48  ;;  %v897_v41 = vld [vmem:[#allocation2 + $0x1aa8] sm:$0xff] }
 0x1d8   :  { %2915 = vmatpush.msra.mxu0 %v257_v50  ;;  %2955 = vmatpush.msra.mxu2 %v769_v51  ;;  %v97_v46 = vld [vmem:[#allocation2 + $0x1a8] sm:$0xff] }
 0x1d9   :  { %2934 = vmatpush.msra.mxu1 %v529_v40  ;;  %2974 = vmatpush.msra.mxu3 %v1041_v52  ;;  %v369_v37 = vld [vmem:[#allocation2 + $0xa28] sm:$0xff]  ;;  %v5021_v52 = vpop.f32.mrf.mxu1 }
 0x1da   :  { %2916 = vmatpush.msra.mxu0 %v241_v53  ;;  %2956 = vmatpush.msra.mxu2 %v753_v47  ;;  %v609_v48 = vld [vmem:[#allocation2 + $0x11a8] sm:$0xff]  ;;  %v5023_v47 = vpop.f32.mrf.mxu2 }
 0x1db   :  { %2935 = vmatpush.msra.mxu1 %v513_v54  ;;  %2975 = vmatpush.msra.mxu3 %v1025_v56  ;;  %v881_v50 = vld [vmem:[#allocation2 + $0x1a28] sm:$0xff] }
 0x1dc   :  { %2909 = vmatmul.f32.vlgmr.msrb.gmra.mxu3 %v5003_v4  ;;  %2917 = vmatpush.msra.mxu0 %v225_v58  ;;  %v81_v40 = vld [vmem:[#allocation2 + $0x128] sm:$0xff] }
 0x1dd   :  { %2936 = vmatpush.msra.mxu1 %v497_v59  ;;  %2957 = vmatpush.msra.mxu2 %v737_v61  ;;  %v353_v51 = vld [vmem:[#allocation2 + $0x9a8] sm:$0xff] }
 0x1de   :  { %2976 = vmatpush.msra.mxu3 %v1009_v0  ;;  %2869 = vmatmul.f32.vlgmr.msrb.gmra.mxu1 %v5006_v10  ;;  %v593_v53 = vld [vmem:[#allocation2 + $0x1128] sm:$0xff] }
 0x1df   :  { %2918 = vmatpush.msra.mxu0 %v209_v5  ;;  %2937 = vmatpush.msra.mxu1 %v481_v6  ;;  %v865_v54 = vld [vmem:[#allocation2 + $0x19a8] sm:$0xff]  ;;  %v5025_v6 = vpop.f32.mrf.mxu3 }
 0x1e0   :  { %2958 = vmatpush.msra.mxu2 %v721_v8  ;;  %2977 = vmatpush.msra.mxu3 %v993_v9  ;;  %v65_v56 = vld [vmem:[#allocation2 + $0xa8] sm:$0xff] }
 0x1e1   :  { %2919 = vmatpush.msra.mxu0 %v193_v11  ;;  %2938 = vmatpush.msra.mxu1 %v465_v12  ;;  %v337_v58 = vld [vmem:[#allocation2 + $0x928] sm:$0xff]  ;;  %v2450_v11 = vpop.f32.mrf.mxu0 }
 0x1e2   :  { %2959 = vmatpush.msra.mxu2 %v705_v14  ;;  %2978 = vmatpush.msra.mxu3 %v977_v15  ;;  %v577_v59 = vld [vmem:[#allocation2 + $0x10a8] sm:$0xff] }
 0x1e3   :  { %2920 = vmatpush.msra.mxu0 %v177_v17  ;;  %2939 = vmatpush.msra.mxu1 %v449_v18  ;;  %v849_v61 = vld [vmem:[#allocation2 + $0x1928] sm:$0xff] }
 0x1e4   :  { %2960 = vmatpush.msra.mxu2 %v689_v19  ;;  %2979 = vmatpush.msra.mxu3 %v961_v2  ;;  %v49_v0 = vld [vmem:[#allocation2 + $0x28] sm:$0xff]  ;;  %v2470_v2 = vpop.f32.mrf.mxu1 }
 0x1e5   :  { %2921 = vmatpush.msra.mxu0 %v161_v20  ;;  %2940 = vmatpush.msra.mxu1 %v433_v23  ;;  %v321_v5 = vld [vmem:[#allocation2 + $0x8a8] sm:$0xff] }
 0x1e6   :  { %2961 = vmatpush.msra.mxu2 %v673_v26  ;;  %2980 = vmatpush.msra.mxu3 %v945_v28  ;;  %v561_v8 = vld [vmem:[#allocation2 + $0x1028] sm:$0xff]  ;;  %v2490_v26 = vpop.f32.mrf.mxu2 }
 0x1e7   :  { %2922 = vmatpush.msra.mxu0 %v145_v30  ;;  %2941 = vmatpush.msra.mxu1 %v417_v16  ;;  %v833_v9 = vld [vmem:[#allocation2 + $0x18a8] sm:$0xff] }
 0x1e8   :  { %2962 = vmatpush.msra.mxu2 %v657_v32  ;;  %2981 = vmatpush.msra.mxu3 %v929_v33  ;;  %v1313_v12 = vld [vmem:[#allocation2 + $0x27a8] sm:$0xff] }
 0x1e9   :  { %2923 = vmatpush.msra.mxu0 %v129_v34  ;;  %2942 = vmatpush.msra.mxu1 %v401_v1  ;;  %v1825_v14 = vld [vmem:[#allocation2 + $0x37a8] sm:$0xff]  ;;  %v2510_v1 = vpop.f32.mrf.mxu3 }
 0x1ea   :  { %2963 = vmatpush.msra.mxu2 %v641_v22  ;;  %2982 = vmatpush.msra.mxu3 %v913_v7  ;;  %v305_v15 = vld [vmem:[#allocation2 + $0x828] sm:$0xff] }
 0x1eb   :  { %2924 = vmatpush.msra.mxu0 %v113_v36  ;;  %2943 = vmatpush.msra.mxu1 %v385_v38  ;;  %v817_v17 = vld [vmem:[#allocation2 + $0x1828] sm:$0xff]  ;;  %v2311_v36 = vadd.f32 %v5013_v24, %v5011_v60 }
 0x1ec   :  { %2964 = vmatpush.msra.mxu2 %v625_v31  ;;  %2983 = vmatpush.msra.mxu3 %v897_v41  ;;  %v1297_v18 = vld [vmem:[#allocation2 + $0x2728] sm:$0xff] }
 0x1ed   :  { %2925 = vmatpush.msra.mxu0 %v97_v46  ;;  %2944 = vmatpush.msra.mxu1 %v369_v37  ;;  %v1569_v19 = vld [vmem:[#allocation2 + $0x2fa8] sm:$0xff]  ;;  %v2471_v37 = vadd.f32 %v2470_v2, %v2450_v11  ;;  %v2331_v60 = vadd.f32 %v5015_v29, %v2311_v36 }
 0x1ee   :  { %2965 = vmatpush.msra.mxu2 %v609_v48  ;;  %2984 = vmatpush.msra.mxu3 %v881_v50  ;;  %v1809_v20 = vld [vmem:[#allocation2 + $0x3728] sm:$0xff]  ;;  %v2530_v48 = vpop.f32.mrf.mxu0 }
 0x1ef   :  { %2926 = vmatpush.msra.mxu0 %v81_v40  ;;  %2945 = vmatpush.msra.mxu1 %v353_v51  ;;  %v2081_v23 = vld [vmem:[#allocation2 + $0x3fa8] sm:$0xff] }
 0x1f0   :  { %2966 = vmatpush.msra.mxu2 %v593_v53  ;;  %2985 = vmatpush.msra.mxu3 %v865_v54  ;;  %v1281_v28 = vld [vmem:[#allocation2 + $0x26a8] sm:$0xff] }
 0x1f1   :  { %2927 = vmatpush.msra.mxu0 %v65_v56  ;;  %2946 = vmatpush.msra.mxu1 %v337_v58  ;;  %v1553_v30 = vld [vmem:[#allocation2 + $0x2f28] sm:$0xff]  ;;  %v5030_v56 = vpop.f32.mrf.mxu1 }
 0x1f2   :  { %2967 = vmatpush.msra.mxu2 %v577_v59  ;;  %2986 = vmatpush.msra.mxu3 %v849_v61  ;;  %v1793_v16 = vld [vmem:[#allocation2 + $0x36a8] sm:$0xff]  ;;  %v2151_v61 = vadd.f32 %v4976_v27, %v4971_v35 }
 0x1f3   :  { %2928 = vmatpush.msra.mxu0 %v49_v0  ;;  %2947 = vmatpush.msra.mxu1 %v321_v5  ;;  %v2065_v32 = vld [vmem:[#allocation2 + $0x3f28] sm:$0xff]  ;;  %v2491_v0 = vadd.f32 %v2490_v26, %v2471_v37  ;;  %v5034_v5 = vpop.f32.mrf.mxu2 }
 0x1f4   :  { %2968 = vmatpush.msra.mxu2 %v561_v8  ;;  %2987 = vmatpush.msra.mxu3 %v833_v9  ;;  %v1265_v33 = vld [vmem:[#allocation2 + $0x2628] sm:$0xff] }
 0x1f5   :  { %2993 = vmatpush.msrb.mxu0 %v1313_v12  ;;  %2948 = vmatpush.msra.mxu1 %v305_v15  ;;  %v1537_v34 = vld [vmem:[#allocation2 + $0x2ea8] sm:$0xff]  ;;  %v2351_v12 = vadd.f32 %v5017_v21, %v2331_v60 }
 0x1f6   :  { %3033 = vmatpush.msrb.mxu2 %v1825_v14  ;;  %2988 = vmatpush.msra.mxu3 %v817_v17  ;;  %v1777_v22 = vld [vmem:[#allocation2 + $0x3628] sm:$0xff]  ;;  %v5037_v17 = vpop.f32.mrf.mxu3 }
 0x1f7   :  { %2994 = vmatpush.msrb.mxu0 %v1297_v18  ;;  %3013 = vmatpush.msrb.mxu1 %v1569_v19  ;;  %v2049_v7 = vld [vmem:[#allocation2 + $0x3ea8] sm:$0xff]  ;;  %v2171_v18 = vadd.f32 %v4981_v43, %v2151_v61  ;;  %v2511_v19 = vadd.f32 %v2510_v1, %v2491_v0 }
 0x1f8   :  { %3034 = vmatpush.msrb.mxu2 %v1809_v20  ;;  %3053 = vmatpush.msrb.mxu3 %v2081_v23  ;;  %v1249_v38 = vld [vmem:[#allocation2 + $0x25a8] sm:$0xff]  ;;  %v2610_v23 = vpop.f32.mrf.mxu0 }
 0x1f9   :  { %2995 = vmatpush.msrb.mxu0 %v1281_v28  ;;  %3014 = vmatpush.msrb.mxu1 %v1553_v30  ;;  %v1521_v31 = vld [vmem:[#allocation2 + $0x2e28] sm:$0xff]  ;;  %v2371_v28 = vadd.f32 %v5019_v45, %v2351_v12  ;;  %v2531_v1 = vadd.f32 %v2530_v48, %v2511_v19 }
 0x1fa   :  { %3035 = vmatpush.msrb.mxu2 %v1793_v16  ;;  %3054 = vmatpush.msrb.mxu3 %v2065_v32  ;;  %v1761_v41 = vld [vmem:[#allocation2 + $0x35a8] sm:$0xff] }
 0x1fb   :  { %2996 = vmatpush.msrb.mxu0 %v1265_v33  ;;  %3015 = vmatpush.msrb.mxu1 %v1537_v34  ;;  %v2033_v46 = vld [vmem:[#allocation2 + $0x3e28] sm:$0xff]  ;;  %v2630_v33 = vpop.f32.mrf.mxu1  ;;  %v2191_v34 = vadd.f32 %v4989_v42, %v2171_v18 }
 0x1fc   :  { %3036 = vmatpush.msrb.mxu2 %v1777_v22  ;;  %3055 = vmatpush.msrb.mxu3 %v2049_v7  ;;  %v1233_v50 = vld [vmem:[#allocation2 + $0x2528] sm:$0xff]  ;;  %v2631_v36 = vadd.f32 %v2630_v33, %v2610_v23  ;;  %v770_v33 = vld [vmem:[#allocation2 + $0x16b0] sm:$0xff] }
 0x1fd   :  { %v1505_v40 = vld [vmem:[#allocation2 + $0x2da8] sm:$0xff]  ;;  %2997 = vmatpush.msrb.mxu0 %v1249_v38  ;;  %3016 = vmatpush.msrb.mxu1 %v1521_v31  ;;  %v2650_v38 = vpop.f32.mrf.mxu2 }
 0x1fe   :  { %v1745_v51 = vld [vmem:[#allocation2 + $0x3528] sm:$0xff]  ;;  %3037 = vmatpush.msrb.mxu2 %v1761_v41  ;;  %3056 = vmatpush.msrb.mxu3 %v2033_v46  ;;  %v2391_v41 = vadd.f32 %v5021_v52, %v2371_v28  ;;  %v2651_v37 = vadd.f32 %v2650_v38, %v2631_v36  ;;  %v786_v28 = vld [vmem:[#allocation2 + $0x1730] sm:$0xff] }
 0x1ff   :  { %v2017_v53 = vld [vmem:[#allocation2 + $0x3da8] sm:$0xff]  ;;  %2998 = vmatpush.msrb.mxu0 %v1233_v50  ;;  %3017 = vmatpush.msrb.mxu1 %v1505_v40  ;;  %v2670_v50 = vpop.f32.mrf.mxu3  ;;  %v2211_v40 = vadd.f32 %v4991_v55, %v2191_v34  ;;  %v1042_v34 = vld [vmem:[#allocation2 + $0x1f30] sm:$0xff] }
 0x200   :  { %v1217_v24 = vld [vmem:[#allocation2 + $0x24a8] sm:$0xff]  ;;  %3038 = vmatpush.msrb.mxu2 %v1745_v51  ;;  %3057 = vmatpush.msrb.mxu3 %v2017_v53  ;;  %v2551_v51 = vadd.f32 %v5030_v56, %v2531_v1  ;;  %v2671_v60 = vadd.f32 %v2670_v50, %v2651_v37  ;;  %v226_v36 = vld [vmem:[#allocation2 + $0x5b0] sm:$0xff] }
 0x201   :  { %v1489_v54 = vld [vmem:[#allocation2 + $0x2d28] sm:$0xff]  ;;  %2999 = vmatpush.msrb.mxu0 %v1217_v24  ;;  %2969 = vmatmul.f32.vlgmr.msra.gmra.mxu2 %v4973_v25  ;;  %v2411_v24 = vadd.f32 %v5023_v47, %v2391_v41  ;;  %v2231_v61 = vadd.f32 %v4996_v62, %v2211_v40  ;;  %v498_v38 = vld [vmem:[#allocation2 + $0xe30] sm:$0xff] }
 0x202   :  { %v1729_v58 = vld [vmem:[#allocation2 + $0x34a8] sm:$0xff]  ;;  %3018 = vmatpush.msrb.mxu1 %v1489_v54  ;;  %2929 = vmatmul.f32.vlgmr.msra.gmra.mxu0 %v4978_v39  ;;  %v2571_v0 = vadd.f32 %v5034_v5, %v2551_v51  ;;  %v210_v41 = vld [vmem:[#allocation2 + $0x530] sm:$0xff] }
 0x203   :  { %v2001_v59 = vld [vmem:[#allocation2 + $0x3d28] sm:$0xff]  ;;  %3039 = vmatpush.msrb.mxu2 %v1729_v58  ;;  %2989 = vmatmul.f32.vlgmr.msra.gmra.mxu3 %v4983_v44  ;;  %v994_v37 = vld [vmem:[#allocation2 + $0x1db0] sm:$0xff] }
 0x204   :  { %v1201_v8 = vld [vmem:[#allocation2 + $0x2428] sm:$0xff]  ;;  %3058 = vmatpush.msrb.mxu3 %v2001_v59  ;;  %v2690_v59 = vpop.f32.mrf.mxu0  ;;  %2949 = vmatmul.f32.vlgmr.msra.gmra.mxu1 %v4986_v49  ;;  %v706_v50 = vld [vmem:[#allocation2 + $0x14b0] sm:$0xff] }
 0x205   :  { %v1473_v29 = vld [vmem:[#allocation2 + $0x2ca8] sm:$0xff]  ;;  %3000 = vmatpush.msrb.mxu0 %v1201_v8  ;;  %v2691_v56 = vadd.f32 %v2690_v59, %v2671_v60  ;;  %v978_v40 = vld [vmem:[#allocation2 + $0x1d30] sm:$0xff] }
 0x206   :  { %v1713_v9 = vld [vmem:[#allocation2 + $0x3428] sm:$0xff]  ;;  %3019 = vmatpush.msrb.mxu1 %v1473_v29  ;;  %v178_v51 = vld [vmem:[#allocation2 + $0x430] sm:$0xff] }
 0x207   :  { %v1985_v11 = vld [vmem:[#allocation2 + $0x3ca8] sm:$0xff]  ;;  %3040 = vmatpush.msrb.mxu2 %v1713_v9  ;;  %v2710_v9 = vpop.f32.mrf.mxu1  ;;  %v2750_v19 = vpop.f32.mrf.mxu3  ;;  %v690_v60 = vld [vmem:[#allocation2 + $0x1430] sm:$0xff] }
 0x208   :  { %v1185_v14 = vld [vmem:[#allocation2 + $0x23a8] sm:$0xff]  ;;  %3059 = vmatpush.msrb.mxu3 %v1985_v11  ;;  %v2431_v11 = vadd.f32 %v5025_v6, %v2411_v24  ;;  %v2711_v62 = vadd.f32 %v2710_v9, %v2691_v56  ;;  %v802_v6 = vld [vmem:[#allocation2 + $0x17b0] sm:$0xff] }
 0x209   :  { %v1457_v15 = vld [vmem:[#allocation2 + $0x2c28] sm:$0xff]  ;;  %3001 = vmatpush.msrb.mxu0 %v1185_v14  ;;  %v2730_v14 = vpop.f32.mrf.mxu2  ;;  %v162_v24 = vld [vmem:[#allocation2 + $0x3b0] sm:$0xff] }
 0x20a   :  { %v1697_v35 = vld [vmem:[#allocation2 + $0x33a8] sm:$0xff]  ;;  %3020 = vmatpush.msrb.mxu1 %v1457_v15  ;;  %v2251_v15 = vadd.f32 %v5001_v3, %v2231_v61  ;;  %v2731_v18 = vadd.f32 %v2730_v14, %v2711_v62  ;;  %v274_v3 = vld [vmem:[#allocation2 + $0x730] sm:$0xff] }
 0x20b   :  { %v1969_v27 = vld [vmem:[#allocation2 + $0x3c28] sm:$0xff]  ;;  %3041 = vmatpush.msrb.mxu2 %v1697_v35  ;;  %v2591_v35 = vadd.f32 %v5037_v17, %v2571_v0  ;;  %v946_v59 = vld [vmem:[#allocation2 + $0x1c30] sm:$0xff] }
 0x20c   :  { %v1169_v2 = vld [vmem:[#allocation2 + $0x2328] sm:$0xff]  ;;  %3060 = vmatpush.msrb.mxu3 %v1969_v27  ;;  %v290_v27 = vld [vmem:[#allocation2 + $0x7b0] sm:$0xff]  ;;  %v2751_v23 = vadd.f32 %v2750_v19, %v2731_v18  ;;  %v2271_v17 = vadd.f32 %v5009_v13, %v2251_v15 }
 0x20d   :  { %v1441_v20 = vld [vmem:[#allocation2 + $0x2ba8] sm:$0xff]  ;;  %3002 = vmatpush.msrb.mxu0 %v1169_v2  ;;  %v4689_v2 = vrot.slane %v2431_v11, 6  ;;  %v418_v56 = vld [vmem:[#allocation2 + $0xbb0] sm:$0xff] }
 0x20e   :  { %v1681_v21 = vld [vmem:[#allocation2 + $0x3328] sm:$0xff]  ;;  %3021 = vmatpush.msrb.mxu1 %v1441_v20  ;;  %v658_v61 = vld [vmem:[#allocation2 + $0x1330] sm:$0xff] }
 0x20f   :  { %v1953_v26 = vld [vmem:[#allocation2 + $0x3ba8] sm:$0xff]  ;;  %3042 = vmatpush.msrb.mxu2 %v1681_v21  ;;  %v4690_v21 = vrot.slane %v2591_v35, 4  ;;  %v930_v0 = vld [vmem:[#allocation2 + $0x1bb0] sm:$0xff] }
 0x210   :  { %v1153_v30 = vld [vmem:[#allocation2 + $0x22a8] sm:$0xff]  ;;  %3061 = vmatpush.msrb.mxu3 %v1953_v26  ;;  %v546_v26 = vld [vmem:[#allocation2 + $0xfb0] sm:$0xff] }
 0x211   :  { %v1425_v16 = vld [vmem:[#allocation2 + $0x2b28] sm:$0xff]  ;;  %3003 = vmatpush.msrb.mxu0 %v1153_v30  ;;  %v4691_v30 = vrot.slane %v2751_v23, 2  ;;  %v114_v9 = vld [vmem:[#allocation2 + $0x230] sm:$0xff] }
 0x212   :  { %v1665_v32 = vld [vmem:[#allocation2 + $0x32a8] sm:$0xff]  ;;  %3022 = vmatpush.msrb.mxu1 %v1425_v16  ;;  %v1058_v16 = vld [vmem:[#allocation2 + $0x1fb0] sm:$0xff] }
 0x213   :  { %v1937_v43 = vld [vmem:[#allocation2 + $0x3b28] sm:$0xff]  ;;  %3043 = vmatpush.msrb.mxu2 %v1665_v32  ;;  %v4702_v32 = vsel %vm4701_vm0, %v2271_v17, %v4689_v2  ;;  %v4704_v13 = vsel %vm4703_vm1, %v4690_v21, %v4691_v30  ;;  %v386_v11 = vld [vmem:[#allocation2 + $0xab0] sm:$0xff] }
 0x214   :  { %v1137_v22 = vld [vmem:[#allocation2 + $0x2228] sm:$0xff]  ;;  %3062 = vmatpush.msrb.mxu3 %v1937_v43  ;;  %v530_v43 = vld [vmem:[#allocation2 + $0xf30] sm:$0xff]  ;;  %v4706_v1 = vsel %vm4705_vm2, %v4702_v32, %v4704_v13 }
 0x215   :  { %v1409_v7 = vld [vmem:[#allocation2 + $0x2aa8] sm:$0xff]  ;;  %3004 = vmatpush.msrb.mxu0 %v1137_v22  ;;  %v514_v22 = vld [vmem:[#allocation2 + $0xeb0] sm:$0xff]  ;;  %4720 = vst [vmem:[#allocation7] sm:$0xff] %v4706_v1 }
 0x216   :  { %v1649_v45 = vld [vmem:[#allocation2 + $0x3228] sm:$0xff]  ;;  %3023 = vmatpush.msrb.mxu1 %v1409_v7  ;;  %v1026_v7 = vld [vmem:[#allocation2 + $0x1eb0] sm:$0xff] }
 0x217   :  { %v1921_v31 = vld [vmem:[#allocation2 + $0x3aa8] sm:$0xff]  ;;  %3044 = vmatpush.msrb.mxu2 %v1649_v45  ;;  %v738_v45 = vld [vmem:[#allocation2 + $0x15b0] sm:$0xff] }
 0x218   :  { %v1121_v46 = vld [vmem:[#allocation2 + $0x21a8] sm:$0xff]  ;;  %3063 = vmatpush.msrb.mxu3 %v1921_v31  ;;  %v1010_v31 = vld [vmem:[#allocation2 + $0x1e30] sm:$0xff] }
 0x219   :  { %v1393_v42 = vld [vmem:[#allocation2 + $0x2a28] sm:$0xff]  ;;  %3005 = vmatpush.msrb.mxu0 %v1121_v46  ;;  %v482_v46 = vld [vmem:[#allocation2 + $0xdb0] sm:$0xff] }
 0x21a   :  { %v1633_v48 = vld [vmem:[#allocation2 + $0x31a8] sm:$0xff]  ;;  %3024 = vmatpush.msrb.mxu1 %v1393_v42  ;;  %v194_v42 = vld [vmem:[#allocation2 + $0x4b0] sm:$0xff] }
 0x21b   :  { %v1905_v53 = vld [vmem:[#allocation2 + $0x3a28] sm:$0xff]  ;;  %3045 = vmatpush.msrb.mxu2 %v1633_v48  ;;  %v466_v48 = vld [vmem:[#allocation2 + $0xd30] sm:$0xff] }
 0x21c   :  { %v1105_v52 = vld [vmem:[#allocation2 + $0x2128] sm:$0xff]  ;;  %3064 = vmatpush.msrb.mxu3 %v1905_v53  ;;  %v450_v53 = vld [vmem:[#allocation2 + $0xcb0] sm:$0xff] }
 0x21d   :  { %v1377_v54 = vld [vmem:[#allocation2 + $0x29a8] sm:$0xff]  ;;  %3006 = vmatpush.msrb.mxu0 %v1105_v52  ;;  %v962_v52 = vld [vmem:[#allocation2 + $0x1cb0] sm:$0xff] }
 0x21e   :  { %v1617_v58 = vld [vmem:[#allocation2 + $0x3128] sm:$0xff]  ;;  %3025 = vmatpush.msrb.mxu1 %v1377_v54  ;;  %v434_v54 = vld [vmem:[#allocation2 + $0xc30] sm:$0xff] }
 0x21f   :  { %v1889_v55 = vld [vmem:[#allocation2 + $0x39a8] sm:$0xff]  ;;  %3046 = vmatpush.msrb.mxu2 %v1617_v58  ;;  %v674_v58 = vld [vmem:[#allocation2 + $0x13b0] sm:$0xff] }
 0x220   :  { %v1089_v25 = vld [vmem:[#allocation2 + $0x20a8] sm:$0xff]  ;;  %3065 = vmatpush.msrb.mxu3 %v1889_v55  ;;  %v146_v55 = vld [vmem:[#allocation2 + $0x330] sm:$0xff] }
 0x221   :  { %v1361_v8 = vld [vmem:[#allocation2 + $0x2928] sm:$0xff]  ;;  %3007 = vmatpush.msrb.mxu0 %v1089_v25  ;;  %v130_v25 = vld [vmem:[#allocation2 + $0x2b0] sm:$0xff] }
 0x222   :  { %v1601_v47 = vld [vmem:[#allocation2 + $0x30a8] sm:$0xff]  ;;  %3026 = vmatpush.msrb.mxu1 %v1361_v8  ;;  %v402_v8 = vld [vmem:[#allocation2 + $0xb30] sm:$0xff] }
 0x223   :  { %v1873_v29 = vld [vmem:[#allocation2 + $0x3928] sm:$0xff]  ;;  %3047 = vmatpush.msrb.mxu2 %v1601_v47  ;;  %v642_v47 = vld [vmem:[#allocation2 + $0x12b0] sm:$0xff] }
 0x224   :  { %v1073_v39 = vld [vmem:[#allocation2 + $0x2028] sm:$0xff]  ;;  %3066 = vmatpush.msrb.mxu3 %v1873_v29  ;;  %v914_v29 = vld [vmem:[#allocation2 + $0x1b30] sm:$0xff] }
 0x225   :  { %v1345_v12 = vld [vmem:[#allocation2 + $0x28a8] sm:$0xff]  ;;  %3008 = vmatpush.msrb.mxu0 %v1073_v39  ;;  %v626_v39 = vld [vmem:[#allocation2 + $0x1230] sm:$0xff] }
 0x226   :  { %v1585_v44 = vld [vmem:[#allocation2 + $0x3028] sm:$0xff]  ;;  %3027 = vmatpush.msrb.mxu1 %v1345_v12  ;;  %3009 = vmatmul.f32.vlgmr.msrb.gmra.mxu0 %v4998_v63  ;;  %v242_v63 = vld [vmem:[#allocation2 + $0x630] sm:$0xff] }
 0x227   :  { %v1857_v5 = vld [vmem:[#allocation2 + $0x38a8] sm:$0xff]  ;;  %3048 = vmatpush.msrb.mxu2 %v1585_v44  ;;  %3073 = vmatpush.msra.mxu0 %v290_v27  ;;  %v898_v12 = vld [vmem:[#allocation2 + $0x1ab0] sm:$0xff] }
 0x228   :  { %v1329_v49 = vld [vmem:[#allocation2 + $0x2828] sm:$0xff]  ;;  %3067 = vmatpush.msrb.mxu3 %v1857_v5  ;;  %3049 = vmatmul.f32.vlgmr.msrb.gmra.mxu2 %v4993_v57  ;;  %v258_v57 = vld [vmem:[#allocation2 + $0x6b0] sm:$0xff] }
 0x229   :  { %v1841_v20 = vld [vmem:[#allocation2 + $0x3828] sm:$0xff]  ;;  %3113 = vmatpush.msra.mxu2 %v802_v6  ;;  %3028 = vmatpush.msrb.mxu1 %v1329_v49  ;;  %v98_v62 = vld [vmem:[#allocation2 + $0x1b0] sm:$0xff] }
 0x22a   :  { %3068 = vmatpush.msrb.mxu3 %v1841_v20  ;;  %3074 = vmatpush.msra.mxu0 %v274_v3  ;;  %v370_v14 = vld [vmem:[#allocation2 + $0xa30] sm:$0xff] }
 0x22b   :  { %3069 = vmatmul.f32.vlgmr.msrb.gmra.mxu3 %v5003_v4  ;;  %3093 = vmatpush.msra.mxu1 %v546_v26  ;;  %v754_v4 = vld [vmem:[#allocation2 + $0x1630] sm:$0xff] }
 0x22c   :  { %3114 = vmatpush.msra.mxu2 %v786_v28  ;;  %3133 = vmatpush.msra.mxu3 %v1058_v16  ;;  %v610_v44 = vld [vmem:[#allocation2 + $0x11b0] sm:$0xff] }
 0x22d   :  { %3029 = vmatmul.f32.vlgmr.msrb.gmra.mxu1 %v5006_v10  ;;  %3075 = vmatpush.msra.mxu0 %v258_v57  ;;  %v722_v10 = vld [vmem:[#allocation2 + $0x1530] sm:$0xff] }
 0x22e   :  { %3094 = vmatpush.msra.mxu1 %v530_v43  ;;  %3115 = vmatpush.msra.mxu2 %v770_v33  ;;  %v882_v5 = vld [vmem:[#allocation2 + $0x1a30] sm:$0xff] }
 0x22f   :  { %3134 = vmatpush.msra.mxu3 %v1042_v34  ;;  %3076 = vmatpush.msra.mxu0 %v242_v63  ;;  %v82_v15 = vld [vmem:[#allocation2 + $0x130] sm:$0xff] }
 0x230   :  { %3095 = vmatpush.msra.mxu1 %v514_v22  ;;  %3116 = vmatpush.msra.mxu2 %v754_v4  ;;  %v354_v35 = vld [vmem:[#allocation2 + $0x9b0] sm:$0xff] }
 0x231   :  { %3135 = vmatpush.msra.mxu3 %v1026_v7  ;;  %3077 = vmatpush.msra.mxu0 %v226_v36  ;;  %v594_v27 = vld [vmem:[#allocation2 + $0x1130] sm:$0xff] }
 0x232   :  { %3096 = vmatpush.msra.mxu1 %v498_v38  ;;  %3117 = vmatpush.msra.mxu2 %v738_v45  ;;  %v866_v18 = vld [vmem:[#allocation2 + $0x19b0] sm:$0xff] }
 0x233   :  { %3136 = vmatpush.msra.mxu3 %v1010_v31  ;;  %3078 = vmatpush.msra.mxu0 %v210_v41  ;;  %v66_v6 = vld [vmem:[#allocation2 + $0xb0] sm:$0xff] }
 0x234   :  { %3097 = vmatpush.msra.mxu1 %v482_v46  ;;  %3118 = vmatpush.msra.mxu2 %v722_v10  ;;  %v338_v49 = vld [vmem:[#allocation2 + $0x930] sm:$0xff] }
 0x235   :  { %3137 = vmatpush.msra.mxu3 %v994_v37  ;;  %3079 = vmatpush.msra.mxu0 %v194_v42  ;;  %v578_v19 = vld [vmem:[#allocation2 + $0x10b0] sm:$0xff] }
 0x236   :  { %3098 = vmatpush.msra.mxu1 %v466_v48  ;;  %3119 = vmatpush.msra.mxu2 %v706_v50  ;;  %v850_v2 = vld [vmem:[#allocation2 + $0x1930] sm:$0xff] }
 0x237   :  { %3138 = vmatpush.msra.mxu3 %v978_v40  ;;  %3080 = vmatpush.msra.mxu0 %v178_v51  ;;  %v50_v20 = vld [vmem:[#allocation2 + $0x30] sm:$0xff] }
 0x238   :  { %3099 = vmatpush.msra.mxu1 %v450_v53  ;;  %3120 = vmatpush.msra.mxu2 %v690_v60  ;;  %v322_v23 = vld [vmem:[#allocation2 + $0x8b0] sm:$0xff] }
 0x239   :  { %3139 = vmatpush.msra.mxu3 %v962_v52  ;;  %3081 = vmatpush.msra.mxu0 %v162_v24  ;;  %v562_v3 = vld [vmem:[#allocation2 + $0x1030] sm:$0xff] }
 0x23a   :  { %3100 = vmatpush.msra.mxu1 %v434_v54  ;;  %3121 = vmatpush.msra.mxu2 %v674_v58  ;;  %v834_v17 = vld [vmem:[#allocation2 + $0x18b0] sm:$0xff] }
 0x23b   :  { %3140 = vmatpush.msra.mxu3 %v946_v59  ;;  %3082 = vmatpush.msra.mxu0 %v146_v55  ;;  %v1314_v21 = vld [vmem:[#allocation2 + $0x27b0] sm:$0xff] }
 0x23c   :  { %3101 = vmatpush.msra.mxu1 %v418_v56  ;;  %3122 = vmatpush.msra.mxu2 %v658_v61  ;;  %v1826_v26 = vld [vmem:[#allocation2 + $0x37b0] sm:$0xff] }
 0x23d   :  { %3141 = vmatpush.msra.mxu3 %v930_v0  ;;  %3083 = vmatpush.msra.mxu0 %v130_v25  ;;  %v306_v28 = vld [vmem:[#allocation2 + $0x830] sm:$0xff] }
 0x23e   :  { %3102 = vmatpush.msra.mxu1 %v402_v8  ;;  %3123 = vmatpush.msra.mxu2 %v642_v47  ;;  %v818_v30 = vld [vmem:[#allocation2 + $0x1830] sm:$0xff] }
 0x23f   :  { %3142 = vmatpush.msra.mxu3 %v914_v29  ;;  %3084 = vmatpush.msra.mxu0 %v114_v9  ;;  %v1298_v16 = vld [vmem:[#allocation2 + $0x2730] sm:$0xff] }
 0x240   :  { %3103 = vmatpush.msra.mxu1 %v386_v11  ;;  %3124 = vmatpush.msra.mxu2 %v626_v39  ;;  %v1570_v32 = vld [vmem:[#allocation2 + $0x2fb0] sm:$0xff] }
 0x241   :  { %3143 = vmatpush.msra.mxu3 %v898_v12  ;;  %3085 = vmatpush.msra.mxu0 %v98_v62  ;;  %v1810_v57 = vld [vmem:[#allocation2 + $0x3730] sm:$0xff] }
 0x242   :  { %3104 = vmatpush.msra.mxu1 %v370_v14  ;;  %3125 = vmatpush.msra.mxu2 %v610_v44  ;;  %v2082_v43 = vld [vmem:[#allocation2 + $0x3fb0] sm:$0xff] }
 0x243   :  { %3144 = vmatpush.msra.mxu3 %v882_v5  ;;  %3086 = vmatpush.msra.mxu0 %v82_v15  ;;  %v1282_v13 = vld [vmem:[#allocation2 + $0x26b0] sm:$0xff] }
 0x244   :  { %3105 = vmatpush.msra.mxu1 %v354_v35  ;;  %3126 = vmatpush.msra.mxu2 %v594_v27  ;;  %v1554_v33 = vld [vmem:[#allocation2 + $0x2f30] sm:$0xff] }
 0x245   :  { %3145 = vmatpush.msra.mxu3 %v866_v18  ;;  %3087 = vmatpush.msra.mxu0 %v66_v6  ;;  %v1794_v34 = vld [vmem:[#allocation2 + $0x36b0] sm:$0xff] }
 0x246   :  { %3106 = vmatpush.msra.mxu1 %v338_v49  ;;  %3127 = vmatpush.msra.mxu2 %v578_v19  ;;  %v2066_v1 = vld [vmem:[#allocation2 + $0x3f30] sm:$0xff] }
 0x247   :  { %3146 = vmatpush.msra.mxu3 %v850_v2  ;;  %3088 = vmatpush.msra.mxu0 %v50_v20  ;;  %v1266_v63 = vld [vmem:[#allocation2 + $0x2630] sm:$0xff] }
 0x248   :  { %3107 = vmatpush.msra.mxu1 %v322_v23  ;;  %3128 = vmatpush.msra.mxu2 %v562_v3  ;;  %v1538_v22 = vld [vmem:[#allocation2 + $0x2eb0] sm:$0xff] }
 0x249   :  { %3147 = vmatpush.msra.mxu3 %v834_v17  ;;  %3153 = vmatpush.msrb.mxu0 %v1314_v21  ;;  %v1778_v4 = vld [vmem:[#allocation2 + $0x3630] sm:$0xff]  ;;  %v5063_v21 = vld.sshfl [vmem:[#allocation1 + $0x10] sm:$0xff pattern:$0x73625140] }
 0x24a   :  { %3193 = vmatpush.msrb.mxu2 %v1826_v26  ;;  %3108 = vmatpush.msra.mxu1 %v306_v28  ;;  %v2050_v7 = vld [vmem:[#allocation2 + $0x3eb0] sm:$0xff]  ;;  %v291_v26 = vld [vmem:[#allocation2 + $0x7b8] sm:$0xff] }
 0x24b   :  { %3148 = vmatpush.msra.mxu3 %v818_v30  ;;  %3154 = vmatpush.msrb.mxu0 %v1298_v16  ;;  %v1250_v36 = vld [vmem:[#allocation2 + $0x25b0] sm:$0xff]  ;;  %v803_v28 = vld [vmem:[#allocation2 + $0x17b8] sm:$0xff] }
 0x24c   :  { %3173 = vmatpush.msrb.mxu1 %v1570_v32  ;;  %3194 = vmatpush.msrb.mxu2 %v1810_v57  ;;  %v1522_v38 = vld [vmem:[#allocation2 + $0x2e30] sm:$0xff]  ;;  %v5066_v16 = vld.sshfl [vmem:[#allocation1] sm:$0xff pattern:$0x73625140] }
 0x24d   :  { %3213 = vmatpush.msrb.mxu3 %v2082_v43  ;;  %3155 = vmatpush.msrb.mxu0 %v1282_v13  ;;  %v1762_v45 = vld [vmem:[#allocation2 + $0x35b0] sm:$0xff]  ;;  %v275_v43 = vld [vmem:[#allocation2 + $0x738] sm:$0xff] }
 0x24e   :  { %3174 = vmatpush.msrb.mxu1 %v1554_v33  ;;  %3195 = vmatpush.msrb.mxu2 %v1794_v34  ;;  %v2034_v31 = vld [vmem:[#allocation2 + $0x3e30] sm:$0xff]  ;;  %v547_v13 = vld [vmem:[#allocation2 + $0xfb8] sm:$0xff] }
 0x24f   :  { %3214 = vmatpush.msrb.mxu3 %v2066_v1  ;;  %3156 = vmatpush.msrb.mxu0 %v1266_v63  ;;  %v1234_v41 = vld [vmem:[#allocation2 + $0x2530] sm:$0xff]  ;;  %v787_v33 = vld [vmem:[#allocation2 + $0x1738] sm:$0xff]  ;;  %v5072_v1 = vld.sshfl [vmem:[#allocation1 + $0x8] sm:$0xff pattern:$0x73625140] }
 0x250   :  { %3175 = vmatpush.msrb.mxu1 %v1538_v22  ;;  %3196 = vmatpush.msrb.mxu2 %v1778_v4  ;;  %v1506_v46 = vld [vmem:[#allocation2 + $0x2db0] sm:$0xff]  ;;  %v1059_v34 = vld [vmem:[#allocation2 + $0x1fb8] sm:$0xff] }
 0x251   :  { %3215 = vmatpush.msrb.mxu3 %v2050_v7  ;;  %3157 = vmatpush.msrb.mxu0 %v1250_v36  ;;  %v1746_v10 = vld [vmem:[#allocation2 + $0x3530] sm:$0xff]  ;;  %v259_v63 = vld [vmem:[#allocation2 + $0x6b8] sm:$0xff] }
 0x252   :  { %3176 = vmatpush.msrb.mxu1 %v1522_v38  ;;  %v2018_v37 = vld [vmem:[#allocation2 + $0x3db0] sm:$0xff]  ;;  %3197 = vmatpush.msrb.mxu2 %v1762_v45  ;;  %v531_v22 = vld [vmem:[#allocation2 + $0xf38] sm:$0xff] }
 0x253   :  { %3216 = vmatpush.msrb.mxu3 %v2034_v31  ;;  %v1218_v42 = vld [vmem:[#allocation2 + $0x24b0] sm:$0xff]  ;;  %3158 = vmatpush.msrb.mxu0 %v1234_v41  ;;  %v771_v4 = vld [vmem:[#allocation2 + $0x16b8] sm:$0xff]  ;;  %v5075_v41 = vld.sshfl [vmem:[#allocation1 + $0x30] sm:$0xff pattern:$0x73625140] }
 0x254   :  { %v1490_v48 = vld [vmem:[#allocation2 + $0x2d30] sm:$0xff]  ;;  %3177 = vmatpush.msrb.mxu1 %v1506_v46  ;;  %3198 = vmatpush.msrb.mxu2 %v1746_v10  ;;  %v1043_v7 = vld [vmem:[#allocation2 + $0x1f38] sm:$0xff] }
 0x255   :  { %v1730_v50 = vld [vmem:[#allocation2 + $0x34b0] sm:$0xff]  ;;  %3217 = vmatpush.msrb.mxu3 %v2018_v37  ;;  %3159 = vmatpush.msrb.mxu0 %v1218_v42  ;;  %v243_v36 = vld [vmem:[#allocation2 + $0x638] sm:$0xff] }
 0x256   :  { %v2002_v40 = vld [vmem:[#allocation2 + $0x3d30] sm:$0xff]  ;;  %3178 = vmatpush.msrb.mxu1 %v1490_v48  ;;  %3199 = vmatpush.msrb.mxu2 %v1730_v50  ;;  %v515_v38 = vld [vmem:[#allocation2 + $0xeb8] sm:$0xff] }
 0x257   :  { %v1202_v51 = vld [vmem:[#allocation2 + $0x2430] sm:$0xff]  ;;  %3218 = vmatpush.msrb.mxu3 %v2002_v40  ;;  %3129 = vmatmul.f32.vlgmr.msra.gmra.mxu2 %v5063_v21  ;;  %v755_v45 = vld [vmem:[#allocation2 + $0x1638] sm:$0xff] }
 0x258   :  { %v1474_v53 = vld [vmem:[#allocation2 + $0x2cb0] sm:$0xff]  ;;  %3160 = vmatpush.msrb.mxu0 %v1202_v51  ;;  %3109 = vmatmul.f32.vlgmr.msra.gmra.mxu1 %v5072_v1  ;;  %v1027_v31 = vld [vmem:[#allocation2 + $0x1eb8] sm:$0xff] }
 0x259   :  { %v1714_v60 = vld [vmem:[#allocation2 + $0x3430] sm:$0xff]  ;;  %3179 = vmatpush.msrb.mxu1 %v1474_v53  ;;  %3089 = vmatmul.f32.vlgmr.msra.gmra.mxu0 %v5066_v16  ;;  %v227_v46 = vld [vmem:[#allocation2 + $0x5b8] sm:$0xff] }
 0x25a   :  { %v1986_v52 = vld [vmem:[#allocation2 + $0x3cb0] sm:$0xff]  ;;  %3200 = vmatpush.msrb.mxu2 %v1714_v60  ;;  %v499_v10 = vld [vmem:[#allocation2 + $0xe38] sm:$0xff] }
 0x25b   :  { %v1186_v24 = vld [vmem:[#allocation2 + $0x23b0] sm:$0xff]  ;;  %3219 = vmatpush.msrb.mxu3 %v1986_v52  ;;  %v739_v37 = vld [vmem:[#allocation2 + $0x15b8] sm:$0xff]  ;;  %v5084_v52 = vld.sshfl [vmem:[#allocation1 + $0x28] sm:$0xff pattern:$0x73625140] }
 0x25c   :  { %v1458_v54 = vld [vmem:[#allocation2 + $0x2c30] sm:$0xff]  ;;  %3161 = vmatpush.msrb.mxu0 %v1186_v24  ;;  %v5078_v42 = vld.sshfl [vmem:[#allocation1 + $0x20] sm:$0xff pattern:$0x73625140] }
 0x25d   :  { %v1698_v58 = vld [vmem:[#allocation2 + $0x33b0] sm:$0xff]  ;;  %3180 = vmatpush.msrb.mxu1 %v1458_v54  ;;  %v1011_v48 = vld [vmem:[#allocation2 + $0x1e38] sm:$0xff] }
 0x25e   :  { %v1970_v59 = vld [vmem:[#allocation2 + $0x3c30] sm:$0xff]  ;;  %3201 = vmatpush.msrb.mxu2 %v1698_v58  ;;  %v211_v40 = vld [vmem:[#allocation2 + $0x538] sm:$0xff] }
 0x25f   :  { %v1170_v55 = vld [vmem:[#allocation2 + $0x2330] sm:$0xff]  ;;  %3220 = vmatpush.msrb.mxu3 %v1970_v59  ;;  %v483_v51 = vld [vmem:[#allocation2 + $0xdb8] sm:$0xff] }
 0x260   :  { %v1442_v56 = vld [vmem:[#allocation2 + $0x2bb0] sm:$0xff]  ;;  %3162 = vmatpush.msrb.mxu0 %v1170_v55  ;;  %v723_v53 = vld [vmem:[#allocation2 + $0x1538] sm:$0xff] }
 0x261   :  { %v1682_v61 = vld [vmem:[#allocation2 + $0x3330] sm:$0xff]  ;;  %3181 = vmatpush.msrb.mxu1 %v1442_v56  ;;  %v995_v60 = vld [vmem:[#allocation2 + $0x1db8] sm:$0xff] }
 0x262   :  { %v1954_v0 = vld [vmem:[#allocation2 + $0x3bb0] sm:$0xff]  ;;  %3202 = vmatpush.msrb.mxu2 %v1682_v61  ;;  %v195_v24 = vld [vmem:[#allocation2 + $0x4b8] sm:$0xff] }
 0x263   :  { %v1154_v25 = vld [vmem:[#allocation2 + $0x22b0] sm:$0xff]  ;;  %3221 = vmatpush.msrb.mxu3 %v1954_v0  ;;  %v467_v54 = vld [vmem:[#allocation2 + $0xd38] sm:$0xff] }
 0x264   :  { %v1426_v8 = vld [vmem:[#allocation2 + $0x2b30] sm:$0xff]  ;;  %3163 = vmatpush.msrb.mxu0 %v1154_v25  ;;  %v707_v58 = vld [vmem:[#allocation2 + $0x14b8] sm:$0xff] }
 0x265   :  { %v1666_v47 = vld [vmem:[#allocation2 + $0x32b0] sm:$0xff]  ;;  %3182 = vmatpush.msrb.mxu1 %v1426_v8  ;;  %v979_v59 = vld [vmem:[#allocation2 + $0x1d38] sm:$0xff] }
 0x266   :  { %v1938_v29 = vld [vmem:[#allocation2 + $0x3b30] sm:$0xff]  ;;  %3203 = vmatpush.msrb.mxu2 %v1666_v47  ;;  %v179_v55 = vld [vmem:[#allocation2 + $0x438] sm:$0xff] }
 0x267   :  { %v1138_v9 = vld [vmem:[#allocation2 + $0x2230] sm:$0xff]  ;;  %3222 = vmatpush.msrb.mxu3 %v1938_v29  ;;  %v451_v56 = vld [vmem:[#allocation2 + $0xcb8] sm:$0xff] }
 0x268   :  { %v1410_v11 = vld [vmem:[#allocation2 + $0x2ab0] sm:$0xff]  ;;  %3164 = vmatpush.msrb.mxu0 %v1138_v9  ;;  %v691_v61 = vld [vmem:[#allocation2 + $0x1438] sm:$0xff] }
 0x269   :  { %v1650_v39 = vld [vmem:[#allocation2 + $0x3230] sm:$0xff]  ;;  %3183 = vmatpush.msrb.mxu1 %v1410_v11  ;;  %v963_v0 = vld [vmem:[#allocation2 + $0x1cb8] sm:$0xff] }
 0x26a   :  { %v1922_v12 = vld [vmem:[#allocation2 + $0x3ab0] sm:$0xff]  ;;  %3204 = vmatpush.msrb.mxu2 %v1650_v39  ;;  %v163_v25 = vld [vmem:[#allocation2 + $0x3b8] sm:$0xff] }
 0x26b   :  { %v1122_v62 = vld [vmem:[#allocation2 + $0x21b0] sm:$0xff]  ;;  %3223 = vmatpush.msrb.mxu3 %v1922_v12  ;;  %v435_v8 = vld [vmem:[#allocation2 + $0xc38] sm:$0xff] }
 0x26c   :  { %v1394_v14 = vld [vmem:[#allocation2 + $0x2a30] sm:$0xff]  ;;  %3165 = vmatpush.msrb.mxu0 %v1122_v62  ;;  %v675_v47 = vld [vmem:[#allocation2 + $0x13b8] sm:$0xff] }
 0x26d   :  { %v1634_v44 = vld [vmem:[#allocation2 + $0x31b0] sm:$0xff]  ;;  %3184 = vmatpush.msrb.mxu1 %v1394_v14  ;;  %v947_v29 = vld [vmem:[#allocation2 + $0x1c38] sm:$0xff] }
 0x26e   :  { %v1906_v5 = vld [vmem:[#allocation2 + $0x3a30] sm:$0xff]  ;;  %3205 = vmatpush.msrb.mxu2 %v1634_v44  ;;  %v147_v9 = vld [vmem:[#allocation2 + $0x338] sm:$0xff] }
 0x26f   :  { %v1106_v15 = vld [vmem:[#allocation2 + $0x2130] sm:$0xff]  ;;  %3224 = vmatpush.msrb.mxu3 %v1906_v5  ;;  %v419_v11 = vld [vmem:[#allocation2 + $0xbb8] sm:$0xff] }
 0x270   :  { %v1378_v35 = vld [vmem:[#allocation2 + $0x29b0] sm:$0xff]  ;;  %3166 = vmatpush.msrb.mxu0 %v1106_v15  ;;  %v659_v39 = vld [vmem:[#allocation2 + $0x1338] sm:$0xff] }
 0x271   :  { %v1618_v27 = vld [vmem:[#allocation2 + $0x3130] sm:$0xff]  ;;  %3185 = vmatpush.msrb.mxu1 %v1378_v35  ;;  %v931_v12 = vld [vmem:[#allocation2 + $0x1bb8] sm:$0xff] }
 0x272   :  { %v1890_v18 = vld [vmem:[#allocation2 + $0x39b0] sm:$0xff]  ;;  %3206 = vmatpush.msrb.mxu2 %v1618_v27  ;;  %v131_v62 = vld [vmem:[#allocation2 + $0x2b8] sm:$0xff] }
 0x273   :  { %v1090_v6 = vld [vmem:[#allocation2 + $0x20b0] sm:$0xff]  ;;  %3225 = vmatpush.msrb.mxu3 %v1890_v18  ;;  %v403_v14 = vld [vmem:[#allocation2 + $0xb38] sm:$0xff] }
 0x274   :  { %v1362_v49 = vld [vmem:[#allocation2 + $0x2930] sm:$0xff]  ;;  %3167 = vmatpush.msrb.mxu0 %v1090_v6  ;;  %v643_v44 = vld [vmem:[#allocation2 + $0x12b8] sm:$0xff] }
 0x275   :  { %v1602_v19 = vld [vmem:[#allocation2 + $0x30b0] sm:$0xff]  ;;  %3186 = vmatpush.msrb.mxu1 %v1362_v49  ;;  %v915_v5 = vld [vmem:[#allocation2 + $0x1b38] sm:$0xff] }
 0x276   :  { %v1874_v2 = vld [vmem:[#allocation2 + $0x3930] sm:$0xff]  ;;  %3207 = vmatpush.msrb.mxu2 %v1602_v19  ;;  %v115_v15 = vld [vmem:[#allocation2 + $0x238] sm:$0xff] }
 0x277   :  { %v1074_v20 = vld [vmem:[#allocation2 + $0x2030] sm:$0xff]  ;;  %3226 = vmatpush.msrb.mxu3 %v1874_v2  ;;  %v387_v35 = vld [vmem:[#allocation2 + $0xab8] sm:$0xff] }
 0x278   :  { %v1346_v23 = vld [vmem:[#allocation2 + $0x28b0] sm:$0xff]  ;;  %3168 = vmatpush.msrb.mxu0 %v1074_v20  ;;  %v627_v27 = vld [vmem:[#allocation2 + $0x1238] sm:$0xff] }
 0x279   :  { %v1586_v3 = vld [vmem:[#allocation2 + $0x3030] sm:$0xff]  ;;  %3187 = vmatpush.msrb.mxu1 %v1346_v23  ;;  %3169 = vmatmul.f32.vlgmr.msrb.gmra.mxu0 %v5078_v42  ;;  %v899_v18 = vld [vmem:[#allocation2 + $0x1ab8] sm:$0xff] }
 0x27a   :  { %v1858_v17 = vld [vmem:[#allocation2 + $0x38b0] sm:$0xff]  ;;  %3208 = vmatpush.msrb.mxu2 %v1586_v3  ;;  %3233 = vmatpush.msra.mxu0 %v291_v26  ;;  %v99_v6 = vld [vmem:[#allocation2 + $0x1b8] sm:$0xff] }
 0x27b   :  { %v1330_v30 = vld [vmem:[#allocation2 + $0x2830] sm:$0xff]  ;;  %3227 = vmatpush.msrb.mxu3 %v1858_v17  ;;  %3209 = vmatmul.f32.vlgmr.msrb.gmra.mxu2 %v5075_v41  ;;  %v371_v49 = vld [vmem:[#allocation2 + $0xa38] sm:$0xff] }
 0x27c   :  { %v1842_v32 = vld [vmem:[#allocation2 + $0x3830] sm:$0xff]  ;;  %3273 = vmatpush.msra.mxu2 %v803_v28  ;;  %3188 = vmatpush.msrb.mxu1 %v1330_v30  ;;  %v611_v19 = vld [vmem:[#allocation2 + $0x11b8] sm:$0xff] }
 0x27d   :  { %v5069_v57 = vld.sshfl [vmem:[#allocation1 + $0x18] sm:$0xff pattern:$0x73625140]  ;;  %3228 = vmatpush.msrb.mxu3 %v1842_v32  ;;  %3234 = vmatpush.msra.mxu0 %v275_v43  ;;  %v883_v2 = vld [vmem:[#allocation2 + $0x1a38] sm:$0xff] }
 0x27e   :  { %3149 = vmatmul.f32.vlgmr.msra.gmra.mxu3 %v5069_v57  ;;  %3253 = vmatpush.msra.mxu1 %v547_v13  ;;  %v5081_v50 = vld.sshfl [vmem:[#allocation1 + $0x38] sm:$0xff pattern:$0x73625140]  ;;  %v83_v20 = vld [vmem:[#allocation2 + $0x138] sm:$0xff] }
 0x27f   :  { %3274 = vmatpush.msra.mxu2 %v787_v33  ;;  %3293 = vmatpush.msra.mxu3 %v1059_v34  ;;  %v355_v23 = vld [vmem:[#allocation2 + $0x9b8] sm:$0xff] }
 0x280   :  { %3235 = vmatpush.msra.mxu0 %v259_v63  ;;  %3254 = vmatpush.msra.mxu1 %v531_v22  ;;  %v595_v3 = vld [vmem:[#allocation2 + $0x1138] sm:$0xff] }
 0x281   :  { %3275 = vmatpush.msra.mxu2 %v771_v4  ;;  %3294 = vmatpush.msra.mxu3 %v1043_v7  ;;  %v867_v17 = vld [vmem:[#allocation2 + $0x19b8] sm:$0xff] }
 0x282   :  { %3236 = vmatpush.msra.mxu0 %v243_v36  ;;  %3255 = vmatpush.msra.mxu1 %v515_v38  ;;  %v67_v26 = vld [vmem:[#allocation2 + $0xb8] sm:$0xff] }
 0x283   :  { %3276 = vmatpush.msra.mxu2 %v755_v45  ;;  %3295 = vmatpush.msra.mxu3 %v1027_v31  ;;  %v339_v28 = vld [vmem:[#allocation2 + $0x938] sm:$0xff] }
 0x284   :  { %3237 = vmatpush.msra.mxu0 %v227_v46  ;;  %3256 = vmatpush.msra.mxu1 %v499_v10  ;;  %v579_v30 = vld [vmem:[#allocation2 + $0x10b8] sm:$0xff] }
 0x285   :  { %3277 = vmatpush.msra.mxu2 %v739_v37  ;;  %3296 = vmatpush.msra.mxu3 %v1011_v48  ;;  %v851_v32 = vld [vmem:[#allocation2 + $0x1938] sm:$0xff] }
 0x286   :  { %3229 = vmatmul.f32.vlgmr.msrb.gmra.mxu3 %v5081_v50  ;;  %3189 = vmatmul.f32.vlgmr.msrb.gmra.mxu1 %v5084_v52  ;;  %v51_v43 = vld [vmem:[#allocation2 + $0x38] sm:$0xff] }
 0x287   :  { %3238 = vmatpush.msra.mxu0 %v211_v40  ;;  %3257 = vmatpush.msra.mxu1 %v483_v51  ;;  %v323_v13 = vld [vmem:[#allocation2 + $0x8b8] sm:$0xff] }
 0x288   :  { %3278 = vmatpush.msra.mxu2 %v723_v53  ;;  %3297 = vmatpush.msra.mxu3 %v995_v60  ;;  %v563_v33 = vld [vmem:[#allocation2 + $0x1038] sm:$0xff] }
 0x289   :  { %3239 = vmatpush.msra.mxu0 %v195_v24  ;;  %3258 = vmatpush.msra.mxu1 %v467_v54  ;;  %v835_v34 = vld [vmem:[#allocation2 + $0x18b8] sm:$0xff] }
 0x28a   :  { %3279 = vmatpush.msra.mxu2 %v707_v58  ;;  %3298 = vmatpush.msra.mxu3 %v979_v59  ;;  %v1315_v63 = vld [vmem:[#allocation2 + $0x27b8] sm:$0xff] }
 0x28b   :  { %3240 = vmatpush.msra.mxu0 %v179_v55  ;;  %3259 = vmatpush.msra.mxu1 %v451_v56  ;;  %v1827_v22 = vld [vmem:[#allocation2 + $0x37b8] sm:$0xff] }
 0x28c   :  { %3280 = vmatpush.msra.mxu2 %v691_v61  ;;  %3299 = vmatpush.msra.mxu3 %v963_v0  ;;  %v307_v4 = vld [vmem:[#allocation2 + $0x838] sm:$0xff] }
 0x28d   :  { %3241 = vmatpush.msra.mxu0 %v163_v25  ;;  %3260 = vmatpush.msra.mxu1 %v435_v8  ;;  %v819_v7 = vld [vmem:[#allocation2 + $0x1838] sm:$0xff] }
 0x28e   :  { %3281 = vmatpush.msra.mxu2 %v675_v47  ;;  %3300 = vmatpush.msra.mxu3 %v947_v29  ;;  %v1299_v36 = vld [vmem:[#allocation2 + $0x2738] sm:$0xff] }
 0x28f   :  { %3242 = vmatpush.msra.mxu0 %v147_v9  ;;  %3261 = vmatpush.msra.mxu1 %v419_v11  ;;  %v1571_v38 = vld [vmem:[#allocation2 + $0x2fb8] sm:$0xff] }
 0x290   :  { %3282 = vmatpush.msra.mxu2 %v659_v39  ;;  %3301 = vmatpush.msra.mxu3 %v931_v12  ;;  %v1811_v45 = vld [vmem:[#allocation2 + $0x3738] sm:$0xff] }
 0x291   :  { %3243 = vmatpush.msra.mxu0 %v131_v62  ;;  %3262 = vmatpush.msra.mxu1 %v403_v14  ;;  %v2083_v31 = vld [vmem:[#allocation2 + $0x3fb8] sm:$0xff] }
 0x292   :  { %3283 = vmatpush.msra.mxu2 %v643_v44  ;;  %3302 = vmatpush.msra.mxu3 %v915_v5  ;;  %v1283_v46 = vld [vmem:[#allocation2 + $0x26b8] sm:$0xff] }
 0x293   :  { %3244 = vmatpush.msra.mxu0 %v115_v15  ;;  %3263 = vmatpush.msra.mxu1 %v387_v35  ;;  %v1555_v10 = vld [vmem:[#allocation2 + $0x2f38] sm:$0xff] }
 0x294   :  { %3284 = vmatpush.msra.mxu2 %v627_v27  ;;  %3303 = vmatpush.msra.mxu3 %v899_v18  ;;  %v1795_v37 = vld [vmem:[#allocation2 + $0x36b8] sm:$0xff] }
 0x295   :  { %3245 = vmatpush.msra.mxu0 %v99_v6  ;;  %3264 = vmatpush.msra.mxu1 %v371_v49  ;;  %v2067_v48 = vld [vmem:[#allocation2 + $0x3f38] sm:$0xff] }
 0x296   :  { %3285 = vmatpush.msra.mxu2 %v611_v19  ;;  %3304 = vmatpush.msra.mxu3 %v883_v2  ;;  %v1267_v40 = vld [vmem:[#allocation2 + $0x2638] sm:$0xff] }
 0x297   :  { %3246 = vmatpush.msra.mxu0 %v83_v20  ;;  %3265 = vmatpush.msra.mxu1 %v355_v23  ;;  %v1539_v51 = vld [vmem:[#allocation2 + $0x2eb8] sm:$0xff] }
 0x298   :  { %3286 = vmatpush.msra.mxu2 %v595_v3  ;;  %3305 = vmatpush.msra.mxu3 %v867_v17  ;;  %v1779_v53 = vld [vmem:[#allocation2 + $0x3638] sm:$0xff] }
 0x299   :  { %3247 = vmatpush.msra.mxu0 %v67_v26  ;;  %3266 = vmatpush.msra.mxu1 %v339_v28  ;;  %v2051_v60 = vld [vmem:[#allocation2 + $0x3eb8] sm:$0xff] }
 0x29a   :  { %3287 = vmatpush.msra.mxu2 %v579_v30  ;;  %3306 = vmatpush.msra.mxu3 %v851_v32  ;;  %v1251_v24 = vld [vmem:[#allocation2 + $0x25b8] sm:$0xff] }
 0x29b   :  { %3248 = vmatpush.msra.mxu0 %v51_v43  ;;  %3267 = vmatpush.msra.mxu1 %v323_v13  ;;  %v1523_v54 = vld [vmem:[#allocation2 + $0x2e38] sm:$0xff] }
 0x29c   :  { %3288 = vmatpush.msra.mxu2 %v563_v33  ;;  %3307 = vmatpush.msra.mxu3 %v835_v34  ;;  %v1763_v58 = vld [vmem:[#allocation2 + $0x35b8] sm:$0xff] }
 0x29d   :  { %3313 = vmatpush.msrb.mxu0 %v1315_v63  ;;  %3268 = vmatpush.msra.mxu1 %v307_v4  ;;  %v2035_v59 = vld [vmem:[#allocation2 + $0x3e38] sm:$0xff] }
 0x29e   :  { %3353 = vmatpush.msrb.mxu2 %v1827_v22  ;;  %3308 = vmatpush.msra.mxu3 %v819_v7  ;;  %v1235_v55 = vld [vmem:[#allocation2 + $0x2538] sm:$0xff] }
 0x29f   :  { %3314 = vmatpush.msrb.mxu0 %v1299_v36  ;;  %3333 = vmatpush.msrb.mxu1 %v1571_v38  ;;  %v1507_v56 = vld [vmem:[#allocation2 + $0x2db8] sm:$0xff] }
 0x2a0   :  { %3354 = vmatpush.msrb.mxu2 %v1811_v45  ;;  %3373 = vmatpush.msrb.mxu3 %v2083_v31  ;;  %v1747_v61 = vld [vmem:[#allocation2 + $0x3538] sm:$0xff] }
 0x2a1   :  { %3315 = vmatpush.msrb.mxu0 %v1283_v46  ;;  %3334 = vmatpush.msrb.mxu1 %v1555_v10  ;;  %v2019_v0 = vld [vmem:[#allocation2 + $0x3db8] sm:$0xff]  ;;  %v548_v10 = vld [vmem:[#allocation2 + $0xfc0] sm:$0xff] }
 0x2a2   :  { %3355 = vmatpush.msrb.mxu2 %v1795_v37  ;;  %3374 = vmatpush.msrb.mxu3 %v2067_v48  ;;  %v1219_v25 = vld [vmem:[#allocation2 + $0x24b8] sm:$0xff]  ;;  %v788_v37 = vld [vmem:[#allocation2 + $0x1740] sm:$0xff] }
 0x2a3   :  { %3316 = vmatpush.msrb.mxu0 %v1267_v40  ;;  %3335 = vmatpush.msrb.mxu1 %v1539_v51  ;;  %v1491_v8 = vld [vmem:[#allocation2 + $0x2d38] sm:$0xff]  ;;  %v1060_v48 = vld [vmem:[#allocation2 + $0x1fc0] sm:$0xff] }
 0x2a4   :  { %3356 = vmatpush.msrb.mxu2 %v1779_v53  ;;  %3375 = vmatpush.msrb.mxu3 %v2051_v60  ;;  %v1731_v47 = vld [vmem:[#allocation2 + $0x34b8] sm:$0xff]  ;;  %v260_v40 = vld [vmem:[#allocation2 + $0x6c0] sm:$0xff] }
 0x2a5   :  { %3317 = vmatpush.msrb.mxu0 %v1251_v24  ;;  %3336 = vmatpush.msrb.mxu1 %v1523_v54  ;;  %v2003_v29 = vld [vmem:[#allocation2 + $0x3d38] sm:$0xff]  ;;  %v532_v51 = vld [vmem:[#allocation2 + $0xf40] sm:$0xff] }
 0x2a6   :  { %3357 = vmatpush.msrb.mxu2 %v1763_v58  ;;  %3376 = vmatpush.msrb.mxu3 %v2035_v59  ;;  %v1203_v9 = vld [vmem:[#allocation2 + $0x2438] sm:$0xff]  ;;  %v772_v53 = vld [vmem:[#allocation2 + $0x16c0] sm:$0xff] }
 0x2a7   :  { %3318 = vmatpush.msrb.mxu0 %v1235_v55  ;;  %3337 = vmatpush.msrb.mxu1 %v1507_v56  ;;  %v1475_v11 = vld [vmem:[#allocation2 + $0x2cb8] sm:$0xff]  ;;  %v1044_v60 = vld [vmem:[#allocation2 + $0x1f40] sm:$0xff] }
 0x2a8   :  { %3358 = vmatpush.msrb.mxu2 %v1747_v61  ;;  %3377 = vmatpush.msrb.mxu3 %v2019_v0  ;;  %v1715_v39 = vld [vmem:[#allocation2 + $0x3438] sm:$0xff]  ;;  %v516_v24 = vld [vmem:[#allocation2 + $0xec0] sm:$0xff] }
 0x2a9   :  { %3319 = vmatpush.msrb.mxu0 %v1219_v25  ;;  %3338 = vmatpush.msrb.mxu1 %v1491_v8  ;;  %v1987_v12 = vld [vmem:[#allocation2 + $0x3cb8] sm:$0xff]  ;;  %v756_v54 = vld [vmem:[#allocation2 + $0x1640] sm:$0xff] }
 0x2aa   :  { %3359 = vmatpush.msrb.mxu2 %v1731_v47  ;;  %3378 = vmatpush.msrb.mxu3 %v2003_v29  ;;  %v1187_v62 = vld [vmem:[#allocation2 + $0x23b8] sm:$0xff]  ;;  %v1028_v58 = vld [vmem:[#allocation2 + $0x1ec0] sm:$0xff] }
 0x2ab   :  { %v1459_v14 = vld [vmem:[#allocation2 + $0x2c38] sm:$0xff]  ;;  %3320 = vmatpush.msrb.mxu0 %v1203_v9  ;;  %3339 = vmatpush.msrb.mxu1 %v1475_v11  ;;  %v740_v59 = vld [vmem:[#allocation2 + $0x15c0] sm:$0xff] }
 0x2ac   :  { %v1699_v44 = vld [vmem:[#allocation2 + $0x33b8] sm:$0xff]  ;;  %3360 = vmatpush.msrb.mxu2 %v1715_v39  ;;  %3379 = vmatpush.msrb.mxu3 %v1987_v12  ;;  %v1012_v55 = vld [vmem:[#allocation2 + $0x1e40] sm:$0xff] }
 0x2ad   :  { %v1971_v5 = vld [vmem:[#allocation2 + $0x3c38] sm:$0xff]  ;;  %3321 = vmatpush.msrb.mxu0 %v1187_v62  ;;  %3340 = vmatpush.msrb.mxu1 %v1459_v14  ;;  %v212_v56 = vld [vmem:[#allocation2 + $0x540] sm:$0xff] }
 0x2ae   :  { %v1171_v15 = vld [vmem:[#allocation2 + $0x2338] sm:$0xff]  ;;  %3361 = vmatpush.msrb.mxu2 %v1699_v44  ;;  %3380 = vmatpush.msrb.mxu3 %v1971_v5  ;;  %v484_v61 = vld [vmem:[#allocation2 + $0xdc0] sm:$0xff] }
 0x2af   :  { %v1443_v35 = vld [vmem:[#allocation2 + $0x2bb8] sm:$0xff]  ;;  %3322 = vmatpush.msrb.mxu0 %v1171_v15  ;;  %3289 = vmatmul.f32.vlgmr.msra.gmra.mxu2 %v5063_v21  ;;  %v996_v0 = vld [vmem:[#allocation2 + $0x1dc0] sm:$0xff] }
 0x2b0   :  { %v1683_v27 = vld [vmem:[#allocation2 + $0x3338] sm:$0xff]  ;;  %3341 = vmatpush.msrb.mxu1 %v1443_v35  ;;  %3249 = vmatmul.f32.vlgmr.msra.gmra.mxu0 %v5066_v16  ;;  %v292_v16 = vld [vmem:[#allocation2 + $0x7c0] sm:$0xff] }
 0x2b1   :  { %v1955_v18 = vld [vmem:[#allocation2 + $0x3bb8] sm:$0xff]  ;;  %3362 = vmatpush.msrb.mxu2 %v1683_v27  ;;  %3309 = vmatmul.f32.vlgmr.msra.gmra.mxu3 %v5069_v57  ;;  %v804_v57 = vld [vmem:[#allocation2 + $0x17c0] sm:$0xff] }
 0x2b2   :  { %v1155_v6 = vld [vmem:[#allocation2 + $0x22b8] sm:$0xff]  ;;  %3381 = vmatpush.msrb.mxu3 %v1955_v18  ;;  %3269 = vmatmul.f32.vlgmr.msra.gmra.mxu1 %v5072_v1  ;;  %v276_v1 = vld [vmem:[#allocation2 + $0x740] sm:$0xff] }
 0x2b3   :  { %v1427_v49 = vld [vmem:[#allocation2 + $0x2b38] sm:$0xff]  ;;  %3323 = vmatpush.msrb.mxu0 %v1155_v6  ;;  %v196_v25 = vld [vmem:[#allocation2 + $0x4c0] sm:$0xff] }
 0x2b4   :  { %v1667_v19 = vld [vmem:[#allocation2 + $0x32b8] sm:$0xff]  ;;  %3342 = vmatpush.msrb.mxu1 %v1427_v49  ;;  %v468_v8 = vld [vmem:[#allocation2 + $0xd40] sm:$0xff] }
 0x2b5   :  { %v1939_v2 = vld [vmem:[#allocation2 + $0x3b38] sm:$0xff]  ;;  %3363 = vmatpush.msrb.mxu2 %v1667_v19  ;;  %v708_v47 = vld [vmem:[#allocation2 + $0x14c0] sm:$0xff] }
 0x2b6   :  { %v1139_v20 = vld [vmem:[#allocation2 + $0x2238] sm:$0xff]  ;;  %3382 = vmatpush.msrb.mxu3 %v1939_v2  ;;  %v980_v29 = vld [vmem:[#allocation2 + $0x1d40] sm:$0xff] }
 0x2b7   :  { %v1411_v23 = vld [vmem:[#allocation2 + $0x2ab8] sm:$0xff]  ;;  %3324 = vmatpush.msrb.mxu0 %v1139_v20  ;;  %v180_v9 = vld [vmem:[#allocation2 + $0x440] sm:$0xff] }
 0x2b8   :  { %v1651_v3 = vld [vmem:[#allocation2 + $0x3238] sm:$0xff]  ;;  %3343 = vmatpush.msrb.mxu1 %v1411_v23  ;;  %v452_v11 = vld [vmem:[#allocation2 + $0xcc0] sm:$0xff] }
 0x2b9   :  { %v1923_v17 = vld [vmem:[#allocation2 + $0x3ab8] sm:$0xff]  ;;  %3364 = vmatpush.msrb.mxu2 %v1651_v3  ;;  %v692_v39 = vld [vmem:[#allocation2 + $0x1440] sm:$0xff] }
 0x2ba   :  { %v1123_v26 = vld [vmem:[#allocation2 + $0x21b8] sm:$0xff]  ;;  %3383 = vmatpush.msrb.mxu3 %v1923_v17  ;;  %v964_v12 = vld [vmem:[#allocation2 + $0x1cc0] sm:$0xff] }
 0x2bb   :  { %v1395_v28 = vld [vmem:[#allocation2 + $0x2a38] sm:$0xff]  ;;  %3325 = vmatpush.msrb.mxu0 %v1123_v26  ;;  %v164_v62 = vld [vmem:[#allocation2 + $0x3c0] sm:$0xff] }
 0x2bc   :  { %v1635_v30 = vld [vmem:[#allocation2 + $0x31b8] sm:$0xff]  ;;  %3344 = vmatpush.msrb.mxu1 %v1395_v28  ;;  %v436_v14 = vld [vmem:[#allocation2 + $0xc40] sm:$0xff] }
 0x2bd   :  { %v1907_v32 = vld [vmem:[#allocation2 + $0x3a38] sm:$0xff]  ;;  %3365 = vmatpush.msrb.mxu2 %v1635_v30  ;;  %v676_v44 = vld [vmem:[#allocation2 + $0x13c0] sm:$0xff] }
 0x2be   :  { %v1107_v43 = vld [vmem:[#allocation2 + $0x2138] sm:$0xff]  ;;  %3384 = vmatpush.msrb.mxu3 %v1907_v32  ;;  %v948_v5 = vld [vmem:[#allocation2 + $0x1c40] sm:$0xff] }
 0x2bf   :  { %v1379_v13 = vld [vmem:[#allocation2 + $0x29b8] sm:$0xff]  ;;  %3326 = vmatpush.msrb.mxu0 %v1107_v43  ;;  %v148_v15 = vld [vmem:[#allocation2 + $0x340] sm:$0xff] }
 0x2c0   :  { %v1619_v33 = vld [vmem:[#allocation2 + $0x3138] sm:$0xff]  ;;  %3345 = vmatpush.msrb.mxu1 %v1379_v13  ;;  %v420_v35 = vld [vmem:[#allocation2 + $0xbc0] sm:$0xff] }
 0x2c1   :  { %v1891_v34 = vld [vmem:[#allocation2 + $0x39b8] sm:$0xff]  ;;  %3366 = vmatpush.msrb.mxu2 %v1619_v33  ;;  %v660_v27 = vld [vmem:[#allocation2 + $0x1340] sm:$0xff] }
 0x2c2   :  { %v1091_v63 = vld [vmem:[#allocation2 + $0x20b8] sm:$0xff]  ;;  %3385 = vmatpush.msrb.mxu3 %v1891_v34  ;;  %v932_v18 = vld [vmem:[#allocation2 + $0x1bc0] sm:$0xff] }
 0x2c3   :  { %v1363_v22 = vld [vmem:[#allocation2 + $0x2938] sm:$0xff]  ;;  %3327 = vmatpush.msrb.mxu0 %v1091_v63  ;;  %v132_v6 = vld [vmem:[#allocation2 + $0x2c0] sm:$0xff] }
 0x2c4   :  { %v1603_v4 = vld [vmem:[#allocation2 + $0x30b8] sm:$0xff]  ;;  %3346 = vmatpush.msrb.mxu1 %v1363_v22  ;;  %v404_v49 = vld [vmem:[#allocation2 + $0xb40] sm:$0xff] }
 0x2c5   :  { %v1875_v7 = vld [vmem:[#allocation2 + $0x3938] sm:$0xff]  ;;  %3367 = vmatpush.msrb.mxu2 %v1603_v4  ;;  %v644_v19 = vld [vmem:[#allocation2 + $0x12c0] sm:$0xff] }
 0x2c6   :  { %v1075_v21 = vld [vmem:[#allocation2 + $0x2038] sm:$0xff]  ;;  %3386 = vmatpush.msrb.mxu3 %v1875_v7  ;;  %v916_v2 = vld [vmem:[#allocation2 + $0x1b40] sm:$0xff] }
 0x2c7   :  { %v1347_v36 = vld [vmem:[#allocation2 + $0x28b8] sm:$0xff]  ;;  %3328 = vmatpush.msrb.mxu0 %v1075_v21  ;;  %v116_v20 = vld [vmem:[#allocation2 + $0x240] sm:$0xff] }
 0x2c8   :  { %v1587_v38 = vld [vmem:[#allocation2 + $0x3038] sm:$0xff]  ;;  %3347 = vmatpush.msrb.mxu1 %v1347_v36  ;;  %3329 = vmatmul.f32.vlgmr.msrb.gmra.mxu0 %v5078_v42  ;;  %v228_v42 = vld [vmem:[#allocation2 + $0x5c0] sm:$0xff] }
 0x2c9   :  { %v1859_v45 = vld [vmem:[#allocation2 + $0x38b8] sm:$0xff]  ;;  %3368 = vmatpush.msrb.mxu2 %v1587_v38  ;;  %3393 = vmatpush.msra.mxu0 %v292_v16  ;;  %v388_v23 = vld [vmem:[#allocation2 + $0xac0] sm:$0xff] }
 0x2ca   :  { %v1331_v31 = vld [vmem:[#allocation2 + $0x2838] sm:$0xff]  ;;  %3387 = vmatpush.msrb.mxu3 %v1859_v45  ;;  %3369 = vmatmul.f32.vlgmr.msrb.gmra.mxu2 %v5075_v41  ;;  %v244_v41 = vld [vmem:[#allocation2 + $0x640] sm:$0xff] }
 0x2cb   :  { %v1843_v46 = vld [vmem:[#allocation2 + $0x3838] sm:$0xff]  ;;  %3433 = vmatpush.msra.mxu2 %v804_v57  ;;  %3348 = vmatpush.msrb.mxu1 %v1331_v31  ;;  %v628_v3 = vld [vmem:[#allocation2 + $0x1240] sm:$0xff] }
 0x2cc   :  { %3388 = vmatpush.msrb.mxu3 %v1843_v46  ;;  %3394 = vmatpush.msra.mxu0 %v276_v1  ;;  %v900_v17 = vld [vmem:[#allocation2 + $0x1ac0] sm:$0xff] }
 0x2cd   :  { %3389 = vmatmul.f32.vlgmr.msrb.gmra.mxu3 %v5081_v50  ;;  %3413 = vmatpush.msra.mxu1 %v548_v10  ;;  %v500_v50 = vld [vmem:[#allocation2 + $0xe40] sm:$0xff] }
 0x2ce   :  { %3434 = vmatpush.msra.mxu2 %v788_v37  ;;  %3453 = vmatpush.msra.mxu3 %v1060_v48  ;;  %v100_v26 = vld [vmem:[#allocation2 + $0x1c0] sm:$0xff] }
 0x2cf   :  { %3349 = vmatmul.f32.vlgmr.msrb.gmra.mxu1 %v5084_v52  ;;  %3395 = vmatpush.msra.mxu0 %v260_v40  ;;  %v724_v52 = vld [vmem:[#allocation2 + $0x1540] sm:$0xff] }
 0x2d0   :  { %3414 = vmatpush.msra.mxu1 %v532_v51  ;;  %3435 = vmatpush.msra.mxu2 %v772_v53  ;;  %v372_v28 = vld [vmem:[#allocation2 + $0xa40] sm:$0xff] }
 0x2d1   :  { %3454 = vmatpush.msra.mxu3 %v1044_v60  ;;  %3396 = vmatpush.msra.mxu0 %v244_v41  ;;  %v612_v30 = vld [vmem:[#allocation2 + $0x11c0] sm:$0xff] }
 0x2d2   :  { %3415 = vmatpush.msra.mxu1 %v516_v24  ;;  %3436 = vmatpush.msra.mxu2 %v756_v54  ;;  %v884_v32 = vld [vmem:[#allocation2 + $0x1a40] sm:$0xff] }
 0x2d3   :  { %3455 = vmatpush.msra.mxu3 %v1028_v58  ;;  %3397 = vmatpush.msra.mxu0 %v228_v42  ;;  %v84_v43 = vld [vmem:[#allocation2 + $0x140] sm:$0xff] }
 0x2d4   :  { %3416 = vmatpush.msra.mxu1 %v500_v50  ;;  %3437 = vmatpush.msra.mxu2 %v740_v59  ;;  %v356_v13 = vld [vmem:[#allocation2 + $0x9c0] sm:$0xff] }
 0x2d5   :  { %3456 = vmatpush.msra.mxu3 %v1012_v55  ;;  %3398 = vmatpush.msra.mxu0 %v212_v56  ;;  %v596_v33 = vld [vmem:[#allocation2 + $0x1140] sm:$0xff] }
 0x2d6   :  { %3417 = vmatpush.msra.mxu1 %v484_v61  ;;  %3438 = vmatpush.msra.mxu2 %v724_v52  ;;  %v868_v34 = vld [vmem:[#allocation2 + $0x19c0] sm:$0xff] }
 0x2d7   :  { %3457 = vmatpush.msra.mxu3 %v996_v0  ;;  %3399 = vmatpush.msra.mxu0 %v196_v25  ;;  %v68_v63 = vld [vmem:[#allocation2 + $0xc0] sm:$0xff] }
 0x2d8   :  { %3418 = vmatpush.msra.mxu1 %v468_v8  ;;  %3439 = vmatpush.msra.mxu2 %v708_v47  ;;  %v340_v22 = vld [vmem:[#allocation2 + $0x940] sm:$0xff] }
 0x2d9   :  { %3458 = vmatpush.msra.mxu3 %v980_v29  ;;  %3400 = vmatpush.msra.mxu0 %v180_v9  ;;  %v580_v4 = vld [vmem:[#allocation2 + $0x10c0] sm:$0xff] }
 0x2da   :  { %3419 = vmatpush.msra.mxu1 %v452_v11  ;;  %3440 = vmatpush.msra.mxu2 %v692_v39  ;;  %v852_v7 = vld [vmem:[#allocation2 + $0x1940] sm:$0xff] }
 0x2db   :  { %3459 = vmatpush.msra.mxu3 %v964_v12  ;;  %3401 = vmatpush.msra.mxu0 %v164_v62  ;;  %v52_v21 = vld [vmem:[#allocation2 + $0x40] sm:$0xff] }
 0x2dc   :  { %3420 = vmatpush.msra.mxu1 %v436_v14  ;;  %3441 = vmatpush.msra.mxu2 %v676_v44  ;;  %v324_v36 = vld [vmem:[#allocation2 + $0x8c0] sm:$0xff] }
 0x2dd   :  { %3460 = vmatpush.msra.mxu3 %v948_v5  ;;  %3402 = vmatpush.msra.mxu0 %v148_v15  ;;  %v564_v38 = vld [vmem:[#allocation2 + $0x1040] sm:$0xff] }
 0x2de   :  { %3421 = vmatpush.msra.mxu1 %v420_v35  ;;  %3442 = vmatpush.msra.mxu2 %v660_v27  ;;  %v836_v45 = vld [vmem:[#allocation2 + $0x18c0] sm:$0xff] }
 0x2df   :  { %3461 = vmatpush.msra.mxu3 %v932_v18  ;;  %3403 = vmatpush.msra.mxu0 %v132_v6  ;;  %v1316_v16 = vld [vmem:[#allocation2 + $0x27c0] sm:$0xff] }
 0x2e0   :  { %3422 = vmatpush.msra.mxu1 %v404_v49  ;;  %3443 = vmatpush.msra.mxu2 %v644_v19  ;;  %v1828_v57 = vld [vmem:[#allocation2 + $0x37c0] sm:$0xff] }
 0x2e1   :  { %3462 = vmatpush.msra.mxu3 %v916_v2  ;;  %3404 = vmatpush.msra.mxu0 %v116_v20  ;;  %v308_v31 = vld [vmem:[#allocation2 + $0x840] sm:$0xff] }
 0x2e2   :  { %3423 = vmatpush.msra.mxu1 %v388_v23  ;;  %3444 = vmatpush.msra.mxu2 %v628_v3  ;;  %v820_v46 = vld [vmem:[#allocation2 + $0x1840] sm:$0xff] }
 0x2e3   :  { %3463 = vmatpush.msra.mxu3 %v900_v17  ;;  %3405 = vmatpush.msra.mxu0 %v100_v26  ;;  %v1300_v1 = vld [vmem:[#allocation2 + $0x2740] sm:$0xff] }
 0x2e4   :  { %3424 = vmatpush.msra.mxu1 %v372_v28  ;;  %3445 = vmatpush.msra.mxu2 %v612_v30  ;;  %v1572_v10 = vld [vmem:[#allocation2 + $0x2fc0] sm:$0xff] }
 0x2e5   :  { %3464 = vmatpush.msra.mxu3 %v884_v32  ;;  %3406 = vmatpush.msra.mxu0 %v84_v43  ;;  %v1812_v37 = vld [vmem:[#allocation2 + $0x3740] sm:$0xff] }
 0x2e6   :  { %3425 = vmatpush.msra.mxu1 %v356_v13  ;;  %3446 = vmatpush.msra.mxu2 %v596_v33  ;;  %v2084_v48 = vld [vmem:[#allocation2 + $0x3fc0] sm:$0xff] }
 0x2e7   :  { %3465 = vmatpush.msra.mxu3 %v868_v34  ;;  %3407 = vmatpush.msra.mxu0 %v68_v63  ;;  %v1284_v40 = vld [vmem:[#allocation2 + $0x26c0] sm:$0xff] }
 0x2e8   :  { %3426 = vmatpush.msra.mxu1 %v340_v22  ;;  %3447 = vmatpush.msra.mxu2 %v580_v4  ;;  %v1556_v51 = vld [vmem:[#allocation2 + $0x2f40] sm:$0xff] }
 0x2e9   :  { %3466 = vmatpush.msra.mxu3 %v852_v7  ;;  %3408 = vmatpush.msra.mxu0 %v52_v21  ;;  %v1796_v53 = vld [vmem:[#allocation2 + $0x36c0] sm:$0xff] }
 0x2ea   :  { %3427 = vmatpush.msra.mxu1 %v324_v36  ;;  %3448 = vmatpush.msra.mxu2 %v564_v38  ;;  %v2068_v60 = vld [vmem:[#allocation2 + $0x3f40] sm:$0xff] }
 0x2eb   :  { %3467 = vmatpush.msra.mxu3 %v836_v45  ;;  %3473 = vmatpush.msrb.mxu0 %v1316_v16  ;;  %v1268_v41 = vld [vmem:[#allocation2 + $0x2640] sm:$0xff]  ;;  %v5095_v45 = vpop.f32.mrf.mxu0 }
 0x2ec   :  { %3513 = vmatpush.msrb.mxu2 %v1828_v57  ;;  %3428 = vmatpush.msra.mxu1 %v308_v31  ;;  %v1540_v24 = vld [vmem:[#allocation2 + $0x2ec0] sm:$0xff]  ;;  %v5097_v57 = vld.sshfl [vmem:[#allocation1 + $0x10] sm:$0xff pattern:$0x73625140] }
 0x2ed   :  { %3468 = vmatpush.msra.mxu3 %v820_v46  ;;  %3474 = vmatpush.msrb.mxu0 %v1300_v1  ;;  %v1780_v54 = vld [vmem:[#allocation2 + $0x3640] sm:$0xff]  ;;  %v293_v31 = vld [vmem:[#allocation2 + $0x7c8] sm:$0xff] }
 0x2ee   :  { %3493 = vmatpush.msrb.mxu1 %v1572_v10  ;;  %3514 = vmatpush.msrb.mxu2 %v1812_v37  ;;  %v2052_v58 = vld [vmem:[#allocation2 + $0x3ec0] sm:$0xff]  ;;  %v805_v46 = vld [vmem:[#allocation2 + $0x17c8] sm:$0xff]  ;;  %v5100_v10 = vpop.f32.mrf.mxu1  ;;  %v5102_v37 = vld.sshfl [vmem:[#allocation1] sm:$0xff pattern:$0x73625140] }
 0x2ef   :  { %3533 = vmatpush.msrb.mxu3 %v2084_v48  ;;  %3475 = vmatpush.msrb.mxu0 %v1284_v40  ;;  %v1252_v42 = vld [vmem:[#allocation2 + $0x25c0] sm:$0xff]  ;;  %v5105_v40 = vpop.f32.mrf.mxu2 }
 0x2f0   :  { %3494 = vmatpush.msrb.mxu1 %v1556_v51  ;;  %3515 = vmatpush.msrb.mxu2 %v1796_v53  ;;  %v1524_v50 = vld [vmem:[#allocation2 + $0x2e40] sm:$0xff]  ;;  %v5107_v51 = vld.sshfl [vmem:[#allocation1 + $0x18] sm:$0xff pattern:$0x73625140]  ;;  %v277_v53 = vld [vmem:[#allocation2 + $0x748] sm:$0xff] }
 0x2f1   :  { %3534 = vmatpush.msrb.mxu3 %v2068_v60  ;;  %3476 = vmatpush.msrb.mxu0 %v1268_v41  ;;  %v1764_v59 = vld [vmem:[#allocation2 + $0x35c0] sm:$0xff]  ;;  %v549_v60 = vld [vmem:[#allocation2 + $0xfc8] sm:$0xff] }
 0x2f2   :  { %3495 = vmatpush.msrb.mxu1 %v1540_v24  ;;  %v2036_v55 = vld [vmem:[#allocation2 + $0x3e40] sm:$0xff]  ;;  %3516 = vmatpush.msrb.mxu2 %v1780_v54  ;;  %v789_v41 = vld [vmem:[#allocation2 + $0x1748] sm:$0xff] }
 0x2f3   :  { %3535 = vmatpush.msrb.mxu3 %v2052_v58  ;;  %v1236_v56 = vld [vmem:[#allocation2 + $0x2540] sm:$0xff]  ;;  %3477 = vmatpush.msrb.mxu0 %v1252_v42  ;;  %v1061_v24 = vld [vmem:[#allocation2 + $0x1fc8] sm:$0xff] }
 0x2f4   :  { %v1508_v61 = vld [vmem:[#allocation2 + $0x2dc0] sm:$0xff]  ;;  %3496 = vmatpush.msrb.mxu1 %v1524_v50  ;;  %3517 = vmatpush.msrb.mxu2 %v1764_v59  ;;  %v261_v58 = vld [vmem:[#allocation2 + $0x6c8] sm:$0xff]  ;;  %v5113_v50 = vpop.f32.mrf.mxu3 }
 0x2f5   :  { %v1748_v52 = vld [vmem:[#allocation2 + $0x3540] sm:$0xff]  ;;  %3536 = vmatpush.msrb.mxu3 %v2036_v55  ;;  %3478 = vmatpush.msrb.mxu0 %v1236_v56  ;;  %v533_v42 = vld [vmem:[#allocation2 + $0xf48] sm:$0xff] }
 0x2f6   :  { %v2020_v0 = vld [vmem:[#allocation2 + $0x3dc0] sm:$0xff]  ;;  %3497 = vmatpush.msrb.mxu1 %v1508_v61  ;;  %3518 = vmatpush.msrb.mxu2 %v1748_v52  ;;  %v773_v59 = vld [vmem:[#allocation2 + $0x16c8] sm:$0xff] }
 0x2f7   :  { %v1220_v25 = vld [vmem:[#allocation2 + $0x24c0] sm:$0xff]  ;;  %3537 = vmatpush.msrb.mxu3 %v2020_v0  ;;  %3449 = vmatmul.f32.vlgmr.msra.gmra.mxu2 %v5097_v57  ;;  %v1045_v55 = vld [vmem:[#allocation2 + $0x1f48] sm:$0xff]  ;;  %v5115_v0 = vpop.f32.mrf.mxu0 }
 0x2f8   :  { %v1492_v8 = vld [vmem:[#allocation2 + $0x2d40] sm:$0xff]  ;;  %3479 = vmatpush.msrb.mxu0 %v1220_v25  ;;  %3469 = vmatmul.f32.vlgmr.msra.gmra.mxu3 %v5107_v51  ;;  %v245_v56 = vld [vmem:[#allocation2 + $0x648] sm:$0xff] }
 0x2f9   :  { %v1732_v47 = vld [vmem:[#allocation2 + $0x34c0] sm:$0xff]  ;;  %3498 = vmatpush.msrb.mxu1 %v1492_v8  ;;  %3409 = vmatmul.f32.vlgmr.msra.gmra.mxu0 %v5102_v37  ;;  %v517_v61 = vld [vmem:[#allocation2 + $0xec8] sm:$0xff] }
 0x2fa   :  { %v2004_v29 = vld [vmem:[#allocation2 + $0x3d40] sm:$0xff]  ;;  %3519 = vmatpush.msrb.mxu2 %v1732_v47  ;;  %v757_v52 = vld [vmem:[#allocation2 + $0x1648] sm:$0xff] }
 0x2fb   :  { %v1204_v9 = vld [vmem:[#allocation2 + $0x2440] sm:$0xff]  ;;  %3538 = vmatpush.msrb.mxu3 %v2004_v29  ;;  %v1029_v25 = vld [vmem:[#allocation2 + $0x1ec8] sm:$0xff] }
 0x2fc   :  { %v1476_v11 = vld [vmem:[#allocation2 + $0x2cc0] sm:$0xff]  ;;  %3480 = vmatpush.msrb.mxu0 %v1204_v9  ;;  %v5117_v8 = vld.sshfl [vmem:[#allocation1 + $0x30] sm:$0xff pattern:$0x73625140] }
 0x2fd   :  { %v1716_v39 = vld [vmem:[#allocation2 + $0x3440] sm:$0xff]  ;;  %3499 = vmatpush.msrb.mxu1 %v1476_v11  ;;  %v229_v47 = vld [vmem:[#allocation2 + $0x5c8] sm:$0xff]  ;;  %v5120_v11 = vpop.f32.mrf.mxu1 }
 0x2fe   :  { %v1988_v12 = vld [vmem:[#allocation2 + $0x3cc0] sm:$0xff]  ;;  %3520 = vmatpush.msrb.mxu2 %v1716_v39  ;;  %v501_v29 = vld [vmem:[#allocation2 + $0xe48] sm:$0xff]  ;;  %v5122_v39 = vld.sshfl [vmem:[#allocation1 + $0x20] sm:$0xff pattern:$0x73625140] }
 0x2ff   :  { %v1188_v62 = vld [vmem:[#allocation2 + $0x23c0] sm:$0xff]  ;;  %3539 = vmatpush.msrb.mxu3 %v1988_v12  ;;  %v741_v9 = vld [vmem:[#allocation2 + $0x15c8] sm:$0xff] }
 0x300   :  { %v1460_v14 = vld [vmem:[#allocation2 + $0x2c40] sm:$0xff]  ;;  %3481 = vmatpush.msrb.mxu0 %v1188_v62  ;;  %v1013_v12 = vld [vmem:[#allocation2 + $0x1e48] sm:$0xff]  ;;  %v5125_v62 = vpop.f32.mrf.mxu2 }
 0x301   :  { %v1700_v44 = vld [vmem:[#allocation2 + $0x33c0] sm:$0xff]  ;;  %3500 = vmatpush.msrb.mxu1 %v1460_v14  ;;  %v5127_v14 = vld.sshfl [vmem:[#allocation1 + $0x38] sm:$0xff pattern:$0x73625140] }
 0x302   :  { %v1972_v5 = vld [vmem:[#allocation2 + $0x3c40] sm:$0xff]  ;;  %3521 = vmatpush.msrb.mxu2 %v1700_v44  ;;  %v213_v44 = vld [vmem:[#allocation2 + $0x548] sm:$0xff] }
 0x303   :  { %v1172_v15 = vld [vmem:[#allocation2 + $0x2340] sm:$0xff]  ;;  %3540 = vmatpush.msrb.mxu3 %v1972_v5  ;;  %v485_v5 = vld [vmem:[#allocation2 + $0xdc8] sm:$0xff] }
 0x304   :  { %v1444_v35 = vld [vmem:[#allocation2 + $0x2bc0] sm:$0xff]  ;;  %3482 = vmatpush.msrb.mxu0 %v1172_v15  ;;  %v725_v15 = vld [vmem:[#allocation2 + $0x1548] sm:$0xff] }
 0x305   :  { %v1684_v27 = vld [vmem:[#allocation2 + $0x3340] sm:$0xff]  ;;  %3501 = vmatpush.msrb.mxu1 %v1444_v35  ;;  %v997_v35 = vld [vmem:[#allocation2 + $0x1dc8] sm:$0xff] }
 0x306   :  { %v1956_v18 = vld [vmem:[#allocation2 + $0x3bc0] sm:$0xff]  ;;  %3522 = vmatpush.msrb.mxu2 %v1684_v27 }
 0x307   :  { %v1156_v6 = vld [vmem:[#allocation2 + $0x22c0] sm:$0xff]  ;;  %3541 = vmatpush.msrb.mxu3 %v1956_v18  ;;  %v197_v18 = vld [vmem:[#allocation2 + $0x4c8] sm:$0xff] }
 0x308   :  { %v1428_v49 = vld [vmem:[#allocation2 + $0x2b40] sm:$0xff]  ;;  %3483 = vmatpush.msrb.mxu0 %v1156_v6  ;;  %v469_v6 = vld [vmem:[#allocation2 + $0xd48] sm:$0xff] }
 0x309   :  { %v1668_v19 = vld [vmem:[#allocation2 + $0x32c0] sm:$0xff]  ;;  %3502 = vmatpush.msrb.mxu1 %v1428_v49  ;;  %v5133_v49 = vpop.f32.mrf.mxu3 }
 0x30a   :  { %v1940_v2 = vld [vmem:[#allocation2 + $0x3b40] sm:$0xff]  ;;  %3523 = vmatpush.msrb.mxu2 %v1668_v19  ;;  %v709_v19 = vld [vmem:[#allocation2 + $0x14c8] sm:$0xff] }
 0x30b   :  { %v1140_v20 = vld [vmem:[#allocation2 + $0x2240] sm:$0xff]  ;;  %3542 = vmatpush.msrb.mxu3 %v1940_v2  ;;  %v981_v2 = vld [vmem:[#allocation2 + $0x1d48] sm:$0xff] }
 0x30c   :  { %v1412_v23 = vld [vmem:[#allocation2 + $0x2ac0] sm:$0xff]  ;;  %3484 = vmatpush.msrb.mxu0 %v1140_v20  ;;  %v5135_v20 = vpop.f32.mrf.mxu0 }
 0x30d   :  { %v1652_v3 = vld [vmem:[#allocation2 + $0x3240] sm:$0xff]  ;;  %3503 = vmatpush.msrb.mxu1 %v1412_v23  ;;  %v181_v23 = vld [vmem:[#allocation2 + $0x448] sm:$0xff] }
 0x30e   :  { %v1924_v17 = vld [vmem:[#allocation2 + $0x3ac0] sm:$0xff]  ;;  %3524 = vmatpush.msrb.mxu2 %v1652_v3  ;;  %v453_v3 = vld [vmem:[#allocation2 + $0xcc8] sm:$0xff] }
 0x30f   :  { %v1124_v26 = vld [vmem:[#allocation2 + $0x21c0] sm:$0xff]  ;;  %3543 = vmatpush.msrb.mxu3 %v1924_v17  ;;  %v693_v17 = vld [vmem:[#allocation2 + $0x1448] sm:$0xff] }
 0x310   :  { %v1396_v28 = vld [vmem:[#allocation2 + $0x2a40] sm:$0xff]  ;;  %3485 = vmatpush.msrb.mxu0 %v1124_v26  ;;  %v965_v26 = vld [vmem:[#allocation2 + $0x1cc8] sm:$0xff] }
 0x311   :  { %v1636_v30 = vld [vmem:[#allocation2 + $0x31c0] sm:$0xff]  ;;  %3504 = vmatpush.msrb.mxu1 %v1396_v28  ;;  %v165_v28 = vld [vmem:[#allocation2 + $0x3c8] sm:$0xff] }
 0x312   :  { %v1908_v32 = vld [vmem:[#allocation2 + $0x3a40] sm:$0xff]  ;;  %3525 = vmatpush.msrb.mxu2 %v1636_v30  ;;  %v437_v30 = vld [vmem:[#allocation2 + $0xc48] sm:$0xff] }
 0x313   :  { %v1108_v43 = vld [vmem:[#allocation2 + $0x2140] sm:$0xff]  ;;  %3544 = vmatpush.msrb.mxu3 %v1908_v32  ;;  %v5137_v32 = vpop.f32.mrf.mxu1 }
 0x314   :  { %v1380_v13 = vld [vmem:[#allocation2 + $0x29c0] sm:$0xff]  ;;  %3486 = vmatpush.msrb.mxu0 %v1108_v43  ;;  %v677_v43 = vld [vmem:[#allocation2 + $0x13c8] sm:$0xff] }
 0x315   :  { %v1620_v33 = vld [vmem:[#allocation2 + $0x3140] sm:$0xff]  ;;  %3505 = vmatpush.msrb.mxu1 %v1380_v13  ;;  %v949_v13 = vld [vmem:[#allocation2 + $0x1c48] sm:$0xff] }
 0x316   :  { %v1892_v34 = vld [vmem:[#allocation2 + $0x39c0] sm:$0xff]  ;;  %3526 = vmatpush.msrb.mxu2 %v1620_v33  ;;  %v5139_v33 = vpop.f32.mrf.mxu2 }
 0x317   :  { %v1092_v63 = vld [vmem:[#allocation2 + $0x20c0] sm:$0xff]  ;;  %3545 = vmatpush.msrb.mxu3 %v1892_v34  ;;  %v149_v34 = vld [vmem:[#allocation2 + $0x348] sm:$0xff] }
 0x318   :  { %v1364_v22 = vld [vmem:[#allocation2 + $0x2940] sm:$0xff]  ;;  %3487 = vmatpush.msrb.mxu0 %v1092_v63  ;;  %v421_v63 = vld [vmem:[#allocation2 + $0xbc8] sm:$0xff] }
 0x319   :  { %v1604_v4 = vld [vmem:[#allocation2 + $0x30c0] sm:$0xff]  ;;  %3506 = vmatpush.msrb.mxu1 %v1364_v22  ;;  %v661_v22 = vld [vmem:[#allocation2 + $0x1348] sm:$0xff] }
 0x31a   :  { %v1876_v7 = vld [vmem:[#allocation2 + $0x3940] sm:$0xff]  ;;  %3527 = vmatpush.msrb.mxu2 %v1604_v4  ;;  %v933_v4 = vld [vmem:[#allocation2 + $0x1bc8] sm:$0xff] }
 0x31b   :  { %v1076_v21 = vld [vmem:[#allocation2 + $0x2040] sm:$0xff]  ;;  %3546 = vmatpush.msrb.mxu3 %v1876_v7  ;;  %v133_v7 = vld [vmem:[#allocation2 + $0x2c8] sm:$0xff] }
 0x31c   :  { %v1348_v36 = vld [vmem:[#allocation2 + $0x28c0] sm:$0xff]  ;;  %3488 = vmatpush.msrb.mxu0 %v1076_v21  ;;  %v405_v21 = vld [vmem:[#allocation2 + $0xb48] sm:$0xff] }
 0x31d   :  { %v1588_v38 = vld [vmem:[#allocation2 + $0x3040] sm:$0xff]  ;;  %3507 = vmatpush.msrb.mxu1 %v1348_v36  ;;  %3489 = vmatmul.f32.vlgmr.msrb.gmra.mxu0 %v5122_v39  ;;  %v5141_v36 = vpop.f32.mrf.mxu3 }
 0x31e   :  { %v1860_v16 = vld [vmem:[#allocation2 + $0x38c0] sm:$0xff]  ;;  %3528 = vmatpush.msrb.mxu2 %v1588_v38  ;;  %3553 = vmatpush.msra.mxu0 %v293_v31  ;;  %v645_v38 = vld [vmem:[#allocation2 + $0x12c8] sm:$0xff] }
 0x31f   :  { %v1332_v1 = vld [vmem:[#allocation2 + $0x2840] sm:$0xff]  ;;  %3547 = vmatpush.msrb.mxu3 %v1860_v16  ;;  %3529 = vmatmul.f32.vlgmr.msrb.gmra.mxu2 %v5117_v8  ;;  %v917_v16 = vld [vmem:[#allocation2 + $0x1b48] sm:$0xff] }
 0x320   :  { %v1844_v48 = vld [vmem:[#allocation2 + $0x3840] sm:$0xff]  ;;  %3593 = vmatpush.msra.mxu2 %v805_v46  ;;  %3508 = vmatpush.msrb.mxu1 %v1332_v1  ;;  %v117_v31 = vld [vmem:[#allocation2 + $0x248] sm:$0xff] }
 0x321   :  { %3548 = vmatpush.msrb.mxu3 %v1844_v48  ;;  %v5110_v54 = vld.sshfl [vmem:[#allocation1 + $0x8] sm:$0xff pattern:$0x73625140]  ;;  %3554 = vmatpush.msra.mxu0 %v277_v53  ;;  %v389_v46 = vld [vmem:[#allocation2 + $0xac8] sm:$0xff]  ;;  %v5143_v53 = vpop.f32.mrf.mxu0 }
 0x322   :  { %3429 = vmatmul.f32.vlgmr.msra.gmra.mxu1 %v5110_v54  ;;  %3594 = vmatpush.msra.mxu2 %v789_v41  ;;  %v5130_v27 = vld.sshfl [vmem:[#allocation1 + $0x28] sm:$0xff pattern:$0x73625140]  ;;  %v629_v1 = vld [vmem:[#allocation2 + $0x1248] sm:$0xff] }
 0x323   :  { %3573 = vmatpush.msra.mxu1 %v549_v60  ;;  %3613 = vmatpush.msra.mxu3 %v1061_v24  ;;  %v901_v48 = vld [vmem:[#allocation2 + $0x1ac8] sm:$0xff] }
 0x324   :  { %3555 = vmatpush.msra.mxu0 %v261_v58  ;;  %3595 = vmatpush.msra.mxu2 %v773_v59  ;;  %v101_v60 = vld [vmem:[#allocation2 + $0x1c8] sm:$0xff] }
 0x325   :  { %3574 = vmatpush.msra.mxu1 %v533_v42  ;;  %3614 = vmatpush.msra.mxu3 %v1045_v55  ;;  %v373_v41 = vld [vmem:[#allocation2 + $0xa48] sm:$0xff]  ;;  %v5145_v55 = vpop.f32.mrf.mxu1 }
 0x326   :  { %3556 = vmatpush.msra.mxu0 %v245_v56  ;;  %3596 = vmatpush.msra.mxu2 %v757_v52  ;;  %v613_v24 = vld [vmem:[#allocation2 + $0x11c8] sm:$0xff]  ;;  %v5147_v52 = vpop.f32.mrf.mxu2 }
 0x327   :  { %3575 = vmatpush.msra.mxu1 %v517_v61  ;;  %3615 = vmatpush.msra.mxu3 %v1029_v25  ;;  %v885_v58 = vld [vmem:[#allocation2 + $0x1a48] sm:$0xff] }
 0x328   :  { %3549 = vmatmul.f32.vlgmr.msrb.gmra.mxu3 %v5127_v14  ;;  %3557 = vmatpush.msra.mxu0 %v229_v47  ;;  %v85_v42 = vld [vmem:[#allocation2 + $0x148] sm:$0xff] }
 0x329   :  { %3576 = vmatpush.msra.mxu1 %v501_v29  ;;  %3597 = vmatpush.msra.mxu2 %v741_v9  ;;  %v357_v59 = vld [vmem:[#allocation2 + $0x9c8] sm:$0xff] }
 0x32a   :  { %3616 = vmatpush.msra.mxu3 %v1013_v12  ;;  %3509 = vmatmul.f32.vlgmr.msrb.gmra.mxu1 %v5130_v27  ;;  %v597_v56 = vld [vmem:[#allocation2 + $0x1148] sm:$0xff] }
 0x32b   :  { %3558 = vmatpush.msra.mxu0 %v213_v44  ;;  %3577 = vmatpush.msra.mxu1 %v485_v5  ;;  %v869_v61 = vld [vmem:[#allocation2 + $0x19c8] sm:$0xff]  ;;  %v5149_v5 = vpop.f32.mrf.mxu3 }
 0x32c   :  { %3598 = vmatpush.msra.mxu2 %v725_v15  ;;  %3617 = vmatpush.msra.mxu3 %v997_v35  ;;  %v69_v25 = vld [vmem:[#allocation2 + $0xc8] sm:$0xff] }
 0x32d   :  { %3559 = vmatpush.msra.mxu0 %v197_v18  ;;  %3578 = vmatpush.msra.mxu1 %v469_v6  ;;  %v341_v47 = vld [vmem:[#allocation2 + $0x948] sm:$0xff]  ;;  %v3090_v18 = vpop.f32.mrf.mxu0 }
 0x32e   :  { %3599 = vmatpush.msra.mxu2 %v709_v19  ;;  %3618 = vmatpush.msra.mxu3 %v981_v2  ;;  %v581_v29 = vld [vmem:[#allocation2 + $0x10c8] sm:$0xff] }
 0x32f   :  { %3560 = vmatpush.msra.mxu0 %v181_v23  ;;  %3579 = vmatpush.msra.mxu1 %v453_v3  ;;  %v853_v9 = vld [vmem:[#allocation2 + $0x1948] sm:$0xff] }
 0x330   :  { %3600 = vmatpush.msra.mxu2 %v693_v17  ;;  %3619 = vmatpush.msra.mxu3 %v965_v26  ;;  %v53_v12 = vld [vmem:[#allocation2 + $0x48] sm:$0xff]  ;;  %v3110_v26 = vpop.f32.mrf.mxu1 }
 0x331   :  { %3561 = vmatpush.msra.mxu0 %v165_v28  ;;  %3580 = vmatpush.msra.mxu1 %v437_v30  ;;  %v325_v44 = vld [vmem:[#allocation2 + $0x8c8] sm:$0xff] }
 0x332   :  { %3601 = vmatpush.msra.mxu2 %v677_v43  ;;  %3620 = vmatpush.msra.mxu3 %v949_v13  ;;  %v565_v15 = vld [vmem:[#allocation2 + $0x1048] sm:$0xff]  ;;  %v3130_v43 = vpop.f32.mrf.mxu2 }
 0x333   :  { %3562 = vmatpush.msra.mxu0 %v149_v34  ;;  %3581 = vmatpush.msra.mxu1 %v421_v63  ;;  %v837_v35 = vld [vmem:[#allocation2 + $0x18c8] sm:$0xff] }
 0x334   :  { %3602 = vmatpush.msra.mxu2 %v661_v22  ;;  %3621 = vmatpush.msra.mxu3 %v933_v4  ;;  %v1317_v6 = vld [vmem:[#allocation2 + $0x27c8] sm:$0xff] }
 0x335   :  { %3563 = vmatpush.msra.mxu0 %v133_v7  ;;  %3582 = vmatpush.msra.mxu1 %v405_v21  ;;  %v1829_v19 = vld [vmem:[#allocation2 + $0x37c8] sm:$0xff]  ;;  %v3150_v21 = vpop.f32.mrf.mxu3 }
 0x336   :  { %3603 = vmatpush.msra.mxu2 %v645_v38  ;;  %3622 = vmatpush.msra.mxu3 %v917_v16  ;;  %v309_v2 = vld [vmem:[#allocation2 + $0x848] sm:$0xff] }
 0x337   :  { %3564 = vmatpush.msra.mxu0 %v117_v31  ;;  %3583 = vmatpush.msra.mxu1 %v389_v46  ;;  %v821_v23 = vld [vmem:[#allocation2 + $0x1848] sm:$0xff]  ;;  %v2951_v31 = vadd.f32 %v5137_v32, %v5135_v20 }
 0x338   :  { %3604 = vmatpush.msra.mxu2 %v629_v1  ;;  %3623 = vmatpush.msra.mxu3 %v901_v48  ;;  %v1301_v3 = vld [vmem:[#allocation2 + $0x2748] sm:$0xff] }
 0x339   :  { %3565 = vmatpush.msra.mxu0 %v101_v60  ;;  %3584 = vmatpush.msra.mxu1 %v373_v41  ;;  %v1573_v17 = vld [vmem:[#allocation2 + $0x2fc8] sm:$0xff]  ;;  %v3111_v41 = vadd.f32 %v3110_v26, %v3090_v18  ;;  %v2971_v20 = vadd.f32 %v5139_v33, %v2951_v31 }
 0x33a   :  { %3605 = vmatpush.msra.mxu2 %v613_v24  ;;  %3624 = vmatpush.msra.mxu3 %v885_v58  ;;  %v1813_v28 = vld [vmem:[#allocation2 + $0x3748] sm:$0xff]  ;;  %v3170_v24 = vpop.f32.mrf.mxu0 }
 0x33b   :  { %3566 = vmatpush.msra.mxu0 %v85_v42  ;;  %3585 = vmatpush.msra.mxu1 %v357_v59  ;;  %v2085_v30 = vld [vmem:[#allocation2 + $0x3fc8] sm:$0xff] }
 0x33c   :  { %3606 = vmatpush.msra.mxu2 %v597_v56  ;;  %3625 = vmatpush.msra.mxu3 %v869_v61  ;;  %v1285_v13 = vld [vmem:[#allocation2 + $0x26c8] sm:$0xff] }
 0x33d   :  { %3567 = vmatpush.msra.mxu0 %v69_v25  ;;  %3586 = vmatpush.msra.mxu1 %v341_v47  ;;  %v1557_v34 = vld [vmem:[#allocation2 + $0x2f48] sm:$0xff]  ;;  %v5154_v25 = vpop.f32.mrf.mxu1 }
 0x33e   :  { %3607 = vmatpush.msra.mxu2 %v581_v29  ;;  %3626 = vmatpush.msra.mxu3 %v853_v9  ;;  %v1797_v63 = vld [vmem:[#allocation2 + $0x36c8] sm:$0xff]  ;;  %v2791_v9 = vadd.f32 %v5100_v10, %v5095_v45 }
 0x33f   :  { %3568 = vmatpush.msra.mxu0 %v53_v12  ;;  %3587 = vmatpush.msra.mxu1 %v325_v44  ;;  %v2069_v22 = vld [vmem:[#allocation2 + $0x3f48] sm:$0xff]  ;;  %v3131_v12 = vadd.f32 %v3130_v43, %v3111_v41  ;;  %v5158_v44 = vpop.f32.mrf.mxu2 }
 0x340   :  { %3608 = vmatpush.msra.mxu2 %v565_v15  ;;  %3627 = vmatpush.msra.mxu3 %v837_v35  ;;  %v1269_v4 = vld [vmem:[#allocation2 + $0x2648] sm:$0xff] }
 0x341   :  { %3633 = vmatpush.msrb.mxu0 %v1317_v6  ;;  %3588 = vmatpush.msra.mxu1 %v309_v2  ;;  %v1541_v7 = vld [vmem:[#allocation2 + $0x2ec8] sm:$0xff]  ;;  %v2991_v6 = vadd.f32 %v5141_v36, %v2971_v20 }
 0x342   :  { %3673 = vmatpush.msrb.mxu2 %v1829_v19  ;;  %3628 = vmatpush.msra.mxu3 %v821_v23  ;;  %v1781_v38 = vld [vmem:[#allocation2 + $0x3648] sm:$0xff]  ;;  %v5161_v23 = vpop.f32.mrf.mxu3 }
 0x343   :  { %3634 = vmatpush.msrb.mxu0 %v1301_v3  ;;  %3653 = vmatpush.msrb.mxu1 %v1573_v17  ;;  %v2053_v16 = vld [vmem:[#allocation2 + $0x3ec8] sm:$0xff]  ;;  %v2811_v3 = vadd.f32 %v5105_v40, %v2791_v9  ;;  %v3151_v17 = vadd.f32 %v3150_v21, %v3131_v12 }
 0x344   :  { %3674 = vmatpush.msrb.mxu2 %v1813_v28  ;;  %3693 = vmatpush.msrb.mxu3 %v2085_v30  ;;  %v1253_v46 = vld [vmem:[#allocation2 + $0x25c8] sm:$0xff]  ;;  %v3250_v30 = vpop.f32.mrf.mxu0 }
 0x345   :  { %3635 = vmatpush.msrb.mxu0 %v1285_v13  ;;  %3654 = vmatpush.msrb.mxu1 %v1557_v34  ;;  %v1525_v1 = vld [vmem:[#allocation2 + $0x2e48] sm:$0xff]  ;;  %v3011_v13 = vadd.f32 %v5143_v53, %v2991_v6  ;;  %v3171_v21 = vadd.f32 %v3170_v24, %v3151_v17 }
 0x346   :  { %3675 = vmatpush.msrb.mxu2 %v1797_v63  ;;  %3694 = vmatpush.msrb.mxu3 %v2069_v22  ;;  %v1765_v48 = vld [vmem:[#allocation2 + $0x35c8] sm:$0xff] }
 0x347   :  { %3636 = vmatpush.msrb.mxu0 %v1269_v4  ;;  %3655 = vmatpush.msrb.mxu1 %v1541_v7  ;;  %v2037_v60 = vld [vmem:[#allocation2 + $0x3e48] sm:$0xff]  ;;  %v3270_v4 = vpop.f32.mrf.mxu1  ;;  %v2831_v7 = vadd.f32 %v5113_v50, %v2811_v3 }
 0x348   :  { %3676 = vmatpush.msrb.mxu2 %v1781_v38  ;;  %3695 = vmatpush.msrb.mxu3 %v2053_v16  ;;  %v1237_v58 = vld [vmem:[#allocation2 + $0x2548] sm:$0xff]  ;;  %v3271_v31 = vadd.f32 %v3270_v4, %v3250_v30 }
 0x349   :  { %v1509_v42 = vld [vmem:[#allocation2 + $0x2dc8] sm:$0xff]  ;;  %3637 = vmatpush.msrb.mxu0 %v1253_v46  ;;  %3656 = vmatpush.msrb.mxu1 %v1525_v1  ;;  %v3290_v46 = vpop.f32.mrf.mxu2 }
 0x34a   :  { %v1749_v59 = vld [vmem:[#allocation2 + $0x3548] sm:$0xff]  ;;  %3677 = vmatpush.msrb.mxu2 %v1765_v48  ;;  %3696 = vmatpush.msrb.mxu3 %v2037_v60  ;;  %v3031_v48 = vadd.f32 %v5145_v55, %v3011_v13  ;;  %v3291_v41 = vadd.f32 %v3290_v46, %v3271_v31  ;;  %v790_v13 = vld [vmem:[#allocation2 + $0x1750] sm:$0xff] }
 0x34b   :  { %v2021_v56 = vld [vmem:[#allocation2 + $0x3dc8] sm:$0xff]  ;;  %3638 = vmatpush.msrb.mxu0 %v1237_v58  ;;  %3657 = vmatpush.msrb.mxu1 %v1509_v42  ;;  %v3310_v58 = vpop.f32.mrf.mxu3  ;;  %v2851_v42 = vadd.f32 %v5115_v0, %v2831_v7  ;;  %v1046_v7 = vld [vmem:[#allocation2 + $0x1f50] sm:$0xff] }
 0x34c   :  { %v1221_v32 = vld [vmem:[#allocation2 + $0x24c8] sm:$0xff]  ;;  %3678 = vmatpush.msrb.mxu2 %v1749_v59  ;;  %3697 = vmatpush.msrb.mxu3 %v2021_v56  ;;  %v3191_v59 = vadd.f32 %v5154_v25, %v3171_v21  ;;  %v3311_v20 = vadd.f32 %v3310_v58, %v3291_v41  ;;  %v230_v31 = vld [vmem:[#allocation2 + $0x5d0] sm:$0xff] }
 0x34d   :  { %v1493_v61 = vld [vmem:[#allocation2 + $0x2d48] sm:$0xff]  ;;  %3639 = vmatpush.msrb.mxu0 %v1221_v32  ;;  %3609 = vmatmul.f32.vlgmr.msra.gmra.mxu2 %v5097_v57  ;;  %v3051_v32 = vadd.f32 %v5147_v52, %v3031_v48  ;;  %v2871_v9 = vadd.f32 %v5120_v11, %v2851_v42  ;;  %v502_v46 = vld [vmem:[#allocation2 + $0xe50] sm:$0xff] }
 0x34e   :  { %v1733_v47 = vld [vmem:[#allocation2 + $0x34c8] sm:$0xff]  ;;  %3658 = vmatpush.msrb.mxu1 %v1493_v61  ;;  %3569 = vmatmul.f32.vlgmr.msra.gmra.mxu0 %v5102_v37  ;;  %v3211_v12 = vadd.f32 %v5158_v44, %v3191_v59  ;;  %v214_v48 = vld [vmem:[#allocation2 + $0x550] sm:$0xff] }
 0x34f   :  { %v2005_v29 = vld [vmem:[#allocation2 + $0x3d48] sm:$0xff]  ;;  %3679 = vmatpush.msrb.mxu2 %v1733_v47  ;;  %3629 = vmatmul.f32.vlgmr.msra.gmra.mxu3 %v5107_v51  ;;  %v998_v41 = vld [vmem:[#allocation2 + $0x1dd0] sm:$0xff] }
 0x350   :  { %v1205_v15 = vld [vmem:[#allocation2 + $0x2448] sm:$0xff]  ;;  %3698 = vmatpush.msrb.mxu3 %v2005_v29  ;;  %v3330_v29 = vpop.f32.mrf.mxu0  ;;  %3589 = vmatmul.f32.vlgmr.msra.gmra.mxu1 %v5110_v54  ;;  %v710_v58 = vld [vmem:[#allocation2 + $0x14d0] sm:$0xff] }
 0x351   :  { %v1477_v33 = vld [vmem:[#allocation2 + $0x2cc8] sm:$0xff]  ;;  %3640 = vmatpush.msrb.mxu0 %v1205_v15  ;;  %v3331_v25 = vadd.f32 %v3330_v29, %v3311_v20  ;;  %v982_v42 = vld [vmem:[#allocation2 + $0x1d50] sm:$0xff] }
 0x352   :  { %v1717_v35 = vld [vmem:[#allocation2 + $0x3448] sm:$0xff]  ;;  %3659 = vmatpush.msrb.mxu1 %v1477_v33  ;;  %v182_v59 = vld [vmem:[#allocation2 + $0x450] sm:$0xff] }
 0x353   :  { %v1989_v18 = vld [vmem:[#allocation2 + $0x3cc8] sm:$0xff]  ;;  %3680 = vmatpush.msrb.mxu2 %v1717_v35  ;;  %v3350_v35 = vpop.f32.mrf.mxu1  ;;  %v3390_v17 = vpop.f32.mrf.mxu3  ;;  %v694_v20 = vld [vmem:[#allocation2 + $0x1450] sm:$0xff] }
 0x354   :  { %v1189_v19 = vld [vmem:[#allocation2 + $0x23c8] sm:$0xff]  ;;  %3699 = vmatpush.msrb.mxu3 %v1989_v18  ;;  %v3071_v18 = vadd.f32 %v5149_v5, %v3051_v32  ;;  %v3351_v11 = vadd.f32 %v3350_v35, %v3331_v25  ;;  %v806_v5 = vld [vmem:[#allocation2 + $0x17d0] sm:$0xff] }
 0x355   :  { %v1461_v2 = vld [vmem:[#allocation2 + $0x2c48] sm:$0xff]  ;;  %3641 = vmatpush.msrb.mxu0 %v1189_v19  ;;  %v3370_v19 = vpop.f32.mrf.mxu2  ;;  %v166_v32 = vld [vmem:[#allocation2 + $0x3d0] sm:$0xff] }
 0x356   :  { %v1701_v45 = vld [vmem:[#allocation2 + $0x33c8] sm:$0xff]  ;;  %3660 = vmatpush.msrb.mxu1 %v1461_v2  ;;  %v2891_v2 = vadd.f32 %v5125_v62, %v2871_v9  ;;  %v3371_v3 = vadd.f32 %v3370_v19, %v3351_v11  ;;  %v278_v62 = vld [vmem:[#allocation2 + $0x750] sm:$0xff] }
 0x357   :  { %v1973_v10 = vld [vmem:[#allocation2 + $0x3c48] sm:$0xff]  ;;  %3681 = vmatpush.msrb.mxu2 %v1701_v45  ;;  %v3231_v45 = vadd.f32 %v5161_v23, %v3211_v12  ;;  %v950_v29 = vld [vmem:[#allocation2 + $0x1c50] sm:$0xff] }
 0x358   :  { %v1173_v26 = vld [vmem:[#allocation2 + $0x2348] sm:$0xff]  ;;  %3700 = vmatpush.msrb.mxu3 %v1973_v10  ;;  %v294_v10 = vld [vmem:[#allocation2 + $0x7d0] sm:$0xff]  ;;  %v3391_v30 = vadd.f32 %v3390_v17, %v3371_v3  ;;  %v2911_v23 = vadd.f32 %v5133_v49, %v2891_v2 }
 0x359   :  { %v1445_v28 = vld [vmem:[#allocation2 + $0x2bc8] sm:$0xff]  ;;  %3642 = vmatpush.msrb.mxu0 %v1173_v26  ;;  %v4692_v26 = vrot.slane %v3071_v18, 6  ;;  %v774_v49 = vld [vmem:[#allocation2 + $0x16d0] sm:$0xff] }
 0x35a   :  { %v1685_v36 = vld [vmem:[#allocation2 + $0x3348] sm:$0xff]  ;;  %3661 = vmatpush.msrb.mxu1 %v1445_v28  ;;  %v422_v25 = vld [vmem:[#allocation2 + $0xbd0] sm:$0xff] }
 0x35b   :  { %v1957_v43 = vld [vmem:[#allocation2 + $0x3bc8] sm:$0xff]  ;;  %3682 = vmatpush.msrb.mxu2 %v1685_v36  ;;  %v4693_v36 = vrot.slane %v3231_v45, 4  ;;  %v662_v9 = vld [vmem:[#allocation2 + $0x1350] sm:$0xff] }
 0x35c   :  { %v1157_v34 = vld [vmem:[#allocation2 + $0x22c8] sm:$0xff]  ;;  %3701 = vmatpush.msrb.mxu3 %v1957_v43  ;;  %v550_v43 = vld [vmem:[#allocation2 + $0xfd0] sm:$0xff] }
 0x35d   :  { %v1429_v63 = vld [vmem:[#allocation2 + $0x2b48] sm:$0xff]  ;;  %3643 = vmatpush.msrb.mxu0 %v1157_v34  ;;  %v4694_v34 = vrot.slane %v3391_v30, 2  ;;  %v934_v12 = vld [vmem:[#allocation2 + $0x1bd0] sm:$0xff] }
 0x35e   :  { %v1669_v22 = vld [vmem:[#allocation2 + $0x32c8] sm:$0xff]  ;;  %3662 = vmatpush.msrb.mxu1 %v1429_v63  ;;  %v1062_v63 = vld [vmem:[#allocation2 + $0x1fd0] sm:$0xff] }
 0x35f   :  { %v1941_v40 = vld [vmem:[#allocation2 + $0x3b48] sm:$0xff]  ;;  %3683 = vmatpush.msrb.mxu2 %v1669_v22  ;;  %v4707_v22 = vsel %vm4701_vm0, %v2911_v23, %v4692_v26  ;;  %v4708_v4 = vsel %vm4703_vm1, %v4693_v36, %v4694_v34  ;;  %v118_v35 = vld [vmem:[#allocation2 + $0x250] sm:$0xff] }
 0x360   :  { %v1141_v38 = vld [vmem:[#allocation2 + $0x2248] sm:$0xff]  ;;  %3702 = vmatpush.msrb.mxu3 %v1941_v40  ;;  %v534_v40 = vld [vmem:[#allocation2 + $0xf50] sm:$0xff]  ;;  %v4709_v21 = vsel %vm4705_vm2, %v4707_v22, %v4708_v4 }
 0x361   :  { %v1413_v16 = vld [vmem:[#allocation2 + $0x2ac8] sm:$0xff]  ;;  %3644 = vmatpush.msrb.mxu0 %v1141_v38  ;;  %v518_v38 = vld [vmem:[#allocation2 + $0xed0] sm:$0xff]  ;;  %4721 = vst [vmem:[#allocation7 + $0x8] sm:$0xff] %v4709_v21 }
 0x362   :  { %v1653_v53 = vld [vmem:[#allocation2 + $0x3248] sm:$0xff]  ;;  %3663 = vmatpush.msrb.mxu1 %v1413_v16  ;;  %v1030_v16 = vld [vmem:[#allocation2 + $0x1ed0] sm:$0xff] }
 0x363   :  { %v1925_v1 = vld [vmem:[#allocation2 + $0x3ac8] sm:$0xff]  ;;  %3684 = vmatpush.msrb.mxu2 %v1653_v53  ;;  %v742_v53 = vld [vmem:[#allocation2 + $0x15d0] sm:$0xff] }
 0x364   :  { %v1125_v60 = vld [vmem:[#allocation2 + $0x21c8] sm:$0xff]  ;;  %3703 = vmatpush.msrb.mxu3 %v1925_v1  ;;  %v1014_v1 = vld [vmem:[#allocation2 + $0x1e50] sm:$0xff] }
 0x365   :  { %v1397_v50 = vld [vmem:[#allocation2 + $0x2a48] sm:$0xff]  ;;  %3645 = vmatpush.msrb.mxu0 %v1125_v60  ;;  %v486_v60 = vld [vmem:[#allocation2 + $0xdd0] sm:$0xff] }
 0x366   :  { %v1637_v24 = vld [vmem:[#allocation2 + $0x31c8] sm:$0xff]  ;;  %3664 = vmatpush.msrb.mxu1 %v1397_v50  ;;  %v198_v50 = vld [vmem:[#allocation2 + $0x4d0] sm:$0xff] }
 0x367   :  { %v1909_v56 = vld [vmem:[#allocation2 + $0x3a48] sm:$0xff]  ;;  %3685 = vmatpush.msrb.mxu2 %v1637_v24  ;;  %v470_v24 = vld [vmem:[#allocation2 + $0xd50] sm:$0xff] }
 0x368   :  { %v1109_v55 = vld [vmem:[#allocation2 + $0x2148] sm:$0xff]  ;;  %3704 = vmatpush.msrb.mxu3 %v1909_v56  ;;  %v454_v56 = vld [vmem:[#allocation2 + $0xcd0] sm:$0xff] }
 0x369   :  { %v1381_v61 = vld [vmem:[#allocation2 + $0x29c8] sm:$0xff]  ;;  %3646 = vmatpush.msrb.mxu0 %v1109_v55  ;;  %v966_v55 = vld [vmem:[#allocation2 + $0x1cd0] sm:$0xff] }
 0x36a   :  { %v1621_v47 = vld [vmem:[#allocation2 + $0x3148] sm:$0xff]  ;;  %3665 = vmatpush.msrb.mxu1 %v1381_v61  ;;  %v438_v61 = vld [vmem:[#allocation2 + $0xc50] sm:$0xff] }
 0x36b   :  { %v1893_v0 = vld [vmem:[#allocation2 + $0x39c8] sm:$0xff]  ;;  %3686 = vmatpush.msrb.mxu2 %v1621_v47  ;;  %v678_v47 = vld [vmem:[#allocation2 + $0x13d0] sm:$0xff] }
 0x36c   :  { %v1093_v57 = vld [vmem:[#allocation2 + $0x20c8] sm:$0xff]  ;;  %3705 = vmatpush.msrb.mxu3 %v1893_v0  ;;  %v150_v0 = vld [vmem:[#allocation2 + $0x350] sm:$0xff] }
 0x36d   :  { %v1365_v15 = vld [vmem:[#allocation2 + $0x2948] sm:$0xff]  ;;  %3647 = vmatpush.msrb.mxu0 %v1093_v57  ;;  %v134_v57 = vld [vmem:[#allocation2 + $0x2d0] sm:$0xff] }
 0x36e   :  { %v1605_v52 = vld [vmem:[#allocation2 + $0x30c8] sm:$0xff]  ;;  %3666 = vmatpush.msrb.mxu1 %v1365_v15  ;;  %v406_v15 = vld [vmem:[#allocation2 + $0xb50] sm:$0xff] }
 0x36f   :  { %v1877_v33 = vld [vmem:[#allocation2 + $0x3948] sm:$0xff]  ;;  %3687 = vmatpush.msrb.mxu2 %v1605_v52  ;;  %v646_v52 = vld [vmem:[#allocation2 + $0x12d0] sm:$0xff] }
 0x370   :  { %v1077_v37 = vld [vmem:[#allocation2 + $0x2048] sm:$0xff]  ;;  %3706 = vmatpush.msrb.mxu3 %v1877_v33  ;;  %v918_v33 = vld [vmem:[#allocation2 + $0x1b50] sm:$0xff] }
 0x371   :  { %v1349_v6 = vld [vmem:[#allocation2 + $0x28c8] sm:$0xff]  ;;  %3648 = vmatpush.msrb.mxu0 %v1077_v37  ;;  %v390_v18 = vld [vmem:[#allocation2 + $0xad0] sm:$0xff] }
 0x372   :  { %v1589_v51 = vld [vmem:[#allocation2 + $0x3048] sm:$0xff]  ;;  %3667 = vmatpush.msrb.mxu1 %v1349_v6  ;;  %3649 = vmatmul.f32.vlgmr.msrb.gmra.mxu0 %v5122_v39  ;;  %v246_v39 = vld [vmem:[#allocation2 + $0x650] sm:$0xff] }
 0x373   :  { %v1861_v44 = vld [vmem:[#allocation2 + $0x38c8] sm:$0xff]  ;;  %3688 = vmatpush.msrb.mxu2 %v1589_v51  ;;  %3713 = vmatpush.msra.mxu0 %v294_v10  ;;  %v630_v37 = vld [vmem:[#allocation2 + $0x1250] sm:$0xff] }
 0x374   :  { %v1333_v54 = vld [vmem:[#allocation2 + $0x2848] sm:$0xff]  ;;  %3707 = vmatpush.msrb.mxu3 %v1861_v44  ;;  %3689 = vmatmul.f32.vlgmr.msrb.gmra.mxu2 %v5117_v8  ;;  %v262_v8 = vld [vmem:[#allocation2 + $0x6d0] sm:$0xff] }
 0x375   :  { %v1845_v28 = vld [vmem:[#allocation2 + $0x3848] sm:$0xff]  ;;  %3753 = vmatpush.msra.mxu2 %v806_v5  ;;  %3668 = vmatpush.msrb.mxu1 %v1333_v54  ;;  %v902_v6 = vld [vmem:[#allocation2 + $0x1ad0] sm:$0xff] }
 0x376   :  { %3708 = vmatpush.msrb.mxu3 %v1845_v28  ;;  %3714 = vmatpush.msra.mxu0 %v278_v62  ;;  %v102_v11 = vld [vmem:[#allocation2 + $0x1d0] sm:$0xff] }
 0x377   :  { %3709 = vmatmul.f32.vlgmr.msrb.gmra.mxu3 %v5127_v14  ;;  %3733 = vmatpush.msra.mxu1 %v550_v43  ;;  %v758_v14 = vld [vmem:[#allocation2 + $0x1650] sm:$0xff] }
 0x378   :  { %3754 = vmatpush.msra.mxu2 %v790_v13  ;;  %3773 = vmatpush.msra.mxu3 %v1062_v63  ;;  %v374_v19 = vld [vmem:[#allocation2 + $0xa50] sm:$0xff] }
 0x379   :  { %3669 = vmatmul.f32.vlgmr.msrb.gmra.mxu1 %v5130_v27  ;;  %3715 = vmatpush.msra.mxu0 %v262_v8  ;;  %v726_v27 = vld [vmem:[#allocation2 + $0x1550] sm:$0xff] }
 0x37a   :  { %3734 = vmatpush.msra.mxu1 %v534_v40  ;;  %3755 = vmatpush.msra.mxu2 %v774_v49  ;;  %v614_v51 = vld [vmem:[#allocation2 + $0x11d0] sm:$0xff] }
 0x37b   :  { %3774 = vmatpush.msra.mxu3 %v1046_v7  ;;  %3716 = vmatpush.msra.mxu0 %v246_v39  ;;  %v886_v44 = vld [vmem:[#allocation2 + $0x1a50] sm:$0xff] }
 0x37c   :  { %3735 = vmatpush.msra.mxu1 %v518_v38  ;;  %3756 = vmatpush.msra.mxu2 %v758_v14  ;;  %v86_v2 = vld [vmem:[#allocation2 + $0x150] sm:$0xff] }
 0x37d   :  { %3775 = vmatpush.msra.mxu3 %v1030_v16  ;;  %3717 = vmatpush.msra.mxu0 %v230_v31  ;;  %v358_v45 = vld [vmem:[#allocation2 + $0x9d0] sm:$0xff] }
 0x37e   :  { %3736 = vmatpush.msra.mxu1 %v502_v46  ;;  %3757 = vmatpush.msra.mxu2 %v742_v53  ;;  %v598_v10 = vld [vmem:[#allocation2 + $0x1150] sm:$0xff] }
 0x37f   :  { %3776 = vmatpush.msra.mxu3 %v1014_v1  ;;  %3718 = vmatpush.msra.mxu0 %v214_v48  ;;  %v870_v3 = vld [vmem:[#allocation2 + $0x19d0] sm:$0xff] }
 0x380   :  { %3737 = vmatpush.msra.mxu1 %v486_v60  ;;  %3758 = vmatpush.msra.mxu2 %v726_v27  ;;  %v70_v5 = vld [vmem:[#allocation2 + $0xd0] sm:$0xff] }
 0x381   :  { %3777 = vmatpush.msra.mxu3 %v998_v41  ;;  %3719 = vmatpush.msra.mxu0 %v198_v50  ;;  %v342_v54 = vld [vmem:[#allocation2 + $0x950] sm:$0xff] }
 0x382   :  { %3738 = vmatpush.msra.mxu1 %v470_v24  ;;  %3759 = vmatpush.msra.mxu2 %v710_v58  ;;  %v582_v17 = vld [vmem:[#allocation2 + $0x10d0] sm:$0xff] }
 0x383   :  { %3778 = vmatpush.msra.mxu3 %v982_v42  ;;  %3720 = vmatpush.msra.mxu0 %v182_v59  ;;  %v854_v26 = vld [vmem:[#allocation2 + $0x1950] sm:$0xff] }
 0x384   :  { %3739 = vmatpush.msra.mxu1 %v454_v56  ;;  %3760 = vmatpush.msra.mxu2 %v694_v20  ;;  %v54_v28 = vld [vmem:[#allocation2 + $0x50] sm:$0xff] }
 0x385   :  { %3779 = vmatpush.msra.mxu3 %v966_v55  ;;  %3721 = vmatpush.msra.mxu0 %v166_v32  ;;  %v326_v30 = vld [vmem:[#allocation2 + $0x8d0] sm:$0xff] }
 0x386   :  { %3740 = vmatpush.msra.mxu1 %v438_v61  ;;  %3761 = vmatpush.msra.mxu2 %v678_v47  ;;  %v566_v62 = vld [vmem:[#allocation2 + $0x1050] sm:$0xff] }
 0x387   :  { %3780 = vmatpush.msra.mxu3 %v950_v29  ;;  %3722 = vmatpush.msra.mxu0 %v150_v0  ;;  %v838_v23 = vld [vmem:[#allocation2 + $0x18d0] sm:$0xff] }
 0x388   :  { %3741 = vmatpush.msra.mxu1 %v422_v25  ;;  %3762 = vmatpush.msra.mxu2 %v662_v9  ;;  %v1318_v36 = vld [vmem:[#allocation2 + $0x27d0] sm:$0xff] }
 0x389   :  { %3781 = vmatpush.msra.mxu3 %v934_v12  ;;  %3723 = vmatpush.msra.mxu0 %v134_v57  ;;  %v1830_v43 = vld [vmem:[#allocation2 + $0x37d0] sm:$0xff] }
 0x38a   :  { %3742 = vmatpush.msra.mxu1 %v406_v15  ;;  %3763 = vmatpush.msra.mxu2 %v646_v52  ;;  %v310_v13 = vld [vmem:[#allocation2 + $0x850] sm:$0xff] }
 0x38b   :  { %3782 = vmatpush.msra.mxu3 %v918_v33  ;;  %3724 = vmatpush.msra.mxu0 %v118_v35  ;;  %v822_v34 = vld [vmem:[#allocation2 + $0x1850] sm:$0xff] }
 0x38c   :  { %3743 = vmatpush.msra.mxu1 %v390_v18  ;;  %3764 = vmatpush.msra.mxu2 %v630_v37  ;;  %v1302_v63 = vld [vmem:[#allocation2 + $0x2750] sm:$0xff] }
 0x38d   :  { %3783 = vmatpush.msra.mxu3 %v902_v6  ;;  %3725 = vmatpush.msra.mxu0 %v102_v11  ;;  %v1574_v22 = vld [vmem:[#allocation2 + $0x2fd0] sm:$0xff] }
 0x38e   :  { %3744 = vmatpush.msra.mxu1 %v374_v19  ;;  %3765 = vmatpush.msra.mxu2 %v614_v51  ;;  %v1814_v8 = vld [vmem:[#allocation2 + $0x3750] sm:$0xff] }
 0x38f   :  { %3784 = vmatpush.msra.mxu3 %v886_v44  ;;  %3726 = vmatpush.msra.mxu0 %v86_v2  ;;  %v2086_v40 = vld [vmem:[#allocation2 + $0x3fd0] sm:$0xff] }
 0x390   :  { %3745 = vmatpush.msra.mxu1 %v358_v45  ;;  %3766 = vmatpush.msra.mxu2 %v598_v10  ;;  %v1286_v4 = vld [vmem:[#allocation2 + $0x26d0] sm:$0xff] }
 0x391   :  { %3785 = vmatpush.msra.mxu3 %v870_v3  ;;  %3727 = vmatpush.msra.mxu0 %v70_v5  ;;  %v1558_v49 = vld [vmem:[#allocation2 + $0x2f50] sm:$0xff] }
 0x392   :  { %3746 = vmatpush.msra.mxu1 %v342_v54  ;;  %3767 = vmatpush.msra.mxu2 %v582_v17  ;;  %v1798_v7 = vld [vmem:[#allocation2 + $0x36d0] sm:$0xff] }
 0x393   :  { %3786 = vmatpush.msra.mxu3 %v854_v26  ;;  %3728 = vmatpush.msra.mxu0 %v54_v28  ;;  %v2070_v21 = vld [vmem:[#allocation2 + $0x3f50] sm:$0xff] }
 0x394   :  { %3747 = vmatpush.msra.mxu1 %v326_v30  ;;  %3768 = vmatpush.msra.mxu2 %v566_v62  ;;  %v1270_v39 = vld [vmem:[#allocation2 + $0x2650] sm:$0xff] }
 0x395   :  { %3787 = vmatpush.msra.mxu3 %v838_v23  ;;  %3793 = vmatpush.msrb.mxu0 %v1318_v36  ;;  %v1542_v38 = vld [vmem:[#allocation2 + $0x2ed0] sm:$0xff]  ;;  %v5187_v36 = vld.sshfl [vmem:[#allocation1 + $0x10] sm:$0xff pattern:$0x73625140] }
 0x396   :  { %3833 = vmatpush.msrb.mxu2 %v1830_v43  ;;  %3748 = vmatpush.msra.mxu1 %v310_v13  ;;  %v1782_v14 = vld [vmem:[#allocation2 + $0x3650] sm:$0xff]  ;;  %v295_v43 = vld [vmem:[#allocation2 + $0x7d8] sm:$0xff] }
 0x397   :  { %3788 = vmatpush.msra.mxu3 %v822_v34  ;;  %3794 = vmatpush.msrb.mxu0 %v1302_v63  ;;  %v2054_v16 = vld [vmem:[#allocation2 + $0x3ed0] sm:$0xff]  ;;  %v807_v13 = vld [vmem:[#allocation2 + $0x17d8] sm:$0xff] }
 0x398   :  { %3813 = vmatpush.msrb.mxu1 %v1574_v22  ;;  %3834 = vmatpush.msrb.mxu2 %v1814_v8  ;;  %v1254_v31 = vld [vmem:[#allocation2 + $0x25d0] sm:$0xff]  ;;  %v5190_v63 = vld.sshfl [vmem:[#allocation1] sm:$0xff pattern:$0x73625140] }
 0x399   :  { %3853 = vmatpush.msrb.mxu3 %v2086_v40  ;;  %3795 = vmatpush.msrb.mxu0 %v1286_v4  ;;  %v1526_v46 = vld [vmem:[#allocation2 + $0x2e50] sm:$0xff]  ;;  %v279_v40 = vld [vmem:[#allocation2 + $0x758] sm:$0xff] }
 0x39a   :  { %3814 = vmatpush.msrb.mxu1 %v1558_v49  ;;  %3835 = vmatpush.msrb.mxu2 %v1798_v7  ;;  %v1766_v53 = vld [vmem:[#allocation2 + $0x35d0] sm:$0xff]  ;;  %v551_v4 = vld [vmem:[#allocation2 + $0xfd8] sm:$0xff] }
 0x39b   :  { %3854 = vmatpush.msrb.mxu3 %v2070_v21  ;;  %3796 = vmatpush.msrb.mxu0 %v1270_v39  ;;  %v2038_v1 = vld [vmem:[#allocation2 + $0x3e50] sm:$0xff]  ;;  %v791_v49 = vld [vmem:[#allocation2 + $0x1758] sm:$0xff]  ;;  %v5196_v21 = vld.sshfl [vmem:[#allocation1 + $0x8] sm:$0xff pattern:$0x73625140] }
 0x39c   :  { %3815 = vmatpush.msrb.mxu1 %v1542_v38  ;;  %3836 = vmatpush.msrb.mxu2 %v1782_v14  ;;  %v1238_v48 = vld [vmem:[#allocation2 + $0x2550] sm:$0xff]  ;;  %v1063_v7 = vld [vmem:[#allocation2 + $0x1fd8] sm:$0xff] }
 0x39d   :  { %3855 = vmatpush.msrb.mxu3 %v2054_v16  ;;  %v1510_v60 = vld [vmem:[#allocation2 + $0x2dd0] sm:$0xff]  ;;  %3797 = vmatpush.msrb.mxu0 %v1254_v31  ;;  %v263_v39 = vld [vmem:[#allocation2 + $0x6d8] sm:$0xff] }
 0x39e   :  { %3816 = vmatpush.msrb.mxu1 %v1526_v46  ;;  %v1750_v27 = vld [vmem:[#allocation2 + $0x3550] sm:$0xff]  ;;  %3837 = vmatpush.msrb.mxu2 %v1766_v53  ;;  %v535_v38 = vld [vmem:[#allocation2 + $0xf58] sm:$0xff] }
 0x39f   :  { %v2022_v41 = vld [vmem:[#allocation2 + $0x3dd0] sm:$0xff]  ;;  %3856 = vmatpush.msrb.mxu3 %v2038_v1  ;;  %3798 = vmatpush.msrb.mxu0 %v1238_v48  ;;  %v775_v14 = vld [vmem:[#allocation2 + $0x16d8] sm:$0xff]  ;;  %v5199_v48 = vld.sshfl [vmem:[#allocation1 + $0x30] sm:$0xff pattern:$0x73625140] }
 0x3a0   :  { %v1222_v50 = vld [vmem:[#allocation2 + $0x24d0] sm:$0xff]  ;;  %3817 = vmatpush.msrb.mxu1 %v1510_v60  ;;  %3838 = vmatpush.msrb.mxu2 %v1750_v27  ;;  %v1047_v16 = vld [vmem:[#allocation2 + $0x1f58] sm:$0xff] }
 0x3a1   :  { %v1494_v24 = vld [vmem:[#allocation2 + $0x2d50] sm:$0xff]  ;;  %3857 = vmatpush.msrb.mxu3 %v2022_v41  ;;  %3799 = vmatpush.msrb.mxu0 %v1222_v50  ;;  %v247_v31 = vld [vmem:[#allocation2 + $0x658] sm:$0xff] }
 0x3a2   :  { %v1734_v58 = vld [vmem:[#allocation2 + $0x34d0] sm:$0xff]  ;;  %3818 = vmatpush.msrb.mxu1 %v1494_v24  ;;  %3769 = vmatmul.f32.vlgmr.msra.gmra.mxu2 %v5187_v36  ;;  %v519_v46 = vld [vmem:[#allocation2 + $0xed8] sm:$0xff] }
 0x3a3   :  { %v2006_v42 = vld [vmem:[#allocation2 + $0x3d50] sm:$0xff]  ;;  %3839 = vmatpush.msrb.mxu2 %v1734_v58  ;;  %3729 = vmatmul.f32.vlgmr.msra.gmra.mxu0 %v5190_v63  ;;  %v759_v53 = vld [vmem:[#allocation2 + $0x1658] sm:$0xff] }
 0x3a4   :  { %v1206_v59 = vld [vmem:[#allocation2 + $0x2450] sm:$0xff]  ;;  %3858 = vmatpush.msrb.mxu3 %v2006_v42  ;;  %3749 = vmatmul.f32.vlgmr.msra.gmra.mxu1 %v5196_v21  ;;  %v1031_v1 = vld [vmem:[#allocation2 + $0x1ed8] sm:$0xff] }
 0x3a5   :  { %v1478_v56 = vld [vmem:[#allocation2 + $0x2cd0] sm:$0xff]  ;;  %3800 = vmatpush.msrb.mxu0 %v1206_v59  ;;  %v231_v60 = vld [vmem:[#allocation2 + $0x5d8] sm:$0xff] }
 0x3a6   :  { %v1718_v20 = vld [vmem:[#allocation2 + $0x3450] sm:$0xff]  ;;  %3819 = vmatpush.msrb.mxu1 %v1478_v56  ;;  %v503_v27 = vld [vmem:[#allocation2 + $0xe58] sm:$0xff] }
 0x3a7   :  { %v1990_v55 = vld [vmem:[#allocation2 + $0x3cd0] sm:$0xff]  ;;  %3840 = vmatpush.msrb.mxu2 %v1718_v20  ;;  %v743_v41 = vld [vmem:[#allocation2 + $0x15d8] sm:$0xff] }
 0x3a8   :  { %v1190_v32 = vld [vmem:[#allocation2 + $0x23d0] sm:$0xff]  ;;  %3859 = vmatpush.msrb.mxu3 %v1990_v55  ;;  %v5202_v50 = vld.sshfl [vmem:[#allocation1 + $0x20] sm:$0xff pattern:$0x73625140] }
 0x3a9   :  { %v1462_v61 = vld [vmem:[#allocation2 + $0x2c50] sm:$0xff]  ;;  %3801 = vmatpush.msrb.mxu0 %v1190_v32  ;;  %v1015_v24 = vld [vmem:[#allocation2 + $0x1e58] sm:$0xff]  ;;  %v5208_v55 = vld.sshfl [vmem:[#allocation1 + $0x28] sm:$0xff pattern:$0x73625140] }
 0x3aa   :  { %v1702_v47 = vld [vmem:[#allocation2 + $0x33d0] sm:$0xff]  ;;  %3820 = vmatpush.msrb.mxu1 %v1462_v61  ;;  %v215_v42 = vld [vmem:[#allocation2 + $0x558] sm:$0xff] }
 0x3ab   :  { %v1974_v29 = vld [vmem:[#allocation2 + $0x3c50] sm:$0xff]  ;;  %3841 = vmatpush.msrb.mxu2 %v1702_v47  ;;  %v487_v59 = vld [vmem:[#allocation2 + $0xdd8] sm:$0xff] }
 0x3ac   :  { %v1174_v0 = vld [vmem:[#allocation2 + $0x2350] sm:$0xff]  ;;  %3860 = vmatpush.msrb.mxu3 %v1974_v29  ;;  %v727_v56 = vld [vmem:[#allocation2 + $0x1558] sm:$0xff] }
 0x3ad   :  { %v1446_v25 = vld [vmem:[#allocation2 + $0x2bd0] sm:$0xff]  ;;  %3802 = vmatpush.msrb.mxu0 %v1174_v0  ;;  %v999_v20 = vld [vmem:[#allocation2 + $0x1dd8] sm:$0xff] }
 0x3ae   :  { %v1686_v9 = vld [vmem:[#allocation2 + $0x3350] sm:$0xff]  ;;  %3821 = vmatpush.msrb.mxu1 %v1446_v25  ;;  %v199_v32 = vld [vmem:[#allocation2 + $0x4d8] sm:$0xff] }
 0x3af   :  { %v1958_v12 = vld [vmem:[#allocation2 + $0x3bd0] sm:$0xff]  ;;  %3842 = vmatpush.msrb.mxu2 %v1686_v9  ;;  %v471_v61 = vld [vmem:[#allocation2 + $0xd58] sm:$0xff] }
 0x3b0   :  { %v1158_v57 = vld [vmem:[#allocation2 + $0x22d0] sm:$0xff]  ;;  %3861 = vmatpush.msrb.mxu3 %v1958_v12  ;;  %v711_v47 = vld [vmem:[#allocation2 + $0x14d8] sm:$0xff] }
 0x3b1   :  { %v1430_v15 = vld [vmem:[#allocation2 + $0x2b50] sm:$0xff]  ;;  %3803 = vmatpush.msrb.mxu0 %v1158_v57  ;;  %v983_v29 = vld [vmem:[#allocation2 + $0x1d58] sm:$0xff] }
 0x3b2   :  { %v1670_v52 = vld [vmem:[#allocation2 + $0x32d0] sm:$0xff]  ;;  %3822 = vmatpush.msrb.mxu1 %v1430_v15  ;;  %v183_v0 = vld [vmem:[#allocation2 + $0x458] sm:$0xff] }
 0x3b3   :  { %v1942_v33 = vld [vmem:[#allocation2 + $0x3b50] sm:$0xff]  ;;  %3843 = vmatpush.msrb.mxu2 %v1670_v52  ;;  %v455_v25 = vld [vmem:[#allocation2 + $0xcd8] sm:$0xff] }
 0x3b4   :  { %v1142_v35 = vld [vmem:[#allocation2 + $0x2250] sm:$0xff]  ;;  %3862 = vmatpush.msrb.mxu3 %v1942_v33  ;;  %v695_v9 = vld [vmem:[#allocation2 + $0x1458] sm:$0xff] }
 0x3b5   :  { %v1414_v18 = vld [vmem:[#allocation2 + $0x2ad0] sm:$0xff]  ;;  %3804 = vmatpush.msrb.mxu0 %v1142_v35  ;;  %v967_v12 = vld [vmem:[#allocation2 + $0x1cd8] sm:$0xff] }
 0x3b6   :  { %v1654_v37 = vld [vmem:[#allocation2 + $0x3250] sm:$0xff]  ;;  %3823 = vmatpush.msrb.mxu1 %v1414_v18  ;;  %v167_v57 = vld [vmem:[#allocation2 + $0x3d8] sm:$0xff] }
 0x3b7   :  { %v1926_v6 = vld [vmem:[#allocation2 + $0x3ad0] sm:$0xff]  ;;  %3844 = vmatpush.msrb.mxu2 %v1654_v37  ;;  %v439_v15 = vld [vmem:[#allocation2 + $0xc58] sm:$0xff] }
 0x3b8   :  { %v1126_v11 = vld [vmem:[#allocation2 + $0x21d0] sm:$0xff]  ;;  %3863 = vmatpush.msrb.mxu3 %v1926_v6  ;;  %v679_v52 = vld [vmem:[#allocation2 + $0x13d8] sm:$0xff] }
 0x3b9   :  { %v1398_v19 = vld [vmem:[#allocation2 + $0x2a50] sm:$0xff]  ;;  %3805 = vmatpush.msrb.mxu0 %v1126_v11  ;;  %v951_v33 = vld [vmem:[#allocation2 + $0x1c58] sm:$0xff] }
 0x3ba   :  { %v1638_v51 = vld [vmem:[#allocation2 + $0x31d0] sm:$0xff]  ;;  %3824 = vmatpush.msrb.mxu1 %v1398_v19  ;;  %v151_v35 = vld [vmem:[#allocation2 + $0x358] sm:$0xff] }
 0x3bb   :  { %v1910_v44 = vld [vmem:[#allocation2 + $0x3a50] sm:$0xff]  ;;  %3845 = vmatpush.msrb.mxu2 %v1638_v51  ;;  %v423_v18 = vld [vmem:[#allocation2 + $0xbd8] sm:$0xff] }
 0x3bc   :  { %v1110_v2 = vld [vmem:[#allocation2 + $0x2150] sm:$0xff]  ;;  %3864 = vmatpush.msrb.mxu3 %v1910_v44  ;;  %v663_v37 = vld [vmem:[#allocation2 + $0x1358] sm:$0xff] }
 0x3bd   :  { %v1382_v45 = vld [vmem:[#allocation2 + $0x29d0] sm:$0xff]  ;;  %3806 = vmatpush.msrb.mxu0 %v1110_v2  ;;  %v935_v6 = vld [vmem:[#allocation2 + $0x1bd8] sm:$0xff] }
 0x3be   :  { %v1622_v10 = vld [vmem:[#allocation2 + $0x3150] sm:$0xff]  ;;  %3825 = vmatpush.msrb.mxu1 %v1382_v45  ;;  %v135_v11 = vld [vmem:[#allocation2 + $0x2d8] sm:$0xff] }
 0x3bf   :  { %v1894_v3 = vld [vmem:[#allocation2 + $0x39d0] sm:$0xff]  ;;  %3846 = vmatpush.msrb.mxu2 %v1622_v10  ;;  %v407_v19 = vld [vmem:[#allocation2 + $0xb58] sm:$0xff] }
 0x3c0   :  { %v1094_v5 = vld [vmem:[#allocation2 + $0x20d0] sm:$0xff]  ;;  %3865 = vmatpush.msrb.mxu3 %v1894_v3  ;;  %v647_v51 = vld [vmem:[#allocation2 + $0x12d8] sm:$0xff] }
 0x3c1   :  { %v1366_v54 = vld [vmem:[#allocation2 + $0x2950] sm:$0xff]  ;;  %3807 = vmatpush.msrb.mxu0 %v1094_v5  ;;  %v919_v44 = vld [vmem:[#allocation2 + $0x1b58] sm:$0xff] }
 0x3c2   :  { %v1606_v17 = vld [vmem:[#allocation2 + $0x30d0] sm:$0xff]  ;;  %3826 = vmatpush.msrb.mxu1 %v1366_v54  ;;  %v119_v2 = vld [vmem:[#allocation2 + $0x258] sm:$0xff] }
 0x3c3   :  { %v1878_v26 = vld [vmem:[#allocation2 + $0x3950] sm:$0xff]  ;;  %3847 = vmatpush.msrb.mxu2 %v1606_v17  ;;  %v391_v45 = vld [vmem:[#allocation2 + $0xad8] sm:$0xff] }
 0x3c4   :  { %v1078_v28 = vld [vmem:[#allocation2 + $0x2050] sm:$0xff]  ;;  %3866 = vmatpush.msrb.mxu3 %v1878_v26  ;;  %v631_v10 = vld [vmem:[#allocation2 + $0x1258] sm:$0xff] }
 0x3c5   :  { %v1350_v30 = vld [vmem:[#allocation2 + $0x28d0] sm:$0xff]  ;;  %3808 = vmatpush.msrb.mxu0 %v1078_v28  ;;  %v903_v3 = vld [vmem:[#allocation2 + $0x1ad8] sm:$0xff] }
 0x3c6   :  { %v1590_v62 = vld [vmem:[#allocation2 + $0x3050] sm:$0xff]  ;;  %3827 = vmatpush.msrb.mxu1 %v1350_v30  ;;  %3809 = vmatmul.f32.vlgmr.msrb.gmra.mxu0 %v5202_v50  ;;  %v103_v5 = vld [vmem:[#allocation2 + $0x1d8] sm:$0xff] }
 0x3c7   :  { %v1862_v23 = vld [vmem:[#allocation2 + $0x38d0] sm:$0xff]  ;;  %3848 = vmatpush.msrb.mxu2 %v1590_v62  ;;  %3873 = vmatpush.msra.mxu0 %v295_v43  ;;  %v375_v54 = vld [vmem:[#allocation2 + $0xa58] sm:$0xff] }
 0x3c8   :  { %v1334_v34 = vld [vmem:[#allocation2 + $0x2850] sm:$0xff]  ;;  %3867 = vmatpush.msrb.mxu3 %v1862_v23  ;;  %3849 = vmatmul.f32.vlgmr.msrb.gmra.mxu2 %v5199_v48  ;;  %v615_v17 = vld [vmem:[#allocation2 + $0x11d8] sm:$0xff] }
 0x3c9   :  { %v1846_v22 = vld [vmem:[#allocation2 + $0x3850] sm:$0xff]  ;;  %3913 = vmatpush.msra.mxu2 %v807_v13  ;;  %3828 = vmatpush.msrb.mxu1 %v1334_v34  ;;  %v887_v26 = vld [vmem:[#allocation2 + $0x1a58] sm:$0xff] }
 0x3ca   :  { %v5193_v8 = vld.sshfl [vmem:[#allocation1 + $0x18] sm:$0xff pattern:$0x73625140]  ;;  %3868 = vmatpush.msrb.mxu3 %v1846_v22  ;;  %3874 = vmatpush.msra.mxu0 %v279_v40  ;;  %v87_v28 = vld [vmem:[#allocation2 + $0x158] sm:$0xff] }
 0x3cb   :  { %3789 = vmatmul.f32.vlgmr.msra.gmra.mxu3 %v5193_v8  ;;  %3893 = vmatpush.msra.mxu1 %v551_v4  ;;  %v5205_v58 = vld.sshfl [vmem:[#allocation1 + $0x38] sm:$0xff pattern:$0x73625140]  ;;  %v359_v30 = vld [vmem:[#allocation2 + $0x9d8] sm:$0xff] }
 0x3cc   :  { %3914 = vmatpush.msra.mxu2 %v791_v49  ;;  %3933 = vmatpush.msra.mxu3 %v1063_v7  ;;  %v599_v62 = vld [vmem:[#allocation2 + $0x1158] sm:$0xff] }
 0x3cd   :  { %3875 = vmatpush.msra.mxu0 %v263_v39  ;;  %3894 = vmatpush.msra.mxu1 %v535_v38  ;;  %v871_v23 = vld [vmem:[#allocation2 + $0x19d8] sm:$0xff] }
 0x3ce   :  { %3915 = vmatpush.msra.mxu2 %v775_v14  ;;  %3934 = vmatpush.msra.mxu3 %v1047_v16  ;;  %v71_v43 = vld [vmem:[#allocation2 + $0xd8] sm:$0xff] }
 0x3cf   :  { %3876 = vmatpush.msra.mxu0 %v247_v31  ;;  %3895 = vmatpush.msra.mxu1 %v519_v46  ;;  %v343_v13 = vld [vmem:[#allocation2 + $0x958] sm:$0xff] }
 0x3d0   :  { %3916 = vmatpush.msra.mxu2 %v759_v53  ;;  %3935 = vmatpush.msra.mxu3 %v1031_v1  ;;  %v583_v34 = vld [vmem:[#allocation2 + $0x10d8] sm:$0xff] }
 0x3d1   :  { %3877 = vmatpush.msra.mxu0 %v231_v60  ;;  %3896 = vmatpush.msra.mxu1 %v503_v27  ;;  %v855_v22 = vld [vmem:[#allocation2 + $0x1958] sm:$0xff] }
 0x3d2   :  { %3917 = vmatpush.msra.mxu2 %v743_v41  ;;  %3936 = vmatpush.msra.mxu3 %v1015_v24  ;;  %v55_v40 = vld [vmem:[#allocation2 + $0x58] sm:$0xff] }
 0x3d3   :  { %3869 = vmatmul.f32.vlgmr.msrb.gmra.mxu3 %v5205_v58  ;;  %3829 = vmatmul.f32.vlgmr.msrb.gmra.mxu1 %v5208_v55  ;;  %v327_v4 = vld [vmem:[#allocation2 + $0x8d8] sm:$0xff] }
 0x3d4   :  { %3878 = vmatpush.msra.mxu0 %v215_v42  ;;  %3897 = vmatpush.msra.mxu1 %v487_v59  ;;  %v567_v49 = vld [vmem:[#allocation2 + $0x1058] sm:$0xff] }
 0x3d5   :  { %3918 = vmatpush.msra.mxu2 %v727_v56  ;;  %3937 = vmatpush.msra.mxu3 %v999_v20  ;;  %v839_v7 = vld [vmem:[#allocation2 + $0x18d8] sm:$0xff] }
 0x3d6   :  { %3879 = vmatpush.msra.mxu0 %v199_v32  ;;  %3898 = vmatpush.msra.mxu1 %v471_v61  ;;  %v1319_v39 = vld [vmem:[#allocation2 + $0x27d8] sm:$0xff] }
 0x3d7   :  { %3919 = vmatpush.msra.mxu2 %v711_v47  ;;  %3938 = vmatpush.msra.mxu3 %v983_v29  ;;  %v1831_v38 = vld [vmem:[#allocation2 + $0x37d8] sm:$0xff] }
 0x3d8   :  { %3880 = vmatpush.msra.mxu0 %v183_v0  ;;  %3899 = vmatpush.msra.mxu1 %v455_v25  ;;  %v311_v14 = vld [vmem:[#allocation2 + $0x858] sm:$0xff] }
 0x3d9   :  { %3920 = vmatpush.msra.mxu2 %v695_v9  ;;  %3939 = vmatpush.msra.mxu3 %v967_v12  ;;  %v823_v16 = vld [vmem:[#allocation2 + $0x1858] sm:$0xff] }
 0x3da   :  { %3881 = vmatpush.msra.mxu0 %v167_v57  ;;  %3900 = vmatpush.msra.mxu1 %v439_v15  ;;  %v1303_v31 = vld [vmem:[#allocation2 + $0x2758] sm:$0xff] }
 0x3db   :  { %3921 = vmatpush.msra.mxu2 %v679_v52  ;;  %3940 = vmatpush.msra.mxu3 %v951_v33  ;;  %v1575_v46 = vld [vmem:[#allocation2 + $0x2fd8] sm:$0xff] }
 0x3dc   :  { %3882 = vmatpush.msra.mxu0 %v151_v35  ;;  %3901 = vmatpush.msra.mxu1 %v423_v18  ;;  %v1815_v53 = vld [vmem:[#allocation2 + $0x3758] sm:$0xff] }
 0x3dd   :  { %3922 = vmatpush.msra.mxu2 %v663_v37  ;;  %3941 = vmatpush.msra.mxu3 %v935_v6  ;;  %v2087_v1 = vld [vmem:[#allocation2 + $0x3fd8] sm:$0xff] }
 0x3de   :  { %3883 = vmatpush.msra.mxu0 %v135_v11  ;;  %3902 = vmatpush.msra.mxu1 %v407_v19  ;;  %v1287_v60 = vld [vmem:[#allocation2 + $0x26d8] sm:$0xff] }
 0x3df   :  { %3923 = vmatpush.msra.mxu2 %v647_v51  ;;  %3942 = vmatpush.msra.mxu3 %v919_v44  ;;  %v1559_v27 = vld [vmem:[#allocation2 + $0x2f58] sm:$0xff] }
 0x3e0   :  { %3884 = vmatpush.msra.mxu0 %v119_v2  ;;  %3903 = vmatpush.msra.mxu1 %v391_v45  ;;  %v1799_v41 = vld [vmem:[#allocation2 + $0x36d8] sm:$0xff] }
 0x3e1   :  { %3924 = vmatpush.msra.mxu2 %v631_v10  ;;  %3943 = vmatpush.msra.mxu3 %v903_v3  ;;  %v2071_v24 = vld [vmem:[#allocation2 + $0x3f58] sm:$0xff] }
 0x3e2   :  { %3885 = vmatpush.msra.mxu0 %v103_v5  ;;  %3904 = vmatpush.msra.mxu1 %v375_v54  ;;  %v1271_v42 = vld [vmem:[#allocation2 + $0x2658] sm:$0xff] }
 0x3e3   :  { %3925 = vmatpush.msra.mxu2 %v615_v17  ;;  %3944 = vmatpush.msra.mxu3 %v887_v26  ;;  %v1543_v59 = vld [vmem:[#allocation2 + $0x2ed8] sm:$0xff] }
 0x3e4   :  { %3886 = vmatpush.msra.mxu0 %v87_v28  ;;  %3905 = vmatpush.msra.mxu1 %v359_v30  ;;  %v1783_v56 = vld [vmem:[#allocation2 + $0x3658] sm:$0xff] }
 0x3e5   :  { %3926 = vmatpush.msra.mxu2 %v599_v62  ;;  %3945 = vmatpush.msra.mxu3 %v871_v23  ;;  %v2055_v20 = vld [vmem:[#allocation2 + $0x3ed8] sm:$0xff] }
 0x3e6   :  { %3887 = vmatpush.msra.mxu0 %v71_v43  ;;  %3906 = vmatpush.msra.mxu1 %v343_v13  ;;  %v1255_v32 = vld [vmem:[#allocation2 + $0x25d8] sm:$0xff] }
 0x3e7   :  { %3927 = vmatpush.msra.mxu2 %v583_v34  ;;  %3946 = vmatpush.msra.mxu3 %v855_v22  ;;  %v1527_v61 = vld [vmem:[#allocation2 + $0x2e58] sm:$0xff] }
 0x3e8   :  { %3888 = vmatpush.msra.mxu0 %v55_v40  ;;  %3907 = vmatpush.msra.mxu1 %v327_v4  ;;  %v1767_v47 = vld [vmem:[#allocation2 + $0x35d8] sm:$0xff] }
 0x3e9   :  { %3928 = vmatpush.msra.mxu2 %v567_v49  ;;  %3947 = vmatpush.msra.mxu3 %v839_v7  ;;  %v2039_v29 = vld [vmem:[#allocation2 + $0x3e58] sm:$0xff] }
 0x3ea   :  { %3953 = vmatpush.msrb.mxu0 %v1319_v39  ;;  %3908 = vmatpush.msra.mxu1 %v311_v14  ;;  %v1239_v0 = vld [vmem:[#allocation2 + $0x2558] sm:$0xff] }
 0x3eb   :  { %3993 = vmatpush.msrb.mxu2 %v1831_v38  ;;  %3948 = vmatpush.msra.mxu3 %v823_v16  ;;  %v1511_v25 = vld [vmem:[#allocation2 + $0x2dd8] sm:$0xff] }
 0x3ec   :  { %3954 = vmatpush.msrb.mxu0 %v1303_v31  ;;  %3973 = vmatpush.msrb.mxu1 %v1575_v46  ;;  %v1751_v9 = vld [vmem:[#allocation2 + $0x3558] sm:$0xff] }
 0x3ed   :  { %3994 = vmatpush.msrb.mxu2 %v1815_v53  ;;  %4013 = vmatpush.msrb.mxu3 %v2087_v1  ;;  %v2023_v12 = vld [vmem:[#allocation2 + $0x3dd8] sm:$0xff] }
 0x3ee   :  { %3955 = vmatpush.msrb.mxu0 %v1287_v60  ;;  %3974 = vmatpush.msrb.mxu1 %v1559_v27  ;;  %v1223_v57 = vld [vmem:[#allocation2 + $0x24d8] sm:$0xff]  ;;  %v552_v27 = vld [vmem:[#allocation2 + $0xfe0] sm:$0xff] }
 0x3ef   :  { %3995 = vmatpush.msrb.mxu2 %v1799_v41  ;;  %4014 = vmatpush.msrb.mxu3 %v2071_v24  ;;  %v1495_v15 = vld [vmem:[#allocation2 + $0x2d58] sm:$0xff]  ;;  %v792_v41 = vld [vmem:[#allocation2 + $0x1760] sm:$0xff] }
 0x3f0   :  { %3956 = vmatpush.msrb.mxu0 %v1271_v42  ;;  %3975 = vmatpush.msrb.mxu1 %v1543_v59  ;;  %v1735_v52 = vld [vmem:[#allocation2 + $0x34d8] sm:$0xff]  ;;  %v1064_v24 = vld [vmem:[#allocation2 + $0x1fe0] sm:$0xff] }
 0x3f1   :  { %3996 = vmatpush.msrb.mxu2 %v1783_v56  ;;  %4015 = vmatpush.msrb.mxu3 %v2055_v20  ;;  %v2007_v33 = vld [vmem:[#allocation2 + $0x3d58] sm:$0xff]  ;;  %v264_v42 = vld [vmem:[#allocation2 + $0x6e0] sm:$0xff] }
 0x3f2   :  { %3957 = vmatpush.msrb.mxu0 %v1255_v32  ;;  %3976 = vmatpush.msrb.mxu1 %v1527_v61  ;;  %v1207_v35 = vld [vmem:[#allocation2 + $0x2458] sm:$0xff]  ;;  %v536_v59 = vld [vmem:[#allocation2 + $0xf60] sm:$0xff] }
 0x3f3   :  { %3997 = vmatpush.msrb.mxu2 %v1767_v47  ;;  %4016 = vmatpush.msrb.mxu3 %v2039_v29  ;;  %v1479_v18 = vld [vmem:[#allocation2 + $0x2cd8] sm:$0xff]  ;;  %v776_v56 = vld [vmem:[#allocation2 + $0x16e0] sm:$0xff] }
 0x3f4   :  { %3958 = vmatpush.msrb.mxu0 %v1239_v0  ;;  %3977 = vmatpush.msrb.mxu1 %v1511_v25  ;;  %v1719_v37 = vld [vmem:[#allocation2 + $0x3458] sm:$0xff]  ;;  %v1048_v20 = vld [vmem:[#allocation2 + $0x1f60] sm:$0xff] }
 0x3f5   :  { %3998 = vmatpush.msrb.mxu2 %v1751_v9  ;;  %4017 = vmatpush.msrb.mxu3 %v2023_v12  ;;  %v1991_v6 = vld [vmem:[#allocation2 + $0x3cd8] sm:$0xff]  ;;  %v520_v32 = vld [vmem:[#allocation2 + $0xee0] sm:$0xff] }
 0x3f6   :  { %3959 = vmatpush.msrb.mxu0 %v1223_v57  ;;  %3978 = vmatpush.msrb.mxu1 %v1495_v15  ;;  %v1191_v11 = vld [vmem:[#allocation2 + $0x23d8] sm:$0xff]  ;;  %v760_v61 = vld [vmem:[#allocation2 + $0x1660] sm:$0xff] }
 0x3f7   :  { %3999 = vmatpush.msrb.mxu2 %v1735_v52  ;;  %4018 = vmatpush.msrb.mxu3 %v2007_v33  ;;  %v1463_v19 = vld [vmem:[#allocation2 + $0x2c58] sm:$0xff]  ;;  %v1032_v47 = vld [vmem:[#allocation2 + $0x1ee0] sm:$0xff] }
 0x3f8   :  { %3960 = vmatpush.msrb.mxu0 %v1207_v35  ;;  %3979 = vmatpush.msrb.mxu1 %v1479_v18  ;;  %v1703_v51 = vld [vmem:[#allocation2 + $0x33d8] sm:$0xff]  ;;  %v744_v29 = vld [vmem:[#allocation2 + $0x15e0] sm:$0xff] }
 0x3f9   :  { %v1975_v44 = vld [vmem:[#allocation2 + $0x3c58] sm:$0xff]  ;;  %4000 = vmatpush.msrb.mxu2 %v1719_v37  ;;  %4019 = vmatpush.msrb.mxu3 %v1991_v6  ;;  %v1016_v0 = vld [vmem:[#allocation2 + $0x1e60] sm:$0xff] }
 0x3fa   :  { %v1175_v2 = vld [vmem:[#allocation2 + $0x2358] sm:$0xff]  ;;  %3961 = vmatpush.msrb.mxu0 %v1191_v11  ;;  %3980 = vmatpush.msrb.mxu1 %v1463_v19  ;;  %v216_v25 = vld [vmem:[#allocation2 + $0x560] sm:$0xff] }
 0x3fb   :  { %v1447_v45 = vld [vmem:[#allocation2 + $0x2bd8] sm:$0xff]  ;;  %4001 = vmatpush.msrb.mxu2 %v1703_v51  ;;  %4020 = vmatpush.msrb.mxu3 %v1975_v44  ;;  %v488_v9 = vld [vmem:[#allocation2 + $0xde0] sm:$0xff] }
 0x3fc   :  { %v1687_v10 = vld [vmem:[#allocation2 + $0x3358] sm:$0xff]  ;;  %3962 = vmatpush.msrb.mxu0 %v1175_v2  ;;  %3981 = vmatpush.msrb.mxu1 %v1447_v45  ;;  %v1000_v12 = vld [vmem:[#allocation2 + $0x1de0] sm:$0xff] }
 0x3fd   :  { %v1959_v3 = vld [vmem:[#allocation2 + $0x3bd8] sm:$0xff]  ;;  %4002 = vmatpush.msrb.mxu2 %v1687_v10  ;;  %3889 = vmatmul.f32.vlgmr.msra.gmra.mxu0 %v5190_v63  ;;  %v296_v63 = vld [vmem:[#allocation2 + $0x7e0] sm:$0xff] }
 0x3fe   :  { %v1159_v5 = vld [vmem:[#allocation2 + $0x22d8] sm:$0xff]  ;;  %4021 = vmatpush.msrb.mxu3 %v1959_v3  ;;  %3929 = vmatmul.f32.vlgmr.msra.gmra.mxu2 %v5187_v36  ;;  %v200_v57 = vld [vmem:[#allocation2 + $0x4e0] sm:$0xff] }
 0x3ff   :  { %v1431_v54 = vld [vmem:[#allocation2 + $0x2b58] sm:$0xff]  ;;  %3963 = vmatpush.msrb.mxu0 %v1159_v5  ;;  %3949 = vmatmul.f32.vlgmr.msra.gmra.mxu3 %v5193_v8  ;;  %v808_v8 = vld [vmem:[#allocation2 + $0x17e0] sm:$0xff] }
 0x400   :  { %v1671_v17 = vld [vmem:[#allocation2 + $0x32d8] sm:$0xff]  ;;  %3982 = vmatpush.msrb.mxu1 %v1431_v54  ;;  %v472_v15 = vld [vmem:[#allocation2 + $0xd60] sm:$0xff] }
 0x401   :  { %v1943_v26 = vld [vmem:[#allocation2 + $0x3b58] sm:$0xff]  ;;  %4003 = vmatpush.msrb.mxu2 %v1671_v17  ;;  %3909 = vmatmul.f32.vlgmr.msra.gmra.mxu1 %v5196_v21  ;;  %v280_v21 = vld [vmem:[#allocation2 + $0x760] sm:$0xff] }
 0x402   :  { %v1143_v28 = vld [vmem:[#allocation2 + $0x2258] sm:$0xff]  ;;  %4022 = vmatpush.msrb.mxu3 %v1943_v26  ;;  %v712_v52 = vld [vmem:[#allocation2 + $0x14e0] sm:$0xff] }
 0x403   :  { %v1415_v30 = vld [vmem:[#allocation2 + $0x2ad8] sm:$0xff]  ;;  %3964 = vmatpush.msrb.mxu0 %v1143_v28  ;;  %v984_v33 = vld [vmem:[#allocation2 + $0x1d60] sm:$0xff] }
 0x404   :  { %v1655_v62 = vld [vmem:[#allocation2 + $0x3258] sm:$0xff]  ;;  %3983 = vmatpush.msrb.mxu1 %v1415_v30  ;;  %v184_v35 = vld [vmem:[#allocation2 + $0x460] sm:$0xff] }
 0x405   :  { %v1927_v23 = vld [vmem:[#allocation2 + $0x3ad8] sm:$0xff]  ;;  %4004 = vmatpush.msrb.mxu2 %v1655_v62  ;;  %v456_v18 = vld [vmem:[#allocation2 + $0xce0] sm:$0xff] }
 0x406   :  { %v1127_v43 = vld [vmem:[#allocation2 + $0x21d8] sm:$0xff]  ;;  %4023 = vmatpush.msrb.mxu3 %v1927_v23  ;;  %v696_v37 = vld [vmem:[#allocation2 + $0x1460] sm:$0xff] }
 0x407   :  { %v1399_v13 = vld [vmem:[#allocation2 + $0x2a58] sm:$0xff]  ;;  %3965 = vmatpush.msrb.mxu0 %v1127_v43  ;;  %v968_v6 = vld [vmem:[#allocation2 + $0x1ce0] sm:$0xff] }
 0x408   :  { %v1639_v34 = vld [vmem:[#allocation2 + $0x31d8] sm:$0xff]  ;;  %3984 = vmatpush.msrb.mxu1 %v1399_v13  ;;  %v168_v11 = vld [vmem:[#allocation2 + $0x3e0] sm:$0xff] }
 0x409   :  { %v1911_v22 = vld [vmem:[#allocation2 + $0x3a58] sm:$0xff]  ;;  %4005 = vmatpush.msrb.mxu2 %v1639_v34  ;;  %v440_v19 = vld [vmem:[#allocation2 + $0xc60] sm:$0xff] }
 0x40a   :  { %v1111_v40 = vld [vmem:[#allocation2 + $0x2158] sm:$0xff]  ;;  %4024 = vmatpush.msrb.mxu3 %v1911_v22  ;;  %v680_v51 = vld [vmem:[#allocation2 + $0x13e0] sm:$0xff] }
 0x40b   :  { %v1383_v4 = vld [vmem:[#allocation2 + $0x29d8] sm:$0xff]  ;;  %3966 = vmatpush.msrb.mxu0 %v1111_v40  ;;  %v952_v44 = vld [vmem:[#allocation2 + $0x1c60] sm:$0xff] }
 0x40c   :  { %v1623_v49 = vld [vmem:[#allocation2 + $0x3158] sm:$0xff]  ;;  %3985 = vmatpush.msrb.mxu1 %v1383_v4  ;;  %v152_v2 = vld [vmem:[#allocation2 + $0x360] sm:$0xff] }
 0x40d   :  { %v1895_v7 = vld [vmem:[#allocation2 + $0x39d8] sm:$0xff]  ;;  %4006 = vmatpush.msrb.mxu2 %v1623_v49  ;;  %v424_v45 = vld [vmem:[#allocation2 + $0xbe0] sm:$0xff] }
 0x40e   :  { %v1095_v39 = vld [vmem:[#allocation2 + $0x20d8] sm:$0xff]  ;;  %4025 = vmatpush.msrb.mxu3 %v1895_v7  ;;  %v664_v10 = vld [vmem:[#allocation2 + $0x1360] sm:$0xff] }
 0x40f   :  { %v1367_v38 = vld [vmem:[#allocation2 + $0x2958] sm:$0xff]  ;;  %3967 = vmatpush.msrb.mxu0 %v1095_v39  ;;  %v936_v3 = vld [vmem:[#allocation2 + $0x1be0] sm:$0xff] }
 0x410   :  { %v1607_v14 = vld [vmem:[#allocation2 + $0x30d8] sm:$0xff]  ;;  %3986 = vmatpush.msrb.mxu1 %v1367_v38  ;;  %v136_v5 = vld [vmem:[#allocation2 + $0x2e0] sm:$0xff] }
 0x411   :  { %v1879_v16 = vld [vmem:[#allocation2 + $0x3958] sm:$0xff]  ;;  %4007 = vmatpush.msrb.mxu2 %v1607_v14  ;;  %v408_v54 = vld [vmem:[#allocation2 + $0xb60] sm:$0xff] }
 0x412   :  { %v1079_v36 = vld [vmem:[#allocation2 + $0x2058] sm:$0xff]  ;;  %4026 = vmatpush.msrb.mxu3 %v1879_v16  ;;  %v648_v17 = vld [vmem:[#allocation2 + $0x12e0] sm:$0xff] }
 0x413   :  { %v1351_v31 = vld [vmem:[#allocation2 + $0x28d8] sm:$0xff]  ;;  %3968 = vmatpush.msrb.mxu0 %v1079_v36  ;;  %v920_v26 = vld [vmem:[#allocation2 + $0x1b60] sm:$0xff] }
 0x414   :  { %v1591_v46 = vld [vmem:[#allocation2 + $0x3058] sm:$0xff]  ;;  %3987 = vmatpush.msrb.mxu1 %v1351_v31  ;;  %3969 = vmatmul.f32.vlgmr.msrb.gmra.mxu0 %v5202_v50  ;;  %v232_v50 = vld [vmem:[#allocation2 + $0x5e0] sm:$0xff] }
 0x415   :  { %v1863_v53 = vld [vmem:[#allocation2 + $0x38d8] sm:$0xff]  ;;  %4008 = vmatpush.msrb.mxu2 %v1591_v46  ;;  %4033 = vmatpush.msra.mxu0 %v296_v63  ;;  %v120_v28 = vld [vmem:[#allocation2 + $0x260] sm:$0xff] }
 0x416   :  { %v1335_v1 = vld [vmem:[#allocation2 + $0x2858] sm:$0xff]  ;;  %4027 = vmatpush.msrb.mxu3 %v1863_v53  ;;  %4009 = vmatmul.f32.vlgmr.msrb.gmra.mxu2 %v5199_v48  ;;  %v248_v48 = vld [vmem:[#allocation2 + $0x660] sm:$0xff] }
 0x417   :  { %v1847_v60 = vld [vmem:[#allocation2 + $0x3858] sm:$0xff]  ;;  %4073 = vmatpush.msra.mxu2 %v808_v8  ;;  %3988 = vmatpush.msrb.mxu1 %v1335_v1  ;;  %v392_v30 = vld [vmem:[#allocation2 + $0xae0] sm:$0xff] }
 0x418   :  { %4028 = vmatpush.msrb.mxu3 %v1847_v60  ;;  %4034 = vmatpush.msra.mxu0 %v280_v21  ;;  %v632_v62 = vld [vmem:[#allocation2 + $0x1260] sm:$0xff] }
 0x419   :  { %4029 = vmatmul.f32.vlgmr.msrb.gmra.mxu3 %v5205_v58  ;;  %4053 = vmatpush.msra.mxu1 %v552_v27  ;;  %v504_v58 = vld [vmem:[#allocation2 + $0xe60] sm:$0xff] }
 0x41a   :  { %4074 = vmatpush.msra.mxu2 %v792_v41  ;;  %4093 = vmatpush.msra.mxu3 %v1064_v24  ;;  %v904_v23 = vld [vmem:[#allocation2 + $0x1ae0] sm:$0xff] }
 0x41b   :  { %3989 = vmatmul.f32.vlgmr.msrb.gmra.mxu1 %v5208_v55  ;;  %4035 = vmatpush.msra.mxu0 %v264_v42  ;;  %v728_v55 = vld [vmem:[#allocation2 + $0x1560] sm:$0xff] }
 0x41c   :  { %4054 = vmatpush.msra.mxu1 %v536_v59  ;;  %4075 = vmatpush.msra.mxu2 %v776_v56  ;;  %v104_v43 = vld [vmem:[#allocation2 + $0x1e0] sm:$0xff] }
 0x41d   :  { %4094 = vmatpush.msra.mxu3 %v1048_v20  ;;  %4036 = vmatpush.msra.mxu0 %v248_v48  ;;  %v376_v13 = vld [vmem:[#allocation2 + $0xa60] sm:$0xff] }
 0x41e   :  { %4055 = vmatpush.msra.mxu1 %v520_v32  ;;  %4076 = vmatpush.msra.mxu2 %v760_v61  ;;  %v616_v34 = vld [vmem:[#allocation2 + $0x11e0] sm:$0xff] }
 0x41f   :  { %4095 = vmatpush.msra.mxu3 %v1032_v47  ;;  %4037 = vmatpush.msra.mxu0 %v232_v50  ;;  %v888_v22 = vld [vmem:[#allocation2 + $0x1a60] sm:$0xff] }
 0x420   :  { %4056 = vmatpush.msra.mxu1 %v504_v58  ;;  %4077 = vmatpush.msra.mxu2 %v744_v29  ;;  %v88_v40 = vld [vmem:[#allocation2 + $0x160] sm:$0xff] }
 0x421   :  { %4096 = vmatpush.msra.mxu3 %v1016_v0  ;;  %4038 = vmatpush.msra.mxu0 %v216_v25  ;;  %v360_v4 = vld [vmem:[#allocation2 + $0x9e0] sm:$0xff] }
 0x422   :  { %4057 = vmatpush.msra.mxu1 %v488_v9  ;;  %4078 = vmatpush.msra.mxu2 %v728_v55  ;;  %v600_v49 = vld [vmem:[#allocation2 + $0x1160] sm:$0xff] }
 0x423   :  { %4097 = vmatpush.msra.mxu3 %v1000_v12  ;;  %4039 = vmatpush.msra.mxu0 %v200_v57  ;;  %v872_v7 = vld [vmem:[#allocation2 + $0x19e0] sm:$0xff] }
 0x424   :  { %4058 = vmatpush.msra.mxu1 %v472_v15  ;;  %4079 = vmatpush.msra.mxu2 %v712_v52  ;;  %v72_v39 = vld [vmem:[#allocation2 + $0xe0] sm:$0xff] }
 0x425   :  { %4098 = vmatpush.msra.mxu3 %v984_v33  ;;  %4040 = vmatpush.msra.mxu0 %v184_v35  ;;  %v344_v38 = vld [vmem:[#allocation2 + $0x960] sm:$0xff] }
 0x426   :  { %4059 = vmatpush.msra.mxu1 %v456_v18  ;;  %4080 = vmatpush.msra.mxu2 %v696_v37  ;;  %v584_v14 = vld [vmem:[#allocation2 + $0x10e0] sm:$0xff] }
 0x427   :  { %4099 = vmatpush.msra.mxu3 %v968_v6  ;;  %4041 = vmatpush.msra.mxu0 %v168_v11  ;;  %v856_v16 = vld [vmem:[#allocation2 + $0x1960] sm:$0xff] }
 0x428   :  { %4060 = vmatpush.msra.mxu1 %v440_v19  ;;  %4081 = vmatpush.msra.mxu2 %v680_v51  ;;  %v56_v36 = vld [vmem:[#allocation2 + $0x60] sm:$0xff] }
 0x429   :  { %4100 = vmatpush.msra.mxu3 %v952_v44  ;;  %4042 = vmatpush.msra.mxu0 %v152_v2  ;;  %v328_v31 = vld [vmem:[#allocation2 + $0x8e0] sm:$0xff] }
 0x42a   :  { %4061 = vmatpush.msra.mxu1 %v424_v45  ;;  %4082 = vmatpush.msra.mxu2 %v664_v10  ;;  %v568_v46 = vld [vmem:[#allocation2 + $0x1060] sm:$0xff] }
 0x42b   :  { %4101 = vmatpush.msra.mxu3 %v936_v3  ;;  %4043 = vmatpush.msra.mxu0 %v136_v5  ;;  %v840_v53 = vld [vmem:[#allocation2 + $0x18e0] sm:$0xff] }
 0x42c   :  { %4062 = vmatpush.msra.mxu1 %v408_v54  ;;  %4083 = vmatpush.msra.mxu2 %v648_v17  ;;  %v1320_v63 = vld [vmem:[#allocation2 + $0x27e0] sm:$0xff] }
 0x42d   :  { %4102 = vmatpush.msra.mxu3 %v920_v26  ;;  %4044 = vmatpush.msra.mxu0 %v120_v28  ;;  %v1832_v8 = vld [vmem:[#allocation2 + $0x37e0] sm:$0xff] }
 0x42e   :  { %4063 = vmatpush.msra.mxu1 %v392_v30  ;;  %4084 = vmatpush.msra.mxu2 %v632_v62  ;;  %v312_v1 = vld [vmem:[#allocation2 + $0x860] sm:$0xff] }
 0x42f   :  { %4103 = vmatpush.msra.mxu3 %v904_v23  ;;  %4045 = vmatpush.msra.mxu0 %v104_v43  ;;  %v824_v60 = vld [vmem:[#allocation2 + $0x1860] sm:$0xff] }
 0x430   :  { %4064 = vmatpush.msra.mxu1 %v376_v13  ;;  %4085 = vmatpush.msra.mxu2 %v616_v34  ;;  %v1304_v21 = vld [vmem:[#allocation2 + $0x2760] sm:$0xff] }
 0x431   :  { %4104 = vmatpush.msra.mxu3 %v888_v22  ;;  %4046 = vmatpush.msra.mxu0 %v88_v40  ;;  %v1576_v27 = vld [vmem:[#allocation2 + $0x2fe0] sm:$0xff] }
 0x432   :  { %4065 = vmatpush.msra.mxu1 %v360_v4  ;;  %4086 = vmatpush.msra.mxu2 %v600_v49  ;;  %v1816_v41 = vld [vmem:[#allocation2 + $0x3760] sm:$0xff] }
 0x433   :  { %4105 = vmatpush.msra.mxu3 %v872_v7  ;;  %4047 = vmatpush.msra.mxu0 %v72_v39  ;;  %v2088_v24 = vld [vmem:[#allocation2 + $0x3fe0] sm:$0xff] }
 0x434   :  { %4066 = vmatpush.msra.mxu1 %v344_v38  ;;  %4087 = vmatpush.msra.mxu2 %v584_v14  ;;  %v1288_v42 = vld [vmem:[#allocation2 + $0x26e0] sm:$0xff] }
 0x435   :  { %4106 = vmatpush.msra.mxu3 %v856_v16  ;;  %4048 = vmatpush.msra.mxu0 %v56_v36  ;;  %v1560_v59 = vld [vmem:[#allocation2 + $0x2f60] sm:$0xff] }
 0x436   :  { %4067 = vmatpush.msra.mxu1 %v328_v31  ;;  %4088 = vmatpush.msra.mxu2 %v568_v46  ;;  %v1800_v56 = vld [vmem:[#allocation2 + $0x36e0] sm:$0xff] }
 0x437   :  { %4107 = vmatpush.msra.mxu3 %v840_v53  ;;  %4113 = vmatpush.msrb.mxu0 %v1320_v63  ;;  %v2072_v20 = vld [vmem:[#allocation2 + $0x3f60] sm:$0xff]  ;;  %v5219_v53 = vpop.f32.mrf.mxu0 }
 0x438   :  { %4153 = vmatpush.msrb.mxu2 %v1832_v8  ;;  %4068 = vmatpush.msra.mxu1 %v312_v1  ;;  %v1272_v48 = vld [vmem:[#allocation2 + $0x2660] sm:$0xff]  ;;  %v5221_v8 = vld.sshfl [vmem:[#allocation1 + $0x10] sm:$0xff pattern:$0x73625140] }
 0x439   :  { %4108 = vmatpush.msra.mxu3 %v824_v60  ;;  %4114 = vmatpush.msrb.mxu0 %v1304_v21  ;;  %v1544_v32 = vld [vmem:[#allocation2 + $0x2ee0] sm:$0xff]  ;;  %v297_v1 = vld [vmem:[#allocation2 + $0x7e8] sm:$0xff] }
 0x43a   :  { %4133 = vmatpush.msrb.mxu1 %v1576_v27  ;;  %4154 = vmatpush.msrb.mxu2 %v1816_v41  ;;  %v1784_v61 = vld [vmem:[#allocation2 + $0x3660] sm:$0xff]  ;;  %v809_v60 = vld [vmem:[#allocation2 + $0x17e8] sm:$0xff]  ;;  %v5224_v27 = vpop.f32.mrf.mxu1  ;;  %v5226_v41 = vld.sshfl [vmem:[#allocation1] sm:$0xff pattern:$0x73625140] }
 0x43b   :  { %4173 = vmatpush.msrb.mxu3 %v2088_v24  ;;  %4115 = vmatpush.msrb.mxu0 %v1288_v42  ;;  %v2056_v47 = vld [vmem:[#allocation2 + $0x3ee0] sm:$0xff]  ;;  %v5229_v42 = vpop.f32.mrf.mxu2 }
 0x43c   :  { %4134 = vmatpush.msrb.mxu1 %v1560_v59  ;;  %4155 = vmatpush.msrb.mxu2 %v1800_v56  ;;  %v1256_v50 = vld [vmem:[#allocation2 + $0x25e0] sm:$0xff]  ;;  %v5231_v59 = vld.sshfl [vmem:[#allocation1 + $0x18] sm:$0xff pattern:$0x73625140]  ;;  %v281_v56 = vld [vmem:[#allocation2 + $0x768] sm:$0xff] }
 0x43d   :  { %4174 = vmatpush.msrb.mxu3 %v2072_v20  ;;  %v1528_v58 = vld [vmem:[#allocation2 + $0x2e60] sm:$0xff]  ;;  %4116 = vmatpush.msrb.mxu0 %v1272_v48  ;;  %v553_v20 = vld [vmem:[#allocation2 + $0xfe8] sm:$0xff] }
 0x43e   :  { %4135 = vmatpush.msrb.mxu1 %v1544_v32  ;;  %v1768_v29 = vld [vmem:[#allocation2 + $0x35e0] sm:$0xff]  ;;  %4156 = vmatpush.msrb.mxu2 %v1784_v61  ;;  %v793_v48 = vld [vmem:[#allocation2 + $0x1768] sm:$0xff] }
 0x43f   :  { %v2040_v0 = vld [vmem:[#allocation2 + $0x3e60] sm:$0xff]  ;;  %4175 = vmatpush.msrb.mxu3 %v2056_v47  ;;  %4117 = vmatpush.msrb.mxu0 %v1256_v50  ;;  %v1065_v32 = vld [vmem:[#allocation2 + $0x1fe8] sm:$0xff] }
 0x440   :  { %v1240_v25 = vld [vmem:[#allocation2 + $0x2560] sm:$0xff]  ;;  %4136 = vmatpush.msrb.mxu1 %v1528_v58  ;;  %4157 = vmatpush.msrb.mxu2 %v1768_v29  ;;  %v265_v47 = vld [vmem:[#allocation2 + $0x6e8] sm:$0xff]  ;;  %v5237_v58 = vpop.f32.mrf.mxu3 }
 0x441   :  { %v1512_v9 = vld [vmem:[#allocation2 + $0x2de0] sm:$0xff]  ;;  %4176 = vmatpush.msrb.mxu3 %v2040_v0  ;;  %4118 = vmatpush.msrb.mxu0 %v1240_v25  ;;  %v537_v50 = vld [vmem:[#allocation2 + $0xf68] sm:$0xff] }
 0x442   :  { %v1752_v55 = vld [vmem:[#allocation2 + $0x3560] sm:$0xff]  ;;  %4137 = vmatpush.msrb.mxu1 %v1512_v9  ;;  %4089 = vmatmul.f32.vlgmr.msra.gmra.mxu2 %v5221_v8  ;;  %v777_v29 = vld [vmem:[#allocation2 + $0x16e8] sm:$0xff] }
 0x443   :  { %v2024_v12 = vld [vmem:[#allocation2 + $0x3de0] sm:$0xff]  ;;  %4158 = vmatpush.msrb.mxu2 %v1752_v55  ;;  %4049 = vmatmul.f32.vlgmr.msra.gmra.mxu0 %v5226_v41  ;;  %v1049_v0 = vld [vmem:[#allocation2 + $0x1f68] sm:$0xff] }
 0x444   :  { %v1224_v57 = vld [vmem:[#allocation2 + $0x24e0] sm:$0xff]  ;;  %4177 = vmatpush.msrb.mxu3 %v2024_v12  ;;  %v249_v25 = vld [vmem:[#allocation2 + $0x668] sm:$0xff]  ;;  %v5239_v12 = vpop.f32.mrf.mxu0 }
 0x445   :  { %v1496_v15 = vld [vmem:[#allocation2 + $0x2d60] sm:$0xff]  ;;  %4119 = vmatpush.msrb.mxu0 %v1224_v57  ;;  %4109 = vmatmul.f32.vlgmr.msra.gmra.mxu3 %v5231_v59  ;;  %v521_v9 = vld [vmem:[#allocation2 + $0xee8] sm:$0xff] }
 0x446   :  { %v1736_v52 = vld [vmem:[#allocation2 + $0x34e0] sm:$0xff]  ;;  %4138 = vmatpush.msrb.mxu1 %v1496_v15  ;;  %v761_v55 = vld [vmem:[#allocation2 + $0x1668] sm:$0xff] }
 0x447   :  { %v2008_v33 = vld [vmem:[#allocation2 + $0x3d60] sm:$0xff]  ;;  %4159 = vmatpush.msrb.mxu2 %v1736_v52  ;;  %v1033_v57 = vld [vmem:[#allocation2 + $0x1ee8] sm:$0xff] }
 0x448   :  { %v1208_v35 = vld [vmem:[#allocation2 + $0x2460] sm:$0xff]  ;;  %4178 = vmatpush.msrb.mxu3 %v2008_v33  ;;  %v5241_v15 = vld.sshfl [vmem:[#allocation1 + $0x30] sm:$0xff pattern:$0x73625140] }
 0x449   :  { %v1480_v18 = vld [vmem:[#allocation2 + $0x2ce0] sm:$0xff]  ;;  %4120 = vmatpush.msrb.mxu0 %v1208_v35  ;;  %v233_v52 = vld [vmem:[#allocation2 + $0x5e8] sm:$0xff] }
 0x44a   :  { %v1720_v37 = vld [vmem:[#allocation2 + $0x3460] sm:$0xff]  ;;  %4139 = vmatpush.msrb.mxu1 %v1480_v18  ;;  %v505_v33 = vld [vmem:[#allocation2 + $0xe68] sm:$0xff]  ;;  %v5244_v18 = vpop.f32.mrf.mxu1 }
 0x44b   :  { %v1992_v6 = vld [vmem:[#allocation2 + $0x3ce0] sm:$0xff]  ;;  %4160 = vmatpush.msrb.mxu2 %v1720_v37  ;;  %v745_v35 = vld [vmem:[#allocation2 + $0x15e8] sm:$0xff]  ;;  %v5246_v37 = vld.sshfl [vmem:[#allocation1 + $0x20] sm:$0xff pattern:$0x73625140] }
 0x44c   :  { %v1192_v11 = vld [vmem:[#allocation2 + $0x23e0] sm:$0xff]  ;;  %4179 = vmatpush.msrb.mxu3 %v1992_v6  ;;  %v1017_v6 = vld [vmem:[#allocation2 + $0x1e68] sm:$0xff] }
 0x44d   :  { %v1464_v19 = vld [vmem:[#allocation2 + $0x2c60] sm:$0xff]  ;;  %4121 = vmatpush.msrb.mxu0 %v1192_v11  ;;  %v5249_v11 = vpop.f32.mrf.mxu2 }
 0x44e   :  { %v1704_v51 = vld [vmem:[#allocation2 + $0x33e0] sm:$0xff]  ;;  %4140 = vmatpush.msrb.mxu1 %v1464_v19  ;;  %v5251_v19 = vld.sshfl [vmem:[#allocation1 + $0x38] sm:$0xff pattern:$0x73625140] }
 0x44f   :  { %v1976_v44 = vld [vmem:[#allocation2 + $0x3c60] sm:$0xff]  ;;  %4161 = vmatpush.msrb.mxu2 %v1704_v51  ;;  %v217_v51 = vld [vmem:[#allocation2 + $0x568] sm:$0xff] }
 0x450   :  { %v1176_v2 = vld [vmem:[#allocation2 + $0x2360] sm:$0xff]  ;;  %4180 = vmatpush.msrb.mxu3 %v1976_v44  ;;  %v489_v44 = vld [vmem:[#allocation2 + $0xde8] sm:$0xff] }
 0x451   :  { %v1448_v45 = vld [vmem:[#allocation2 + $0x2be0] sm:$0xff]  ;;  %4122 = vmatpush.msrb.mxu0 %v1176_v2  ;;  %v729_v2 = vld [vmem:[#allocation2 + $0x1568] sm:$0xff] }
 0x452   :  { %v1688_v10 = vld [vmem:[#allocation2 + $0x3360] sm:$0xff]  ;;  %4141 = vmatpush.msrb.mxu1 %v1448_v45  ;;  %v1001_v45 = vld [vmem:[#allocation2 + $0x1de8] sm:$0xff] }
 0x453   :  { %v1960_v3 = vld [vmem:[#allocation2 + $0x3be0] sm:$0xff]  ;;  %4162 = vmatpush.msrb.mxu2 %v1688_v10 }
 0x454   :  { %v1160_v5 = vld [vmem:[#allocation2 + $0x22e0] sm:$0xff]  ;;  %4181 = vmatpush.msrb.mxu3 %v1960_v3  ;;  %v201_v3 = vld [vmem:[#allocation2 + $0x4e8] sm:$0xff] }
 0x455   :  { %v1432_v54 = vld [vmem:[#allocation2 + $0x2b60] sm:$0xff]  ;;  %4123 = vmatpush.msrb.mxu0 %v1160_v5  ;;  %v473_v5 = vld [vmem:[#allocation2 + $0xd68] sm:$0xff] }
 0x456   :  { %v1672_v17 = vld [vmem:[#allocation2 + $0x32e0] sm:$0xff]  ;;  %4142 = vmatpush.msrb.mxu1 %v1432_v54  ;;  %v5257_v54 = vpop.f32.mrf.mxu3 }
 0x457   :  { %v1944_v26 = vld [vmem:[#allocation2 + $0x3b60] sm:$0xff]  ;;  %4163 = vmatpush.msrb.mxu2 %v1672_v17  ;;  %v713_v17 = vld [vmem:[#allocation2 + $0x14e8] sm:$0xff] }
 0x458   :  { %v1144_v28 = vld [vmem:[#allocation2 + $0x2260] sm:$0xff]  ;;  %4182 = vmatpush.msrb.mxu3 %v1944_v26  ;;  %v985_v26 = vld [vmem:[#allocation2 + $0x1d68] sm:$0xff] }
 0x459   :  { %v1416_v30 = vld [vmem:[#allocation2 + $0x2ae0] sm:$0xff]  ;;  %4124 = vmatpush.msrb.mxu0 %v1144_v28  ;;  %v5259_v28 = vpop.f32.mrf.mxu0 }
 0x45a   :  { %v1656_v62 = vld [vmem:[#allocation2 + $0x3260] sm:$0xff]  ;;  %4143 = vmatpush.msrb.mxu1 %v1416_v30  ;;  %v185_v30 = vld [vmem:[#allocation2 + $0x468] sm:$0xff] }
 0x45b   :  { %v1928_v23 = vld [vmem:[#allocation2 + $0x3ae0] sm:$0xff]  ;;  %4164 = vmatpush.msrb.mxu2 %v1656_v62  ;;  %v457_v62 = vld [vmem:[#allocation2 + $0xce8] sm:$0xff] }
 0x45c   :  { %v1128_v43 = vld [vmem:[#allocation2 + $0x21e0] sm:$0xff]  ;;  %4183 = vmatpush.msrb.mxu3 %v1928_v23  ;;  %v697_v23 = vld [vmem:[#allocation2 + $0x1468] sm:$0xff] }
 0x45d   :  { %v1400_v13 = vld [vmem:[#allocation2 + $0x2a60] sm:$0xff]  ;;  %4125 = vmatpush.msrb.mxu0 %v1128_v43  ;;  %v969_v43 = vld [vmem:[#allocation2 + $0x1ce8] sm:$0xff] }
 0x45e   :  { %v1640_v34 = vld [vmem:[#allocation2 + $0x31e0] sm:$0xff]  ;;  %4144 = vmatpush.msrb.mxu1 %v1400_v13  ;;  %v169_v13 = vld [vmem:[#allocation2 + $0x3e8] sm:$0xff] }
 0x45f   :  { %v1912_v22 = vld [vmem:[#allocation2 + $0x3a60] sm:$0xff]  ;;  %4165 = vmatpush.msrb.mxu2 %v1640_v34  ;;  %v441_v34 = vld [vmem:[#allocation2 + $0xc68] sm:$0xff] }
 0x460   :  { %v1112_v40 = vld [vmem:[#allocation2 + $0x2160] sm:$0xff]  ;;  %4184 = vmatpush.msrb.mxu3 %v1912_v22  ;;  %v5261_v22 = vpop.f32.mrf.mxu1 }
 0x461   :  { %v1384_v4 = vld [vmem:[#allocation2 + $0x29e0] sm:$0xff]  ;;  %4126 = vmatpush.msrb.mxu0 %v1112_v40  ;;  %v681_v40 = vld [vmem:[#allocation2 + $0x13e8] sm:$0xff] }
 0x462   :  { %v1624_v49 = vld [vmem:[#allocation2 + $0x3160] sm:$0xff]  ;;  %4145 = vmatpush.msrb.mxu1 %v1384_v4  ;;  %v953_v4 = vld [vmem:[#allocation2 + $0x1c68] sm:$0xff] }
 0x463   :  { %v1896_v7 = vld [vmem:[#allocation2 + $0x39e0] sm:$0xff]  ;;  %4166 = vmatpush.msrb.mxu2 %v1624_v49  ;;  %v5263_v49 = vpop.f32.mrf.mxu2 }
 0x464   :  { %v1096_v39 = vld [vmem:[#allocation2 + $0x20e0] sm:$0xff]  ;;  %4185 = vmatpush.msrb.mxu3 %v1896_v7  ;;  %v153_v7 = vld [vmem:[#allocation2 + $0x368] sm:$0xff] }
 0x465   :  { %v1368_v38 = vld [vmem:[#allocation2 + $0x2960] sm:$0xff]  ;;  %4127 = vmatpush.msrb.mxu0 %v1096_v39  ;;  %v425_v39 = vld [vmem:[#allocation2 + $0xbe8] sm:$0xff] }
 0x466   :  { %v1608_v14 = vld [vmem:[#allocation2 + $0x30e0] sm:$0xff]  ;;  %4146 = vmatpush.msrb.mxu1 %v1368_v38  ;;  %v665_v38 = vld [vmem:[#allocation2 + $0x1368] sm:$0xff] }
 0x467   :  { %v1880_v16 = vld [vmem:[#allocation2 + $0x3960] sm:$0xff]  ;;  %4167 = vmatpush.msrb.mxu2 %v1608_v14  ;;  %v937_v14 = vld [vmem:[#allocation2 + $0x1be8] sm:$0xff] }
 0x468   :  { %v1080_v36 = vld [vmem:[#allocation2 + $0x2060] sm:$0xff]  ;;  %4186 = vmatpush.msrb.mxu3 %v1880_v16  ;;  %v137_v16 = vld [vmem:[#allocation2 + $0x2e8] sm:$0xff] }
 0x469   :  { %v1352_v31 = vld [vmem:[#allocation2 + $0x28e0] sm:$0xff]  ;;  %4128 = vmatpush.msrb.mxu0 %v1080_v36  ;;  %v409_v36 = vld [vmem:[#allocation2 + $0xb68] sm:$0xff] }
 0x46a   :  { %v1592_v46 = vld [vmem:[#allocation2 + $0x3060] sm:$0xff]  ;;  %4147 = vmatpush.msrb.mxu1 %v1352_v31  ;;  %4129 = vmatmul.f32.vlgmr.msrb.gmra.mxu0 %v5246_v37  ;;  %v5265_v31 = vpop.f32.mrf.mxu3 }
 0x46b   :  { %v1864_v63 = vld [vmem:[#allocation2 + $0x38e0] sm:$0xff]  ;;  %4168 = vmatpush.msrb.mxu2 %v1592_v46  ;;  %4193 = vmatpush.msra.mxu0 %v297_v1  ;;  %v649_v46 = vld [vmem:[#allocation2 + $0x12e8] sm:$0xff] }
 0x46c   :  { %v1336_v21 = vld [vmem:[#allocation2 + $0x2860] sm:$0xff]  ;;  %4187 = vmatpush.msrb.mxu3 %v1864_v63  ;;  %4169 = vmatmul.f32.vlgmr.msrb.gmra.mxu2 %v5241_v15  ;;  %v921_v63 = vld [vmem:[#allocation2 + $0x1b68] sm:$0xff] }
 0x46d   :  { %v1848_v24 = vld [vmem:[#allocation2 + $0x3860] sm:$0xff]  ;;  %4233 = vmatpush.msra.mxu2 %v809_v60  ;;  %4148 = vmatpush.msrb.mxu1 %v1336_v21  ;;  %v121_v1 = vld [vmem:[#allocation2 + $0x268] sm:$0xff] }
 0x46e   :  { %4188 = vmatpush.msrb.mxu3 %v1848_v24  ;;  %v5234_v61 = vld.sshfl [vmem:[#allocation1 + $0x8] sm:$0xff pattern:$0x73625140]  ;;  %4194 = vmatpush.msra.mxu0 %v281_v56  ;;  %v393_v60 = vld [vmem:[#allocation2 + $0xae8] sm:$0xff]  ;;  %v5267_v56 = vpop.f32.mrf.mxu0 }
 0x46f   :  { %4069 = vmatmul.f32.vlgmr.msra.gmra.mxu1 %v5234_v61  ;;  %4234 = vmatpush.msra.mxu2 %v793_v48  ;;  %v5254_v10 = vld.sshfl [vmem:[#allocation1 + $0x28] sm:$0xff pattern:$0x73625140]  ;;  %v633_v21 = vld [vmem:[#allocation2 + $0x1268] sm:$0xff] }
 0x470   :  { %4213 = vmatpush.msra.mxu1 %v553_v20  ;;  %4253 = vmatpush.msra.mxu3 %v1065_v32  ;;  %v905_v24 = vld [vmem:[#allocation2 + $0x1ae8] sm:$0xff] }
 0x471   :  { %4195 = vmatpush.msra.mxu0 %v265_v47  ;;  %4235 = vmatpush.msra.mxu2 %v777_v29  ;;  %v105_v20 = vld [vmem:[#allocation2 + $0x1e8] sm:$0xff] }
 0x472   :  { %4214 = vmatpush.msra.mxu1 %v537_v50  ;;  %4254 = vmatpush.msra.mxu3 %v1049_v0  ;;  %v377_v48 = vld [vmem:[#allocation2 + $0xa68] sm:$0xff]  ;;  %v5269_v0 = vpop.f32.mrf.mxu1 }
 0x473   :  { %4196 = vmatpush.msra.mxu0 %v249_v25  ;;  %4236 = vmatpush.msra.mxu2 %v761_v55  ;;  %v617_v32 = vld [vmem:[#allocation2 + $0x11e8] sm:$0xff]  ;;  %v5271_v55 = vpop.f32.mrf.mxu2 }
 0x474   :  { %4215 = vmatpush.msra.mxu1 %v521_v9  ;;  %4255 = vmatpush.msra.mxu3 %v1033_v57  ;;  %v889_v47 = vld [vmem:[#allocation2 + $0x1a68] sm:$0xff] }
 0x475   :  { %4189 = vmatmul.f32.vlgmr.msrb.gmra.mxu3 %v5251_v19  ;;  %4197 = vmatpush.msra.mxu0 %v233_v52  ;;  %v89_v50 = vld [vmem:[#allocation2 + $0x168] sm:$0xff] }
 0x476   :  { %4216 = vmatpush.msra.mxu1 %v505_v33  ;;  %4237 = vmatpush.msra.mxu2 %v745_v35  ;;  %v361_v29 = vld [vmem:[#allocation2 + $0x9e8] sm:$0xff] }
 0x477   :  { %4256 = vmatpush.msra.mxu3 %v1017_v6  ;;  %4149 = vmatmul.f32.vlgmr.msrb.gmra.mxu1 %v5254_v10  ;;  %v601_v25 = vld [vmem:[#allocation2 + $0x1168] sm:$0xff] }
 0x478   :  { %4198 = vmatpush.msra.mxu0 %v217_v51  ;;  %4217 = vmatpush.msra.mxu1 %v489_v44  ;;  %v873_v9 = vld [vmem:[#allocation2 + $0x19e8] sm:$0xff]  ;;  %v5273_v44 = vpop.f32.mrf.mxu3 }
 0x479   :  { %4238 = vmatpush.msra.mxu2 %v729_v2  ;;  %4257 = vmatpush.msra.mxu3 %v1001_v45  ;;  %v73_v57 = vld [vmem:[#allocation2 + $0xe8] sm:$0xff] }
 0x47a   :  { %4199 = vmatpush.msra.mxu0 %v201_v3  ;;  %4218 = vmatpush.msra.mxu1 %v473_v5  ;;  %v345_v52 = vld [vmem:[#allocation2 + $0x968] sm:$0xff]  ;;  %v3730_v3 = vpop.f32.mrf.mxu0 }
 0x47b   :  { %4239 = vmatpush.msra.mxu2 %v713_v17  ;;  %4258 = vmatpush.msra.mxu3 %v985_v26  ;;  %v585_v33 = vld [vmem:[#allocation2 + $0x10e8] sm:$0xff] }
 0x47c   :  { %4200 = vmatpush.msra.mxu0 %v185_v30  ;;  %4219 = vmatpush.msra.mxu1 %v457_v62  ;;  %v857_v35 = vld [vmem:[#allocation2 + $0x1968] sm:$0xff] }
 0x47d   :  { %4240 = vmatpush.msra.mxu2 %v697_v23  ;;  %4259 = vmatpush.msra.mxu3 %v969_v43  ;;  %v57_v6 = vld [vmem:[#allocation2 + $0x68] sm:$0xff]  ;;  %v3750_v43 = vpop.f32.mrf.mxu1 }
 0x47e   :  { %4201 = vmatpush.msra.mxu0 %v169_v13  ;;  %4220 = vmatpush.msra.mxu1 %v441_v34  ;;  %v329_v51 = vld [vmem:[#allocation2 + $0x8e8] sm:$0xff] }
 0x47f   :  { %4241 = vmatpush.msra.mxu2 %v681_v40  ;;  %4260 = vmatpush.msra.mxu3 %v953_v4  ;;  %v569_v2 = vld [vmem:[#allocation2 + $0x1068] sm:$0xff]  ;;  %v3770_v40 = vpop.f32.mrf.mxu2 }
 0x480   :  { %4202 = vmatpush.msra.mxu0 %v153_v7  ;;  %4221 = vmatpush.msra.mxu1 %v425_v39  ;;  %v841_v45 = vld [vmem:[#allocation2 + $0x18e8] sm:$0xff] }
 0x481   :  { %4242 = vmatpush.msra.mxu2 %v665_v38  ;;  %4261 = vmatpush.msra.mxu3 %v937_v14  ;;  %v1321_v5 = vld [vmem:[#allocation2 + $0x27e8] sm:$0xff] }
 0x482   :  { %4203 = vmatpush.msra.mxu0 %v137_v16  ;;  %4222 = vmatpush.msra.mxu1 %v409_v36  ;;  %v1833_v17 = vld [vmem:[#allocation2 + $0x37e8] sm:$0xff]  ;;  %v3790_v36 = vpop.f32.mrf.mxu3 }
 0x483   :  { %4243 = vmatpush.msra.mxu2 %v649_v46  ;;  %4262 = vmatpush.msra.mxu3 %v921_v63  ;;  %v313_v26 = vld [vmem:[#allocation2 + $0x868] sm:$0xff] }
 0x484   :  { %4204 = vmatpush.msra.mxu0 %v121_v1  ;;  %4223 = vmatpush.msra.mxu1 %v393_v60  ;;  %v825_v30 = vld [vmem:[#allocation2 + $0x1868] sm:$0xff]  ;;  %v3591_v1 = vadd.f32 %v5261_v22, %v5259_v28 }
 0x485   :  { %4244 = vmatpush.msra.mxu2 %v633_v21  ;;  %4263 = vmatpush.msra.mxu3 %v905_v24  ;;  %v1305_v62 = vld [vmem:[#allocation2 + $0x2768] sm:$0xff] }
 0x486   :  { %4205 = vmatpush.msra.mxu0 %v105_v20  ;;  %4224 = vmatpush.msra.mxu1 %v377_v48  ;;  %v1577_v23 = vld [vmem:[#allocation2 + $0x2fe8] sm:$0xff]  ;;  %v3751_v48 = vadd.f32 %v3750_v43, %v3730_v3  ;;  %v3611_v28 = vadd.f32 %v5263_v49, %v3591_v1 }
 0x487   :  { %4245 = vmatpush.msra.mxu2 %v617_v32  ;;  %4264 = vmatpush.msra.mxu3 %v889_v47  ;;  %v1817_v13 = vld [vmem:[#allocation2 + $0x3768] sm:$0xff]  ;;  %v3810_v32 = vpop.f32.mrf.mxu0 }
 0x488   :  { %4206 = vmatpush.msra.mxu0 %v89_v50  ;;  %4225 = vmatpush.msra.mxu1 %v361_v29  ;;  %v2089_v34 = vld [vmem:[#allocation2 + $0x3fe8] sm:$0xff] }
 0x489   :  { %4246 = vmatpush.msra.mxu2 %v601_v25  ;;  %4265 = vmatpush.msra.mxu3 %v873_v9  ;;  %v1289_v4 = vld [vmem:[#allocation2 + $0x26e8] sm:$0xff] }
 0x48a   :  { %4207 = vmatpush.msra.mxu0 %v73_v57  ;;  %4226 = vmatpush.msra.mxu1 %v345_v52  ;;  %v1561_v7 = vld [vmem:[#allocation2 + $0x2f68] sm:$0xff]  ;;  %v5278_v57 = vpop.f32.mrf.mxu1 }
 0x48b   :  { %4247 = vmatpush.msra.mxu2 %v585_v33  ;;  %4266 = vmatpush.msra.mxu3 %v857_v35  ;;  %v1801_v39 = vld [vmem:[#allocation2 + $0x36e8] sm:$0xff]  ;;  %v3431_v35 = vadd.f32 %v5224_v27, %v5219_v53 }
 0x48c   :  { %4208 = vmatpush.msra.mxu0 %v57_v6  ;;  %4227 = vmatpush.msra.mxu1 %v329_v51  ;;  %v2073_v38 = vld [vmem:[#allocation2 + $0x3f68] sm:$0xff]  ;;  %v3771_v6 = vadd.f32 %v3770_v40, %v3751_v48  ;;  %v5282_v51 = vpop.f32.mrf.mxu2 }
 0x48d   :  { %4248 = vmatpush.msra.mxu2 %v569_v2  ;;  %4267 = vmatpush.msra.mxu3 %v841_v45  ;;  %v1273_v14 = vld [vmem:[#allocation2 + $0x2668] sm:$0xff] }
 0x48e   :  { %4273 = vmatpush.msrb.mxu0 %v1321_v5  ;;  %4228 = vmatpush.msra.mxu1 %v313_v26  ;;  %v1545_v16 = vld [vmem:[#allocation2 + $0x2ee8] sm:$0xff]  ;;  %v3631_v5 = vadd.f32 %v5265_v31, %v3611_v28 }
 0x48f   :  { %4313 = vmatpush.msrb.mxu2 %v1833_v17  ;;  %4268 = vmatpush.msra.mxu3 %v825_v30  ;;  %v1785_v46 = vld [vmem:[#allocation2 + $0x3668] sm:$0xff]  ;;  %v5285_v30 = vpop.f32.mrf.mxu3 }
 0x490   :  { %4274 = vmatpush.msrb.mxu0 %v1305_v62  ;;  %4293 = vmatpush.msrb.mxu1 %v1577_v23  ;;  %v2057_v63 = vld [vmem:[#allocation2 + $0x3ee8] sm:$0xff]  ;;  %v3451_v62 = vadd.f32 %v5229_v42, %v3431_v35  ;;  %v3791_v23 = vadd.f32 %v3790_v36, %v3771_v6 }
 0x491   :  { %4314 = vmatpush.msrb.mxu2 %v1817_v13  ;;  %4333 = vmatpush.msrb.mxu3 %v2089_v34  ;;  %v1257_v60 = vld [vmem:[#allocation2 + $0x25e8] sm:$0xff]  ;;  %v3890_v34 = vpop.f32.mrf.mxu0 }
 0x492   :  { %4275 = vmatpush.msrb.mxu0 %v1289_v4  ;;  %4294 = vmatpush.msrb.mxu1 %v1561_v7  ;;  %v1529_v21 = vld [vmem:[#allocation2 + $0x2e68] sm:$0xff]  ;;  %v3651_v4 = vadd.f32 %v5267_v56, %v3631_v5  ;;  %v3811_v36 = vadd.f32 %v3810_v32, %v3791_v23 }
 0x493   :  { %4315 = vmatpush.msrb.mxu2 %v1801_v39  ;;  %4334 = vmatpush.msrb.mxu3 %v2073_v38  ;;  %v1769_v24 = vld [vmem:[#allocation2 + $0x35e8] sm:$0xff] }
 0x494   :  { %4276 = vmatpush.msrb.mxu0 %v1273_v14  ;;  %4295 = vmatpush.msrb.mxu1 %v1545_v16  ;;  %v2041_v20 = vld [vmem:[#allocation2 + $0x3e68] sm:$0xff]  ;;  %v3910_v14 = vpop.f32.mrf.mxu1  ;;  %v3471_v16 = vadd.f32 %v5237_v58, %v3451_v62 }
 0x495   :  { %4316 = vmatpush.msrb.mxu2 %v1785_v46  ;;  %4335 = vmatpush.msrb.mxu3 %v2057_v63  ;;  %v1241_v47 = vld [vmem:[#allocation2 + $0x2568] sm:$0xff]  ;;  %v3911_v1 = vadd.f32 %v3910_v14, %v3890_v34 }
 0x496   :  { %v1513_v50 = vld [vmem:[#allocation2 + $0x2de8] sm:$0xff]  ;;  %4277 = vmatpush.msrb.mxu0 %v1257_v60  ;;  %4296 = vmatpush.msrb.mxu1 %v1529_v21  ;;  %v3930_v60 = vpop.f32.mrf.mxu2 }
 0x497   :  { %v1753_v29 = vld [vmem:[#allocation2 + $0x3568] sm:$0xff]  ;;  %4317 = vmatpush.msrb.mxu2 %v1769_v24  ;;  %4336 = vmatpush.msrb.mxu3 %v2041_v20  ;;  %v3671_v24 = vadd.f32 %v5269_v0, %v3651_v4  ;;  %v3931_v48 = vadd.f32 %v3930_v60, %v3911_v1  ;;  %v794_v4 = vld [vmem:[#allocation2 + $0x1770] sm:$0xff] }
 0x498   :  { %v2025_v25 = vld [vmem:[#allocation2 + $0x3de8] sm:$0xff]  ;;  %4278 = vmatpush.msrb.mxu0 %v1241_v47  ;;  %4297 = vmatpush.msrb.mxu1 %v1513_v50  ;;  %v3950_v47 = vpop.f32.mrf.mxu3  ;;  %v3491_v50 = vadd.f32 %v5239_v12, %v3471_v16  ;;  %v1050_v16 = vld [vmem:[#allocation2 + $0x1f70] sm:$0xff] }
 0x499   :  { %v1225_v22 = vld [vmem:[#allocation2 + $0x24e8] sm:$0xff]  ;;  %4318 = vmatpush.msrb.mxu2 %v1753_v29  ;;  %4337 = vmatpush.msrb.mxu3 %v2025_v25  ;;  %v3831_v29 = vadd.f32 %v5278_v57, %v3811_v36  ;;  %v3951_v28 = vadd.f32 %v3950_v47, %v3931_v48  ;;  %v234_v1 = vld [vmem:[#allocation2 + $0x5f0] sm:$0xff] }
 0x49a   :  { %v1497_v9 = vld [vmem:[#allocation2 + $0x2d68] sm:$0xff]  ;;  %4279 = vmatpush.msrb.mxu0 %v1225_v22  ;;  %4249 = vmatmul.f32.vlgmr.msra.gmra.mxu2 %v5221_v8  ;;  %v3691_v22 = vadd.f32 %v5271_v55, %v3671_v24  ;;  %v3511_v35 = vadd.f32 %v5244_v18, %v3491_v50  ;;  %v506_v60 = vld [vmem:[#allocation2 + $0xe70] sm:$0xff] }
 0x49b   :  { %v1737_v52 = vld [vmem:[#allocation2 + $0x34e8] sm:$0xff]  ;;  %4298 = vmatpush.msrb.mxu1 %v1497_v9  ;;  %4209 = vmatmul.f32.vlgmr.msra.gmra.mxu0 %v5226_v41  ;;  %v3851_v6 = vadd.f32 %v5282_v51, %v3831_v29  ;;  %v218_v24 = vld [vmem:[#allocation2 + $0x570] sm:$0xff] }
 0x49c   :  { %v2009_v33 = vld [vmem:[#allocation2 + $0x3d68] sm:$0xff]  ;;  %4319 = vmatpush.msrb.mxu2 %v1737_v52  ;;  %4269 = vmatmul.f32.vlgmr.msra.gmra.mxu3 %v5231_v59  ;;  %v1002_v48 = vld [vmem:[#allocation2 + $0x1df0] sm:$0xff] }
 0x49d   :  { %v1209_v2 = vld [vmem:[#allocation2 + $0x2468] sm:$0xff]  ;;  %4338 = vmatpush.msrb.mxu3 %v2009_v33  ;;  %v3970_v33 = vpop.f32.mrf.mxu0  ;;  %4229 = vmatmul.f32.vlgmr.msra.gmra.mxu1 %v5234_v61  ;;  %v714_v47 = vld [vmem:[#allocation2 + $0x14f0] sm:$0xff] }
 0x49e   :  { %v1481_v49 = vld [vmem:[#allocation2 + $0x2ce8] sm:$0xff]  ;;  %4280 = vmatpush.msrb.mxu0 %v1209_v2  ;;  %v3971_v57 = vadd.f32 %v3970_v33, %v3951_v28  ;;  %v986_v50 = vld [vmem:[#allocation2 + $0x1d70] sm:$0xff] }
 0x49f   :  { %v1721_v45 = vld [vmem:[#allocation2 + $0x3468] sm:$0xff]  ;;  %4299 = vmatpush.msrb.mxu1 %v1481_v49  ;;  %v186_v29 = vld [vmem:[#allocation2 + $0x470] sm:$0xff] }
 0x4a0   :  { %v1993_v3 = vld [vmem:[#allocation2 + $0x3ce8] sm:$0xff]  ;;  %4320 = vmatpush.msrb.mxu2 %v1721_v45  ;;  %v3990_v45 = vpop.f32.mrf.mxu1  ;;  %v4030_v23 = vpop.f32.mrf.mxu3  ;;  %v698_v28 = vld [vmem:[#allocation2 + $0x1470] sm:$0xff] }
 0x4a1   :  { %v1193_v17 = vld [vmem:[#allocation2 + $0x23e8] sm:$0xff]  ;;  %4339 = vmatpush.msrb.mxu3 %v1993_v3  ;;  %v3711_v3 = vadd.f32 %v5273_v44, %v3691_v22  ;;  %v3991_v18 = vadd.f32 %v3990_v45, %v3971_v57  ;;  %v810_v44 = vld [vmem:[#allocation2 + $0x17f0] sm:$0xff] }
 0x4a2   :  { %v1465_v26 = vld [vmem:[#allocation2 + $0x2c68] sm:$0xff]  ;;  %4281 = vmatpush.msrb.mxu0 %v1193_v17  ;;  %v4010_v17 = vpop.f32.mrf.mxu2  ;;  %v170_v22 = vld [vmem:[#allocation2 + $0x3f0] sm:$0xff] }
 0x4a3   :  { %v1705_v53 = vld [vmem:[#allocation2 + $0x33e8] sm:$0xff]  ;;  %4300 = vmatpush.msrb.mxu1 %v1465_v26  ;;  %v3531_v26 = vadd.f32 %v5249_v11, %v3511_v35  ;;  %v4011_v62 = vadd.f32 %v4010_v17, %v3991_v18  ;;  %v282_v11 = vld [vmem:[#allocation2 + $0x770] sm:$0xff] }
 0x4a4   :  { %v1977_v27 = vld [vmem:[#allocation2 + $0x3c68] sm:$0xff]  ;;  %4321 = vmatpush.msrb.mxu2 %v1705_v53  ;;  %v3871_v53 = vadd.f32 %v5285_v30, %v3851_v6  ;;  %v954_v33 = vld [vmem:[#allocation2 + $0x1c70] sm:$0xff] }
 0x4a5   :  { %v1177_v43 = vld [vmem:[#allocation2 + $0x2368] sm:$0xff]  ;;  %4340 = vmatpush.msrb.mxu3 %v1977_v27  ;;  %v298_v27 = vld [vmem:[#allocation2 + $0x7f0] sm:$0xff]  ;;  %v4031_v34 = vadd.f32 %v4030_v23, %v4011_v62  ;;  %v3551_v30 = vadd.f32 %v5257_v54, %v3531_v26 }
 0x4a6   :  { %v1449_v13 = vld [vmem:[#allocation2 + $0x2be8] sm:$0xff]  ;;  %4282 = vmatpush.msrb.mxu0 %v1177_v43  ;;  %v4695_v43 = vrot.slane %v3711_v3, 6  ;;  %v778_v54 = vld [vmem:[#allocation2 + $0x16f0] sm:$0xff] }
 0x4a7   :  { %v1689_v31 = vld [vmem:[#allocation2 + $0x3368] sm:$0xff]  ;;  %4301 = vmatpush.msrb.mxu1 %v1449_v13  ;;  %v426_v57 = vld [vmem:[#allocation2 + $0xbf0] sm:$0xff] }
 0x4a8   :  { %v1961_v40 = vld [vmem:[#allocation2 + $0x3be8] sm:$0xff]  ;;  %4322 = vmatpush.msrb.mxu2 %v1689_v31  ;;  %v4696_v31 = vrot.slane %v3871_v53, 4  ;;  %v666_v35 = vld [vmem:[#allocation2 + $0x1370] sm:$0xff] }
 0x4a9   :  { %v1161_v7 = vld [vmem:[#allocation2 + $0x22e8] sm:$0xff]  ;;  %4341 = vmatpush.msrb.mxu3 %v1961_v40  ;;  %v554_v40 = vld [vmem:[#allocation2 + $0xff0] sm:$0xff] }
 0x4aa   :  { %v1433_v39 = vld [vmem:[#allocation2 + $0x2b68] sm:$0xff]  ;;  %4283 = vmatpush.msrb.mxu0 %v1161_v7  ;;  %v4697_v7 = vrot.slane %v4031_v34, 2  ;;  %v938_v6 = vld [vmem:[#allocation2 + $0x1bf0] sm:$0xff] }
 0x4ab   :  { %v1673_v38 = vld [vmem:[#allocation2 + $0x32e8] sm:$0xff]  ;;  %4302 = vmatpush.msrb.mxu1 %v1433_v39  ;;  %v1066_v39 = vld [vmem:[#allocation2 + $0x1ff0] sm:$0xff] }
 0x4ac   :  { %v1945_v42 = vld [vmem:[#allocation2 + $0x3b68] sm:$0xff]  ;;  %4323 = vmatpush.msrb.mxu2 %v1673_v38  ;;  %v4710_v38 = vsel %vm4701_vm0, %v3551_v30, %v4695_v43  ;;  %v4711_v14 = vsel %vm4703_vm1, %v4696_v31, %v4697_v7  ;;  %v122_v45 = vld [vmem:[#allocation2 + $0x270] sm:$0xff] }
 0x4ad   :  { %v1145_v46 = vld [vmem:[#allocation2 + $0x2268] sm:$0xff]  ;;  %4342 = vmatpush.msrb.mxu3 %v1945_v42  ;;  %v538_v42 = vld [vmem:[#allocation2 + $0xf70] sm:$0xff]  ;;  %v4712_v36 = vsel %vm4705_vm2, %v4710_v38, %v4711_v14 }
 0x4ae   :  { %v1417_v63 = vld [vmem:[#allocation2 + $0x2ae8] sm:$0xff]  ;;  %4284 = vmatpush.msrb.mxu0 %v1145_v46  ;;  %v522_v46 = vld [vmem:[#allocation2 + $0xef0] sm:$0xff]  ;;  %4722 = vst [vmem:[#allocation7 + $0x10] sm:$0xff] %v4712_v36 }
 0x4af   :  { %v1657_v56 = vld [vmem:[#allocation2 + $0x3268] sm:$0xff]  ;;  %4303 = vmatpush.msrb.mxu1 %v1417_v63  ;;  %v1034_v63 = vld [vmem:[#allocation2 + $0x1ef0] sm:$0xff] }
 0x4b0   :  { %v1929_v21 = vld [vmem:[#allocation2 + $0x3ae8] sm:$0xff]  ;;  %4324 = vmatpush.msrb.mxu2 %v1657_v56  ;;  %v746_v56 = vld [vmem:[#allocation2 + $0x15f0] sm:$0xff] }
 0x4b1   :  { %v1129_v20 = vld [vmem:[#allocation2 + $0x21e8] sm:$0xff]  ;;  %4343 = vmatpush.msrb.mxu3 %v1929_v21  ;;  %v1018_v21 = vld [vmem:[#allocation2 + $0x1e70] sm:$0xff] }
 0x4b2   :  { %v1401_v58 = vld [vmem:[#allocation2 + $0x2a68] sm:$0xff]  ;;  %4285 = vmatpush.msrb.mxu0 %v1129_v20  ;;  %v490_v20 = vld [vmem:[#allocation2 + $0xdf0] sm:$0xff] }
 0x4b3   :  { %v1641_v32 = vld [vmem:[#allocation2 + $0x31e8] sm:$0xff]  ;;  %4304 = vmatpush.msrb.mxu1 %v1401_v58  ;;  %v202_v58 = vld [vmem:[#allocation2 + $0x4f0] sm:$0xff] }
 0x4b4   :  { %v1913_v25 = vld [vmem:[#allocation2 + $0x3a68] sm:$0xff]  ;;  %4325 = vmatpush.msrb.mxu2 %v1641_v32  ;;  %v474_v32 = vld [vmem:[#allocation2 + $0xd70] sm:$0xff] }
 0x4b5   :  { %v1113_v0 = vld [vmem:[#allocation2 + $0x2168] sm:$0xff]  ;;  %4344 = vmatpush.msrb.mxu3 %v1913_v25  ;;  %v458_v25 = vld [vmem:[#allocation2 + $0xcf0] sm:$0xff] }
 0x4b6   :  { %v1385_v9 = vld [vmem:[#allocation2 + $0x29e8] sm:$0xff]  ;;  %4286 = vmatpush.msrb.mxu0 %v1113_v0  ;;  %v970_v0 = vld [vmem:[#allocation2 + $0x1cf0] sm:$0xff] }
 0x4b7   :  { %v1625_v52 = vld [vmem:[#allocation2 + $0x3168] sm:$0xff]  ;;  %4305 = vmatpush.msrb.mxu1 %v1385_v9  ;;  %v442_v9 = vld [vmem:[#allocation2 + $0xc70] sm:$0xff] }
 0x4b8   :  { %v1897_v12 = vld [vmem:[#allocation2 + $0x39e8] sm:$0xff]  ;;  %4326 = vmatpush.msrb.mxu2 %v1625_v52  ;;  %v682_v52 = vld [vmem:[#allocation2 + $0x13f0] sm:$0xff] }
 0x4b9   :  { %v1097_v8 = vld [vmem:[#allocation2 + $0x20e8] sm:$0xff]  ;;  %4345 = vmatpush.msrb.mxu3 %v1897_v12  ;;  %v154_v12 = vld [vmem:[#allocation2 + $0x370] sm:$0xff] }
 0x4ba   :  { %v1369_v2 = vld [vmem:[#allocation2 + $0x2968] sm:$0xff]  ;;  %4287 = vmatpush.msrb.mxu0 %v1097_v8  ;;  %v138_v8 = vld [vmem:[#allocation2 + $0x2f0] sm:$0xff] }
 0x4bb   :  { %v1609_v55 = vld [vmem:[#allocation2 + $0x30e8] sm:$0xff]  ;;  %4306 = vmatpush.msrb.mxu1 %v1369_v2  ;;  %v410_v2 = vld [vmem:[#allocation2 + $0xb70] sm:$0xff] }
 0x4bc   :  { %v1881_v49 = vld [vmem:[#allocation2 + $0x3968] sm:$0xff]  ;;  %4327 = vmatpush.msrb.mxu2 %v1609_v55  ;;  %v650_v55 = vld [vmem:[#allocation2 + $0x12f0] sm:$0xff] }
 0x4bd   :  { %v1081_v41 = vld [vmem:[#allocation2 + $0x2068] sm:$0xff]  ;;  %4346 = vmatpush.msrb.mxu3 %v1881_v49  ;;  %v922_v49 = vld [vmem:[#allocation2 + $0x1b70] sm:$0xff] }
 0x4be   :  { %v1353_v5 = vld [vmem:[#allocation2 + $0x28e8] sm:$0xff]  ;;  %4288 = vmatpush.msrb.mxu0 %v1081_v41  ;;  %v394_v3 = vld [vmem:[#allocation2 + $0xaf0] sm:$0xff] }
 0x4bf   :  { %v1593_v59 = vld [vmem:[#allocation2 + $0x3068] sm:$0xff]  ;;  %4307 = vmatpush.msrb.mxu1 %v1353_v5  ;;  %4289 = vmatmul.f32.vlgmr.msrb.gmra.mxu0 %v5246_v37  ;;  %v250_v37 = vld [vmem:[#allocation2 + $0x670] sm:$0xff] }
 0x4c0   :  { %v1865_v51 = vld [vmem:[#allocation2 + $0x38e8] sm:$0xff]  ;;  %4328 = vmatpush.msrb.mxu2 %v1593_v59  ;;  %4353 = vmatpush.msra.mxu0 %v298_v27  ;;  %v634_v41 = vld [vmem:[#allocation2 + $0x1270] sm:$0xff] }
 0x4c1   :  { %v1337_v61 = vld [vmem:[#allocation2 + $0x2868] sm:$0xff]  ;;  %4347 = vmatpush.msrb.mxu3 %v1865_v51  ;;  %4329 = vmatmul.f32.vlgmr.msrb.gmra.mxu2 %v5241_v15  ;;  %v266_v15 = vld [vmem:[#allocation2 + $0x6f0] sm:$0xff] }
 0x4c2   :  { %v1849_v13 = vld [vmem:[#allocation2 + $0x3868] sm:$0xff]  ;;  %4393 = vmatpush.msra.mxu2 %v810_v44  ;;  %4308 = vmatpush.msrb.mxu1 %v1337_v61  ;;  %v906_v5 = vld [vmem:[#allocation2 + $0x1af0] sm:$0xff] }
 0x4c3   :  { %4348 = vmatpush.msrb.mxu3 %v1849_v13  ;;  %4354 = vmatpush.msra.mxu0 %v282_v11  ;;  %v106_v18 = vld [vmem:[#allocation2 + $0x1f0] sm:$0xff] }
 0x4c4   :  { %4349 = vmatmul.f32.vlgmr.msrb.gmra.mxu3 %v5251_v19  ;;  %4373 = vmatpush.msra.mxu1 %v554_v40  ;;  %v762_v19 = vld [vmem:[#allocation2 + $0x1670] sm:$0xff] }
 0x4c5   :  { %4394 = vmatpush.msra.mxu2 %v794_v4  ;;  %4413 = vmatpush.msra.mxu3 %v1066_v39  ;;  %v378_v17 = vld [vmem:[#allocation2 + $0xa70] sm:$0xff] }
 0x4c6   :  { %4309 = vmatmul.f32.vlgmr.msrb.gmra.mxu1 %v5254_v10  ;;  %4355 = vmatpush.msra.mxu0 %v266_v15  ;;  %v730_v10 = vld [vmem:[#allocation2 + $0x1570] sm:$0xff] }
 0x4c7   :  { %4374 = vmatpush.msra.mxu1 %v538_v42  ;;  %4395 = vmatpush.msra.mxu2 %v778_v54  ;;  %v618_v59 = vld [vmem:[#allocation2 + $0x11f0] sm:$0xff] }
 0x4c8   :  { %4414 = vmatpush.msra.mxu3 %v1050_v16  ;;  %4356 = vmatpush.msra.mxu0 %v250_v37  ;;  %v890_v51 = vld [vmem:[#allocation2 + $0x1a70] sm:$0xff] }
 0x4c9   :  { %4375 = vmatpush.msra.mxu1 %v522_v46  ;;  %4396 = vmatpush.msra.mxu2 %v762_v19  ;;  %v90_v26 = vld [vmem:[#allocation2 + $0x170] sm:$0xff] }
 0x4ca   :  { %4415 = vmatpush.msra.mxu3 %v1034_v63  ;;  %4357 = vmatpush.msra.mxu0 %v234_v1  ;;  %v362_v53 = vld [vmem:[#allocation2 + $0x9f0] sm:$0xff] }
 0x4cb   :  { %4376 = vmatpush.msra.mxu1 %v506_v60  ;;  %4397 = vmatpush.msra.mxu2 %v746_v56  ;;  %v602_v27 = vld [vmem:[#allocation2 + $0x1170] sm:$0xff] }
 0x4cc   :  { %4416 = vmatpush.msra.mxu3 %v1018_v21  ;;  %4358 = vmatpush.msra.mxu0 %v218_v24  ;;  %v874_v62 = vld [vmem:[#allocation2 + $0x19f0] sm:$0xff] }
 0x4cd   :  { %4377 = vmatpush.msra.mxu1 %v490_v20  ;;  %4398 = vmatpush.msra.mxu2 %v730_v10  ;;  %v74_v44 = vld [vmem:[#allocation2 + $0xf0] sm:$0xff] }
 0x4ce   :  { %4417 = vmatpush.msra.mxu3 %v1002_v48  ;;  %4359 = vmatpush.msra.mxu0 %v202_v58  ;;  %v346_v61 = vld [vmem:[#allocation2 + $0x970] sm:$0xff] }
 0x4cf   :  { %4378 = vmatpush.msra.mxu1 %v474_v32  ;;  %4399 = vmatpush.msra.mxu2 %v714_v47  ;;  %v586_v23 = vld [vmem:[#allocation2 + $0x10f0] sm:$0xff] }
 0x4d0   :  { %4418 = vmatpush.msra.mxu3 %v986_v50  ;;  %4360 = vmatpush.msra.mxu0 %v186_v29  ;;  %v858_v43 = vld [vmem:[#allocation2 + $0x1970] sm:$0xff] }
 0x4d1   :  { %4379 = vmatpush.msra.mxu1 %v458_v25  ;;  %4400 = vmatpush.msra.mxu2 %v698_v28  ;;  %v58_v13 = vld [vmem:[#allocation2 + $0x70] sm:$0xff] }
 0x4d2   :  { %4419 = vmatpush.msra.mxu3 %v970_v0  ;;  %4361 = vmatpush.msra.mxu0 %v170_v22  ;;  %v330_v34 = vld [vmem:[#allocation2 + $0x8f0] sm:$0xff] }
 0x4d3   :  { %4380 = vmatpush.msra.mxu1 %v442_v9  ;;  %4401 = vmatpush.msra.mxu2 %v682_v52  ;;  %v570_v11 = vld [vmem:[#allocation2 + $0x1070] sm:$0xff] }
 0x4d4   :  { %4420 = vmatpush.msra.mxu3 %v954_v33  ;;  %4362 = vmatpush.msra.mxu0 %v154_v12  ;;  %v842_v30 = vld [vmem:[#allocation2 + $0x18f0] sm:$0xff] }
 0x4d5   :  { %4381 = vmatpush.msra.mxu1 %v426_v57  ;;  %4402 = vmatpush.msra.mxu2 %v666_v35  ;;  %v1322_v31 = vld [vmem:[#allocation2 + $0x27f0] sm:$0xff] }
 0x4d6   :  { %4421 = vmatpush.msra.mxu3 %v938_v6  ;;  %4363 = vmatpush.msra.mxu0 %v138_v8  ;;  %v1834_v40 = vld [vmem:[#allocation2 + $0x37f0] sm:$0xff] }
 0x4d7   :  { %4382 = vmatpush.msra.mxu1 %v410_v2  ;;  %4403 = vmatpush.msra.mxu2 %v650_v55  ;;  %v314_v4 = vld [vmem:[#allocation2 + $0x870] sm:$0xff] }
 0x4d8   :  { %4422 = vmatpush.msra.mxu3 %v922_v49  ;;  %4364 = vmatpush.msra.mxu0 %v122_v45  ;;  %v826_v7 = vld [vmem:[#allocation2 + $0x1870] sm:$0xff] }
 0x4d9   :  { %4383 = vmatpush.msra.mxu1 %v394_v3  ;;  %4404 = vmatpush.msra.mxu2 %v634_v41  ;;  %v1306_v39 = vld [vmem:[#allocation2 + $0x2770] sm:$0xff] }
 0x4da   :  { %4423 = vmatpush.msra.mxu3 %v906_v5  ;;  %4365 = vmatpush.msra.mxu0 %v106_v18  ;;  %v1578_v38 = vld [vmem:[#allocation2 + $0x2ff0] sm:$0xff] }
 0x4db   :  { %4384 = vmatpush.msra.mxu1 %v378_v17  ;;  %4405 = vmatpush.msra.mxu2 %v618_v59  ;;  %v1818_v15 = vld [vmem:[#allocation2 + $0x3770] sm:$0xff] }
 0x4dc   :  { %4424 = vmatpush.msra.mxu3 %v890_v51  ;;  %4366 = vmatpush.msra.mxu0 %v90_v26  ;;  %v2090_v42 = vld [vmem:[#allocation2 + $0x3ff0] sm:$0xff] }
 0x4dd   :  { %4385 = vmatpush.msra.mxu1 %v362_v53  ;;  %4406 = vmatpush.msra.mxu2 %v602_v27  ;;  %v1290_v14 = vld [vmem:[#allocation2 + $0x26f0] sm:$0xff] }
 0x4de   :  { %4425 = vmatpush.msra.mxu3 %v874_v62  ;;  %4367 = vmatpush.msra.mxu0 %v74_v44  ;;  %v1562_v54 = vld [vmem:[#allocation2 + $0x2f70] sm:$0xff] }
 0x4df   :  { %4386 = vmatpush.msra.mxu1 %v346_v61  ;;  %4407 = vmatpush.msra.mxu2 %v586_v23  ;;  %v1802_v16 = vld [vmem:[#allocation2 + $0x36f0] sm:$0xff] }
 0x4e0   :  { %4426 = vmatpush.msra.mxu3 %v858_v43  ;;  %4368 = vmatpush.msra.mxu0 %v58_v13  ;;  %v2074_v36 = vld [vmem:[#allocation2 + $0x3f70] sm:$0xff] }
 0x4e1   :  { %4387 = vmatpush.msra.mxu1 %v330_v34  ;;  %4408 = vmatpush.msra.mxu2 %v570_v11  ;;  %v1274_v37 = vld [vmem:[#allocation2 + $0x2670] sm:$0xff] }
 0x4e2   :  { %4427 = vmatpush.msra.mxu3 %v842_v30  ;;  %4433 = vmatpush.msrb.mxu0 %v1322_v31  ;;  %v1546_v46 = vld [vmem:[#allocation2 + $0x2ef0] sm:$0xff]  ;;  %v5311_v31 = vld.sshfl [vmem:[#allocation1 + $0x10] sm:$0xff pattern:$0x73625140] }
 0x4e3   :  { %4473 = vmatpush.msrb.mxu2 %v1834_v40  ;;  %4388 = vmatpush.msra.mxu1 %v314_v4  ;;  %v1786_v19 = vld [vmem:[#allocation2 + $0x3670] sm:$0xff]  ;;  %v299_v40 = vld [vmem:[#allocation2 + $0x7f8] sm:$0xff] }
 0x4e4   :  { %4428 = vmatpush.msra.mxu3 %v826_v7  ;;  %4434 = vmatpush.msrb.mxu0 %v1306_v39  ;;  %v2058_v63 = vld [vmem:[#allocation2 + $0x3ef0] sm:$0xff]  ;;  %v811_v4 = vld [vmem:[#allocation2 + $0x17f8] sm:$0xff] }
 0x4e5   :  { %4453 = vmatpush.msrb.mxu1 %v1578_v38  ;;  %4474 = vmatpush.msrb.mxu2 %v1818_v15  ;;  %v1258_v1 = vld [vmem:[#allocation2 + $0x25f0] sm:$0xff]  ;;  %v5314_v39 = vld.sshfl [vmem:[#allocation1] sm:$0xff pattern:$0x73625140] }
 0x4e6   :  { %4493 = vmatpush.msrb.mxu3 %v2090_v42  ;;  %4435 = vmatpush.msrb.mxu0 %v1290_v14  ;;  %v1530_v60 = vld [vmem:[#allocation2 + $0x2e70] sm:$0xff]  ;;  %v283_v42 = vld [vmem:[#allocation2 + $0x778] sm:$0xff] }
 0x4e7   :  { %4454 = vmatpush.msrb.mxu1 %v1562_v54  ;;  %4475 = vmatpush.msrb.mxu2 %v1802_v16  ;;  %v1770_v56 = vld [vmem:[#allocation2 + $0x35f0] sm:$0xff]  ;;  %v555_v14 = vld [vmem:[#allocation2 + $0xff8] sm:$0xff] }
 0x4e8   :  { %4494 = vmatpush.msrb.mxu3 %v2074_v36  ;;  %4436 = vmatpush.msrb.mxu0 %v1274_v37  ;;  %v2042_v21 = vld [vmem:[#allocation2 + $0x3e70] sm:$0xff]  ;;  %v795_v54 = vld [vmem:[#allocation2 + $0x1778] sm:$0xff]  ;;  %v5320_v36 = vld.sshfl [vmem:[#allocation1 + $0x8] sm:$0xff pattern:$0x73625140] }
 0x4e9   :  { %4455 = vmatpush.msrb.mxu1 %v1546_v46  ;;  %4476 = vmatpush.msrb.mxu2 %v1786_v19  ;;  %v1242_v24 = vld [vmem:[#allocation2 + $0x2570] sm:$0xff]  ;;  %v1067_v16 = vld [vmem:[#allocation2 + $0x1ff8] sm:$0xff] }
 0x4ea   :  { %4495 = vmatpush.msrb.mxu3 %v2058_v63  ;;  %v1514_v20 = vld [vmem:[#allocation2 + $0x2df0] sm:$0xff]  ;;  %4437 = vmatpush.msrb.mxu0 %v1258_v1  ;;  %v267_v37 = vld [vmem:[#allocation2 + $0x6f8] sm:$0xff] }
 0x4eb   :  { %4456 = vmatpush.msrb.mxu1 %v1530_v60  ;;  %v1754_v10 = vld [vmem:[#allocation2 + $0x3570] sm:$0xff]  ;;  %4477 = vmatpush.msrb.mxu2 %v1770_v56  ;;  %v539_v46 = vld [vmem:[#allocation2 + $0xf78] sm:$0xff] }
 0x4ec   :  { %v2026_v48 = vld [vmem:[#allocation2 + $0x3df0] sm:$0xff]  ;;  %4496 = vmatpush.msrb.mxu3 %v2042_v21  ;;  %4438 = vmatpush.msrb.mxu0 %v1242_v24  ;;  %v779_v19 = vld [vmem:[#allocation2 + $0x16f8] sm:$0xff]  ;;  %v5323_v24 = vld.sshfl [vmem:[#allocation1 + $0x30] sm:$0xff pattern:$0x73625140] }
 0x4ed   :  { %v1226_v58 = vld [vmem:[#allocation2 + $0x24f0] sm:$0xff]  ;;  %4457 = vmatpush.msrb.mxu1 %v1514_v20  ;;  %4478 = vmatpush.msrb.mxu2 %v1754_v10  ;;  %v1051_v63 = vld [vmem:[#allocation2 + $0x1f78] sm:$0xff] }
 0x4ee   :  { %v1498_v32 = vld [vmem:[#allocation2 + $0x2d70] sm:$0xff]  ;;  %4497 = vmatpush.msrb.mxu3 %v2026_v48  ;;  %4439 = vmatpush.msrb.mxu0 %v1226_v58  ;;  %v251_v1 = vld [vmem:[#allocation2 + $0x678] sm:$0xff] }
 0x4ef   :  { %v1738_v47 = vld [vmem:[#allocation2 + $0x34f0] sm:$0xff]  ;;  %4458 = vmatpush.msrb.mxu1 %v1498_v32  ;;  %4409 = vmatmul.f32.vlgmr.msra.gmra.mxu2 %v5311_v31  ;;  %v523_v60 = vld [vmem:[#allocation2 + $0xef8] sm:$0xff] }
 0x4f0   :  { %v2010_v50 = vld [vmem:[#allocation2 + $0x3d70] sm:$0xff]  ;;  %4479 = vmatpush.msrb.mxu2 %v1738_v47  ;;  %4369 = vmatmul.f32.vlgmr.msra.gmra.mxu0 %v5314_v39  ;;  %v763_v56 = vld [vmem:[#allocation2 + $0x1678] sm:$0xff] }
 0x4f1   :  { %v1210_v29 = vld [vmem:[#allocation2 + $0x2470] sm:$0xff]  ;;  %4498 = vmatpush.msrb.mxu3 %v2010_v50  ;;  %4389 = vmatmul.f32.vlgmr.msra.gmra.mxu1 %v5320_v36  ;;  %v1035_v21 = vld [vmem:[#allocation2 + $0x1ef8] sm:$0xff] }
 0x4f2   :  { %v1482_v25 = vld [vmem:[#allocation2 + $0x2cf0] sm:$0xff]  ;;  %4440 = vmatpush.msrb.mxu0 %v1210_v29  ;;  %v235_v20 = vld [vmem:[#allocation2 + $0x5f8] sm:$0xff] }
 0x4f3   :  { %v1722_v28 = vld [vmem:[#allocation2 + $0x3470] sm:$0xff]  ;;  %4459 = vmatpush.msrb.mxu1 %v1482_v25  ;;  %v507_v10 = vld [vmem:[#allocation2 + $0xe78] sm:$0xff] }
 0x4f4   :  { %v1994_v0 = vld [vmem:[#allocation2 + $0x3cf0] sm:$0xff]  ;;  %4480 = vmatpush.msrb.mxu2 %v1722_v28  ;;  %v747_v48 = vld [vmem:[#allocation2 + $0x15f8] sm:$0xff] }
 0x4f5   :  { %v1194_v22 = vld [vmem:[#allocation2 + $0x23f0] sm:$0xff]  ;;  %4499 = vmatpush.msrb.mxu3 %v1994_v0  ;;  %v5326_v58 = vld.sshfl [vmem:[#allocation1 + $0x20] sm:$0xff pattern:$0x73625140] }
 0x4f6   :  { %v1466_v9 = vld [vmem:[#allocation2 + $0x2c70] sm:$0xff]  ;;  %4441 = vmatpush.msrb.mxu0 %v1194_v22  ;;  %v1019_v32 = vld [vmem:[#allocation2 + $0x1e78] sm:$0xff]  ;;  %v5332_v0 = vld.sshfl [vmem:[#allocation1 + $0x28] sm:$0xff pattern:$0x73625140] }
 0x4f7   :  { %v1706_v52 = vld [vmem:[#allocation2 + $0x33f0] sm:$0xff]  ;;  %4460 = vmatpush.msrb.mxu1 %v1466_v9  ;;  %v219_v50 = vld [vmem:[#allocation2 + $0x578] sm:$0xff] }
 0x4f8   :  { %v1978_v33 = vld [vmem:[#allocation2 + $0x3c70] sm:$0xff]  ;;  %4481 = vmatpush.msrb.mxu2 %v1706_v52  ;;  %v491_v29 = vld [vmem:[#allocation2 + $0xdf8] sm:$0xff] }
 0x4f9   :  { %v1178_v12 = vld [vmem:[#allocation2 + $0x2370] sm:$0xff]  ;;  %4500 = vmatpush.msrb.mxu3 %v1978_v33  ;;  %v731_v25 = vld [vmem:[#allocation2 + $0x1578] sm:$0xff] }
 0x4fa   :  { %v1450_v57 = vld [vmem:[#allocation2 + $0x2bf0] sm:$0xff]  ;;  %4442 = vmatpush.msrb.mxu0 %v1178_v12  ;;  %v1003_v28 = vld [vmem:[#allocation2 + $0x1df8] sm:$0xff] }
 0x4fb   :  { %v1690_v35 = vld [vmem:[#allocation2 + $0x3370] sm:$0xff]  ;;  %4461 = vmatpush.msrb.mxu1 %v1450_v57  ;;  %v203_v22 = vld [vmem:[#allocation2 + $0x4f8] sm:$0xff] }
 0x4fc   :  { %v1962_v6 = vld [vmem:[#allocation2 + $0x3bf0] sm:$0xff]  ;;  %4482 = vmatpush.msrb.mxu2 %v1690_v35  ;;  %v475_v9 = vld [vmem:[#allocation2 + $0xd78] sm:$0xff] }
 0x4fd   :  { %v1162_v8 = vld [vmem:[#allocation2 + $0x22f0] sm:$0xff]  ;;  %4501 = vmatpush.msrb.mxu3 %v1962_v6  ;;  %v715_v52 = vld [vmem:[#allocation2 + $0x14f8] sm:$0xff] }
 0x4fe   :  { %v1434_v2 = vld [vmem:[#allocation2 + $0x2b70] sm:$0xff]  ;;  %4443 = vmatpush.msrb.mxu0 %v1162_v8  ;;  %v987_v33 = vld [vmem:[#allocation2 + $0x1d78] sm:$0xff] }
 0x4ff   :  { %v1674_v55 = vld [vmem:[#allocation2 + $0x32f0] sm:$0xff]  ;;  %4462 = vmatpush.msrb.mxu1 %v1434_v2  ;;  %v187_v12 = vld [vmem:[#allocation2 + $0x478] sm:$0xff] }
 0x500   :  { %v1946_v49 = vld [vmem:[#allocation2 + $0x3b70] sm:$0xff]  ;;  %4483 = vmatpush.msrb.mxu2 %v1674_v55  ;;  %v459_v57 = vld [vmem:[#allocation2 + $0xcf8] sm:$0xff] }
 0x501   :  { %v1146_v45 = vld [vmem:[#allocation2 + $0x2270] sm:$0xff]  ;;  %4502 = vmatpush.msrb.mxu3 %v1946_v49  ;;  %v699_v35 = vld [vmem:[#allocation2 + $0x1478] sm:$0xff] }
 0x502   :  { %v1418_v3 = vld [vmem:[#allocation2 + $0x2af0] sm:$0xff]  ;;  %4444 = vmatpush.msrb.mxu0 %v1146_v45  ;;  %v971_v6 = vld [vmem:[#allocation2 + $0x1cf8] sm:$0xff] }
 0x503   :  { %v1658_v41 = vld [vmem:[#allocation2 + $0x3270] sm:$0xff]  ;;  %4463 = vmatpush.msrb.mxu1 %v1418_v3  ;;  %v171_v8 = vld [vmem:[#allocation2 + $0x3f8] sm:$0xff] }
 0x504   :  { %v1930_v5 = vld [vmem:[#allocation2 + $0x3af0] sm:$0xff]  ;;  %4484 = vmatpush.msrb.mxu2 %v1658_v41  ;;  %v443_v2 = vld [vmem:[#allocation2 + $0xc78] sm:$0xff] }
 0x505   :  { %v1130_v18 = vld [vmem:[#allocation2 + $0x21f0] sm:$0xff]  ;;  %4503 = vmatpush.msrb.mxu3 %v1930_v5  ;;  %v683_v55 = vld [vmem:[#allocation2 + $0x13f8] sm:$0xff] }
 0x506   :  { %v1402_v17 = vld [vmem:[#allocation2 + $0x2a70] sm:$0xff]  ;;  %4445 = vmatpush.msrb.mxu0 %v1130_v18  ;;  %v955_v49 = vld [vmem:[#allocation2 + $0x1c78] sm:$0xff] }
 0x507   :  { %v1642_v59 = vld [vmem:[#allocation2 + $0x31f0] sm:$0xff]  ;;  %4464 = vmatpush.msrb.mxu1 %v1402_v17  ;;  %v155_v45 = vld [vmem:[#allocation2 + $0x378] sm:$0xff] }
 0x508   :  { %v1914_v51 = vld [vmem:[#allocation2 + $0x3a70] sm:$0xff]  ;;  %4485 = vmatpush.msrb.mxu2 %v1642_v59  ;;  %v427_v3 = vld [vmem:[#allocation2 + $0xbf8] sm:$0xff] }
 0x509   :  { %v1114_v26 = vld [vmem:[#allocation2 + $0x2170] sm:$0xff]  ;;  %4504 = vmatpush.msrb.mxu3 %v1914_v51  ;;  %v667_v41 = vld [vmem:[#allocation2 + $0x1378] sm:$0xff] }
 0x50a   :  { %v1386_v53 = vld [vmem:[#allocation2 + $0x29f0] sm:$0xff]  ;;  %4446 = vmatpush.msrb.mxu0 %v1114_v26  ;;  %v939_v5 = vld [vmem:[#allocation2 + $0x1bf8] sm:$0xff] }
 0x50b   :  { %v1626_v27 = vld [vmem:[#allocation2 + $0x3170] sm:$0xff]  ;;  %4465 = vmatpush.msrb.mxu1 %v1386_v53  ;;  %v139_v18 = vld [vmem:[#allocation2 + $0x2f8] sm:$0xff] }
 0x50c   :  { %v1898_v62 = vld [vmem:[#allocation2 + $0x39f0] sm:$0xff]  ;;  %4486 = vmatpush.msrb.mxu2 %v1626_v27  ;;  %v411_v17 = vld [vmem:[#allocation2 + $0xb78] sm:$0xff] }
 0x50d   :  { %v1098_v44 = vld [vmem:[#allocation2 + $0x20f0] sm:$0xff]  ;;  %4505 = vmatpush.msrb.mxu3 %v1898_v62  ;;  %v651_v59 = vld [vmem:[#allocation2 + $0x12f8] sm:$0xff] }
 0x50e   :  { %v1370_v61 = vld [vmem:[#allocation2 + $0x2970] sm:$0xff]  ;;  %4447 = vmatpush.msrb.mxu0 %v1098_v44  ;;  %v923_v51 = vld [vmem:[#allocation2 + $0x1b78] sm:$0xff] }
 0x50f   :  { %v1610_v23 = vld [vmem:[#allocation2 + $0x30f0] sm:$0xff]  ;;  %4466 = vmatpush.msrb.mxu1 %v1370_v61  ;;  %v123_v26 = vld [vmem:[#allocation2 + $0x278] sm:$0xff] }
 0x510   :  { %v1882_v43 = vld [vmem:[#allocation2 + $0x3970] sm:$0xff]  ;;  %4487 = vmatpush.msrb.mxu2 %v1610_v23  ;;  %v395_v53 = vld [vmem:[#allocation2 + $0xaf8] sm:$0xff] }
 0x511   :  { %v1082_v13 = vld [vmem:[#allocation2 + $0x2070] sm:$0xff]  ;;  %4506 = vmatpush.msrb.mxu3 %v1882_v43  ;;  %v635_v27 = vld [vmem:[#allocation2 + $0x1278] sm:$0xff] }
 0x512   :  { %v1354_v34 = vld [vmem:[#allocation2 + $0x28f0] sm:$0xff]  ;;  %4448 = vmatpush.msrb.mxu0 %v1082_v13  ;;  %v907_v62 = vld [vmem:[#allocation2 + $0x1af8] sm:$0xff] }
 0x513   :  { %v1594_v11 = vld [vmem:[#allocation2 + $0x3070] sm:$0xff]  ;;  %4467 = vmatpush.msrb.mxu1 %v1354_v34  ;;  %4449 = vmatmul.f32.vlgmr.msrb.gmra.mxu0 %v5326_v58  ;;  %v107_v44 = vld [vmem:[#allocation2 + $0x1f8] sm:$0xff] }
 0x514   :  { %v1866_v30 = vld [vmem:[#allocation2 + $0x38f0] sm:$0xff]  ;;  %4488 = vmatpush.msrb.mxu2 %v1594_v11  ;;  %4513 = vmatpush.msra.mxu0 %v299_v40  ;;  %v379_v61 = vld [vmem:[#allocation2 + $0xa78] sm:$0xff] }
 0x515   :  { %v1338_v7 = vld [vmem:[#allocation2 + $0x2870] sm:$0xff]  ;;  %4507 = vmatpush.msrb.mxu3 %v1866_v30  ;;  %4489 = vmatmul.f32.vlgmr.msrb.gmra.mxu2 %v5323_v24  ;;  %v619_v23 = vld [vmem:[#allocation2 + $0x11f8] sm:$0xff] }
 0x516   :  { %v1850_v38 = vld [vmem:[#allocation2 + $0x3870] sm:$0xff]  ;;  %4553 = vmatpush.msra.mxu2 %v811_v4  ;;  %4468 = vmatpush.msrb.mxu1 %v1338_v7  ;;  %v891_v43 = vld [vmem:[#allocation2 + $0x1a78] sm:$0xff] }
 0x517   :  { %v5317_v15 = vld.sshfl [vmem:[#allocation1 + $0x18] sm:$0xff pattern:$0x73625140]  ;;  %4508 = vmatpush.msrb.mxu3 %v1850_v38  ;;  %4514 = vmatpush.msra.mxu0 %v283_v42  ;;  %v91_v13 = vld [vmem:[#allocation2 + $0x178] sm:$0xff] }
 0x518   :  { %4429 = vmatmul.f32.vlgmr.msra.gmra.mxu3 %v5317_v15  ;;  %4533 = vmatpush.msra.mxu1 %v555_v14  ;;  %v5329_v47 = vld.sshfl [vmem:[#allocation1 + $0x38] sm:$0xff pattern:$0x73625140]  ;;  %v363_v34 = vld [vmem:[#allocation2 + $0x9f8] sm:$0xff] }
 0x519   :  { %4554 = vmatpush.msra.mxu2 %v795_v54  ;;  %4573 = vmatpush.msra.mxu3 %v1067_v16  ;;  %v603_v11 = vld [vmem:[#allocation2 + $0x1178] sm:$0xff] }
 0x51a   :  { %4515 = vmatpush.msra.mxu0 %v267_v37  ;;  %4534 = vmatpush.msra.mxu1 %v539_v46  ;;  %v875_v30 = vld [vmem:[#allocation2 + $0x19f8] sm:$0xff] }
 0x51b   :  { %4555 = vmatpush.msra.mxu2 %v779_v19  ;;  %4574 = vmatpush.msra.mxu3 %v1051_v63  ;;  %v75_v40 = vld [vmem:[#allocation2 + $0xf8] sm:$0xff] }
 0x51c   :  { %4516 = vmatpush.msra.mxu0 %v251_v1  ;;  %4535 = vmatpush.msra.mxu1 %v523_v60  ;;  %v347_v4 = vld [vmem:[#allocation2 + $0x978] sm:$0xff] }
 0x51d   :  { %4556 = vmatpush.msra.mxu2 %v763_v56  ;;  %4575 = vmatpush.msra.mxu3 %v1035_v21  ;;  %v587_v7 = vld [vmem:[#allocation2 + $0x10f8] sm:$0xff] }
 0x51e   :  { %4517 = vmatpush.msra.mxu0 %v235_v20  ;;  %4536 = vmatpush.msra.mxu1 %v507_v10  ;;  %v859_v38 = vld [vmem:[#allocation2 + $0x1978] sm:$0xff] }
 0x51f   :  { %4557 = vmatpush.msra.mxu2 %v747_v48  ;;  %4576 = vmatpush.msra.mxu3 %v1019_v32  ;;  %v59_v42 = vld [vmem:[#allocation2 + $0x78] sm:$0xff] }
 0x520   :  { %4509 = vmatmul.f32.vlgmr.msrb.gmra.mxu3 %v5329_v47  ;;  %4469 = vmatmul.f32.vlgmr.msrb.gmra.mxu1 %v5332_v0  ;;  %v331_v14 = vld [vmem:[#allocation2 + $0x8f8] sm:$0xff] }
 0x521   :  { %4518 = vmatpush.msra.mxu0 %v219_v50  ;;  %4537 = vmatpush.msra.mxu1 %v491_v29  ;;  %v571_v54 = vld [vmem:[#allocation2 + $0x1078] sm:$0xff] }
 0x522   :  { %4558 = vmatpush.msra.mxu2 %v731_v25  ;;  %4577 = vmatpush.msra.mxu3 %v1003_v28  ;;  %v843_v16 = vld [vmem:[#allocation2 + $0x18f8] sm:$0xff] }
 0x523   :  { %4519 = vmatpush.msra.mxu0 %v203_v22  ;;  %4538 = vmatpush.msra.mxu1 %v475_v9  ;;  %v1323_v37 = vld [vmem:[#allocation2 + $0x27f8] sm:$0xff] }
 0x524   :  { %4559 = vmatpush.msra.mxu2 %v715_v52  ;;  %4578 = vmatpush.msra.mxu3 %v987_v33  ;;  %v1835_v46 = vld [vmem:[#allocation2 + $0x37f8] sm:$0xff] }
 0x525   :  { %4520 = vmatpush.msra.mxu0 %v187_v12  ;;  %4539 = vmatpush.msra.mxu1 %v459_v57  ;;  %v315_v19 = vld [vmem:[#allocation2 + $0x878] sm:$0xff] }
 0x526   :  { %4560 = vmatpush.msra.mxu2 %v699_v35  ;;  %4579 = vmatpush.msra.mxu3 %v971_v6  ;;  %v827_v63 = vld [vmem:[#allocation2 + $0x1878] sm:$0xff] }
 0x527   :  { %4521 = vmatpush.msra.mxu0 %v171_v8  ;;  %4540 = vmatpush.msra.mxu1 %v443_v2  ;;  %v1307_v1 = vld [vmem:[#allocation2 + $0x2778] sm:$0xff] }
 0x528   :  { %4561 = vmatpush.msra.mxu2 %v683_v55  ;;  %4580 = vmatpush.msra.mxu3 %v955_v49  ;;  %v1579_v60 = vld [vmem:[#allocation2 + $0x2ff8] sm:$0xff] }
 0x529   :  { %4522 = vmatpush.msra.mxu0 %v155_v45  ;;  %4541 = vmatpush.msra.mxu1 %v427_v3  ;;  %v1819_v56 = vld [vmem:[#allocation2 + $0x3778] sm:$0xff] }
 0x52a   :  { %4562 = vmatpush.msra.mxu2 %v667_v41  ;;  %4581 = vmatpush.msra.mxu3 %v939_v5  ;;  %v2091_v21 = vld [vmem:[#allocation2 + $0x3ff8] sm:$0xff] }
 0x52b   :  { %4523 = vmatpush.msra.mxu0 %v139_v18  ;;  %4542 = vmatpush.msra.mxu1 %v411_v17  ;;  %v1291_v20 = vld [vmem:[#allocation2 + $0x26f8] sm:$0xff] }
 0x52c   :  { %4563 = vmatpush.msra.mxu2 %v651_v59  ;;  %4582 = vmatpush.msra.mxu3 %v923_v51  ;;  %v1563_v10 = vld [vmem:[#allocation2 + $0x2f78] sm:$0xff] }
 0x52d   :  { %4524 = vmatpush.msra.mxu0 %v123_v26  ;;  %4543 = vmatpush.msra.mxu1 %v395_v53  ;;  %v1803_v48 = vld [vmem:[#allocation2 + $0x36f8] sm:$0xff] }
 0x52e   :  { %4564 = vmatpush.msra.mxu2 %v635_v27  ;;  %4583 = vmatpush.msra.mxu3 %v907_v62  ;;  %v2075_v32 = vld [vmem:[#allocation2 + $0x3f78] sm:$0xff] }
 0x52f   :  { %4525 = vmatpush.msra.mxu0 %v107_v44  ;;  %4544 = vmatpush.msra.mxu1 %v379_v61  ;;  %v1275_v50 = vld [vmem:[#allocation2 + $0x2678] sm:$0xff] }
 0x530   :  { %4565 = vmatpush.msra.mxu2 %v619_v23  ;;  %4584 = vmatpush.msra.mxu3 %v891_v43  ;;  %v1547_v29 = vld [vmem:[#allocation2 + $0x2ef8] sm:$0xff] }
 0x531   :  { %4526 = vmatpush.msra.mxu0 %v91_v13  ;;  %4545 = vmatpush.msra.mxu1 %v363_v34  ;;  %v1787_v25 = vld [vmem:[#allocation2 + $0x3678] sm:$0xff] }
 0x532   :  { %4566 = vmatpush.msra.mxu2 %v603_v11  ;;  %4585 = vmatpush.msra.mxu3 %v875_v30  ;;  %v2059_v28 = vld [vmem:[#allocation2 + $0x3ef8] sm:$0xff] }
 0x533   :  { %4527 = vmatpush.msra.mxu0 %v75_v40  ;;  %4546 = vmatpush.msra.mxu1 %v347_v4  ;;  %v1259_v22 = vld [vmem:[#allocation2 + $0x25f8] sm:$0xff] }
 0x534   :  { %4567 = vmatpush.msra.mxu2 %v587_v7  ;;  %4586 = vmatpush.msra.mxu3 %v859_v38  ;;  %v1531_v9 = vld [vmem:[#allocation2 + $0x2e78] sm:$0xff] }
 0x535   :  { %4528 = vmatpush.msra.mxu0 %v59_v42  ;;  %4547 = vmatpush.msra.mxu1 %v331_v14  ;;  %v1771_v52 = vld [vmem:[#allocation2 + $0x35f8] sm:$0xff] }
 0x536   :  { %4568 = vmatpush.msra.mxu2 %v571_v54  ;;  %4587 = vmatpush.msra.mxu3 %v843_v16  ;;  %v2043_v33 = vld [vmem:[#allocation2 + $0x3e78] sm:$0xff] }
 0x537   :  { %4593 = vmatpush.msrb.mxu0 %v1323_v37  ;;  %4548 = vmatpush.msra.mxu1 %v315_v19  ;;  %v1243_v12 = vld [vmem:[#allocation2 + $0x2578] sm:$0xff] }
 0x538   :  { %4633 = vmatpush.msrb.mxu2 %v1835_v46  ;;  %4588 = vmatpush.msra.mxu3 %v827_v63  ;;  %v1515_v57 = vld [vmem:[#allocation2 + $0x2df8] sm:$0xff] }
 0x539   :  { %4594 = vmatpush.msrb.mxu0 %v1307_v1  ;;  %4613 = vmatpush.msrb.mxu1 %v1579_v60  ;;  %v1755_v35 = vld [vmem:[#allocation2 + $0x3578] sm:$0xff] }
 0x53a   :  { %4634 = vmatpush.msrb.mxu2 %v1819_v56  ;;  %4653 = vmatpush.msrb.mxu3 %v2091_v21  ;;  %v2027_v6 = vld [vmem:[#allocation2 + $0x3df8] sm:$0xff]  ;;  %v4050_v56 = vpop.f32.mrf.mxu0  ;;  %v4070_v21 = vpop.f32.mrf.mxu1 }
 0x53b   :  { %4595 = vmatpush.msrb.mxu0 %v1291_v20  ;;  %4614 = vmatpush.msrb.mxu1 %v1563_v10  ;;  %v1227_v8 = vld [vmem:[#allocation2 + $0x24f8] sm:$0xff]  ;;  %v4090_v20 = vpop.f32.mrf.mxu2  ;;  %v4110_v10 = vpop.f32.mrf.mxu3 }
 0x53c   :  { %4635 = vmatpush.msrb.mxu2 %v1803_v48  ;;  %4654 = vmatpush.msrb.mxu3 %v2075_v32  ;;  %v1499_v2 = vld [vmem:[#allocation2 + $0x2d78] sm:$0xff] }
 0x53d   :  { %4596 = vmatpush.msrb.mxu0 %v1275_v50  ;;  %4615 = vmatpush.msrb.mxu1 %v1547_v29  ;;  %v1739_v55 = vld [vmem:[#allocation2 + $0x34f8] sm:$0xff] }
 0x53e   :  { %4636 = vmatpush.msrb.mxu2 %v1787_v25  ;;  %4655 = vmatpush.msrb.mxu3 %v2059_v28  ;;  %v2011_v49 = vld [vmem:[#allocation2 + $0x3d78] sm:$0xff] }
 0x53f   :  { %4597 = vmatpush.msrb.mxu0 %v1259_v22  ;;  %4616 = vmatpush.msrb.mxu1 %v1531_v9  ;;  %v1211_v45 = vld [vmem:[#allocation2 + $0x2478] sm:$0xff] }
 0x540   :  { %4637 = vmatpush.msrb.mxu2 %v1771_v52  ;;  %4656 = vmatpush.msrb.mxu3 %v2043_v33  ;;  %v1483_v3 = vld [vmem:[#allocation2 + $0x2cf8] sm:$0xff] }
 0x541   :  { %4598 = vmatpush.msrb.mxu0 %v1243_v12  ;;  %4617 = vmatpush.msrb.mxu1 %v1515_v57  ;;  %v1723_v41 = vld [vmem:[#allocation2 + $0x3478] sm:$0xff] }
 0x542   :  { %4638 = vmatpush.msrb.mxu2 %v1755_v35  ;;  %4657 = vmatpush.msrb.mxu3 %v2027_v6  ;;  %v1995_v5 = vld [vmem:[#allocation2 + $0x3cf8] sm:$0xff]  ;;  %v4130_v48 = vpop.f32.mrf.mxu0  ;;  %v4150_v32 = vpop.f32.mrf.mxu1 }
 0x543   :  { %4599 = vmatpush.msrb.mxu0 %v1227_v8  ;;  %4618 = vmatpush.msrb.mxu1 %v1499_v2  ;;  %v1195_v18 = vld [vmem:[#allocation2 + $0x23f8] sm:$0xff]  ;;  %v4170_v50 = vpop.f32.mrf.mxu2  ;;  %v4190_v29 = vpop.f32.mrf.mxu3 }
 0x544   :  { %4639 = vmatpush.msrb.mxu2 %v1739_v55  ;;  %4658 = vmatpush.msrb.mxu3 %v2011_v49  ;;  %v1467_v17 = vld [vmem:[#allocation2 + $0x2c78] sm:$0xff] }
 0x545   :  { %4600 = vmatpush.msrb.mxu0 %v1211_v45  ;;  %4619 = vmatpush.msrb.mxu1 %v1483_v3  ;;  %v1707_v59 = vld [vmem:[#allocation2 + $0x33f8] sm:$0xff]  ;;  %v4071_v45 = vadd.f32 %v4070_v21, %v4050_v56 }
 0x546   :  { %v1979_v51 = vld [vmem:[#allocation2 + $0x3c78] sm:$0xff]  ;;  %4640 = vmatpush.msrb.mxu2 %v1723_v41  ;;  %4659 = vmatpush.msrb.mxu3 %v1995_v5 }
 0x547   :  { %v1179_v26 = vld [vmem:[#allocation2 + $0x2378] sm:$0xff]  ;;  %4601 = vmatpush.msrb.mxu0 %v1195_v18  ;;  %4620 = vmatpush.msrb.mxu1 %v1467_v17  ;;  %v4091_v17 = vadd.f32 %v4090_v20, %v4071_v45 }
 0x548   :  { %v1451_v53 = vld [vmem:[#allocation2 + $0x2bf8] sm:$0xff]  ;;  %4641 = vmatpush.msrb.mxu2 %v1707_v59  ;;  %4660 = vmatpush.msrb.mxu3 %v1979_v51 }
 0x549   :  { %v1691_v27 = vld [vmem:[#allocation2 + $0x3378] sm:$0xff]  ;;  %4602 = vmatpush.msrb.mxu0 %v1179_v26  ;;  %4621 = vmatpush.msrb.mxu1 %v1451_v53 }
 0x54a   :  { %v1963_v62 = vld [vmem:[#allocation2 + $0x3bf8] sm:$0xff]  ;;  %4642 = vmatpush.msrb.mxu2 %v1691_v27  ;;  %4529 = vmatmul.f32.vlgmr.msra.gmra.mxu0 %v5314_v39  ;;  %v4210_v25 = vpop.f32.mrf.mxu0  ;;  %v4230_v28 = vpop.f32.mrf.mxu1 }
 0x54b   :  { %v1163_v44 = vld [vmem:[#allocation2 + $0x22f8] sm:$0xff]  ;;  %4661 = vmatpush.msrb.mxu3 %v1963_v62  ;;  %4569 = vmatmul.f32.vlgmr.msra.gmra.mxu2 %v5311_v31  ;;  %v4250_v22 = vpop.f32.mrf.mxu2  ;;  %v4231_v35 = vadd.f32 %v4230_v28, %v4210_v25  ;;  %v4111_v62 = vadd.f32 %v4110_v10, %v4091_v17 }
 0x54c   :  { %v1435_v61 = vld [vmem:[#allocation2 + $0x2b78] sm:$0xff]  ;;  %4603 = vmatpush.msrb.mxu0 %v1163_v44  ;;  %4589 = vmatmul.f32.vlgmr.msra.gmra.mxu3 %v5317_v15 }
 0x54d   :  { %v1675_v23 = vld [vmem:[#allocation2 + $0x32f8] sm:$0xff]  ;;  %4622 = vmatpush.msrb.mxu1 %v1435_v61  ;;  %v4251_v2 = vadd.f32 %v4250_v22, %v4231_v35 }
 0x54e   :  { %v1947_v43 = vld [vmem:[#allocation2 + $0x3b78] sm:$0xff]  ;;  %4643 = vmatpush.msrb.mxu2 %v1675_v23  ;;  %4549 = vmatmul.f32.vlgmr.msra.gmra.mxu1 %v5320_v36 }
 0x54f   :  { %v1147_v13 = vld [vmem:[#allocation2 + $0x2278] sm:$0xff]  ;;  %4662 = vmatpush.msrb.mxu3 %v1947_v43 }
 0x550   :  { %v1419_v34 = vld [vmem:[#allocation2 + $0x2af8] sm:$0xff]  ;;  %4604 = vmatpush.msrb.mxu0 %v1147_v13 }
 0x551   :  { %v1659_v11 = vld [vmem:[#allocation2 + $0x3278] sm:$0xff]  ;;  %4623 = vmatpush.msrb.mxu1 %v1419_v34  ;;  %v4131_v34 = vadd.f32 %v4130_v48, %v4111_v62 }
 0x552   :  { %v1931_v30 = vld [vmem:[#allocation2 + $0x3af8] sm:$0xff]  ;;  %4644 = vmatpush.msrb.mxu2 %v1659_v11  ;;  %v4290_v9 = vpop.f32.mrf.mxu0 }
 0x553   :  { %v1131_v40 = vld [vmem:[#allocation2 + $0x21f8] sm:$0xff]  ;;  %4663 = vmatpush.msrb.mxu3 %v1931_v30  ;;  %v4330_v52 = vpop.f32.mrf.mxu2 }
 0x554   :  { %v1403_v4 = vld [vmem:[#allocation2 + $0x2a78] sm:$0xff]  ;;  %4605 = vmatpush.msrb.mxu0 %v1131_v40 }
 0x555   :  { %v1643_v7 = vld [vmem:[#allocation2 + $0x31f8] sm:$0xff]  ;;  %4624 = vmatpush.msrb.mxu1 %v1403_v4 }
 0x556   :  { %v1915_v38 = vld [vmem:[#allocation2 + $0x3a78] sm:$0xff]  ;;  %4645 = vmatpush.msrb.mxu2 %v1643_v7 }
 0x557   :  { %v1115_v42 = vld [vmem:[#allocation2 + $0x2178] sm:$0xff]  ;;  %4664 = vmatpush.msrb.mxu3 %v1915_v38  ;;  %v4151_v38 = vadd.f32 %v4150_v32, %v4131_v34 }
 0x558   :  { %v1387_v14 = vld [vmem:[#allocation2 + $0x29f8] sm:$0xff]  ;;  %4606 = vmatpush.msrb.mxu0 %v1115_v42 }
 0x559   :  { %v1627_v54 = vld [vmem:[#allocation2 + $0x3178] sm:$0xff]  ;;  %4625 = vmatpush.msrb.mxu1 %v1387_v14 }
 0x55a   :  { %v1899_v16 = vld [vmem:[#allocation2 + $0x39f8] sm:$0xff]  ;;  %4646 = vmatpush.msrb.mxu2 %v1627_v54 }
 0x55b   :  { %v1099_v31 = vld [vmem:[#allocation2 + $0x20f8] sm:$0xff]  ;;  %4665 = vmatpush.msrb.mxu3 %v1899_v16 }
 0x55c   :  { %v1371_v37 = vld [vmem:[#allocation2 + $0x2978] sm:$0xff]  ;;  %4607 = vmatpush.msrb.mxu0 %v1099_v31  ;;  %v4171_v31 = vadd.f32 %v4170_v50, %v4151_v38 }
 0x55d   :  { %v1611_v46 = vld [vmem:[#allocation2 + $0x30f8] sm:$0xff]  ;;  %4626 = vmatpush.msrb.mxu1 %v1371_v37 }
 0x55e   :  { %v1883_v19 = vld [vmem:[#allocation2 + $0x3978] sm:$0xff]  ;;  %4647 = vmatpush.msrb.mxu2 %v1611_v46 }
 0x55f   :  { %v1083_v39 = vld [vmem:[#allocation2 + $0x2078] sm:$0xff]  ;;  %4666 = vmatpush.msrb.mxu3 %v1883_v19 }
 0x560   :  { %v1355_v15 = vld [vmem:[#allocation2 + $0x28f8] sm:$0xff]  ;;  %4608 = vmatpush.msrb.mxu0 %v1083_v39 }
 0x561   :  { %v1595_v63 = vld [vmem:[#allocation2 + $0x3078] sm:$0xff]  ;;  %4627 = vmatpush.msrb.mxu1 %v1355_v15  ;;  %4609 = vmatmul.f32.vlgmr.msrb.gmra.mxu0 %v5326_v58  ;;  %v4270_v58 = vpop.f32.mrf.mxu3 }
 0x562   :  { %v1867_v1 = vld [vmem:[#allocation2 + $0x38f8] sm:$0xff]  ;;  %4648 = vmatpush.msrb.mxu2 %v1595_v63  ;;  %v4271_v41 = vadd.f32 %v4270_v58, %v4251_v2  ;;  %v4191_v63 = vadd.f32 %v4190_v29, %v4171_v31 }
 0x563   :  { %v1339_v60 = vld [vmem:[#allocation2 + $0x2878] sm:$0xff]  ;;  %4667 = vmatpush.msrb.mxu3 %v1867_v1  ;;  %4649 = vmatmul.f32.vlgmr.msrb.gmra.mxu2 %v5323_v24  ;;  %v4310_v24 = vpop.f32.mrf.mxu1 }
 0x564   :  { %v1851_v36 = vld [vmem:[#allocation2 + $0x3878] sm:$0xff]  ;;  %4628 = vmatpush.msrb.mxu1 %v1339_v60  ;;  %v4291_v51 = vadd.f32 %v4290_v9, %v4271_v41 }
 0x565   :  { %4668 = vmatpush.msrb.mxu3 %v1851_v36  ;;  %4629 = vmatmul.f32.vlgmr.msrb.gmra.mxu1 %v5332_v0 }
 0x566   :  { %4669 = vmatmul.f32.vlgmr.msrb.gmra.mxu3 %v5329_v47  ;;  %v4311_v23 = vadd.f32 %v4310_v24, %v4291_v51 }
 0x568   :  { %v4331_v40 = vadd.f32 %v4330_v52, %v4311_v23 }
 0x569   :  { %v4350_v33 = vpop.f32.mrf.mxu3 }
 0x56a   :  { %v4351_v14 = vadd.f32 %v4350_v33, %v4331_v40 }
 0x56c   :  { %v4698_v39 = vrot.slane %v4351_v14, 6 }
 0x56d   :  { %v4370_v12 = vpop.f32.mrf.mxu0 }
 0x56e   :  { %v4390_v0 = vpop.f32.mrf.mxu1  ;;  %v4713_v36 = vsel %vm4701_vm0, %v4191_v63, %v4698_v39 }
 0x56f   :  { %v4391_v8 = vadd.f32 %v4390_v0, %v4370_v12 }
 0x572   :  { %v4410_v57 = vpop.f32.mrf.mxu2 }
 0x573   :  { %v4411_v3 = vadd.f32 %v4410_v57, %v4391_v8 }
 0x590   :  { %v4450_v6 = vpop.f32.mrf.mxu0 }
 0x598   :  { %v4490_v49 = vpop.f32.mrf.mxu2 }
 0x59b   :  { %v4430_v47 = vpop.f32.mrf.mxu3 }
 0x59c   :  { %v4431_v59 = vadd.f32 %v4430_v47, %v4411_v3 }
 0x59d   :  { %v4470_v55 = vpop.f32.mrf.mxu1 }
 0x59e   :  { %v4451_v44 = vadd.f32 %v4450_v6, %v4431_v59 }
 0x5a0   :  { %v4471_v11 = vadd.f32 %v4470_v55, %v4451_v44 }
 0x5a2   :  { %v4491_v42 = vadd.f32 %v4490_v49, %v4471_v11 }
 0x5a3   :  { %v4510_v5 = vpop.f32.mrf.mxu3 }
 0x5a4   :  { %v4511_v37 = vadd.f32 %v4510_v5, %v4491_v42 }
 0x5a6   :  { %v4699_v1 = vrot.slane %v4511_v37, 4 }
 0x5c7   :  { %v4530_v18 = vpop.f32.mrf.mxu0 }
 0x5cb   :  { %v4550_v26 = vpop.f32.mrf.mxu1 }
 0x5cc   :  { %v4551_v53 = vadd.f32 %v4550_v26, %v4530_v18 }
 0x5ce   :  { %v4570_v27 = vpop.f32.mrf.mxu2 }
 0x5cf   :  { %v4571_v61 = vadd.f32 %v4570_v27, %v4551_v53  ;;  %v4590_v43 = vpop.f32.mrf.mxu3 }
 0x5d1   :  { %v4591_v13 = vadd.f32 %v4590_v43, %v4571_v61 }
 0x5de   :  { %v4610_v30 = vpop.f32.mrf.mxu0 }
 0x5df   :  { %v4611_v4 = vadd.f32 %v4610_v30, %v4591_v13 }
 0x5e2   :  { %v4630_v7 = vpop.f32.mrf.mxu1 }
 0x5e3   :  { %v4631_v54 = vadd.f32 %v4630_v7, %v4611_v4 }
 0x5e6   :  { %v4650_v16 = vpop.f32.mrf.mxu2 }
 0x5e7   :  { %v4651_v46 = vadd.f32 %v4650_v16, %v4631_v54 }
 0x5e9   :  { %v4670_v19 = vpop.f32.mrf.mxu3 }
 0x5ea   :  { %v4671_v15 = vadd.f32 %v4670_v19, %v4651_v46 }
 0x5ec   :  { %v4700_v60 = vrot.slane %v4671_v15, 2 }
 0x5ee   :  { %v4714_v56 = vsel %vm4703_vm1, %v4699_v1, %v4700_v60 }
 0x5ef   :  { %v4715_v21 = vsel %vm4705_vm2, %v4713_v36, %v4714_v56 }
 0x5f0   :  { %4723 = vst [vmem:[#allocation7 + $0x18] sm:$0xff] %v4715_v21 }
 0x5f1   :  { %4734 = dma.vmem_to_hbm [thread:$0]  %s4730_s1, 512, %s4732_s23, [#allocation4]  }
 0x5f2   :  { %4879 = dma.done.wait [#allocation4], 512  }
 0x5f3   :  { %4880 = vsyncadd [#allocation4], 4294966784 }
 0x5f4   :  { %4739 = vsyncpa [#allocation3], 1 }
 0x5f5   :  { %4740 = vsyncpa [#allocation6], 1 }
 0x5f6   :  { %4741 = vsyncpa [#allocation4], 1 }

</bundles_post_ra>
